<compile_context>
chip_gen: v6e
topology: v6e:2x2x1
jax: 0.10.0
libtpu: 0.0.40
codegen_flags: <defaults>
</compile_context>

<pallas_src>
import functools
import math

import jax
import jax.numpy as jnp
from jax.experimental import pallas as pl
from jax.experimental.pallas import tpu as pltpu

D_FF = 2048
LN_EPS = 1e-5
WEIGHT_DTYPE = jnp.bfloat16  # storage dtype for all projection weights (f32 accumulation)


# ----------------------------------------------------------------------------- in-kernel helpers

def _ln(v, g, b):
    """LayerNorm over the last dim. v:(R, D); g,b:(1, D)."""
    mu = jnp.mean(v, axis=-1, keepdims=True)
    c = v - mu
    var = jnp.mean(c * c, axis=-1, keepdims=True)
    return (c * jax.lax.rsqrt(var + LN_EPS)) * g + b


def _mha(q, k, v, bias, nhead, dh, scale):
    """Multi-head attention for one batch element, fully in registers.

    q:(Lq, nhead*dh), k/v:(Lk, nhead*dh), bias:(Lq, Lk) additive or None.
    Returns (Lq, nhead*dh); per-head outputs are concatenated along lanes (no VMEM
    round-trip / masked 16-lane stores).
    """
    outs = []
    for h in range(nhead):
        c0, c1 = h * dh, (h + 1) * dh
        s = jnp.dot(q[:, c0:c1], k[:, c0:c1].T, preferred_element_type=jnp.float32) * scale
        if bias is not None:
            s = s + bias
        m = jnp.max(s, axis=-1, keepdims=True)
        p = jnp.exp(s - m)
        denom = jnp.sum(p, axis=-1, keepdims=True)
        o = jnp.dot(p, v[:, c0:c1], preferred_element_type=jnp.float32)
        outs.append(o * pl.reciprocal(denom, approx=True))
    return jnp.concatenate(outs, axis=-1)


# ----------------------------------------------------------------------------- fused stack kernels

def _make_encoder_stack_kernel(*, B, L, D, nhead, has_bias):
    dh = D // nhead
    scale = 1.0 / math.sqrt(dh)

    def kernel(*refs):
        it = iter(refs)
        x_ref = next(it)                                  # (B*L, D) f32
        bias_ref = next(it) if has_bias else None         # (B, L, L) f32
        attn_w = next(it)                                 # (1, D, 4D) bf16: [Wq|Wk|Wv|Wo]
        attn_b = next(it)                                 # (1, 1, 4D) f32:  [b_qkv | b_o]
        ff_w1 = next(it)                                  # (1, D, 2048) bf16
        ff_b1 = next(it)                                  # (1, 1, 2048) f32
        ff_w2 = next(it)                                  # (1, 2048, D) bf16
        lnv = next(it)                                    # (1, 5, D): ln1_g,ln1_b,ln2_g,ln2_b,ff_b2
        fin_ref = next(it)                                # (2, D): encoder-stack final norm
        o_ref = next(it)                                  # (B*L, D) f32
        act = next(it)                                    # scratch (B*L, D) f32, persists over layers

        layer = pl.program_id(0)

        @pl.when(layer == 0)
        def _():
            act[...] = x_ref[...]

        x = act[...]                                      # running activation (B*L, D)
        w = attn_w[0]
        bvec = attn_b[0]
        ln = lnv[0]

        # fused QKV projection over the whole (B*L, D) slab (one MXU pass, not B)
        qkv = jnp.dot(x.astype(WEIGHT_DTYPE), w[:, 0:3 * D],
                      preferred_element_type=jnp.float32) + bvec[:, 0:3 * D]

        # per-batch / per-head attention; outputs stay in registers
        rows = []
        for b in range(B):
            qb = qkv[b * L:(b + 1) * L]
            rows.append(_mha(qb[:, 0:D], qb[:, D:2 * D], qb[:, 2 * D:3 * D],
                             bias_ref[b] if has_bias else None, nhead, dh, scale))
        attn = jnp.concatenate(rows, axis=0)              # (B*L, D)

        attn = jnp.dot(attn.astype(WEIGHT_DTYPE), w[:, 3 * D:4 * D],
                       preferred_element_type=jnp.float32) + bvec[:, 3 * D:4 * D]
        x1 = _ln(x + attn, ln[0:1], ln[1:2])

        # feed-forward: the (B*L, 2048) intermediate never leaves VMEM/vregs
        h = jnp.dot(x1.astype(WEIGHT_DTYPE), ff_w1[0],
                    preferred_element_type=jnp.float32) + ff_b1[0]
        h = jnp.maximum(h, 0.0)
        y = jnp.dot(h.astype(WEIGHT_DTYPE), ff_w2[0],
                    preferred_element_type=jnp.float32) + ln[4:5]
        x2 = _ln(x1 + y, ln[2:3], ln[3:4])

        act[...] = x2

        @pl.when(layer == pl.num_programs(0) - 1)
        def _():
            fin = fin_ref[...]
            o_ref[...] = _ln(x2, fin[0:1], fin[1:2]).astype(o_ref.dtype)

    return kernel


def _make_decoder_stack_kernel(*, B, Lt, Ls, D, nhead, has_sa_bias, has_ca_bias):
    dh = D // nhead
    scale = 1.0 / math.sqrt(dh)

    def kernel(*refs):
        it = iter(refs)
        x_ref = next(it)                                  # (B*Lt, D) f32
        mem_ref = next(it)                                # (B*Ls, D) f32
        sa_bias_ref = next(it) if has_sa_bias else None   # (B, Lt, Lt)
        ca_bias_ref = next(it) if has_ca_bias else None   # (B, Lt, Ls)
        sa_w = next(it); sa_b = next(it)                  # (1,D,4D) bf16 / (1,1,4D) f32
        ca_w = next(it); ca_b = next(it)                  # (1,D,4D): [Wq|Wkv|Wo]
        ff_w1 = next(it); ff_b1 = next(it); ff_w2 = next(it)
        lnv = next(it)                                    # (1,7,D): ln1_g/b, ln2_g/b, ln3_g/b, ff_b2
        fin_ref = next(it)                                # (2, D)
        o_ref = next(it)                                  # (B*Lt, D)
        act = next(it)                                    # scratch (B*Lt, D) f32

        layer = pl.program_id(0)

        @pl.when(layer == 0)
        def _():
            act[...] = x_ref[...]

        x = act[...]
        mem = mem_ref[...]
        wsa = sa_w[0]; bsa = sa_b[0]
        wca = ca_w[0]; bca = ca_b[0]
        ln = lnv[0]

        # --- self-attention block (fused QKV over the (B*Lt, D) slab)
        qkv = jnp.dot(x.astype(WEIGHT_DTYPE), wsa[:, 0:3 * D],
                      preferred_element_type=jnp.float32) + bsa[:, 0:3 * D]
        rows = []
        for b in range(B):
            qb = qkv[b * Lt:(b + 1) * Lt]
            rows.append(_mha(qb[:, 0:D], qb[:, D:2 * D], qb[:, 2 * D:3 * D],
                             sa_bias_ref[b] if has_sa_bias else None, nhead, dh, scale))
        sa = jnp.concatenate(rows, axis=0)
        sa = jnp.dot(sa.astype(WEIGHT_DTYPE), wsa[:, 3 * D:4 * D],
                     preferred_element_type=jnp.float32) + bsa[:, 3 * D:4 * D]
        x1 = _ln(x + sa, ln[0:1], ln[1:2])

        # --- cross-attention block (Q from tgt, fused KV from memory)
        q = jnp.dot(x1.astype(WEIGHT_DTYPE), wca[:, 0:D],
                    preferred_element_type=jnp.float32) + bca[:, 0:D]
        kv = jnp.dot(mem.astype(WEIGHT_DTYPE), wca[:, D:3 * D],
                     preferred_element_type=jnp.float32) + bca[:, D:3 * D]
        rows = []
        for b in range(B):
            qb = q[b * Lt:(b + 1) * Lt]
            kvb = kv[b * Ls:(b + 1) * Ls]
            rows.append(_mha(qb, kvb[:, 0:D], kvb[:, D:2 * D],
                             ca_bias_ref[b] if has_ca_bias else None, nhead, dh, scale))
        ca = jnp.concatenate(rows, axis=0)
        ca = jnp.dot(ca.astype(WEIGHT_DTYPE), wca[:, 3 * D:4 * D],
                     preferred_element_type=jnp.float32) + bca[:, 3 * D:4 * D]
        x2 = _ln(x1 + ca, ln[2:3], ln[3:4])

        # --- feed-forward block
        h = jnp.dot(x2.astype(WEIGHT_DTYPE), ff_w1[0],
                    preferred_element_type=jnp.float32) + ff_b1[0]
        h = jnp.maximum(h, 0.0)
        y = jnp.dot(h.astype(WEIGHT_DTYPE), ff_w2[0],
                    preferred_element_type=jnp.float32) + ln[6:7]
        x3 = _ln(x2 + y, ln[4:5], ln[5:6])

        act[...] = x3

        @pl.when(layer == pl.num_programs(0) - 1)
        def _():
            fin = fin_ref[...]
            o_ref[...] = _ln(x3, fin[0:1], fin[1:2]).astype(o_ref.dtype)

    return kernel


# ----------------------------------------------------------------------------- stack wrappers

def _layer_spec(full_shape):
    """Per-layer weight spec: block (1, ...) indexed by the layer grid axis."""
    nd = len(full_shape) - 1
    return pl.BlockSpec((1,) + tuple(full_shape[1:]), lambda l, _nd=nd: (l,) + (0,) * _nd)


def _resident_spec(full_shape):
    """Layer-invariant spec: single full block, resident across the layer grid."""
    nd = len(full_shape)
    return pl.BlockSpec(tuple(full_shape), lambda l, _nd=nd: (0,) * _nd)


def _encoder_cost(B, L, D, nhead, NL):
    proj = B * L * (2 * D * 3 * D + 2 * D * D + 4 * D * D_FF)
    attn = 4 * B * L * L * D
    weight_bytes = NL * 2 * (4 * D * D + 2 * D * D_FF)
    act_bytes = 2 * B * L * D * 4
    return pl.CostEstimate(flops=int(NL * (proj + attn)),
                           transcendentals=int(NL * (B * nhead * L * L + 4 * B * L)),
                           bytes_accessed=int(weight_bytes + act_bytes))


def _decoder_cost(B, Lt, Ls, D, nhead, NL):
    proj = B * Lt * (2 * D * 3 * D + 4 * D * D + 4 * D * D_FF) + B * Ls * 4 * D * D
    attn = 4 * B * Lt * (Lt + Ls) * D
    weight_bytes = NL * 2 * (8 * D * D + 2 * D * D_FF)
    act_bytes = (2 * B * Lt + B * Ls) * D * 4
    return pl.CostEstimate(flops=int(NL * (proj + attn)),
                           transcendentals=int(NL * (B * nhead * Lt * (Lt + Ls) + 6 * B * Lt)),
                           bytes_accessed=int(weight_bytes + act_bytes))


def encoder_stack(x2, p, nhead, *, B, L, bias=None):
    """Whole encoder stack + final norm in one pallas_call. x2: (B*L, D)."""
    BL, D = x2.shape
    NL = p["attn_w"].shape[0]
    has_bias = bias is not None
    kern = _make_encoder_stack_kernel(B=B, L=L, D=D, nhead=nhead, has_bias=has_bias)

    args, in_specs = [x2], [_resident_spec((BL, D))]
    if has_bias:
        args.append(bias)
        in_specs.append(_resident_spec(bias.shape))
    for name in ("attn_w", "attn_b", "ff_w1", "ff_b1", "ff_w2", "lnv"):
        args.append(p[name])
        in_specs.append(_layer_spec(p[name].shape))
    args.append(p["final_ln"])
    in_specs.append(_resident_spec(p["final_ln"].shape))

    return pl.pallas_call(
        kern,
        grid=(NL,),
        out_shape=jax.ShapeDtypeStruct((BL, D), jnp.float32),
        in_specs=in_specs,
        out_specs=_resident_spec((BL, D)),
        scratch_shapes=[pltpu.VMEM((BL, D), jnp.float32)],
        compiler_params=pltpu.CompilerParams(dimension_semantics=("arbitrary",)),
        cost_estimate=_encoder_cost(B, L, D, nhead, NL),
    )(*args)


def decoder_stack(x2, mem2, p, nhead, *, B, Lt, Ls, sa_bias=None, ca_bias=None):
    """Whole decoder stack + final norm in one pallas_call. x2: (B*Lt, D), mem2: (B*Ls, D)."""
    BLt, D = x2.shape
    NL = p["sa_w"].shape[0]
    kern = _make_decoder_stack_kernel(B=B, Lt=Lt, Ls=Ls, D=D, nhead=nhead,
                                      has_sa_bias=sa_bias is not None,
                                      has_ca_bias=ca_bias is not None)

    args = [x2, mem2]
    in_specs = [_resident_spec((BLt, D)), _resident_spec(mem2.shape)]
    if sa_bias is not None:
        args.append(sa_bias)
        in_specs.append(_resident_spec(sa_bias.shape))
    if ca_bias is not None:
        args.append(ca_bias)
        in_specs.append(_resident_spec(ca_bias.shape))
    for name in ("sa_w", "sa_b", "ca_w", "ca_b", "ff_w1", "ff_b1", "ff_w2", "lnv"):
        args.append(p[name])
        in_specs.append(_layer_spec(p[name].shape))
    args.append(p["final_ln"])
    in_specs.append(_resident_spec(p["final_ln"].shape))

    return pl.pallas_call(
        kern,
        grid=(NL,),
        out_shape=jax.ShapeDtypeStruct((BLt, D), jnp.float32),
        in_specs=in_specs,
        out_specs=_resident_spec((BLt, D)),
        scratch_shapes=[pltpu.VMEM((BLt, D), jnp.float32)],
        compiler_params=pltpu.CompilerParams(dimension_semantics=("arbitrary",)),
        cost_estimate=_decoder_cost(B, Lt, Ls, D, nhead, NL),
    )(*args)


# ----------------------------------------------------------------------------- model glue (plain JAX)

def _attn_bias(B, Lq, Lk, attn_mask=None, key_padding_mask=None):
    """Build (B, Lq, Lk) additive bias, or None if no mask is present (skip zero DMA)."""
    if attn_mask is None and key_padding_mask is None:
        return None
    bias = jnp.zeros((B, Lq, Lk), jnp.float32)
    if attn_mask is not None:
        bias = bias + attn_mask.astype(jnp.float32)[None, :, :]
    if key_padding_mask is not None:
        # NOTE: PyTorch uses -inf (a fully-masked key row would produce NaN there);
        # a large finite negative keeps this kernel NaN-free.
        bias = bias + jnp.where(key_padding_mask[:, None, :], -1e9, 0.0).astype(jnp.float32)
    return bias


def transformer_forward(src, tgt, params, nhead, memory_mask=None,
                        src_key_padding_mask=None, tgt_key_padding_mask=None,
                        memory_key_padding_mask=None):
    """PyTorch nn.Transformer forward (eval mode, post-norm, relu)."""
    Ls, B, D = src.shape
    Lt = tgt.shape[0]

    # flatten once per stack (tiny); kernels work on lane-dense (B*L, D) slabs
    src2 = jnp.transpose(src, (1, 0, 2)).reshape(B * Ls, D)
    tgt2 = jnp.transpose(tgt, (1, 0, 2)).reshape(B * Lt, D)

    enc_bias = _attn_bias(B, Ls, Ls, None, src_key_padding_mask)
    dec_sa_bias = _attn_bias(B, Lt, Lt, None, tgt_key_padding_mask)
    dec_ca_bias = _attn_bias(B, Lt, Ls, memory_mask, memory_key_padding_mask)

    memory2 = encoder_stack(src2, params["encoder"], nhead, B=B, L=Ls, bias=enc_bias)
    out2 = decoder_stack(tgt2, memory2, params["decoder"], nhead, B=B, Lt=Lt, Ls=Ls,
                         sa_bias=dec_sa_bias, ca_bias=dec_ca_bias)

    return jnp.transpose(out2.reshape(B, Lt, D), (1, 0, 2))   # back to (Lt, B, D)


def dual_branch_forward(targets, detections, params, nhead,
                        src_key_padding_mask=None, tgt_key_padding_mask=None,
                        memory_mask=None):
    """Matches DualBranchTransformer.forward argument routing exactly."""
    # TODO(synk): on v7x run the two streams on the 2 TensorCores in parallel.
    transformed_targets = transformer_forward(
        src=detections, tgt=targets, params=params["target_stream"], nhead=nhead,
        memory_mask=memory_mask,
        src_key_padding_mask=tgt_key_padding_mask,
        tgt_key_padding_mask=src_key_padding_mask,
        memory_key_padding_mask=None)
    mm = memory_mask.T if memory_mask is not None else None
    transformed_detections = transformer_forward(
        src=targets, tgt=detections, params=params["detection_stream"], nhead=nhead,
        memory_mask=mm,
        src_key_padding_mask=src_key_padding_mask,
        tgt_key_padding_mask=tgt_key_padding_mask,
        memory_key_padding_mask=None)
    return transformed_detections, transformed_targets


# ----------------------------------------------------------------------------- deterministic init

def _w(key, fan_in, fan_out):
    return jax.random.normal(key, (fan_in, fan_out), jnp.float32) / math.sqrt(fan_in)


def _init_encoder_stack(key, d, n_layers):
    attn_w, ff_w1, ff_w2 = [], [], []
    for k in jax.random.split(key, n_layers):
        k1, k2, k3, k4 = jax.random.split(k, 4)
        attn_w.append(jnp.concatenate([_w(k1, d, 3 * d), _w(k2, d, d)], axis=1))   # (d, 4d)
        ff_w1.append(_w(k3, d, D_FF))
        ff_w2.append(_w(k4, D_FF, d))
    ones, zeros = jnp.ones((d,), jnp.float32), jnp.zeros((d,), jnp.float32)
    lnv = jnp.stack([ones, zeros, ones, zeros, zeros])   # ln1_g, ln1_b, ln2_g, ln2_b, ff_b2
    return dict(
        attn_w=jnp.stack(attn_w).astype(WEIGHT_DTYPE),          # (NL, d, 4d)
        attn_b=jnp.zeros((n_layers, 1, 4 * d), jnp.float32),    # [b_qkv | b_o]
        ff_w1=jnp.stack(ff_w1).astype(WEIGHT_DTYPE),            # (NL, d, 2048)
        ff_b1=jnp.zeros((n_layers, 1, D_FF), jnp.float32),
        ff_w2=jnp.stack(ff_w2).astype(WEIGHT_DTYPE),            # (NL, 2048, d)
        lnv=jnp.tile(lnv[None], (n_layers, 1, 1)),              # (NL, 5, d)
        final_ln=jnp.stack([ones, zeros]),                      # (2, d) encoder-stack norm
    )


def _init_decoder_stack(key, d, n_layers):
    sa_w, ca_w, ff_w1, ff_w2 = [], [], [], []
    for k in jax.random.split(key, n_layers):
        k1, k2, k3, k4, k5, k6, k7 = jax.random.split(k, 7)
        sa_w.append(jnp.concatenate([_w(k1, d, 3 * d), _w(k2, d, d)], axis=1))              # (d,4d)
        ca_w.append(jnp.concatenate([_w(k3, d, d), _w(k4, d, 2 * d), _w(k5, d, d)], axis=1))  # (d,4d)
        ff_w1.append(_w(k6, d, D_FF))
        ff_w2.append(_w(k7, D_FF, d))
    ones, zeros = jnp.ones((d,), jnp.float32), jnp.zeros((d,), jnp.float32)
    lnv = jnp.stack([ones, zeros, ones, zeros, ones, zeros, zeros])  # ln1,ln2,ln3 g/b + ff_b2
    return dict(
        sa_w=jnp.stack(sa_w).astype(WEIGHT_DTYPE),
        sa_b=jnp.zeros((n_layers, 1, 4 * d), jnp.float32),
        ca_w=jnp.stack(ca_w).astype(WEIGHT_DTYPE),
        ca_b=jnp.zeros((n_layers, 1, 4 * d), jnp.float32),
        ff_w1=jnp.stack(ff_w1).astype(WEIGHT_DTYPE),
        ff_b1=jnp.zeros((n_layers, 1, D_FF), jnp.float32),
        ff_w2=jnp.stack(ff_w2).astype(WEIGHT_DTYPE),
        lnv=jnp.tile(lnv[None], (n_layers, 1, 1)),              # (NL, 7, d)
        final_ln=jnp.stack([ones, zeros]),                      # (2, d) decoder-stack norm
    )


def _init_transformer(key, d, n_enc, n_dec):
    k1, k2 = jax.random.split(key)
    return dict(encoder=_init_encoder_stack(k1, d, n_enc),
                decoder=_init_decoder_stack(k2, d, n_dec))


def init_dual_branch(key, d_model, nhead=2, encoder_num_layers=2, decoder_num_layers=2):
    k1, k2 = jax.random.split(key)
    return dict(
        target_stream=_init_transformer(k1, d_model, encoder_num_layers, decoder_num_layers),
        detection_stream=_init_transformer(k2, d_model, encoder_num_layers, decoder_num_layers),
    )


# ----------------------------------------------------------------------------- demo

if __name__ == "__main__":
    d_model = 32
    nhead = 2
    batch = 2
    num_targets_plus_1 = 8     # num_targets + null-target
    num_detections = 6

    key = jax.random.PRNGKey(0)
    k_t, k_d, k_m, k_p = jax.random.split(key, 4)

    targets = jax.random.normal(k_t, (num_targets_plus_1, batch, d_model), jnp.float32)
    detections = jax.random.normal(k_d, (num_detections, batch, d_model), jnp.float32)
    # additive memory mask, shape (num_targets+1, num_detections)
    memory_mask = 0.1 * jax.random.normal(
        k_m, (num_targets_plus_1, num_detections), jnp.float32)

    params = init_dual_branch(k_p, d_model, nhead,
                              encoder_num_layers=2, decoder_num_layers=2)

    fwd = jax.jit(functools.partial(dual_branch_forward, nhead=nhead))
    transformed_detections, transformed_targets = fwd(
        targets, detections, params,
        src_key_padding_mask=None, tgt_key_padding_mask=None, memory_mask=memory_mask)

    jax.block_until_ready((transformed_detections, transformed_targets))

    assert transformed_detections.shape == (num_detections, batch, d_model)
    assert transformed_targets.shape == (num_targets_plus_1, batch, d_model)
    assert bool(jnp.all(jnp.isfinite(transformed_detections)))
    assert bool(jnp.all(jnp.isfinite(transformed_targets)))
    print("KERNEL_OK")
</pallas_src>

<mosaic_0001>
module attributes {stable_mosaic.version = 11 : i64} {
  func.func @kernel(%arg0: i32, %arg1: memref<16x32xf32, #tpu.memory_space<vmem>>, %arg2: memref<1x32x128xbf16, #tpu.memory_space<vmem>>, %arg3: memref<1x1x128xf32, #tpu.memory_space<vmem>>, %arg4: memref<1x32x2048xbf16, #tpu.memory_space<vmem>>, %arg5: memref<1x1x2048xf32, #tpu.memory_space<vmem>>, %arg6: memref<1x2048x32xbf16, #tpu.memory_space<vmem>>, %arg7: memref<1x5x32xf32, #tpu.memory_space<vmem>>, %arg8: memref<2x32xf32, #tpu.memory_space<vmem>>, %arg9: memref<16x32xf32, #tpu.memory_space<vmem>>, %arg10: memref<16x32xf32, #tpu.memory_space<vmem>>) attributes {dimension_semantics = [#tpu.dimension_semantics<arbitrary>], iteration_bounds = array<i64: 2>, scalar_prefetch = 0 : i64, scratch_operands = 1 : i64, tpu.core_type = #tpu.core_type<tc>, window_params = [{pipeline_mode = #tpu.pipeline_mode<synchronous>, transform_indices = @transform_0, window_bounds = array<i64: 16, 32>}, {transform_indices = @transform_1, window_bounds = array<i64: 1, 32, 128>}, {transform_indices = @transform_2, window_bounds = array<i64: 1, 1, 128>}, {transform_indices = @transform_3, window_bounds = array<i64: 1, 32, 2048>}, {transform_indices = @transform_4, window_bounds = array<i64: 1, 1, 2048>}, {transform_indices = @transform_5, window_bounds = array<i64: 1, 2048, 32>}, {transform_indices = @transform_6, window_bounds = array<i64: 1, 5, 32>}, {pipeline_mode = #tpu.pipeline_mode<synchronous>, transform_indices = @transform_7, window_bounds = array<i64: 2, 32>}, {pipeline_mode = #tpu.pipeline_mode<synchronous>, transform_indices = @transform_8, window_bounds = array<i64: 16, 32>}]} {
    %c0_i32 = arith.constant 0 : i32
    %0 = arith.cmpi eq, %arg0, %c0_i32 : i32
    %1 = arith.extui %0 : i1 to i32
    %c0_i32_0 = arith.constant 0 : i32
    %2 = arith.cmpi ne, %1, %c0_i32_0 : i32
    scf.if %2 {
      %c0_57 = arith.constant 0 : index
      %c0_58 = arith.constant 0 : index
      %172 = vector.load %arg1[%c0_57, %c0_58] : memref<16x32xf32, #tpu.memory_space<vmem>>, vector<16x32xf32>
      %c0_59 = arith.constant 0 : index
      %c0_60 = arith.constant 0 : index
      %173 = vector.load %arg10[%c0_59, %c0_60] : memref<16x32xf32, #tpu.memory_space<vmem>>, vector<16x32xf32>
      tpu.vector_store %arg10[%c0_59, %c0_60], %172 {strides = array<i32>} : memref<16x32xf32, #tpu.memory_space<vmem>>, vector<16x32xf32>,
    } else {
    }
    %c0 = arith.constant 0 : index
    %c0_1 = arith.constant 0 : index
    %3 = vector.load %arg10[%c0, %c0_1] : memref<16x32xf32, #tpu.memory_space<vmem>>, vector<16x32xf32>
    %c0_2 = arith.constant 0 : index
    %c0_3 = arith.constant 0 : index
    %c0_4 = arith.constant 0 : index
    %4 = vector.load %arg2[%c0_2, %c0_3, %c0_4] : memref<1x32x128xbf16, #tpu.memory_space<vmem>>, vector<1x32x128xbf16>
    %5 = vector.shape_cast %4 : vector<1x32x128xbf16> to vector<32x128xbf16>
    %c0_5 = arith.constant 0 : index
    %c0_6 = arith.constant 0 : index
    %c0_7 = arith.constant 0 : index
    %6 = vector.load %arg3[%c0_5, %c0_6, %c0_7] : memref<1x1x128xf32, #tpu.memory_space<vmem>>, vector<1x1x128xf32>
    %7 = vector.shape_cast %6 : vector<1x1x128xf32> to vector<1x128xf32>
    %c0_8 = arith.constant 0 : index
    %c0_9 = arith.constant 0 : index
    %c0_10 = arith.constant 0 : index
    %8 = vector.load %arg7[%c0_8, %c0_9, %c0_10] : memref<1x5x32xf32, #tpu.memory_space<vmem>>, vector<1x5x32xf32>
    %9 = vector.shape_cast %8 : vector<1x5x32xf32> to vector<5x32xf32>
    %10 = arith.truncf %3 : vector<16x32xf32> to vector<16x32xbf16>
    %11 = vector.extract_strided_slice %5 {offsets = [0, 0], sizes = [32, 96], strides = [1, 1]} : vector<32x128xbf16> to vector<32x96xbf16>
    %cst = arith.constant dense<0.000000e+00> : vector<16x96xf32>
    %12 = tpu.matmul %10, %11, %cst {dimension_numbers = #tpu.dot_dimension_numbers<[1], [0], [0], [1], [0, 0, 1, 1], [], []>} : vector<16x32xbf16>, vector<32x96xbf16>, vector<16x96xf32> -> vector<16x96xf32>
    %13 = vector.extract_strided_slice %7 {offsets = [0, 0], sizes = [1, 96], strides = [1, 1]} : vector<1x128xf32> to vector<1x96xf32>
    %14 = vector.broadcast %13 : vector<1x96xf32> to vector<16x96xf32>
    %15 = arith.addf %12, %14 : vector<16x96xf32>
    %16 = vector.extract_strided_slice %15 {offsets = [0, 0], sizes = [8, 96], strides = [1, 1]} : vector<16x96xf32> to vector<8x96xf32>
    %17 = vector.extract_strided_slice %16 {offsets = [0, 0], sizes = [8, 32], strides = [1, 1]} : vector<8x96xf32> to vector<8x32xf32>
    %18 = vector.extract_strided_slice %16 {offsets = [0, 32], sizes = [8, 32], strides = [1, 1]} : vector<8x96xf32> to vector<8x32xf32>
    %19 = vector.extract_strided_slice %16 {offsets = [0, 64], sizes = [8, 32], strides = [1, 1]} : vector<8x96xf32> to vector<8x32xf32>
    %20 = vector.extract_strided_slice %17 {offsets = [0, 0], sizes = [8, 16], strides = [1, 1]} : vector<8x32xf32> to vector<8x16xf32>
    %21 = vector.extract_strided_slice %18 {offsets = [0, 0], sizes = [8, 16], strides = [1, 1]} : vector<8x32xf32> to vector<8x16xf32>
    %22 = tpu.transpose %21, [1, 0] : vector<8x16xf32> -> vector<16x8xf32>
    %cst_11 = arith.constant dense<0.000000e+00> : vector<8x8xf32>
    %23 = tpu.matmul %20, %22, %cst_11 {dimension_numbers = #tpu.dot_dimension_numbers<[1], [0], [0], [1], [0, 0, 1, 1], [], []>} : vector<8x16xf32>, vector<16x8xf32>, vector<8x8xf32> -> vector<8x8xf32>
    %cst_12 = arith.constant 2.500000e-01 : f32
    %24 = vector.broadcast %cst_12 : f32 to vector<8x8xf32>
    %25 = arith.mulf %23, %24 : vector<8x8xf32>
    %cst_13 = arith.constant dense<0xFF800000> : vector<8xf32>
    %26 = vector.multi_reduction <maximumf>, %25, %cst_13 [1] : vector<8x8xf32> to vector<8xf32>
    %27 = vector.shape_cast %26 : vector<8xf32> to vector<8x1xf32>
    %28 = vector.broadcast %27 : vector<8x1xf32> to vector<8x8xf32>
    %29 = arith.subf %25, %28 : vector<8x8xf32>
    %30 = math.exp %29 : vector<8x8xf32>
    %cst_14 = arith.constant dense<0.000000e+00> : vector<8xf32>
    %31 = vector.multi_reduction <add>, %30, %cst_14 [1] : vector<8x8xf32> to vector<8xf32>
    %32 = vector.shape_cast %31 : vector<8xf32> to vector<8x1xf32>
    %33 = vector.extract_strided_slice %19 {offsets = [0, 0], sizes = [8, 16], strides = [1, 1]} : vector<8x32xf32> to vector<8x16xf32>
    %cst_15 = arith.constant dense<0.000000e+00> : vector<8x16xf32>
    %34 = tpu.matmul %30, %33, %cst_15 {dimension_numbers = #tpu.dot_dimension_numbers<[1], [0], [0], [1], [0, 0, 1, 1], [], []>} : vector<8x8xf32>, vector<8x16xf32>, vector<8x16xf32> -> vector<8x16xf32>
    %35 = tpu.reciprocal %32 {approx = true} : vector<8x1xf32> -> vector<8x1xf32>
    %36 = vector.broadcast %35 : vector<8x1xf32> to vector<8x16xf32>
    %37 = arith.mulf %34, %36 : vector<8x16xf32>
    %38 = vector.extract_strided_slice %17 {offsets = [0, 16], sizes = [8, 16], strides = [1, 1]} : vector<8x32xf32> to vector<8x16xf32>
    %39 = vector.extract_strided_slice %18 {offsets = [0, 16], sizes = [8, 16], strides = [1, 1]} : vector<8x32xf32> to vector<8x16xf32>
    %40 = tpu.transpose %39, [1, 0] : vector<8x16xf32> -> vector<16x8xf32>
    %cst_16 = arith.constant dense<0.000000e+00> : vector<8x8xf32>
    %41 = tpu.matmul %38, %40, %cst_16 {dimension_numbers = #tpu.dot_dimension_numbers<[1], [0], [0], [1], [0, 0, 1, 1], [], []>} : vector<8x16xf32>, vector<16x8xf32>, vector<8x8xf32> -> vector<8x8xf32>
    %cst_17 = arith.constant 2.500000e-01 : f32
    %42 = vector.broadcast %cst_17 : f32 to vector<8x8xf32>
    %43 = arith.mulf %41, %42 : vector<8x8xf32>
    %cst_18 = arith.constant dense<0xFF800000> : vector<8xf32>
    %44 = vector.multi_reduction <maximumf>, %43, %cst_18 [1] : vector<8x8xf32> to vector<8xf32>
    %45 = vector.shape_cast %44 : vector<8xf32> to vector<8x1xf32>
    %46 = vector.broadcast %45 : vector<8x1xf32> to vector<8x8xf32>
    %47 = arith.subf %43, %46 : vector<8x8xf32>
    %48 = math.exp %47 : vector<8x8xf32>
    %cst_19 = arith.constant dense<0.000000e+00> : vector<8xf32>
    %49 = vector.multi_reduction <add>, %48, %cst_19 [1] : vector<8x8xf32> to vector<8xf32>
    %50 = vector.shape_cast %49 : vector<8xf32> to vector<8x1xf32>
    %51 = vector.extract_strided_slice %19 {offsets = [0, 16], sizes = [8, 16], strides = [1, 1]} : vector<8x32xf32> to vector<8x16xf32>
    %cst_20 = arith.constant dense<0.000000e+00> : vector<8x16xf32>
    %52 = tpu.matmul %48, %51, %cst_20 {dimension_numbers = #tpu.dot_dimension_numbers<[1], [0], [0], [1], [0, 0, 1, 1], [], []>} : vector<8x8xf32>, vector<8x16xf32>, vector<8x16xf32> -> vector<8x16xf32>
    %53 = tpu.reciprocal %50 {approx = true} : vector<8x1xf32> -> vector<8x1xf32>
    %54 = vector.broadcast %53 : vector<8x1xf32> to vector<8x16xf32>
    %55 = arith.mulf %52, %54 : vector<8x16xf32>
    %56 = tpu.concatenate %37, %55 in 1 : vector<8x16xf32>, vector<8x16xf32> -> vector<8x32xf32>
    %57 = vector.extract_strided_slice %15 {offsets = [8, 0], sizes = [8, 96], strides = [1, 1]} : vector<16x96xf32> to vector<8x96xf32>
    %58 = vector.extract_strided_slice %57 {offsets = [0, 0], sizes = [8, 32], strides = [1, 1]} : vector<8x96xf32> to vector<8x32xf32>
    %59 = vector.extract_strided_slice %57 {offsets = [0, 32], sizes = [8, 32], strides = [1, 1]} : vector<8x96xf32> to vector<8x32xf32>
    %60 = vector.extract_strided_slice %57 {offsets = [0, 64], sizes = [8, 32], strides = [1, 1]} : vector<8x96xf32> to vector<8x32xf32>
    %61 = vector.extract_strided_slice %58 {offsets = [0, 0], sizes = [8, 16], strides = [1, 1]} : vector<8x32xf32> to vector<8x16xf32>
    %62 = vector.extract_strided_slice %59 {offsets = [0, 0], sizes = [8, 16], strides = [1, 1]} : vector<8x32xf32> to vector<8x16xf32>
    %63 = tpu.transpose %62, [1, 0] : vector<8x16xf32> -> vector<16x8xf32>
    %cst_21 = arith.constant dense<0.000000e+00> : vector<8x8xf32>
    %64 = tpu.matmul %61, %63, %cst_21 {dimension_numbers = #tpu.dot_dimension_numbers<[1], [0], [0], [1], [0, 0, 1, 1], [], []>} : vector<8x16xf32>, vector<16x8xf32>, vector<8x8xf32> -> vector<8x8xf32>
    %cst_22 = arith.constant 2.500000e-01 : f32
    %65 = vector.broadcast %cst_22 : f32 to vector<8x8xf32>
    %66 = arith.mulf %64, %65 : vector<8x8xf32>
    %cst_23 = arith.constant dense<0xFF800000> : vector<8xf32>
    %67 = vector.multi_reduction <maximumf>, %66, %cst_23 [1] : vector<8x8xf32> to vector<8xf32>
    %68 = vector.shape_cast %67 : vector<8xf32> to vector<8x1xf32>
    %69 = vector.broadcast %68 : vector<8x1xf32> to vector<8x8xf32>
    %70 = arith.subf %66, %69 : vector<8x8xf32>
    %71 = math.exp %70 : vector<8x8xf32>
    %cst_24 = arith.constant dense<0.000000e+00> : vector<8xf32>
    %72 = vector.multi_reduction <add>, %71, %cst_24 [1] : vector<8x8xf32> to vector<8xf32>
    %73 = vector.shape_cast %72 : vector<8xf32> to vector<8x1xf32>
    %74 = vector.extract_strided_slice %60 {offsets = [0, 0], sizes = [8, 16], strides = [1, 1]} : vector<8x32xf32> to vector<8x16xf32>
    %cst_25 = arith.constant dense<0.000000e+00> : vector<8x16xf32>
    %75 = tpu.matmul %71, %74, %cst_25 {dimension_numbers = #tpu.dot_dimension_numbers<[1], [0], [0], [1], [0, 0, 1, 1], [], []>} : vector<8x8xf32>, vector<8x16xf32>, vector<8x16xf32> -> vector<8x16xf32>
    %76 = tpu.reciprocal %73 {approx = true} : vector<8x1xf32> -> vector<8x1xf32>
    %77 = vector.broadcast %76 : vector<8x1xf32> to vector<8x16xf32>
    %78 = arith.mulf %75, %77 : vector<8x16xf32>
    %79 = vector.extract_strided_slice %58 {offsets = [0, 16], sizes = [8, 16], strides = [1, 1]} : vector<8x32xf32> to vector<8x16xf32>
    %80 = vector.extract_strided_slice %59 {offsets = [0, 16], sizes = [8, 16], strides = [1, 1]} : vector<8x32xf32> to vector<8x16xf32>
    %81 = tpu.transpose %80, [1, 0] : vector<8x16xf32> -> vector<16x8xf32>
    %cst_26 = arith.constant dense<0.000000e+00> : vector<8x8xf32>
    %82 = tpu.matmul %79, %81, %cst_26 {dimension_numbers = #tpu.dot_dimension_numbers<[1], [0], [0], [1], [0, 0, 1, 1], [], []>} : vector<8x16xf32>, vector<16x8xf32>, vector<8x8xf32> -> vector<8x8xf32>
    %cst_27 = arith.constant 2.500000e-01 : f32
    %83 = vector.broadcast %cst_27 : f32 to vector<8x8xf32>
    %84 = arith.mulf %82, %83 : vector<8x8xf32>
    %cst_28 = arith.constant dense<0xFF800000> : vector<8xf32>
    %85 = vector.multi_reduction <maximumf>, %84, %cst_28 [1] : vector<8x8xf32> to vector<8xf32>
    %86 = vector.shape_cast %85 : vector<8xf32> to vector<8x1xf32>
    %87 = vector.broadcast %86 : vector<8x1xf32> to vector<8x8xf32>
    %88 = arith.subf %84, %87 : vector<8x8xf32>
    %89 = math.exp %88 : vector<8x8xf32>
    %cst_29 = arith.constant dense<0.000000e+00> : vector<8xf32>
    %90 = vector.multi_reduction <add>, %89, %cst_29 [1] : vector<8x8xf32> to vector<8xf32>
    %91 = vector.shape_cast %90 : vector<8xf32> to vector<8x1xf32>
    %92 = vector.extract_strided_slice %60 {offsets = [0, 16], sizes = [8, 16], strides = [1, 1]} : vector<8x32xf32> to vector<8x16xf32>
    %cst_30 = arith.constant dense<0.000000e+00> : vector<8x16xf32>
    %93 = tpu.matmul %89, %92, %cst_30 {dimension_numbers = #tpu.dot_dimension_numbers<[1], [0], [0], [1], [0, 0, 1, 1], [], []>} : vector<8x8xf32>, vector<8x16xf32>, vector<8x16xf32> -> vector<8x16xf32>
    %94 = tpu.reciprocal %91 {approx = true} : vector<8x1xf32> -> vector<8x1xf32>
    %95 = vector.broadcast %94 : vector<8x1xf32> to vector<8x16xf32>
    %96 = arith.mulf %93, %95 : vector<8x16xf32>
    %97 = tpu.concatenate %78, %96 in 1 : vector<8x16xf32>, vector<8x16xf32> -> vector<8x32xf32>
    %98 = tpu.concatenate %56, %97 in 0 : vector<8x32xf32>, vector<8x32xf32> -> vector<16x32xf32>
    %99 = arith.truncf %98 : vector<16x32xf32> to vector<16x32xbf16>
    %100 = vector.extract_strided_slice %5 {offsets = [0, 96], sizes = [32, 32], strides = [1, 1]} : vector<32x128xbf16> to vector<32x32xbf16>
    %cst_31 = arith.constant dense<0.000000e+00> : vector<16x32xf32>
    %101 = tpu.matmul %99, %100, %cst_31 {dimension_numbers = #tpu.dot_dimension_numbers<[1], [0], [0], [1], [0, 0, 1, 1], [], []>} : vector<16x32xbf16>, vector<32x32xbf16>, vector<16x32xf32> -> vector<16x32xf32>
    %102 = vector.extract_strided_slice %7 {offsets = [0, 96], sizes = [1, 32], strides = [1, 1]} : vector<1x128xf32> to vector<1x32xf32>
    %103 = vector.broadcast %102 : vector<1x32xf32> to vector<16x32xf32>
    %104 = arith.addf %101, %103 : vector<16x32xf32>
    %105 = arith.addf %3, %104 : vector<16x32xf32>
    %106 = vector.extract_strided_slice %9 {offsets = [0, 0], sizes = [1, 32], strides = [1, 1]} : vector<5x32xf32> to vector<1x32xf32>
    %107 = vector.extract_strided_slice %9 {offsets = [1, 0], sizes = [1, 32], strides = [1, 1]} : vector<5x32xf32> to vector<1x32xf32>
    %cst_32 = arith.constant dense<0.000000e+00> : vector<16xf32>
    %108 = vector.multi_reduction <add>, %105, %cst_32 [1] : vector<16x32xf32> to vector<16xf32>
    %109 = vector.shape_cast %108 : vector<16xf32> to vector<16x1xf32>
    %cst_33 = arith.constant 3.200000e+01 : f32
    %110 = vector.broadcast %cst_33 : f32 to vector<16x1xf32>
    %111 = arith.divf %109, %110 : vector<16x1xf32>
    %112 = vector.broadcast %111 : vector<16x1xf32> to vector<16x32xf32>
    %113 = arith.subf %105, %112 : vector<16x32xf32>
    %114 = arith.mulf %113, %113 : vector<16x32xf32>
    %cst_34 = arith.constant dense<0.000000e+00> : vector<16xf32>
    %115 = vector.multi_reduction <add>, %114, %cst_34 [1] : vector<16x32xf32> to vector<16xf32>
    %116 = vector.shape_cast %115 : vector<16xf32> to vector<16x1xf32>
    %cst_35 = arith.constant 3.200000e+01 : f32
    %117 = vector.broadcast %cst_35 : f32 to vector<16x1xf32>
    %118 = arith.divf %116, %117 : vector<16x1xf32>
    %cst_36 = arith.constant 9.99999974E-6 : f32
    %119 = vector.broadcast %cst_36 : f32 to vector<16x1xf32>
    %120 = arith.addf %118, %119 : vector<16x1xf32>
    %121 = math.rsqrt %120 : vector<16x1xf32>
    %122 = vector.broadcast %121 : vector<16x1xf32> to vector<16x32xf32>
    %123 = arith.mulf %113, %122 : vector<16x32xf32>
    %124 = vector.broadcast %106 : vector<1x32xf32> to vector<16x32xf32>
    %125 = arith.mulf %123, %124 : vector<16x32xf32>
    %126 = vector.broadcast %107 : vector<1x32xf32> to vector<16x32xf32>
    %127 = arith.addf %125, %126 : vector<16x32xf32>
    %128 = arith.truncf %127 : vector<16x32xf32> to vector<16x32xbf16>
    %c0_37 = arith.constant 0 : index
    %c0_38 = arith.constant 0 : index
    %c0_39 = arith.constant 0 : index
    %129 = vector.load %arg4[%c0_37, %c0_38, %c0_39] : memref<1x32x2048xbf16, #tpu.memory_space<vmem>>, vector<1x32x2048xbf16>
    %130 = vector.shape_cast %129 : vector<1x32x2048xbf16> to vector<32x2048xbf16>
    %cst_40 = arith.constant dense<0.000000e+00> : vector<16x2048xf32>
    %131 = tpu.matmul %128, %130, %cst_40 {dimension_numbers = #tpu.dot_dimension_numbers<[1], [0], [0], [1], [0, 0, 1, 1], [], []>} : vector<16x32xbf16>, vector<32x2048xbf16>, vector<16x2048xf32> -> vector<16x2048xf32>
    %c0_41 = arith.constant 0 : index
    %c0_42 = arith.constant 0 : index
    %c0_43 = arith.constant 0 : index
    %132 = vector.load %arg5[%c0_41, %c0_42, %c0_43] : memref<1x1x2048xf32, #tpu.memory_space<vmem>>, vector<1x1x2048xf32>
    %133 = vector.shape_cast %132 : vector<1x1x2048xf32> to vector<1x2048xf32>
    %134 = vector.broadcast %133 : vector<1x2048xf32> to vector<16x2048xf32>
    %135 = arith.addf %131, %134 : vector<16x2048xf32>
    %cst_44 = arith.constant 0.000000e+00 : f32
    %136 = vector.broadcast %cst_44 : f32 to vector<16x2048xf32>
    %137 = arith.maximumf %135, %136 : vector<16x2048xf32>
    %138 = arith.truncf %137 : vector<16x2048xf32> to vector<16x2048xbf16>
    %c0_45 = arith.constant 0 : index
    %c0_46 = arith.constant 0 : index
    %c0_47 = arith.constant 0 : index
    %139 = vector.load %arg6[%c0_45, %c0_46, %c0_47] : memref<1x2048x32xbf16, #tpu.memory_space<vmem>>, vector<1x2048x32xbf16>
    %140 = vector.shape_cast %139 : vector<1x2048x32xbf16> to vector<2048x32xbf16>
    %cst_48 = arith.constant dense<0.000000e+00> : vector<16x32xf32>
    %141 = tpu.matmul %138, %140, %cst_48 {dimension_numbers = #tpu.dot_dimension_numbers<[1], [0], [0], [1], [0, 0, 1, 1], [], []>} : vector<16x2048xbf16>, vector<2048x32xbf16>, vector<16x32xf32> -> vector<16x32xf32>
    %142 = vector.extract_strided_slice %9 {offsets = [4, 0], sizes = [1, 32], strides = [1, 1]} : vector<5x32xf32> to vector<1x32xf32>
    %143 = vector.broadcast %142 : vector<1x32xf32> to vector<16x32xf32>
    %144 = arith.addf %141, %143 : vector<16x32xf32>
    %145 = arith.addf %127, %144 : vector<16x32xf32>
    %146 = vector.extract_strided_slice %9 {offsets = [2, 0], sizes = [1, 32], strides = [1, 1]} : vector<5x32xf32> to vector<1x32xf32>
    %147 = vector.extract_strided_slice %9 {offsets = [3, 0], sizes = [1, 32], strides = [1, 1]} : vector<5x32xf32> to vector<1x32xf32>
    %cst_49 = arith.constant dense<0.000000e+00> : vector<16xf32>
    %148 = vector.multi_reduction <add>, %145, %cst_49 [1] : vector<16x32xf32> to vector<16xf32>
    %149 = vector.shape_cast %148 : vector<16xf32> to vector<16x1xf32>
    %cst_50 = arith.constant 3.200000e+01 : f32
    %150 = vector.broadcast %cst_50 : f32 to vector<16x1xf32>
    %151 = arith.divf %149, %150 : vector<16x1xf32>
    %152 = vector.broadcast %151 : vector<16x1xf32> to vector<16x32xf32>
    %153 = arith.subf %145, %152 : vector<16x32xf32>
    %154 = arith.mulf %153, %153 : vector<16x32xf32>
    %cst_51 = arith.constant dense<0.000000e+00> : vector<16xf32>
    %155 = vector.multi_reduction <add>, %154, %cst_51 [1] : vector<16x32xf32> to vector<16xf32>
    %156 = vector.shape_cast %155 : vector<16xf32> to vector<16x1xf32>
    %cst_52 = arith.constant 3.200000e+01 : f32
    %157 = vector.broadcast %cst_52 : f32 to vector<16x1xf32>
    %158 = arith.divf %156, %157 : vector<16x1xf32>
    %cst_53 = arith.constant 9.99999974E-6 : f32
    %159 = vector.broadcast %cst_53 : f32 to vector<16x1xf32>
    %160 = arith.addf %158, %159 : vector<16x1xf32>
    %161 = math.rsqrt %160 : vector<16x1xf32>
    %162 = vector.broadcast %161 : vector<16x1xf32> to vector<16x32xf32>
    %163 = arith.mulf %153, %162 : vector<16x32xf32>
    %164 = vector.broadcast %146 : vector<1x32xf32> to vector<16x32xf32>
    %165 = arith.mulf %163, %164 : vector<16x32xf32>
    %166 = vector.broadcast %147 : vector<1x32xf32> to vector<16x32xf32>
    %167 = arith.addf %165, %166 : vector<16x32xf32>
    %c0_54 = arith.constant 0 : index
    %c0_55 = arith.constant 0 : index
    %168 = vector.load %arg10[%c0_54, %c0_55] : memref<16x32xf32, #tpu.memory_space<vmem>>, vector<16x32xf32>
    tpu.vector_store %arg10[%c0_54, %c0_55], %167 {strides = array<i32>} : memref<16x32xf32, #tpu.memory_space<vmem>>, vector<16x32xf32>,
    %c1_i32 = arith.constant 1 : i32
    %169 = arith.cmpi eq, %arg0, %c1_i32 : i32
    %170 = arith.extui %169 : i1 to i32
    %c0_i32_56 = arith.constant 0 : i32
    %171 = arith.cmpi ne, %170, %c0_i32_56 : i32
    scf.if %171 {
      %c0_57 = arith.constant 0 : index
      %c0_58 = arith.constant 0 : index
      %172 = vector.load %arg8[%c0_57, %c0_58] : memref<2x32xf32, #tpu.memory_space<vmem>>, vector<2x32xf32>
      %173 = vector.extract_strided_slice %172 {offsets = [0, 0], sizes = [1, 32], strides = [1, 1]} : vector<2x32xf32> to vector<1x32xf32>
      %174 = vector.extract_strided_slice %172 {offsets = [1, 0], sizes = [1, 32], strides = [1, 1]} : vector<2x32xf32> to vector<1x32xf32>
      %cst_59 = arith.constant dense<0.000000e+00> : vector<16xf32>
      %175 = vector.multi_reduction <add>, %167, %cst_59 [1] : vector<16x32xf32> to vector<16xf32>
      %176 = vector.shape_cast %175 : vector<16xf32> to vector<16x1xf32>
      %cst_60 = arith.constant 3.200000e+01 : f32
      %177 = vector.broadcast %cst_60 : f32 to vector<16x1xf32>
      %178 = arith.divf %176, %177 : vector<16x1xf32>
      %179 = vector.broadcast %178 : vector<16x1xf32> to vector<16x32xf32>
      %180 = arith.subf %167, %179 : vector<16x32xf32>
      %181 = arith.mulf %180, %180 : vector<16x32xf32>
      %cst_61 = arith.constant dense<0.000000e+00> : vector<16xf32>
      %182 = vector.multi_reduction <add>, %181, %cst_61 [1] : vector<16x32xf32> to vector<16xf32>
      %183 = vector.shape_cast %182 : vector<16xf32> to vector<16x1xf32>
      %cst_62 = arith.constant 3.200000e+01 : f32
      %184 = vector.broadcast %cst_62 : f32 to vector<16x1xf32>
      %185 = arith.divf %183, %184 : vector<16x1xf32>
      %cst_63 = arith.constant 9.99999974E-6 : f32
      %186 = vector.broadcast %cst_63 : f32 to vector<16x1xf32>
      %187 = arith.addf %185, %186 : vector<16x1xf32>
      %188 = math.rsqrt %187 : vector<16x1xf32>
      %189 = vector.broadcast %188 : vector<16x1xf32> to vector<16x32xf32>
      %190 = arith.mulf %180, %189 : vector<16x32xf32>
      %191 = vector.broadcast %173 : vector<1x32xf32> to vector<16x32xf32>
      %192 = arith.mulf %190, %191 : vector<16x32xf32>
      %193 = vector.broadcast %174 : vector<1x32xf32> to vector<16x32xf32>
      %194 = arith.addf %192, %193 : vector<16x32xf32>
      %c0_64 = arith.constant 0 : index
      %c0_65 = arith.constant 0 : index
      %195 = vector.load %arg9[%c0_64, %c0_65] : memref<16x32xf32, #tpu.memory_space<vmem>>, vector<16x32xf32>
      tpu.vector_store %arg9[%c0_64, %c0_65], %194 {strides = array<i32>} : memref<16x32xf32, #tpu.memory_space<vmem>>, vector<16x32xf32>,
    } else {
    }
    return
  }
  func.func @transform_0(%arg0: i32) -> (i32, i32) {
    %c0_i32 = arith.constant 0 : i32
    %c0_i32_0 = arith.constant 0 : i32
    %c0_i32_1 = arith.constant 0 : i32
    return %c0_i32, %c0_i32_0 : i32, i32
  }
  func.func @transform_1(%arg0: i32) -> (i32, i32, i32) {
    %c0_i32 = arith.constant 0 : i32
    %c0_i32_0 = arith.constant 0 : i32
    %c0_i32_1 = arith.constant 0 : i32
    return %arg0, %c0_i32, %c0_i32_0 : i32, i32, i32
  }
  func.func @transform_2(%arg0: i32) -> (i32, i32, i32) {
    %c0_i32 = arith.constant 0 : i32
    %c0_i32_0 = arith.constant 0 : i32
    %c0_i32_1 = arith.constant 0 : i32
    return %arg0, %c0_i32, %c0_i32_0 : i32, i32, i32
  }
  func.func @transform_3(%arg0: i32) -> (i32, i32, i32) {
    %c0_i32 = arith.constant 0 : i32
    %c0_i32_0 = arith.constant 0 : i32
    %c0_i32_1 = arith.constant 0 : i32
    return %arg0, %c0_i32, %c0_i32_0 : i32, i32, i32
  }
  func.func @transform_4(%arg0: i32) -> (i32, i32, i32) {
    %c0_i32 = arith.constant 0 : i32
    %c0_i32_0 = arith.constant 0 : i32
    %c0_i32_1 = arith.constant 0 : i32
    return %arg0, %c0_i32, %c0_i32_0 : i32, i32, i32
  }
  func.func @transform_5(%arg0: i32) -> (i32, i32, i32) {
    %c0_i32 = arith.constant 0 : i32
    %c0_i32_0 = arith.constant 0 : i32
    %c0_i32_1 = arith.constant 0 : i32
    return %arg0, %c0_i32, %c0_i32_0 : i32, i32, i32
  }
  func.func @transform_6(%arg0: i32) -> (i32, i32, i32) {
    %c0_i32 = arith.constant 0 : i32
    %c0_i32_0 = arith.constant 0 : i32
    %c0_i32_1 = arith.constant 0 : i32
    return %arg0, %c0_i32, %c0_i32_0 : i32, i32, i32
  }
  func.func @transform_7(%arg0: i32) -> (i32, i32) {
    %c0_i32 = arith.constant 0 : i32
    %c0_i32_0 = arith.constant 0 : i32
    %c0_i32_1 = arith.constant 0 : i32
    return %c0_i32, %c0_i32_0 : i32, i32
  }
  func.func @transform_8(%arg0: i32) -> (i32, i32) {
    %c0_i32 = arith.constant 0 : i32
    %c0_i32_0 = arith.constant 0 : i32
    %c0_i32_1 = arith.constant 0 : i32
    return %c0_i32, %c0_i32_0 : i32, i32
  }
}

module attributes {stable_mosaic.version = 11 : i64} {
  func.func @kernel(%arg0: i32, %arg1: memref<12x32xf32, #tpu.memory_space<vmem>>, %arg2: memref<16x32xf32, #tpu.memory_space<vmem>>, %arg3: memref<2x6x8xf32, #tpu.memory_space<vmem>>, %arg4: memref<1x32x128xbf16, #tpu.memory_space<vmem>>, %arg5: memref<1x1x128xf32, #tpu.memory_space<vmem>>, %arg6: memref<1x32x128xbf16, #tpu.memory_space<vmem>>, %arg7: memref<1x1x128xf32, #tpu.memory_space<vmem>>, %arg8: memref<1x32x2048xbf16, #tpu.memory_space<vmem>>, %arg9: memref<1x1x2048xf32, #tpu.memory_space<vmem>>, %arg10: memref<1x2048x32xbf16, #tpu.memory_space<vmem>>, %arg11: memref<1x7x32xf32, #tpu.memory_space<vmem>>, %arg12: memref<2x32xf32, #tpu.memory_space<vmem>>, %arg13: memref<12x32xf32, #tpu.memory_space<vmem>>, %arg14: memref<12x32xf32, #tpu.memory_space<vmem>>) attributes {dimension_semantics = [#tpu.dimension_semantics<arbitrary>], iteration_bounds = array<i64: 2>, scalar_prefetch = 0 : i64, scratch_operands = 1 : i64, tpu.core_type = #tpu.core_type<tc>, window_params = [{pipeline_mode = #tpu.pipeline_mode<synchronous>, transform_indices = @transform_0, window_bounds = array<i64: 12, 32>}, {pipeline_mode = #tpu.pipeline_mode<synchronous>, transform_indices = @transform_1, window_bounds = array<i64: 16, 32>}, {pipeline_mode = #tpu.pipeline_mode<synchronous>, transform_indices = @transform_2, window_bounds = array<i64: 2, 6, 8>}, {transform_indices = @transform_3, window_bounds = array<i64: 1, 32, 128>}, {transform_indices = @transform_4, window_bounds = array<i64: 1, 1, 128>}, {transform_indices = @transform_5, window_bounds = array<i64: 1, 32, 128>}, {transform_indices = @transform_6, window_bounds = array<i64: 1, 1, 128>}, {transform_indices = @transform_7, window_bounds = array<i64: 1, 32, 2048>}, {transform_indices = @transform_8, window_bounds = array<i64: 1, 1, 2048>}, {transform_indices = @transform_9, window_bounds = array<i64: 1, 2048, 32>}, {transform_indices = @transform_10, window_bounds = array<i64: 1, 7, 32>}, {pipeline_mode = #tpu.pipeline_mode<synchronous>, transform_indices = @transform_11, window_bounds = array<i64: 2, 32>}, {pipeline_mode = #tpu.pipeline_mode<synchronous>, transform_indices = @transform_12, window_bounds = array<i64: 12, 32>}]} {
    %c0_i32 = arith.constant 0 : i32
    %0 = arith.cmpi eq, %arg0, %c0_i32 : i32
    %1 = arith.extui %0 : i1 to i32
    %c0_i32_0 = arith.constant 0 : i32
    %2 = arith.cmpi ne, %1, %c0_i32_0 : i32
    scf.if %2 {
      %c0_98 = arith.constant 0 : index
      %c0_99 = arith.constant 0 : index
      %309 = vector.load %arg1[%c0_98, %c0_99] : memref<12x32xf32, #tpu.memory_space<vmem>>, vector<12x32xf32>
      %c0_100 = arith.constant 0 : index
      %c0_101 = arith.constant 0 : index
      %310 = vector.load %arg14[%c0_100, %c0_101] : memref<12x32xf32, #tpu.memory_space<vmem>>, vector<12x32xf32>
      tpu.vector_store %arg14[%c0_100, %c0_101], %309 {strides = array<i32>} : memref<12x32xf32, #tpu.memory_space<vmem>>, vector<12x32xf32>,
    } else {
    }
    %c0 = arith.constant 0 : index
    %c0_1 = arith.constant 0 : index
    %3 = vector.load %arg14[%c0, %c0_1] : memref<12x32xf32, #tpu.memory_space<vmem>>, vector<12x32xf32>
    %c0_2 = arith.constant 0 : index
    %c0_3 = arith.constant 0 : index
    %4 = vector.load %arg2[%c0_2, %c0_3] : memref<16x32xf32, #tpu.memory_space<vmem>>, vector<16x32xf32>
    %c0_4 = arith.constant 0 : index
    %c0_5 = arith.constant 0 : index
    %c0_6 = arith.constant 0 : index
    %5 = vector.load %arg4[%c0_4, %c0_5, %c0_6] : memref<1x32x128xbf16, #tpu.memory_space<vmem>>, vector<1x32x128xbf16>
    %6 = vector.shape_cast %5 : vector<1x32x128xbf16> to vector<32x128xbf16>
    %c0_7 = arith.constant 0 : index
    %c0_8 = arith.constant 0 : index
    %c0_9 = arith.constant 0 : index
    %7 = vector.load %arg5[%c0_7, %c0_8, %c0_9] : memref<1x1x128xf32, #tpu.memory_space<vmem>>, vector<1x1x128xf32>
    %8 = vector.shape_cast %7 : vector<1x1x128xf32> to vector<1x128xf32>
    %c0_10 = arith.constant 0 : index
    %c0_11 = arith.constant 0 : index
    %c0_12 = arith.constant 0 : index
    %9 = vector.load %arg6[%c0_10, %c0_11, %c0_12] : memref<1x32x128xbf16, #tpu.memory_space<vmem>>, vector<1x32x128xbf16>
    %10 = vector.shape_cast %9 : vector<1x32x128xbf16> to vector<32x128xbf16>
    %c0_13 = arith.constant 0 : index
    %c0_14 = arith.constant 0 : index
    %c0_15 = arith.constant 0 : index
    %11 = vector.load %arg7[%c0_13, %c0_14, %c0_15] : memref<1x1x128xf32, #tpu.memory_space<vmem>>, vector<1x1x128xf32>
    %12 = vector.shape_cast %11 : vector<1x1x128xf32> to vector<1x128xf32>
    %c0_16 = arith.constant 0 : index
    %c0_17 = arith.constant 0 : index
    %c0_18 = arith.constant 0 : index
    %13 = vector.load %arg11[%c0_16, %c0_17, %c0_18] : memref<1x7x32xf32, #tpu.memory_space<vmem>>, vector<1x7x32xf32>
    %14 = vector.shape_cast %13 : vector<1x7x32xf32> to vector<7x32xf32>
    %15 = arith.truncf %3 : vector<12x32xf32> to vector<12x32xbf16>
    %16 = vector.extract_strided_slice %6 {offsets = [0, 0], sizes = [32, 96], strides = [1, 1]} : vector<32x128xbf16> to vector<32x96xbf16>
    %cst = arith.constant dense<0.000000e+00> : vector<12x96xf32>
    %17 = tpu.matmul %15, %16, %cst {dimension_numbers = #tpu.dot_dimension_numbers<[1], [0], [0], [1], [0, 0, 1, 1], [], []>} : vector<12x32xbf16>, vector<32x96xbf16>, vector<12x96xf32> -> vector<12x96xf32>
    %18 = vector.extract_strided_slice %8 {offsets = [0, 0], sizes = [1, 96], strides = [1, 1]} : vector<1x128xf32> to vector<1x96xf32>
    %19 = vector.broadcast %18 : vector<1x96xf32> to vector<12x96xf32>
    %20 = arith.addf %17, %19 : vector<12x96xf32>
    %21 = vector.extract_strided_slice %20 {offsets = [0, 0], sizes = [6, 96], strides = [1, 1]} : vector<12x96xf32> to vector<6x96xf32>
    %22 = vector.extract_strided_slice %21 {offsets = [0, 0], sizes = [6, 32], strides = [1, 1]} : vector<6x96xf32> to vector<6x32xf32>
    %23 = vector.extract_strided_slice %21 {offsets = [0, 32], sizes = [6, 32], strides = [1, 1]} : vector<6x96xf32> to vector<6x32xf32>
    %24 = vector.extract_strided_slice %21 {offsets = [0, 64], sizes = [6, 32], strides = [1, 1]} : vector<6x96xf32> to vector<6x32xf32>
    %25 = vector.extract_strided_slice %22 {offsets = [0, 0], sizes = [6, 16], strides = [1, 1]} : vector<6x32xf32> to vector<6x16xf32>
    %26 = vector.extract_strided_slice %23 {offsets = [0, 0], sizes = [6, 16], strides = [1, 1]} : vector<6x32xf32> to vector<6x16xf32>
    %27 = tpu.transpose %26, [1, 0] : vector<6x16xf32> -> vector<16x6xf32>
    %cst_19 = arith.constant dense<0.000000e+00> : vector<6x6xf32>
    %28 = tpu.matmul %25, %27, %cst_19 {dimension_numbers = #tpu.dot_dimension_numbers<[1], [0], [0], [1], [0, 0, 1, 1], [], []>} : vector<6x16xf32>, vector<16x6xf32>, vector<6x6xf32> -> vector<6x6xf32>
    %cst_20 = arith.constant 2.500000e-01 : f32
    %29 = vector.broadcast %cst_20 : f32 to vector<6x6xf32>
    %30 = arith.mulf %28, %29 : vector<6x6xf32>
    %cst_21 = arith.constant dense<0xFF800000> : vector<6xf32>
    %31 = vector.multi_reduction <maximumf>, %30, %cst_21 [1] : vector<6x6xf32> to vector<6xf32>
    %32 = vector.shape_cast %31 : vector<6xf32> to vector<6x1xf32>
    %33 = vector.broadcast %32 : vector<6x1xf32> to vector<6x6xf32>
    %34 = arith.subf %30, %33 : vector<6x6xf32>
    %35 = math.exp %34 : vector<6x6xf32>
    %cst_22 = arith.constant dense<0.000000e+00> : vector<6xf32>
    %36 = vector.multi_reduction <add>, %35, %cst_22 [1] : vector<6x6xf32> to vector<6xf32>
    %37 = vector.shape_cast %36 : vector<6xf32> to vector<6x1xf32>
    %38 = vector.extract_strided_slice %24 {offsets = [0, 0], sizes = [6, 16], strides = [1, 1]} : vector<6x32xf32> to vector<6x16xf32>
    %cst_23 = arith.constant dense<0.000000e+00> : vector<6x16xf32>
    %39 = tpu.matmul %35, %38, %cst_23 {dimension_numbers = #tpu.dot_dimension_numbers<[1], [0], [0], [1], [0, 0, 1, 1], [], []>} : vector<6x6xf32>, vector<6x16xf32>, vector<6x16xf32> -> vector<6x16xf32>
    %40 = tpu.reciprocal %37 {approx = true} : vector<6x1xf32> -> vector<6x1xf32>
    %41 = vector.broadcast %40 : vector<6x1xf32> to vector<6x16xf32>
    %42 = arith.mulf %39, %41 : vector<6x16xf32>
    %43 = vector.extract_strided_slice %22 {offsets = [0, 16], sizes = [6, 16], strides = [1, 1]} : vector<6x32xf32> to vector<6x16xf32>
    %44 = vector.extract_strided_slice %23 {offsets = [0, 16], sizes = [6, 16], strides = [1, 1]} : vector<6x32xf32> to vector<6x16xf32>
    %45 = tpu.transpose %44, [1, 0] : vector<6x16xf32> -> vector<16x6xf32>
    %cst_24 = arith.constant dense<0.000000e+00> : vector<6x6xf32>
    %46 = tpu.matmul %43, %45, %cst_24 {dimension_numbers = #tpu.dot_dimension_numbers<[1], [0], [0], [1], [0, 0, 1, 1], [], []>} : vector<6x16xf32>, vector<16x6xf32>, vector<6x6xf32> -> vector<6x6xf32>
    %cst_25 = arith.constant 2.500000e-01 : f32
    %47 = vector.broadcast %cst_25 : f32 to vector<6x6xf32>
    %48 = arith.mulf %46, %47 : vector<6x6xf32>
    %cst_26 = arith.constant dense<0xFF800000> : vector<6xf32>
    %49 = vector.multi_reduction <maximumf>, %48, %cst_26 [1] : vector<6x6xf32> to vector<6xf32>
    %50 = vector.shape_cast %49 : vector<6xf32> to vector<6x1xf32>
    %51 = vector.broadcast %50 : vector<6x1xf32> to vector<6x6xf32>
    %52 = arith.subf %48, %51 : vector<6x6xf32>
    %53 = math.exp %52 : vector<6x6xf32>
    %cst_27 = arith.constant dense<0.000000e+00> : vector<6xf32>
    %54 = vector.multi_reduction <add>, %53, %cst_27 [1] : vector<6x6xf32> to vector<6xf32>
    %55 = vector.shape_cast %54 : vector<6xf32> to vector<6x1xf32>
    %56 = vector.extract_strided_slice %24 {offsets = [0, 16], sizes = [6, 16], strides = [1, 1]} : vector<6x32xf32> to vector<6x16xf32>
    %cst_28 = arith.constant dense<0.000000e+00> : vector<6x16xf32>
    %57 = tpu.matmul %53, %56, %cst_28 {dimension_numbers = #tpu.dot_dimension_numbers<[1], [0], [0], [1], [0, 0, 1, 1], [], []>} : vector<6x6xf32>, vector<6x16xf32>, vector<6x16xf32> -> vector<6x16xf32>
    %58 = tpu.reciprocal %55 {approx = true} : vector<6x1xf32> -> vector<6x1xf32>
    %59 = vector.broadcast %58 : vector<6x1xf32> to vector<6x16xf32>
    %60 = arith.mulf %57, %59 : vector<6x16xf32>
    %61 = tpu.concatenate %42, %60 in 1 : vector<6x16xf32>, vector<6x16xf32> -> vector<6x32xf32>
    %62 = vector.extract_strided_slice %20 {offsets = [6, 0], sizes = [6, 96], strides = [1, 1]} : vector<12x96xf32> to vector<6x96xf32>
    %63 = vector.extract_strided_slice %62 {offsets = [0, 0], sizes = [6, 32], strides = [1, 1]} : vector<6x96xf32> to vector<6x32xf32>
    %64 = vector.extract_strided_slice %62 {offsets = [0, 32], sizes = [6, 32], strides = [1, 1]} : vector<6x96xf32> to vector<6x32xf32>
    %65 = vector.extract_strided_slice %62 {offsets = [0, 64], sizes = [6, 32], strides = [1, 1]} : vector<6x96xf32> to vector<6x32xf32>
    %66 = vector.extract_strided_slice %63 {offsets = [0, 0], sizes = [6, 16], strides = [1, 1]} : vector<6x32xf32> to vector<6x16xf32>
    %67 = vector.extract_strided_slice %64 {offsets = [0, 0], sizes = [6, 16], strides = [1, 1]} : vector<6x32xf32> to vector<6x16xf32>
    %68 = tpu.transpose %67, [1, 0] : vector<6x16xf32> -> vector<16x6xf32>
    %cst_29 = arith.constant dense<0.000000e+00> : vector<6x6xf32>
    %69 = tpu.matmul %66, %68, %cst_29 {dimension_numbers = #tpu.dot_dimension_numbers<[1], [0], [0], [1], [0, 0, 1, 1], [], []>} : vector<6x16xf32>, vector<16x6xf32>, vector<6x6xf32> -> vector<6x6xf32>
    %cst_30 = arith.constant 2.500000e-01 : f32
    %70 = vector.broadcast %cst_30 : f32 to vector<6x6xf32>
    %71 = arith.mulf %69, %70 : vector<6x6xf32>
    %cst_31 = arith.constant dense<0xFF800000> : vector<6xf32>
    %72 = vector.multi_reduction <maximumf>, %71, %cst_31 [1] : vector<6x6xf32> to vector<6xf32>
    %73 = vector.shape_cast %72 : vector<6xf32> to vector<6x1xf32>
    %74 = vector.broadcast %73 : vector<6x1xf32> to vector<6x6xf32>
    %75 = arith.subf %71, %74 : vector<6x6xf32>
    %76 = math.exp %75 : vector<6x6xf32>
    %cst_32 = arith.constant dense<0.000000e+00> : vector<6xf32>
    %77 = vector.multi_reduction <add>, %76, %cst_32 [1] : vector<6x6xf32> to vector<6xf32>
    %78 = vector.shape_cast %77 : vector<6xf32> to vector<6x1xf32>
    %79 = vector.extract_strided_slice %65 {offsets = [0, 0], sizes = [6, 16], strides = [1, 1]} : vector<6x32xf32> to vector<6x16xf32>
    %cst_33 = arith.constant dense<0.000000e+00> : vector<6x16xf32>
    %80 = tpu.matmul %76, %79, %cst_33 {dimension_numbers = #tpu.dot_dimension_numbers<[1], [0], [0], [1], [0, 0, 1, 1], [], []>} : vector<6x6xf32>, vector<6x16xf32>, vector<6x16xf32> -> vector<6x16xf32>
    %81 = tpu.reciprocal %78 {approx = true} : vector<6x1xf32> -> vector<6x1xf32>
    %82 = vector.broadcast %81 : vector<6x1xf32> to vector<6x16xf32>
    %83 = arith.mulf %80, %82 : vector<6x16xf32>
    %84 = vector.extract_strided_slice %63 {offsets = [0, 16], sizes = [6, 16], strides = [1, 1]} : vector<6x32xf32> to vector<6x16xf32>
    %85 = vector.extract_strided_slice %64 {offsets = [0, 16], sizes = [6, 16], strides = [1, 1]} : vector<6x32xf32> to vector<6x16xf32>
    %86 = tpu.transpose %85, [1, 0] : vector<6x16xf32> -> vector<16x6xf32>
    %cst_34 = arith.constant dense<0.000000e+00> : vector<6x6xf32>
    %87 = tpu.matmul %84, %86, %cst_34 {dimension_numbers = #tpu.dot_dimension_numbers<[1], [0], [0], [1], [0, 0, 1, 1], [], []>} : vector<6x16xf32>, vector<16x6xf32>, vector<6x6xf32> -> vector<6x6xf32>
    %cst_35 = arith.constant 2.500000e-01 : f32
    %88 = vector.broadcast %cst_35 : f32 to vector<6x6xf32>
    %89 = arith.mulf %87, %88 : vector<6x6xf32>
    %cst_36 = arith.constant dense<0xFF800000> : vector<6xf32>
    %90 = vector.multi_reduction <maximumf>, %89, %cst_36 [1] : vector<6x6xf32> to vector<6xf32>
    %91 = vector.shape_cast %90 : vector<6xf32> to vector<6x1xf32>
    %92 = vector.broadcast %91 : vector<6x1xf32> to vector<6x6xf32>
    %93 = arith.subf %89, %92 : vector<6x6xf32>
    %94 = math.exp %93 : vector<6x6xf32>
    %cst_37 = arith.constant dense<0.000000e+00> : vector<6xf32>
    %95 = vector.multi_reduction <add>, %94, %cst_37 [1] : vector<6x6xf32> to vector<6xf32>
    %96 = vector.shape_cast %95 : vector<6xf32> to vector<6x1xf32>
    %97 = vector.extract_strided_slice %65 {offsets = [0, 16], sizes = [6, 16], strides = [1, 1]} : vector<6x32xf32> to vector<6x16xf32>
    %cst_38 = arith.constant dense<0.000000e+00> : vector<6x16xf32>
    %98 = tpu.matmul %94, %97, %cst_38 {dimension_numbers = #tpu.dot_dimension_numbers<[1], [0], [0], [1], [0, 0, 1, 1], [], []>} : vector<6x6xf32>, vector<6x16xf32>, vector<6x16xf32> -> vector<6x16xf32>
    %99 = tpu.reciprocal %96 {approx = true} : vector<6x1xf32> -> vector<6x1xf32>
    %100 = vector.broadcast %99 : vector<6x1xf32> to vector<6x16xf32>
    %101 = arith.mulf %98, %100 : vector<6x16xf32>
    %102 = tpu.concatenate %83, %101 in 1 : vector<6x16xf32>, vector<6x16xf32> -> vector<6x32xf32>
    %103 = tpu.concatenate %61, %102 in 0 : vector<6x32xf32>, vector<6x32xf32> -> vector<12x32xf32>
    %104 = arith.truncf %103 : vector<12x32xf32> to vector<12x32xbf16>
    %105 = vector.extract_strided_slice %6 {offsets = [0, 96], sizes = [32, 32], strides = [1, 1]} : vector<32x128xbf16> to vector<32x32xbf16>
    %cst_39 = arith.constant dense<0.000000e+00> : vector<12x32xf32>
    %106 = tpu.matmul %104, %105, %cst_39 {dimension_numbers = #tpu.dot_dimension_numbers<[1], [0], [0], [1], [0, 0, 1, 1], [], []>} : vector<12x32xbf16>, vector<32x32xbf16>, vector<12x32xf32> -> vector<12x32xf32>
    %107 = vector.extract_strided_slice %8 {offsets = [0, 96], sizes = [1, 32], strides = [1, 1]} : vector<1x128xf32> to vector<1x32xf32>
    %108 = vector.broadcast %107 : vector<1x32xf32> to vector<12x32xf32>
    %109 = arith.addf %106, %108 : vector<12x32xf32>
    %110 = arith.addf %3, %109 : vector<12x32xf32>
    %111 = vector.extract_strided_slice %14 {offsets = [0, 0], sizes = [1, 32], strides = [1, 1]} : vector<7x32xf32> to vector<1x32xf32>
    %112 = vector.extract_strided_slice %14 {offsets = [1, 0], sizes = [1, 32], strides = [1, 1]} : vector<7x32xf32> to vector<1x32xf32>
    %cst_40 = arith.constant dense<0.000000e+00> : vector<12xf32>
    %113 = vector.multi_reduction <add>, %110, %cst_40 [1] : vector<12x32xf32> to vector<12xf32>
    %114 = vector.shape_cast %113 : vector<12xf32> to vector<12x1xf32>
    %cst_41 = arith.constant 3.200000e+01 : f32
    %115 = vector.broadcast %cst_41 : f32 to vector<12x1xf32>
    %116 = arith.divf %114, %115 : vector<12x1xf32>
    %117 = vector.broadcast %116 : vector<12x1xf32> to vector<12x32xf32>
    %118 = arith.subf %110, %117 : vector<12x32xf32>
    %119 = arith.mulf %118, %118 : vector<12x32xf32>
    %cst_42 = arith.constant dense<0.000000e+00> : vector<12xf32>
    %120 = vector.multi_reduction <add>, %119, %cst_42 [1] : vector<12x32xf32> to vector<12xf32>
    %121 = vector.shape_cast %120 : vector<12xf32> to vector<12x1xf32>
    %cst_43 = arith.constant 3.200000e+01 : f32
    %122 = vector.broadcast %cst_43 : f32 to vector<12x1xf32>
    %123 = arith.divf %121, %122 : vector<12x1xf32>
    %cst_44 = arith.constant 9.99999974E-6 : f32
    %124 = vector.broadcast %cst_44 : f32 to vector<12x1xf32>
    %125 = arith.addf %123, %124 : vector<12x1xf32>
    %126 = math.rsqrt %125 : vector<12x1xf32>
    %127 = vector.broadcast %126 : vector<12x1xf32> to vector<12x32xf32>
    %128 = arith.mulf %118, %127 : vector<12x32xf32>
    %129 = vector.broadcast %111 : vector<1x32xf32> to vector<12x32xf32>
    %130 = arith.mulf %128, %129 : vector<12x32xf32>
    %131 = vector.broadcast %112 : vector<1x32xf32> to vector<12x32xf32>
    %132 = arith.addf %130, %131 : vector<12x32xf32>
    %133 = arith.truncf %132 : vector<12x32xf32> to vector<12x32xbf16>
    %134 = vector.extract_strided_slice %10 {offsets = [0, 0], sizes = [32, 32], strides = [1, 1]} : vector<32x128xbf16> to vector<32x32xbf16>
    %cst_45 = arith.constant dense<0.000000e+00> : vector<12x32xf32>
    %135 = tpu.matmul %133, %134, %cst_45 {dimension_numbers = #tpu.dot_dimension_numbers<[1], [0], [0], [1], [0, 0, 1, 1], [], []>} : vector<12x32xbf16>, vector<32x32xbf16>, vector<12x32xf32> -> vector<12x32xf32>
    %136 = vector.extract_strided_slice %12 {offsets = [0, 0], sizes = [1, 32], strides = [1, 1]} : vector<1x128xf32> to vector<1x32xf32>
    %137 = vector.broadcast %136 : vector<1x32xf32> to vector<12x32xf32>
    %138 = arith.addf %135, %137 : vector<12x32xf32>
    %139 = arith.truncf %4 : vector<16x32xf32> to vector<16x32xbf16>
    %140 = vector.extract_strided_slice %10 {offsets = [0, 32], sizes = [32, 64], strides = [1, 1]} : vector<32x128xbf16> to vector<32x64xbf16>
    %cst_46 = arith.constant dense<0.000000e+00> : vector<16x64xf32>
    %141 = tpu.matmul %139, %140, %cst_46 {dimension_numbers = #tpu.dot_dimension_numbers<[1], [0], [0], [1], [0, 0, 1, 1], [], []>} : vector<16x32xbf16>, vector<32x64xbf16>, vector<16x64xf32> -> vector<16x64xf32>
    %142 = vector.extract_strided_slice %12 {offsets = [0, 32], sizes = [1, 64], strides = [1, 1]} : vector<1x128xf32> to vector<1x64xf32>
    %143 = vector.broadcast %142 : vector<1x64xf32> to vector<16x64xf32>
    %144 = arith.addf %141, %143 : vector<16x64xf32>
    %145 = vector.extract_strided_slice %138 {offsets = [0, 0], sizes = [6, 32], strides = [1, 1]} : vector<12x32xf32> to vector<6x32xf32>
    %146 = vector.extract_strided_slice %144 {offsets = [0, 0], sizes = [8, 64], strides = [1, 1]} : vector<16x64xf32> to vector<8x64xf32>
    %147 = vector.extract_strided_slice %146 {offsets = [0, 0], sizes = [8, 32], strides = [1, 1]} : vector<8x64xf32> to vector<8x32xf32>
    %148 = vector.extract_strided_slice %146 {offsets = [0, 32], sizes = [8, 32], strides = [1, 1]} : vector<8x64xf32> to vector<8x32xf32>
    %c0_47 = arith.constant 0 : index
    %c0_48 = arith.constant 0 : index
    %c0_49 = arith.constant 0 : index
    %149 = vector.load %arg3[%c0_47, %c0_48, %c0_49] : memref<2x6x8xf32, #tpu.memory_space<vmem>>, vector<1x6x8xf32>
    %150 = vector.shape_cast %149 : vector<1x6x8xf32> to vector<6x8xf32>
    %151 = vector.extract_strided_slice %145 {offsets = [0, 0], sizes = [6, 16], strides = [1, 1]} : vector<6x32xf32> to vector<6x16xf32>
    %152 = vector.extract_strided_slice %147 {offsets = [0, 0], sizes = [8, 16], strides = [1, 1]} : vector<8x32xf32> to vector<8x16xf32>
    %153 = tpu.transpose %152, [1, 0] : vector<8x16xf32> -> vector<16x8xf32>
    %cst_50 = arith.constant dense<0.000000e+00> : vector<6x8xf32>
    %154 = tpu.matmul %151, %153, %cst_50 {dimension_numbers = #tpu.dot_dimension_numbers<[1], [0], [0], [1], [0, 0, 1, 1], [], []>} : vector<6x16xf32>, vector<16x8xf32>, vector<6x8xf32> -> vector<6x8xf32>
    %cst_51 = arith.constant 2.500000e-01 : f32
    %155 = vector.broadcast %cst_51 : f32 to vector<6x8xf32>
    %156 = arith.mulf %154, %155 : vector<6x8xf32>
    %157 = arith.addf %156, %150 : vector<6x8xf32>
    %cst_52 = arith.constant dense<0xFF800000> : vector<6xf32>
    %158 = vector.multi_reduction <maximumf>, %157, %cst_52 [1] : vector<6x8xf32> to vector<6xf32>
    %159 = vector.shape_cast %158 : vector<6xf32> to vector<6x1xf32>
    %160 = vector.broadcast %159 : vector<6x1xf32> to vector<6x8xf32>
    %161 = arith.subf %157, %160 : vector<6x8xf32>
    %162 = math.exp %161 : vector<6x8xf32>
    %cst_53 = arith.constant dense<0.000000e+00> : vector<6xf32>
    %163 = vector.multi_reduction <add>, %162, %cst_53 [1] : vector<6x8xf32> to vector<6xf32>
    %164 = vector.shape_cast %163 : vector<6xf32> to vector<6x1xf32>
    %165 = vector.extract_strided_slice %148 {offsets = [0, 0], sizes = [8, 16], strides = [1, 1]} : vector<8x32xf32> to vector<8x16xf32>
    %cst_54 = arith.constant dense<0.000000e+00> : vector<6x16xf32>
    %166 = tpu.matmul %162, %165, %cst_54 {dimension_numbers = #tpu.dot_dimension_numbers<[1], [0], [0], [1], [0, 0, 1, 1], [], []>} : vector<6x8xf32>, vector<8x16xf32>, vector<6x16xf32> -> vector<6x16xf32>
    %167 = tpu.reciprocal %164 {approx = true} : vector<6x1xf32> -> vector<6x1xf32>
    %168 = vector.broadcast %167 : vector<6x1xf32> to vector<6x16xf32>
    %169 = arith.mulf %166, %168 : vector<6x16xf32>
    %170 = vector.extract_strided_slice %145 {offsets = [0, 16], sizes = [6, 16], strides = [1, 1]} : vector<6x32xf32> to vector<6x16xf32>
    %171 = vector.extract_strided_slice %147 {offsets = [0, 16], sizes = [8, 16], strides = [1, 1]} : vector<8x32xf32> to vector<8x16xf32>
    %172 = tpu.transpose %171, [1, 0] : vector<8x16xf32> -> vector<16x8xf32>
    %cst_55 = arith.constant dense<0.000000e+00> : vector<6x8xf32>
    %173 = tpu.matmul %170, %172, %cst_55 {dimension_numbers = #tpu.dot_dimension_numbers<[1], [0], [0], [1], [0, 0, 1, 1], [], []>} : vector<6x16xf32>, vector<16x8xf32>, vector<6x8xf32> -> vector<6x8xf32>
    %cst_56 = arith.constant 2.500000e-01 : f32
    %174 = vector.broadcast %cst_56 : f32 to vector<6x8xf32>
    %175 = arith.mulf %173, %174 : vector<6x8xf32>
    %176 = arith.addf %175, %150 : vector<6x8xf32>
    %cst_57 = arith.constant dense<0xFF800000> : vector<6xf32>
    %177 = vector.multi_reduction <maximumf>, %176, %cst_57 [1] : vector<6x8xf32> to vector<6xf32>
    %178 = vector.shape_cast %177 : vector<6xf32> to vector<6x1xf32>
    %179 = vector.broadcast %178 : vector<6x1xf32> to vector<6x8xf32>
    %180 = arith.subf %176, %179 : vector<6x8xf32>
    %181 = math.exp %180 : vector<6x8xf32>
    %cst_58 = arith.constant dense<0.000000e+00> : vector<6xf32>
    %182 = vector.multi_reduction <add>, %181, %cst_58 [1] : vector<6x8xf32> to vector<6xf32>
    %183 = vector.shape_cast %182 : vector<6xf32> to vector<6x1xf32>
    %184 = vector.extract_strided_slice %148 {offsets = [0, 16], sizes = [8, 16], strides = [1, 1]} : vector<8x32xf32> to vector<8x16xf32>
    %cst_59 = arith.constant dense<0.000000e+00> : vector<6x16xf32>
    %185 = tpu.matmul %181, %184, %cst_59 {dimension_numbers = #tpu.dot_dimension_numbers<[1], [0], [0], [1], [0, 0, 1, 1], [], []>} : vector<6x8xf32>, vector<8x16xf32>, vector<6x16xf32> -> vector<6x16xf32>
    %186 = tpu.reciprocal %183 {approx = true} : vector<6x1xf32> -> vector<6x1xf32>
    %187 = vector.broadcast %186 : vector<6x1xf32> to vector<6x16xf32>
    %188 = arith.mulf %185, %187 : vector<6x16xf32>
    %189 = tpu.concatenate %169, %188 in 1 : vector<6x16xf32>, vector<6x16xf32> -> vector<6x32xf32>
    %190 = vector.extract_strided_slice %138 {offsets = [6, 0], sizes = [6, 32], strides = [1, 1]} : vector<12x32xf32> to vector<6x32xf32>
    %191 = vector.extract_strided_slice %144 {offsets = [8, 0], sizes = [8, 64], strides = [1, 1]} : vector<16x64xf32> to vector<8x64xf32>
    %192 = vector.extract_strided_slice %191 {offsets = [0, 0], sizes = [8, 32], strides = [1, 1]} : vector<8x64xf32> to vector<8x32xf32>
    %193 = vector.extract_strided_slice %191 {offsets = [0, 32], sizes = [8, 32], strides = [1, 1]} : vector<8x64xf32> to vector<8x32xf32>
    %c1 = arith.constant 1 : index
    %c0_60 = arith.constant 0 : index
    %c0_61 = arith.constant 0 : index
    %194 = vector.load %arg3[%c1, %c0_60, %c0_61] : memref<2x6x8xf32, #tpu.memory_space<vmem>>, vector<1x6x8xf32>
    %195 = vector.shape_cast %194 : vector<1x6x8xf32> to vector<6x8xf32>
    %196 = vector.extract_strided_slice %190 {offsets = [0, 0], sizes = [6, 16], strides = [1, 1]} : vector<6x32xf32> to vector<6x16xf32>
    %197 = vector.extract_strided_slice %192 {offsets = [0, 0], sizes = [8, 16], strides = [1, 1]} : vector<8x32xf32> to vector<8x16xf32>
    %198 = tpu.transpose %197, [1, 0] : vector<8x16xf32> -> vector<16x8xf32>
    %cst_62 = arith.constant dense<0.000000e+00> : vector<6x8xf32>
    %199 = tpu.matmul %196, %198, %cst_62 {dimension_numbers = #tpu.dot_dimension_numbers<[1], [0], [0], [1], [0, 0, 1, 1], [], []>} : vector<6x16xf32>, vector<16x8xf32>, vector<6x8xf32> -> vector<6x8xf32>
    %cst_63 = arith.constant 2.500000e-01 : f32
    %200 = vector.broadcast %cst_63 : f32 to vector<6x8xf32>
    %201 = arith.mulf %199, %200 : vector<6x8xf32>
    %202 = arith.addf %201, %195 : vector<6x8xf32>
    %cst_64 = arith.constant dense<0xFF800000> : vector<6xf32>
    %203 = vector.multi_reduction <maximumf>, %202, %cst_64 [1] : vector<6x8xf32> to vector<6xf32>
    %204 = vector.shape_cast %203 : vector<6xf32> to vector<6x1xf32>
    %205 = vector.broadcast %204 : vector<6x1xf32> to vector<6x8xf32>
    %206 = arith.subf %202, %205 : vector<6x8xf32>
    %207 = math.exp %206 : vector<6x8xf32>
    %cst_65 = arith.constant dense<0.000000e+00> : vector<6xf32>
    %208 = vector.multi_reduction <add>, %207, %cst_65 [1] : vector<6x8xf32> to vector<6xf32>
    %209 = vector.shape_cast %208 : vector<6xf32> to vector<6x1xf32>
    %210 = vector.extract_strided_slice %193 {offsets = [0, 0], sizes = [8, 16], strides = [1, 1]} : vector<8x32xf32> to vector<8x16xf32>
    %cst_66 = arith.constant dense<0.000000e+00> : vector<6x16xf32>
    %211 = tpu.matmul %207, %210, %cst_66 {dimension_numbers = #tpu.dot_dimension_numbers<[1], [0], [0], [1], [0, 0, 1, 1], [], []>} : vector<6x8xf32>, vector<8x16xf32>, vector<6x16xf32> -> vector<6x16xf32>
    %212 = tpu.reciprocal %209 {approx = true} : vector<6x1xf32> -> vector<6x1xf32>
    %213 = vector.broadcast %212 : vector<6x1xf32> to vector<6x16xf32>
    %214 = arith.mulf %211, %213 : vector<6x16xf32>
    %215 = vector.extract_strided_slice %190 {offsets = [0, 16], sizes = [6, 16], strides = [1, 1]} : vector<6x32xf32> to vector<6x16xf32>
    %216 = vector.extract_strided_slice %192 {offsets = [0, 16], sizes = [8, 16], strides = [1, 1]} : vector<8x32xf32> to vector<8x16xf32>
    %217 = tpu.transpose %216, [1, 0] : vector<8x16xf32> -> vector<16x8xf32>
    %cst_67 = arith.constant dense<0.000000e+00> : vector<6x8xf32>
    %218 = tpu.matmul %215, %217, %cst_67 {dimension_numbers = #tpu.dot_dimension_numbers<[1], [0], [0], [1], [0, 0, 1, 1], [], []>} : vector<6x16xf32>, vector<16x8xf32>, vector<6x8xf32> -> vector<6x8xf32>
    %cst_68 = arith.constant 2.500000e-01 : f32
    %219 = vector.broadcast %cst_68 : f32 to vector<6x8xf32>
    %220 = arith.mulf %218, %219 : vector<6x8xf32>
    %221 = arith.addf %220, %195 : vector<6x8xf32>
    %cst_69 = arith.constant dense<0xFF800000> : vector<6xf32>
    %222 = vector.multi_reduction <maximumf>, %221, %cst_69 [1] : vector<6x8xf32> to vector<6xf32>
    %223 = vector.shape_cast %222 : vector<6xf32> to vector<6x1xf32>
    %224 = vector.broadcast %223 : vector<6x1xf32> to vector<6x8xf32>
    %225 = arith.subf %221, %224 : vector<6x8xf32>
    %226 = math.exp %225 : vector<6x8xf32>
    %cst_70 = arith.constant dense<0.000000e+00> : vector<6xf32>
    %227 = vector.multi_reduction <add>, %226, %cst_70 [1] : vector<6x8xf32> to vector<6xf32>
    %228 = vector.shape_cast %227 : vector<6xf32> to vector<6x1xf32>
    %229 = vector.extract_strided_slice %193 {offsets = [0, 16], sizes = [8, 16], strides = [1, 1]} : vector<8x32xf32> to vector<8x16xf32>
    %cst_71 = arith.constant dense<0.000000e+00> : vector<6x16xf32>
    %230 = tpu.matmul %226, %229, %cst_71 {dimension_numbers = #tpu.dot_dimension_numbers<[1], [0], [0], [1], [0, 0, 1, 1], [], []>} : vector<6x8xf32>, vector<8x16xf32>, vector<6x16xf32> -> vector<6x16xf32>
    %231 = tpu.reciprocal %228 {approx = true} : vector<6x1xf32> -> vector<6x1xf32>
    %232 = vector.broadcast %231 : vector<6x1xf32> to vector<6x16xf32>
    %233 = arith.mulf %230, %232 : vector<6x16xf32>
    %234 = tpu.concatenate %214, %233 in 1 : vector<6x16xf32>, vector<6x16xf32> -> vector<6x32xf32>
    %235 = tpu.concatenate %189, %234 in 0 : vector<6x32xf32>, vector<6x32xf32> -> vector<12x32xf32>
    %236 = arith.truncf %235 : vector<12x32xf32> to vector<12x32xbf16>
    %237 = vector.extract_strided_slice %10 {offsets = [0, 96], sizes = [32, 32], strides = [1, 1]} : vector<32x128xbf16> to vector<32x32xbf16>
    %cst_72 = arith.constant dense<0.000000e+00> : vector<12x32xf32>
    %238 = tpu.matmul %236, %237, %cst_72 {dimension_numbers = #tpu.dot_dimension_numbers<[1], [0], [0], [1], [0, 0, 1, 1], [], []>} : vector<12x32xbf16>, vector<32x32xbf16>, vector<12x32xf32> -> vector<12x32xf32>
    %239 = vector.extract_strided_slice %12 {offsets = [0, 96], sizes = [1, 32], strides = [1, 1]} : vector<1x128xf32> to vector<1x32xf32>
    %240 = vector.broadcast %239 : vector<1x32xf32> to vector<12x32xf32>
    %241 = arith.addf %238, %240 : vector<12x32xf32>
    %242 = arith.addf %132, %241 : vector<12x32xf32>
    %243 = vector.extract_strided_slice %14 {offsets = [2, 0], sizes = [1, 32], strides = [1, 1]} : vector<7x32xf32> to vector<1x32xf32>
    %244 = vector.extract_strided_slice %14 {offsets = [3, 0], sizes = [1, 32], strides = [1, 1]} : vector<7x32xf32> to vector<1x32xf32>
    %cst_73 = arith.constant dense<0.000000e+00> : vector<12xf32>
    %245 = vector.multi_reduction <add>, %242, %cst_73 [1] : vector<12x32xf32> to vector<12xf32>
    %246 = vector.shape_cast %245 : vector<12xf32> to vector<12x1xf32>
    %cst_74 = arith.constant 3.200000e+01 : f32
    %247 = vector.broadcast %cst_74 : f32 to vector<12x1xf32>
    %248 = arith.divf %246, %247 : vector<12x1xf32>
    %249 = vector.broadcast %248 : vector<12x1xf32> to vector<12x32xf32>
    %250 = arith.subf %242, %249 : vector<12x32xf32>
    %251 = arith.mulf %250, %250 : vector<12x32xf32>
    %cst_75 = arith.constant dense<0.000000e+00> : vector<12xf32>
    %252 = vector.multi_reduction <add>, %251, %cst_75 [1] : vector<12x32xf32> to vector<12xf32>
    %253 = vector.shape_cast %252 : vector<12xf32> to vector<12x1xf32>
    %cst_76 = arith.constant 3.200000e+01 : f32
    %254 = vector.broadcast %cst_76 : f32 to vector<12x1xf32>
    %255 = arith.divf %253, %254 : vector<12x1xf32>
    %cst_77 = arith.constant 9.99999974E-6 : f32
    %256 = vector.broadcast %cst_77 : f32 to vector<12x1xf32>
    %257 = arith.addf %255, %256 : vector<12x1xf32>
    %258 = math.rsqrt %257 : vector<12x1xf32>
    %259 = vector.broadcast %258 : vector<12x1xf32> to vector<12x32xf32>
    %260 = arith.mulf %250, %259 : vector<12x32xf32>
    %261 = vector.broadcast %243 : vector<1x32xf32> to vector<12x32xf32>
    %262 = arith.mulf %260, %261 : vector<12x32xf32>
    %263 = vector.broadcast %244 : vector<1x32xf32> to vector<12x32xf32>
    %264 = arith.addf %262, %263 : vector<12x32xf32>
    %265 = arith.truncf %264 : vector<12x32xf32> to vector<12x32xbf16>
    %c0_78 = arith.constant 0 : index
    %c0_79 = arith.constant 0 : index
    %c0_80 = arith.constant 0 : index
    %266 = vector.load %arg8[%c0_78, %c0_79, %c0_80] : memref<1x32x2048xbf16, #tpu.memory_space<vmem>>, vector<1x32x2048xbf16>
    %267 = vector.shape_cast %266 : vector<1x32x2048xbf16> to vector<32x2048xbf16>
    %cst_81 = arith.constant dense<0.000000e+00> : vector<12x2048xf32>
    %268 = tpu.matmul %265, %267, %cst_81 {dimension_numbers = #tpu.dot_dimension_numbers<[1], [0], [0], [1], [0, 0, 1, 1], [], []>} : vector<12x32xbf16>, vector<32x2048xbf16>, vector<12x2048xf32> -> vector<12x2048xf32>
    %c0_82 = arith.constant 0 : index
    %c0_83 = arith.constant 0 : index
    %c0_84 = arith.constant 0 : index
    %269 = vector.load %arg9[%c0_82, %c0_83, %c0_84] : memref<1x1x2048xf32, #tpu.memory_space<vmem>>, vector<1x1x2048xf32>
    %270 = vector.shape_cast %269 : vector<1x1x2048xf32> to vector<1x2048xf32>
    %271 = vector.broadcast %270 : vector<1x2048xf32> to vector<12x2048xf32>
    %272 = arith.addf %268, %271 : vector<12x2048xf32>
    %cst_85 = arith.constant 0.000000e+00 : f32
    %273 = vector.broadcast %cst_85 : f32 to vector<12x2048xf32>
    %274 = arith.maximumf %272, %273 : vector<12x2048xf32>
    %275 = arith.truncf %274 : vector<12x2048xf32> to vector<12x2048xbf16>
    %c0_86 = arith.constant 0 : index
    %c0_87 = arith.constant 0 : index
    %c0_88 = arith.constant 0 : index
    %276 = vector.load %arg10[%c0_86, %c0_87, %c0_88] : memref<1x2048x32xbf16, #tpu.memory_space<vmem>>, vector<1x2048x32xbf16>
    %277 = vector.shape_cast %276 : vector<1x2048x32xbf16> to vector<2048x32xbf16>
    %cst_89 = arith.constant dense<0.000000e+00> : vector<12x32xf32>
    %278 = tpu.matmul %275, %277, %cst_89 {dimension_numbers = #tpu.dot_dimension_numbers<[1], [0], [0], [1], [0, 0, 1, 1], [], []>} : vector<12x2048xbf16>, vector<2048x32xbf16>, vector<12x32xf32> -> vector<12x32xf32>
    %279 = vector.extract_strided_slice %14 {offsets = [6, 0], sizes = [1, 32], strides = [1, 1]} : vector<7x32xf32> to vector<1x32xf32>
    %280 = vector.broadcast %279 : vector<1x32xf32> to vector<12x32xf32>
    %281 = arith.addf %278, %280 : vector<12x32xf32>
    %282 = arith.addf %264, %281 : vector<12x32xf32>
    %283 = vector.extract_strided_slice %14 {offsets = [4, 0], sizes = [1, 32], strides = [1, 1]} : vector<7x32xf32> to vector<1x32xf32>
    %284 = vector.extract_strided_slice %14 {offsets = [5, 0], sizes = [1, 32], strides = [1, 1]} : vector<7x32xf32> to vector<1x32xf32>
    %cst_90 = arith.constant dense<0.000000e+00> : vector<12xf32>
    %285 = vector.multi_reduction <add>, %282, %cst_90 [1] : vector<12x32xf32> to vector<12xf32>
    %286 = vector.shape_cast %285 : vector<12xf32> to vector<12x1xf32>
    %cst_91 = arith.constant 3.200000e+01 : f32
    %287 = vector.broadcast %cst_91 : f32 to vector<12x1xf32>
    %288 = arith.divf %286, %287 : vector<12x1xf32>
    %289 = vector.broadcast %288 : vector<12x1xf32> to vector<12x32xf32>
    %290 = arith.subf %282, %289 : vector<12x32xf32>
    %291 = arith.mulf %290, %290 : vector<12x32xf32>
    %cst_92 = arith.constant dense<0.000000e+00> : vector<12xf32>
    %292 = vector.multi_reduction <add>, %291, %cst_92 [1] : vector<12x32xf32> to vector<12xf32>
    %293 = vector.shape_cast %292 : vector<12xf32> to vector<12x1xf32>
    %cst_93 = arith.constant 3.200000e+01 : f32
    %294 = vector.broadcast %cst_93 : f32 to vector<12x1xf32>
    %295 = arith.divf %293, %294 : vector<12x1xf32>
    %cst_94 = arith.constant 9.99999974E-6 : f32
    %296 = vector.broadcast %cst_94 : f32 to vector<12x1xf32>
    %297 = arith.addf %295, %296 : vector<12x1xf32>
    %298 = math.rsqrt %297 : vector<12x1xf32>
    %299 = vector.broadcast %298 : vector<12x1xf32> to vector<12x32xf32>
    %300 = arith.mulf %290, %299 : vector<12x32xf32>
    %301 = vector.broadcast %283 : vector<1x32xf32> to vector<12x32xf32>
    %302 = arith.mulf %300, %301 : vector<12x32xf32>
    %303 = vector.broadcast %284 : vector<1x32xf32> to vector<12x32xf32>
    %304 = arith.addf %302, %303 : vector<12x32xf32>
    %c0_95 = arith.constant 0 : index
    %c0_96 = arith.constant 0 : index
    %305 = vector.load %arg14[%c0_95, %c0_96] : memref<12x32xf32, #tpu.memory_space<vmem>>, vector<12x32xf32>
    tpu.vector_store %arg14[%c0_95, %c0_96], %304 {strides = array<i32>} : memref<12x32xf32, #tpu.memory_space<vmem>>, vector<12x32xf32>,
    %c1_i32 = arith.constant 1 : i32
    %306 = arith.cmpi eq, %arg0, %c1_i32 : i32
    %307 = arith.extui %306 : i1 to i32
    %c0_i32_97 = arith.constant 0 : i32
    %308 = arith.cmpi ne, %307, %c0_i32_97 : i32
    scf.if %308 {
      %c0_98 = arith.constant 0 : index
      %c0_99 = arith.constant 0 : index
      %309 = vector.load %arg12[%c0_98, %c0_99] : memref<2x32xf32, #tpu.memory_space<vmem>>, vector<2x32xf32>
      %310 = vector.extract_strided_slice %309 {offsets = [0, 0], sizes = [1, 32], strides = [1, 1]} : vector<2x32xf32> to vector<1x32xf32>
      %311 = vector.extract_strided_slice %309 {offsets = [1, 0], sizes = [1, 32], strides = [1, 1]} : vector<2x32xf32> to vector<1x32xf32>
      %cst_100 = arith.constant dense<0.000000e+00> : vector<12xf32>
      %312 = vector.multi_reduction <add>, %304, %cst_100 [1] : vector<12x32xf32> to vector<12xf32>
      %313 = vector.shape_cast %312 : vector<12xf32> to vector<12x1xf32>
      %cst_101 = arith.constant 3.200000e+01 : f32
      %314 = vector.broadcast %cst_101 : f32 to vector<12x1xf32>
      %315 = arith.divf %313, %314 : vector<12x1xf32>
      %316 = vector.broadcast %315 : vector<12x1xf32> to vector<12x32xf32>
      %317 = arith.subf %304, %316 : vector<12x32xf32>
      %318 = arith.mulf %317, %317 : vector<12x32xf32>
      %cst_102 = arith.constant dense<0.000000e+00> : vector<12xf32>
      %319 = vector.multi_reduction <add>, %318, %cst_102 [1] : vector<12x32xf32> to vector<12xf32>
      %320 = vector.shape_cast %319 : vector<12xf32> to vector<12x1xf32>
      %cst_103 = arith.constant 3.200000e+01 : f32
      %321 = vector.broadcast %cst_103 : f32 to vector<12x1xf32>
      %322 = arith.divf %320, %321 : vector<12x1xf32>
      %cst_104 = arith.constant 9.99999974E-6 : f32
      %323 = vector.broadcast %cst_104 : f32 to vector<12x1xf32>
      %324 = arith.addf %322, %323 : vector<12x1xf32>
      %325 = math.rsqrt %324 : vector<12x1xf32>
      %326 = vector.broadcast %325 : vector<12x1xf32> to vector<12x32xf32>
      %327 = arith.mulf %317, %326 : vector<12x32xf32>
      %328 = vector.broadcast %310 : vector<1x32xf32> to vector<12x32xf32>
      %329 = arith.mulf %327, %328 : vector<12x32xf32>
      %330 = vector.broadcast %311 : vector<1x32xf32> to vector<12x32xf32>
      %331 = arith.addf %329, %330 : vector<12x32xf32>
      %c0_105 = arith.constant 0 : index
      %c0_106 = arith.constant 0 : index
      %332 = vector.load %arg13[%c0_105, %c0_106] : memref<12x32xf32, #tpu.memory_space<vmem>>, vector<12x32xf32>
      tpu.vector_store %arg13[%c0_105, %c0_106], %331 {strides = array<i32>} : memref<12x32xf32, #tpu.memory_space<vmem>>, vector<12x32xf32>,
    } else {
    }
    return
  }
  func.func @transform_0(%arg0: i32) -> (i32, i32) {
    %c0_i32 = arith.constant 0 : i32
    %c0_i32_0 = arith.constant 0 : i32
    %c0_i32_1 = arith.constant 0 : i32
    return %c0_i32, %c0_i32_0 : i32, i32
  }
  func.func @transform_1(%arg0: i32) -> (i32, i32) {
    %c0_i32 = arith.constant 0 : i32
    %c0_i32_0 = arith.constant 0 : i32
    %c0_i32_1 = arith.constant 0 : i32
    return %c0_i32, %c0_i32_0 : i32, i32
  }
  func.func @transform_2(%arg0: i32) -> (i32, i32, i32) {
    %c0_i32 = arith.constant 0 : i32
    %c0_i32_0 = arith.constant 0 : i32
    %c0_i32_1 = arith.constant 0 : i32
    %c0_i32_2 = arith.constant 0 : i32
    return %c0_i32, %c0_i32_0, %c0_i32_1 : i32, i32, i32
  }
  func.func @transform_3(%arg0: i32) -> (i32, i32, i32) {
    %c0_i32 = arith.constant 0 : i32
    %c0_i32_0 = arith.constant 0 : i32
    %c0_i32_1 = arith.constant 0 : i32
    return %arg0, %c0_i32, %c0_i32_0 : i32, i32, i32
  }
  func.func @transform_4(%arg0: i32) -> (i32, i32, i32) {
    %c0_i32 = arith.constant 0 : i32
    %c0_i32_0 = arith.constant 0 : i32
    %c0_i32_1 = arith.constant 0 : i32
    return %arg0, %c0_i32, %c0_i32_0 : i32, i32, i32
  }
  func.func @transform_5(%arg0: i32) -> (i32, i32, i32) {
    %c0_i32 = arith.constant 0 : i32
    %c0_i32_0 = arith.constant 0 : i32
    %c0_i32_1 = arith.constant 0 : i32
    return %arg0, %c0_i32, %c0_i32_0 : i32, i32, i32
  }
  func.func @transform_6(%arg0: i32) -> (i32, i32, i32) {
    %c0_i32 = arith.constant 0 : i32
    %c0_i32_0 = arith.constant 0 : i32
    %c0_i32_1 = arith.constant 0 : i32
    return %arg0, %c0_i32, %c0_i32_0 : i32, i32, i32
  }
  func.func @transform_7(%arg0: i32) -> (i32, i32, i32) {
    %c0_i32 = arith.constant 0 : i32
    %c0_i32_0 = arith.constant 0 : i32
    %c0_i32_1 = arith.constant 0 : i32
    return %arg0, %c0_i32, %c0_i32_0 : i32, i32, i32
  }
  func.func @transform_8(%arg0: i32) -> (i32, i32, i32) {
    %c0_i32 = arith.constant 0 : i32
    %c0_i32_0 = arith.constant 0 : i32
    %c0_i32_1 = arith.constant 0 : i32
    return %arg0, %c0_i32, %c0_i32_0 : i32, i32, i32
  }
  func.func @transform_9(%arg0: i32) -> (i32, i32, i32) {
    %c0_i32 = arith.constant 0 : i32
    %c0_i32_0 = arith.constant 0 : i32
    %c0_i32_1 = arith.constant 0 : i32
    return %arg0, %c0_i32, %c0_i32_0 : i32, i32, i32
  }
  func.func @transform_10(%arg0: i32) -> (i32, i32, i32) {
    %c0_i32 = arith.constant 0 : i32
    %c0_i32_0 = arith.constant 0 : i32
    %c0_i32_1 = arith.constant 0 : i32
    return %arg0, %c0_i32, %c0_i32_0 : i32, i32, i32
  }
  func.func @transform_11(%arg0: i32) -> (i32, i32) {
    %c0_i32 = arith.constant 0 : i32
    %c0_i32_0 = arith.constant 0 : i32
    %c0_i32_1 = arith.constant 0 : i32
    return %c0_i32, %c0_i32_0 : i32, i32
  }
  func.func @transform_12(%arg0: i32) -> (i32, i32) {
    %c0_i32 = arith.constant 0 : i32
    %c0_i32_0 = arith.constant 0 : i32
    %c0_i32_1 = arith.constant 0 : i32
    return %c0_i32, %c0_i32_0 : i32, i32
  }
}

module attributes {stable_mosaic.version = 11 : i64} {
  func.func @kernel(%arg0: i32, %arg1: memref<12x32xf32, #tpu.memory_space<vmem>>, %arg2: memref<1x32x128xbf16, #tpu.memory_space<vmem>>, %arg3: memref<1x1x128xf32, #tpu.memory_space<vmem>>, %arg4: memref<1x32x2048xbf16, #tpu.memory_space<vmem>>, %arg5: memref<1x1x2048xf32, #tpu.memory_space<vmem>>, %arg6: memref<1x2048x32xbf16, #tpu.memory_space<vmem>>, %arg7: memref<1x5x32xf32, #tpu.memory_space<vmem>>, %arg8: memref<2x32xf32, #tpu.memory_space<vmem>>, %arg9: memref<12x32xf32, #tpu.memory_space<vmem>>, %arg10: memref<12x32xf32, #tpu.memory_space<vmem>>) attributes {dimension_semantics = [#tpu.dimension_semantics<arbitrary>], iteration_bounds = array<i64: 2>, scalar_prefetch = 0 : i64, scratch_operands = 1 : i64, tpu.core_type = #tpu.core_type<tc>, window_params = [{pipeline_mode = #tpu.pipeline_mode<synchronous>, transform_indices = @transform_0, window_bounds = array<i64: 12, 32>}, {transform_indices = @transform_1, window_bounds = array<i64: 1, 32, 128>}, {transform_indices = @transform_2, window_bounds = array<i64: 1, 1, 128>}, {transform_indices = @transform_3, window_bounds = array<i64: 1, 32, 2048>}, {transform_indices = @transform_4, window_bounds = array<i64: 1, 1, 2048>}, {transform_indices = @transform_5, window_bounds = array<i64: 1, 2048, 32>}, {transform_indices = @transform_6, window_bounds = array<i64: 1, 5, 32>}, {pipeline_mode = #tpu.pipeline_mode<synchronous>, transform_indices = @transform_7, window_bounds = array<i64: 2, 32>}, {pipeline_mode = #tpu.pipeline_mode<synchronous>, transform_indices = @transform_8, window_bounds = array<i64: 12, 32>}]} {
    %c0_i32 = arith.constant 0 : i32
    %0 = arith.cmpi eq, %arg0, %c0_i32 : i32
    %1 = arith.extui %0 : i1 to i32
    %c0_i32_0 = arith.constant 0 : i32
    %2 = arith.cmpi ne, %1, %c0_i32_0 : i32
    scf.if %2 {
      %c0_57 = arith.constant 0 : index
      %c0_58 = arith.constant 0 : index
      %172 = vector.load %arg1[%c0_57, %c0_58] : memref<12x32xf32, #tpu.memory_space<vmem>>, vector<12x32xf32>
      %c0_59 = arith.constant 0 : index
      %c0_60 = arith.constant 0 : index
      %173 = vector.load %arg10[%c0_59, %c0_60] : memref<12x32xf32, #tpu.memory_space<vmem>>, vector<12x32xf32>
      tpu.vector_store %arg10[%c0_59, %c0_60], %172 {strides = array<i32>} : memref<12x32xf32, #tpu.memory_space<vmem>>, vector<12x32xf32>,
    } else {
    }
    %c0 = arith.constant 0 : index
    %c0_1 = arith.constant 0 : index
    %3 = vector.load %arg10[%c0, %c0_1] : memref<12x32xf32, #tpu.memory_space<vmem>>, vector<12x32xf32>
    %c0_2 = arith.constant 0 : index
    %c0_3 = arith.constant 0 : index
    %c0_4 = arith.constant 0 : index
    %4 = vector.load %arg2[%c0_2, %c0_3, %c0_4] : memref<1x32x128xbf16, #tpu.memory_space<vmem>>, vector<1x32x128xbf16>
    %5 = vector.shape_cast %4 : vector<1x32x128xbf16> to vector<32x128xbf16>
    %c0_5 = arith.constant 0 : index
    %c0_6 = arith.constant 0 : index
    %c0_7 = arith.constant 0 : index
    %6 = vector.load %arg3[%c0_5, %c0_6, %c0_7] : memref<1x1x128xf32, #tpu.memory_space<vmem>>, vector<1x1x128xf32>
    %7 = vector.shape_cast %6 : vector<1x1x128xf32> to vector<1x128xf32>
    %c0_8 = arith.constant 0 : index
    %c0_9 = arith.constant 0 : index
    %c0_10 = arith.constant 0 : index
    %8 = vector.load %arg7[%c0_8, %c0_9, %c0_10] : memref<1x5x32xf32, #tpu.memory_space<vmem>>, vector<1x5x32xf32>
    %9 = vector.shape_cast %8 : vector<1x5x32xf32> to vector<5x32xf32>
    %10 = arith.truncf %3 : vector<12x32xf32> to vector<12x32xbf16>
    %11 = vector.extract_strided_slice %5 {offsets = [0, 0], sizes = [32, 96], strides = [1, 1]} : vector<32x128xbf16> to vector<32x96xbf16>
    %cst = arith.constant dense<0.000000e+00> : vector<12x96xf32>
    %12 = tpu.matmul %10, %11, %cst {dimension_numbers = #tpu.dot_dimension_numbers<[1], [0], [0], [1], [0, 0, 1, 1], [], []>} : vector<12x32xbf16>, vector<32x96xbf16>, vector<12x96xf32> -> vector<12x96xf32>
    %13 = vector.extract_strided_slice %7 {offsets = [0, 0], sizes = [1, 96], strides = [1, 1]} : vector<1x128xf32> to vector<1x96xf32>
    %14 = vector.broadcast %13 : vector<1x96xf32> to vector<12x96xf32>
    %15 = arith.addf %12, %14 : vector<12x96xf32>
    %16 = vector.extract_strided_slice %15 {offsets = [0, 0], sizes = [6, 96], strides = [1, 1]} : vector<12x96xf32> to vector<6x96xf32>
    %17 = vector.extract_strided_slice %16 {offsets = [0, 0], sizes = [6, 32], strides = [1, 1]} : vector<6x96xf32> to vector<6x32xf32>
    %18 = vector.extract_strided_slice %16 {offsets = [0, 32], sizes = [6, 32], strides = [1, 1]} : vector<6x96xf32> to vector<6x32xf32>
    %19 = vector.extract_strided_slice %16 {offsets = [0, 64], sizes = [6, 32], strides = [1, 1]} : vector<6x96xf32> to vector<6x32xf32>
    %20 = vector.extract_strided_slice %17 {offsets = [0, 0], sizes = [6, 16], strides = [1, 1]} : vector<6x32xf32> to vector<6x16xf32>
    %21 = vector.extract_strided_slice %18 {offsets = [0, 0], sizes = [6, 16], strides = [1, 1]} : vector<6x32xf32> to vector<6x16xf32>
    %22 = tpu.transpose %21, [1, 0] : vector<6x16xf32> -> vector<16x6xf32>
    %cst_11 = arith.constant dense<0.000000e+00> : vector<6x6xf32>
    %23 = tpu.matmul %20, %22, %cst_11 {dimension_numbers = #tpu.dot_dimension_numbers<[1], [0], [0], [1], [0, 0, 1, 1], [], []>} : vector<6x16xf32>, vector<16x6xf32>, vector<6x6xf32> -> vector<6x6xf32>
    %cst_12 = arith.constant 2.500000e-01 : f32
    %24 = vector.broadcast %cst_12 : f32 to vector<6x6xf32>
    %25 = arith.mulf %23, %24 : vector<6x6xf32>
    %cst_13 = arith.constant dense<0xFF800000> : vector<6xf32>
    %26 = vector.multi_reduction <maximumf>, %25, %cst_13 [1] : vector<6x6xf32> to vector<6xf32>
    %27 = vector.shape_cast %26 : vector<6xf32> to vector<6x1xf32>
    %28 = vector.broadcast %27 : vector<6x1xf32> to vector<6x6xf32>
    %29 = arith.subf %25, %28 : vector<6x6xf32>
    %30 = math.exp %29 : vector<6x6xf32>
    %cst_14 = arith.constant dense<0.000000e+00> : vector<6xf32>
    %31 = vector.multi_reduction <add>, %30, %cst_14 [1] : vector<6x6xf32> to vector<6xf32>
    %32 = vector.shape_cast %31 : vector<6xf32> to vector<6x1xf32>
    %33 = vector.extract_strided_slice %19 {offsets = [0, 0], sizes = [6, 16], strides = [1, 1]} : vector<6x32xf32> to vector<6x16xf32>
    %cst_15 = arith.constant dense<0.000000e+00> : vector<6x16xf32>
    %34 = tpu.matmul %30, %33, %cst_15 {dimension_numbers = #tpu.dot_dimension_numbers<[1], [0], [0], [1], [0, 0, 1, 1], [], []>} : vector<6x6xf32>, vector<6x16xf32>, vector<6x16xf32> -> vector<6x16xf32>
    %35 = tpu.reciprocal %32 {approx = true} : vector<6x1xf32> -> vector<6x1xf32>
    %36 = vector.broadcast %35 : vector<6x1xf32> to vector<6x16xf32>
    %37 = arith.mulf %34, %36 : vector<6x16xf32>
    %38 = vector.extract_strided_slice %17 {offsets = [0, 16], sizes = [6, 16], strides = [1, 1]} : vector<6x32xf32> to vector<6x16xf32>
    %39 = vector.extract_strided_slice %18 {offsets = [0, 16], sizes = [6, 16], strides = [1, 1]} : vector<6x32xf32> to vector<6x16xf32>
    %40 = tpu.transpose %39, [1, 0] : vector<6x16xf32> -> vector<16x6xf32>
    %cst_16 = arith.constant dense<0.000000e+00> : vector<6x6xf32>
    %41 = tpu.matmul %38, %40, %cst_16 {dimension_numbers = #tpu.dot_dimension_numbers<[1], [0], [0], [1], [0, 0, 1, 1], [], []>} : vector<6x16xf32>, vector<16x6xf32>, vector<6x6xf32> -> vector<6x6xf32>
    %cst_17 = arith.constant 2.500000e-01 : f32
    %42 = vector.broadcast %cst_17 : f32 to vector<6x6xf32>
    %43 = arith.mulf %41, %42 : vector<6x6xf32>
    %cst_18 = arith.constant dense<0xFF800000> : vector<6xf32>
    %44 = vector.multi_reduction <maximumf>, %43, %cst_18 [1] : vector<6x6xf32> to vector<6xf32>
    %45 = vector.shape_cast %44 : vector<6xf32> to vector<6x1xf32>
    %46 = vector.broadcast %45 : vector<6x1xf32> to vector<6x6xf32>
    %47 = arith.subf %43, %46 : vector<6x6xf32>
    %48 = math.exp %47 : vector<6x6xf32>
    %cst_19 = arith.constant dense<0.000000e+00> : vector<6xf32>
    %49 = vector.multi_reduction <add>, %48, %cst_19 [1] : vector<6x6xf32> to vector<6xf32>
    %50 = vector.shape_cast %49 : vector<6xf32> to vector<6x1xf32>
    %51 = vector.extract_strided_slice %19 {offsets = [0, 16], sizes = [6, 16], strides = [1, 1]} : vector<6x32xf32> to vector<6x16xf32>
    %cst_20 = arith.constant dense<0.000000e+00> : vector<6x16xf32>
    %52 = tpu.matmul %48, %51, %cst_20 {dimension_numbers = #tpu.dot_dimension_numbers<[1], [0], [0], [1], [0, 0, 1, 1], [], []>} : vector<6x6xf32>, vector<6x16xf32>, vector<6x16xf32> -> vector<6x16xf32>
    %53 = tpu.reciprocal %50 {approx = true} : vector<6x1xf32> -> vector<6x1xf32>
    %54 = vector.broadcast %53 : vector<6x1xf32> to vector<6x16xf32>
    %55 = arith.mulf %52, %54 : vector<6x16xf32>
    %56 = tpu.concatenate %37, %55 in 1 : vector<6x16xf32>, vector<6x16xf32> -> vector<6x32xf32>
    %57 = vector.extract_strided_slice %15 {offsets = [6, 0], sizes = [6, 96], strides = [1, 1]} : vector<12x96xf32> to vector<6x96xf32>
    %58 = vector.extract_strided_slice %57 {offsets = [0, 0], sizes = [6, 32], strides = [1, 1]} : vector<6x96xf32> to vector<6x32xf32>
    %59 = vector.extract_strided_slice %57 {offsets = [0, 32], sizes = [6, 32], strides = [1, 1]} : vector<6x96xf32> to vector<6x32xf32>
    %60 = vector.extract_strided_slice %57 {offsets = [0, 64], sizes = [6, 32], strides = [1, 1]} : vector<6x96xf32> to vector<6x32xf32>
    %61 = vector.extract_strided_slice %58 {offsets = [0, 0], sizes = [6, 16], strides = [1, 1]} : vector<6x32xf32> to vector<6x16xf32>
    %62 = vector.extract_strided_slice %59 {offsets = [0, 0], sizes = [6, 16], strides = [1, 1]} : vector<6x32xf32> to vector<6x16xf32>
    %63 = tpu.transpose %62, [1, 0] : vector<6x16xf32> -> vector<16x6xf32>
    %cst_21 = arith.constant dense<0.000000e+00> : vector<6x6xf32>
    %64 = tpu.matmul %61, %63, %cst_21 {dimension_numbers = #tpu.dot_dimension_numbers<[1], [0], [0], [1], [0, 0, 1, 1], [], []>} : vector<6x16xf32>, vector<16x6xf32>, vector<6x6xf32> -> vector<6x6xf32>
    %cst_22 = arith.constant 2.500000e-01 : f32
    %65 = vector.broadcast %cst_22 : f32 to vector<6x6xf32>
    %66 = arith.mulf %64, %65 : vector<6x6xf32>
    %cst_23 = arith.constant dense<0xFF800000> : vector<6xf32>
    %67 = vector.multi_reduction <maximumf>, %66, %cst_23 [1] : vector<6x6xf32> to vector<6xf32>
    %68 = vector.shape_cast %67 : vector<6xf32> to vector<6x1xf32>
    %69 = vector.broadcast %68 : vector<6x1xf32> to vector<6x6xf32>
    %70 = arith.subf %66, %69 : vector<6x6xf32>
    %71 = math.exp %70 : vector<6x6xf32>
    %cst_24 = arith.constant dense<0.000000e+00> : vector<6xf32>
    %72 = vector.multi_reduction <add>, %71, %cst_24 [1] : vector<6x6xf32> to vector<6xf32>
    %73 = vector.shape_cast %72 : vector<6xf32> to vector<6x1xf32>
    %74 = vector.extract_strided_slice %60 {offsets = [0, 0], sizes = [6, 16], strides = [1, 1]} : vector<6x32xf32> to vector<6x16xf32>
    %cst_25 = arith.constant dense<0.000000e+00> : vector<6x16xf32>
    %75 = tpu.matmul %71, %74, %cst_25 {dimension_numbers = #tpu.dot_dimension_numbers<[1], [0], [0], [1], [0, 0, 1, 1], [], []>} : vector<6x6xf32>, vector<6x16xf32>, vector<6x16xf32> -> vector<6x16xf32>
    %76 = tpu.reciprocal %73 {approx = true} : vector<6x1xf32> -> vector<6x1xf32>
    %77 = vector.broadcast %76 : vector<6x1xf32> to vector<6x16xf32>
    %78 = arith.mulf %75, %77 : vector<6x16xf32>
    %79 = vector.extract_strided_slice %58 {offsets = [0, 16], sizes = [6, 16], strides = [1, 1]} : vector<6x32xf32> to vector<6x16xf32>
    %80 = vector.extract_strided_slice %59 {offsets = [0, 16], sizes = [6, 16], strides = [1, 1]} : vector<6x32xf32> to vector<6x16xf32>
    %81 = tpu.transpose %80, [1, 0] : vector<6x16xf32> -> vector<16x6xf32>
    %cst_26 = arith.constant dense<0.000000e+00> : vector<6x6xf32>
    %82 = tpu.matmul %79, %81, %cst_26 {dimension_numbers = #tpu.dot_dimension_numbers<[1], [0], [0], [1], [0, 0, 1, 1], [], []>} : vector<6x16xf32>, vector<16x6xf32>, vector<6x6xf32> -> vector<6x6xf32>
    %cst_27 = arith.constant 2.500000e-01 : f32
    %83 = vector.broadcast %cst_27 : f32 to vector<6x6xf32>
    %84 = arith.mulf %82, %83 : vector<6x6xf32>
    %cst_28 = arith.constant dense<0xFF800000> : vector<6xf32>
    %85 = vector.multi_reduction <maximumf>, %84, %cst_28 [1] : vector<6x6xf32> to vector<6xf32>
    %86 = vector.shape_cast %85 : vector<6xf32> to vector<6x1xf32>
    %87 = vector.broadcast %86 : vector<6x1xf32> to vector<6x6xf32>
    %88 = arith.subf %84, %87 : vector<6x6xf32>
    %89 = math.exp %88 : vector<6x6xf32>
    %cst_29 = arith.constant dense<0.000000e+00> : vector<6xf32>
    %90 = vector.multi_reduction <add>, %89, %cst_29 [1] : vector<6x6xf32> to vector<6xf32>
    %91 = vector.shape_cast %90 : vector<6xf32> to vector<6x1xf32>
    %92 = vector.extract_strided_slice %60 {offsets = [0, 16], sizes = [6, 16], strides = [1, 1]} : vector<6x32xf32> to vector<6x16xf32>
    %cst_30 = arith.constant dense<0.000000e+00> : vector<6x16xf32>
    %93 = tpu.matmul %89, %92, %cst_30 {dimension_numbers = #tpu.dot_dimension_numbers<[1], [0], [0], [1], [0, 0, 1, 1], [], []>} : vector<6x6xf32>, vector<6x16xf32>, vector<6x16xf32> -> vector<6x16xf32>
    %94 = tpu.reciprocal %91 {approx = true} : vector<6x1xf32> -> vector<6x1xf32>
    %95 = vector.broadcast %94 : vector<6x1xf32> to vector<6x16xf32>
    %96 = arith.mulf %93, %95 : vector<6x16xf32>
    %97 = tpu.concatenate %78, %96 in 1 : vector<6x16xf32>, vector<6x16xf32> -> vector<6x32xf32>
    %98 = tpu.concatenate %56, %97 in 0 : vector<6x32xf32>, vector<6x32xf32> -> vector<12x32xf32>
    %99 = arith.truncf %98 : vector<12x32xf32> to vector<12x32xbf16>
    %100 = vector.extract_strided_slice %5 {offsets = [0, 96], sizes = [32, 32], strides = [1, 1]} : vector<32x128xbf16> to vector<32x32xbf16>
    %cst_31 = arith.constant dense<0.000000e+00> : vector<12x32xf32>
    %101 = tpu.matmul %99, %100, %cst_31 {dimension_numbers = #tpu.dot_dimension_numbers<[1], [0], [0], [1], [0, 0, 1, 1], [], []>} : vector<12x32xbf16>, vector<32x32xbf16>, vector<12x32xf32> -> vector<12x32xf32>
    %102 = vector.extract_strided_slice %7 {offsets = [0, 96], sizes = [1, 32], strides = [1, 1]} : vector<1x128xf32> to vector<1x32xf32>
    %103 = vector.broadcast %102 : vector<1x32xf32> to vector<12x32xf32>
    %104 = arith.addf %101, %103 : vector<12x32xf32>
    %105 = arith.addf %3, %104 : vector<12x32xf32>
    %106 = vector.extract_strided_slice %9 {offsets = [0, 0], sizes = [1, 32], strides = [1, 1]} : vector<5x32xf32> to vector<1x32xf32>
    %107 = vector.extract_strided_slice %9 {offsets = [1, 0], sizes = [1, 32], strides = [1, 1]} : vector<5x32xf32> to vector<1x32xf32>
    %cst_32 = arith.constant dense<0.000000e+00> : vector<12xf32>
    %108 = vector.multi_reduction <add>, %105, %cst_32 [1] : vector<12x32xf32> to vector<12xf32>
    %109 = vector.shape_cast %108 : vector<12xf32> to vector<12x1xf32>
    %cst_33 = arith.constant 3.200000e+01 : f32
    %110 = vector.broadcast %cst_33 : f32 to vector<12x1xf32>
    %111 = arith.divf %109, %110 : vector<12x1xf32>
    %112 = vector.broadcast %111 : vector<12x1xf32> to vector<12x32xf32>
    %113 = arith.subf %105, %112 : vector<12x32xf32>
    %114 = arith.mulf %113, %113 : vector<12x32xf32>
    %cst_34 = arith.constant dense<0.000000e+00> : vector<12xf32>
    %115 = vector.multi_reduction <add>, %114, %cst_34 [1] : vector<12x32xf32> to vector<12xf32>
    %116 = vector.shape_cast %115 : vector<12xf32> to vector<12x1xf32>
    %cst_35 = arith.constant 3.200000e+01 : f32
    %117 = vector.broadcast %cst_35 : f32 to vector<12x1xf32>
    %118 = arith.divf %116, %117 : vector<12x1xf32>
    %cst_36 = arith.constant 9.99999974E-6 : f32
    %119 = vector.broadcast %cst_36 : f32 to vector<12x1xf32>
    %120 = arith.addf %118, %119 : vector<12x1xf32>
    %121 = math.rsqrt %120 : vector<12x1xf32>
    %122 = vector.broadcast %121 : vector<12x1xf32> to vector<12x32xf32>
    %123 = arith.mulf %113, %122 : vector<12x32xf32>
    %124 = vector.broadcast %106 : vector<1x32xf32> to vector<12x32xf32>
    %125 = arith.mulf %123, %124 : vector<12x32xf32>
    %126 = vector.broadcast %107 : vector<1x32xf32> to vector<12x32xf32>
    %127 = arith.addf %125, %126 : vector<12x32xf32>
    %128 = arith.truncf %127 : vector<12x32xf32> to vector<12x32xbf16>
    %c0_37 = arith.constant 0 : index
    %c0_38 = arith.constant 0 : index
    %c0_39 = arith.constant 0 : index
    %129 = vector.load %arg4[%c0_37, %c0_38, %c0_39] : memref<1x32x2048xbf16, #tpu.memory_space<vmem>>, vector<1x32x2048xbf16>
    %130 = vector.shape_cast %129 : vector<1x32x2048xbf16> to vector<32x2048xbf16>
    %cst_40 = arith.constant dense<0.000000e+00> : vector<12x2048xf32>
    %131 = tpu.matmul %128, %130, %cst_40 {dimension_numbers = #tpu.dot_dimension_numbers<[1], [0], [0], [1], [0, 0, 1, 1], [], []>} : vector<12x32xbf16>, vector<32x2048xbf16>, vector<12x2048xf32> -> vector<12x2048xf32>
    %c0_41 = arith.constant 0 : index
    %c0_42 = arith.constant 0 : index
    %c0_43 = arith.constant 0 : index
    %132 = vector.load %arg5[%c0_41, %c0_42, %c0_43] : memref<1x1x2048xf32, #tpu.memory_space<vmem>>, vector<1x1x2048xf32>
    %133 = vector.shape_cast %132 : vector<1x1x2048xf32> to vector<1x2048xf32>
    %134 = vector.broadcast %133 : vector<1x2048xf32> to vector<12x2048xf32>
    %135 = arith.addf %131, %134 : vector<12x2048xf32>
    %cst_44 = arith.constant 0.000000e+00 : f32
    %136 = vector.broadcast %cst_44 : f32 to vector<12x2048xf32>
    %137 = arith.maximumf %135, %136 : vector<12x2048xf32>
    %138 = arith.truncf %137 : vector<12x2048xf32> to vector<12x2048xbf16>
    %c0_45 = arith.constant 0 : index
    %c0_46 = arith.constant 0 : index
    %c0_47 = arith.constant 0 : index
    %139 = vector.load %arg6[%c0_45, %c0_46, %c0_47] : memref<1x2048x32xbf16, #tpu.memory_space<vmem>>, vector<1x2048x32xbf16>
    %140 = vector.shape_cast %139 : vector<1x2048x32xbf16> to vector<2048x32xbf16>
    %cst_48 = arith.constant dense<0.000000e+00> : vector<12x32xf32>
    %141 = tpu.matmul %138, %140, %cst_48 {dimension_numbers = #tpu.dot_dimension_numbers<[1], [0], [0], [1], [0, 0, 1, 1], [], []>} : vector<12x2048xbf16>, vector<2048x32xbf16>, vector<12x32xf32> -> vector<12x32xf32>
    %142 = vector.extract_strided_slice %9 {offsets = [4, 0], sizes = [1, 32], strides = [1, 1]} : vector<5x32xf32> to vector<1x32xf32>
    %143 = vector.broadcast %142 : vector<1x32xf32> to vector<12x32xf32>
    %144 = arith.addf %141, %143 : vector<12x32xf32>
    %145 = arith.addf %127, %144 : vector<12x32xf32>
    %146 = vector.extract_strided_slice %9 {offsets = [2, 0], sizes = [1, 32], strides = [1, 1]} : vector<5x32xf32> to vector<1x32xf32>
    %147 = vector.extract_strided_slice %9 {offsets = [3, 0], sizes = [1, 32], strides = [1, 1]} : vector<5x32xf32> to vector<1x32xf32>
    %cst_49 = arith.constant dense<0.000000e+00> : vector<12xf32>
    %148 = vector.multi_reduction <add>, %145, %cst_49 [1] : vector<12x32xf32> to vector<12xf32>
    %149 = vector.shape_cast %148 : vector<12xf32> to vector<12x1xf32>
    %cst_50 = arith.constant 3.200000e+01 : f32
    %150 = vector.broadcast %cst_50 : f32 to vector<12x1xf32>
    %151 = arith.divf %149, %150 : vector<12x1xf32>
    %152 = vector.broadcast %151 : vector<12x1xf32> to vector<12x32xf32>
    %153 = arith.subf %145, %152 : vector<12x32xf32>
    %154 = arith.mulf %153, %153 : vector<12x32xf32>
    %cst_51 = arith.constant dense<0.000000e+00> : vector<12xf32>
    %155 = vector.multi_reduction <add>, %154, %cst_51 [1] : vector<12x32xf32> to vector<12xf32>
    %156 = vector.shape_cast %155 : vector<12xf32> to vector<12x1xf32>
    %cst_52 = arith.constant 3.200000e+01 : f32
    %157 = vector.broadcast %cst_52 : f32 to vector<12x1xf32>
    %158 = arith.divf %156, %157 : vector<12x1xf32>
    %cst_53 = arith.constant 9.99999974E-6 : f32
    %159 = vector.broadcast %cst_53 : f32 to vector<12x1xf32>
    %160 = arith.addf %158, %159 : vector<12x1xf32>
    %161 = math.rsqrt %160 : vector<12x1xf32>
    %162 = vector.broadcast %161 : vector<12x1xf32> to vector<12x32xf32>
    %163 = arith.mulf %153, %162 : vector<12x32xf32>
    %164 = vector.broadcast %146 : vector<1x32xf32> to vector<12x32xf32>
    %165 = arith.mulf %163, %164 : vector<12x32xf32>
    %166 = vector.broadcast %147 : vector<1x32xf32> to vector<12x32xf32>
    %167 = arith.addf %165, %166 : vector<12x32xf32>
    %c0_54 = arith.constant 0 : index
    %c0_55 = arith.constant 0 : index
    %168 = vector.load %arg10[%c0_54, %c0_55] : memref<12x32xf32, #tpu.memory_space<vmem>>, vector<12x32xf32>
    tpu.vector_store %arg10[%c0_54, %c0_55], %167 {strides = array<i32>} : memref<12x32xf32, #tpu.memory_space<vmem>>, vector<12x32xf32>,
    %c1_i32 = arith.constant 1 : i32
    %169 = arith.cmpi eq, %arg0, %c1_i32 : i32
    %170 = arith.extui %169 : i1 to i32
    %c0_i32_56 = arith.constant 0 : i32
    %171 = arith.cmpi ne, %170, %c0_i32_56 : i32
    scf.if %171 {
      %c0_57 = arith.constant 0 : index
      %c0_58 = arith.constant 0 : index
      %172 = vector.load %arg8[%c0_57, %c0_58] : memref<2x32xf32, #tpu.memory_space<vmem>>, vector<2x32xf32>
      %173 = vector.extract_strided_slice %172 {offsets = [0, 0], sizes = [1, 32], strides = [1, 1]} : vector<2x32xf32> to vector<1x32xf32>
      %174 = vector.extract_strided_slice %172 {offsets = [1, 0], sizes = [1, 32], strides = [1, 1]} : vector<2x32xf32> to vector<1x32xf32>
      %cst_59 = arith.constant dense<0.000000e+00> : vector<12xf32>
      %175 = vector.multi_reduction <add>, %167, %cst_59 [1] : vector<12x32xf32> to vector<12xf32>
      %176 = vector.shape_cast %175 : vector<12xf32> to vector<12x1xf32>
      %cst_60 = arith.constant 3.200000e+01 : f32
      %177 = vector.broadcast %cst_60 : f32 to vector<12x1xf32>
      %178 = arith.divf %176, %177 : vector<12x1xf32>
      %179 = vector.broadcast %178 : vector<12x1xf32> to vector<12x32xf32>
      %180 = arith.subf %167, %179 : vector<12x32xf32>
      %181 = arith.mulf %180, %180 : vector<12x32xf32>
      %cst_61 = arith.constant dense<0.000000e+00> : vector<12xf32>
      %182 = vector.multi_reduction <add>, %181, %cst_61 [1] : vector<12x32xf32> to vector<12xf32>
      %183 = vector.shape_cast %182 : vector<12xf32> to vector<12x1xf32>
      %cst_62 = arith.constant 3.200000e+01 : f32
      %184 = vector.broadcast %cst_62 : f32 to vector<12x1xf32>
      %185 = arith.divf %183, %184 : vector<12x1xf32>
      %cst_63 = arith.constant 9.99999974E-6 : f32
      %186 = vector.broadcast %cst_63 : f32 to vector<12x1xf32>
      %187 = arith.addf %185, %186 : vector<12x1xf32>
      %188 = math.rsqrt %187 : vector<12x1xf32>
      %189 = vector.broadcast %188 : vector<12x1xf32> to vector<12x32xf32>
      %190 = arith.mulf %180, %189 : vector<12x32xf32>
      %191 = vector.broadcast %173 : vector<1x32xf32> to vector<12x32xf32>
      %192 = arith.mulf %190, %191 : vector<12x32xf32>
      %193 = vector.broadcast %174 : vector<1x32xf32> to vector<12x32xf32>
      %194 = arith.addf %192, %193 : vector<12x32xf32>
      %c0_64 = arith.constant 0 : index
      %c0_65 = arith.constant 0 : index
      %195 = vector.load %arg9[%c0_64, %c0_65] : memref<12x32xf32, #tpu.memory_space<vmem>>, vector<12x32xf32>
      tpu.vector_store %arg9[%c0_64, %c0_65], %194 {strides = array<i32>} : memref<12x32xf32, #tpu.memory_space<vmem>>, vector<12x32xf32>,
    } else {
    }
    return
  }
  func.func @transform_0(%arg0: i32) -> (i32, i32) {
    %c0_i32 = arith.constant 0 : i32
    %c0_i32_0 = arith.constant 0 : i32
    %c0_i32_1 = arith.constant 0 : i32
    return %c0_i32, %c0_i32_0 : i32, i32
  }
  func.func @transform_1(%arg0: i32) -> (i32, i32, i32) {
    %c0_i32 = arith.constant 0 : i32
    %c0_i32_0 = arith.constant 0 : i32
    %c0_i32_1 = arith.constant 0 : i32
    return %arg0, %c0_i32, %c0_i32_0 : i32, i32, i32
  }
  func.func @transform_2(%arg0: i32) -> (i32, i32, i32) {
    %c0_i32 = arith.constant 0 : i32
    %c0_i32_0 = arith.constant 0 : i32
    %c0_i32_1 = arith.constant 0 : i32
    return %arg0, %c0_i32, %c0_i32_0 : i32, i32, i32
  }
  func.func @transform_3(%arg0: i32) -> (i32, i32, i32) {
    %c0_i32 = arith.constant 0 : i32
    %c0_i32_0 = arith.constant 0 : i32
    %c0_i32_1 = arith.constant 0 : i32
    return %arg0, %c0_i32, %c0_i32_0 : i32, i32, i32
  }
  func.func @transform_4(%arg0: i32) -> (i32, i32, i32) {
    %c0_i32 = arith.constant 0 : i32
    %c0_i32_0 = arith.constant 0 : i32
    %c0_i32_1 = arith.constant 0 : i32
    return %arg0, %c0_i32, %c0_i32_0 : i32, i32, i32
  }
  func.func @transform_5(%arg0: i32) -> (i32, i32, i32) {
    %c0_i32 = arith.constant 0 : i32
    %c0_i32_0 = arith.constant 0 : i32
    %c0_i32_1 = arith.constant 0 : i32
    return %arg0, %c0_i32, %c0_i32_0 : i32, i32, i32
  }
  func.func @transform_6(%arg0: i32) -> (i32, i32, i32) {
    %c0_i32 = arith.constant 0 : i32
    %c0_i32_0 = arith.constant 0 : i32
    %c0_i32_1 = arith.constant 0 : i32
    return %arg0, %c0_i32, %c0_i32_0 : i32, i32, i32
  }
  func.func @transform_7(%arg0: i32) -> (i32, i32) {
    %c0_i32 = arith.constant 0 : i32
    %c0_i32_0 = arith.constant 0 : i32
    %c0_i32_1 = arith.constant 0 : i32
    return %c0_i32, %c0_i32_0 : i32, i32
  }
  func.func @transform_8(%arg0: i32) -> (i32, i32) {
    %c0_i32 = arith.constant 0 : i32
    %c0_i32_0 = arith.constant 0 : i32
    %c0_i32_1 = arith.constant 0 : i32
    return %c0_i32, %c0_i32_0 : i32, i32
  }
}

module attributes {stable_mosaic.version = 11 : i64} {
  func.func @kernel(%arg0: i32, %arg1: memref<16x32xf32, #tpu.memory_space<vmem>>, %arg2: memref<12x32xf32, #tpu.memory_space<vmem>>, %arg3: memref<2x8x6xf32, #tpu.memory_space<vmem>>, %arg4: memref<1x32x128xbf16, #tpu.memory_space<vmem>>, %arg5: memref<1x1x128xf32, #tpu.memory_space<vmem>>, %arg6: memref<1x32x128xbf16, #tpu.memory_space<vmem>>, %arg7: memref<1x1x128xf32, #tpu.memory_space<vmem>>, %arg8: memref<1x32x2048xbf16, #tpu.memory_space<vmem>>, %arg9: memref<1x1x2048xf32, #tpu.memory_space<vmem>>, %arg10: memref<1x2048x32xbf16, #tpu.memory_space<vmem>>, %arg11: memref<1x7x32xf32, #tpu.memory_space<vmem>>, %arg12: memref<2x32xf32, #tpu.memory_space<vmem>>, %arg13: memref<16x32xf32, #tpu.memory_space<vmem>>, %arg14: memref<16x32xf32, #tpu.memory_space<vmem>>) attributes {dimension_semantics = [#tpu.dimension_semantics<arbitrary>], iteration_bounds = array<i64: 2>, scalar_prefetch = 0 : i64, scratch_operands = 1 : i64, tpu.core_type = #tpu.core_type<tc>, window_params = [{pipeline_mode = #tpu.pipeline_mode<synchronous>, transform_indices = @transform_0, window_bounds = array<i64: 16, 32>}, {pipeline_mode = #tpu.pipeline_mode<synchronous>, transform_indices = @transform_1, window_bounds = array<i64: 12, 32>}, {pipeline_mode = #tpu.pipeline_mode<synchronous>, transform_indices = @transform_2, window_bounds = array<i64: 2, 8, 6>}, {transform_indices = @transform_3, window_bounds = array<i64: 1, 32, 128>}, {transform_indices = @transform_4, window_bounds = array<i64: 1, 1, 128>}, {transform_indices = @transform_5, window_bounds = array<i64: 1, 32, 128>}, {transform_indices = @transform_6, window_bounds = array<i64: 1, 1, 128>}, {transform_indices = @transform_7, window_bounds = array<i64: 1, 32, 2048>}, {transform_indices = @transform_8, window_bounds = array<i64: 1, 1, 2048>}, {transform_indices = @transform_9, window_bounds = array<i64: 1, 2048, 32>}, {transform_indices = @transform_10, window_bounds = array<i64: 1, 7, 32>}, {pipeline_mode = #tpu.pipeline_mode<synchronous>, transform_indices = @transform_11, window_bounds = array<i64: 2, 32>}, {pipeline_mode = #tpu.pipeline_mode<synchronous>, transform_indices = @transform_12, window_bounds = array<i64: 16, 32>}]} {
    %c0_i32 = arith.constant 0 : i32
    %0 = arith.cmpi eq, %arg0, %c0_i32 : i32
    %1 = arith.extui %0 : i1 to i32
    %c0_i32_0 = arith.constant 0 : i32
    %2 = arith.cmpi ne, %1, %c0_i32_0 : i32
    scf.if %2 {
      %c0_98 = arith.constant 0 : index
      %c0_99 = arith.constant 0 : index
      %309 = vector.load %arg1[%c0_98, %c0_99] : memref<16x32xf32, #tpu.memory_space<vmem>>, vector<16x32xf32>
      %c0_100 = arith.constant 0 : index
      %c0_101 = arith.constant 0 : index
      %310 = vector.load %arg14[%c0_100, %c0_101] : memref<16x32xf32, #tpu.memory_space<vmem>>, vector<16x32xf32>
      tpu.vector_store %arg14[%c0_100, %c0_101], %309 {strides = array<i32>} : memref<16x32xf32, #tpu.memory_space<vmem>>, vector<16x32xf32>,
    } else {
    }
    %c0 = arith.constant 0 : index
    %c0_1 = arith.constant 0 : index
    %3 = vector.load %arg14[%c0, %c0_1] : memref<16x32xf32, #tpu.memory_space<vmem>>, vector<16x32xf32>
    %c0_2 = arith.constant 0 : index
    %c0_3 = arith.constant 0 : index
    %4 = vector.load %arg2[%c0_2, %c0_3] : memref<12x32xf32, #tpu.memory_space<vmem>>, vector<12x32xf32>
    %c0_4 = arith.constant 0 : index
    %c0_5 = arith.constant 0 : index
    %c0_6 = arith.constant 0 : index
    %5 = vector.load %arg4[%c0_4, %c0_5, %c0_6] : memref<1x32x128xbf16, #tpu.memory_space<vmem>>, vector<1x32x128xbf16>
    %6 = vector.shape_cast %5 : vector<1x32x128xbf16> to vector<32x128xbf16>
    %c0_7 = arith.constant 0 : index
    %c0_8 = arith.constant 0 : index
    %c0_9 = arith.constant 0 : index
    %7 = vector.load %arg5[%c0_7, %c0_8, %c0_9] : memref<1x1x128xf32, #tpu.memory_space<vmem>>, vector<1x1x128xf32>
    %8 = vector.shape_cast %7 : vector<1x1x128xf32> to vector<1x128xf32>
    %c0_10 = arith.constant 0 : index
    %c0_11 = arith.constant 0 : index
    %c0_12 = arith.constant 0 : index
    %9 = vector.load %arg6[%c0_10, %c0_11, %c0_12] : memref<1x32x128xbf16, #tpu.memory_space<vmem>>, vector<1x32x128xbf16>
    %10 = vector.shape_cast %9 : vector<1x32x128xbf16> to vector<32x128xbf16>
    %c0_13 = arith.constant 0 : index
    %c0_14 = arith.constant 0 : index
    %c0_15 = arith.constant 0 : index
    %11 = vector.load %arg7[%c0_13, %c0_14, %c0_15] : memref<1x1x128xf32, #tpu.memory_space<vmem>>, vector<1x1x128xf32>
    %12 = vector.shape_cast %11 : vector<1x1x128xf32> to vector<1x128xf32>
    %c0_16 = arith.constant 0 : index
    %c0_17 = arith.constant 0 : index
    %c0_18 = arith.constant 0 : index
    %13 = vector.load %arg11[%c0_16, %c0_17, %c0_18] : memref<1x7x32xf32, #tpu.memory_space<vmem>>, vector<1x7x32xf32>
    %14 = vector.shape_cast %13 : vector<1x7x32xf32> to vector<7x32xf32>
    %15 = arith.truncf %3 : vector<16x32xf32> to vector<16x32xbf16>
    %16 = vector.extract_strided_slice %6 {offsets = [0, 0], sizes = [32, 96], strides = [1, 1]} : vector<32x128xbf16> to vector<32x96xbf16>
    %cst = arith.constant dense<0.000000e+00> : vector<16x96xf32>
    %17 = tpu.matmul %15, %16, %cst {dimension_numbers = #tpu.dot_dimension_numbers<[1], [0], [0], [1], [0, 0, 1, 1], [], []>} : vector<16x32xbf16>, vector<32x96xbf16>, vector<16x96xf32> -> vector<16x96xf32>
    %18 = vector.extract_strided_slice %8 {offsets = [0, 0], sizes = [1, 96], strides = [1, 1]} : vector<1x128xf32> to vector<1x96xf32>
    %19 = vector.broadcast %18 : vector<1x96xf32> to vector<16x96xf32>
    %20 = arith.addf %17, %19 : vector<16x96xf32>
    %21 = vector.extract_strided_slice %20 {offsets = [0, 0], sizes = [8, 96], strides = [1, 1]} : vector<16x96xf32> to vector<8x96xf32>
    %22 = vector.extract_strided_slice %21 {offsets = [0, 0], sizes = [8, 32], strides = [1, 1]} : vector<8x96xf32> to vector<8x32xf32>
    %23 = vector.extract_strided_slice %21 {offsets = [0, 32], sizes = [8, 32], strides = [1, 1]} : vector<8x96xf32> to vector<8x32xf32>
    %24 = vector.extract_strided_slice %21 {offsets = [0, 64], sizes = [8, 32], strides = [1, 1]} : vector<8x96xf32> to vector<8x32xf32>
    %25 = vector.extract_strided_slice %22 {offsets = [0, 0], sizes = [8, 16], strides = [1, 1]} : vector<8x32xf32> to vector<8x16xf32>
    %26 = vector.extract_strided_slice %23 {offsets = [0, 0], sizes = [8, 16], strides = [1, 1]} : vector<8x32xf32> to vector<8x16xf32>
    %27 = tpu.transpose %26, [1, 0] : vector<8x16xf32> -> vector<16x8xf32>
    %cst_19 = arith.constant dense<0.000000e+00> : vector<8x8xf32>
    %28 = tpu.matmul %25, %27, %cst_19 {dimension_numbers = #tpu.dot_dimension_numbers<[1], [0], [0], [1], [0, 0, 1, 1], [], []>} : vector<8x16xf32>, vector<16x8xf32>, vector<8x8xf32> -> vector<8x8xf32>
    %cst_20 = arith.constant 2.500000e-01 : f32
    %29 = vector.broadcast %cst_20 : f32 to vector<8x8xf32>
    %30 = arith.mulf %28, %29 : vector<8x8xf32>
    %cst_21 = arith.constant dense<0xFF800000> : vector<8xf32>
    %31 = vector.multi_reduction <maximumf>, %30, %cst_21 [1] : vector<8x8xf32> to vector<8xf32>
    %32 = vector.shape_cast %31 : vector<8xf32> to vector<8x1xf32>
    %33 = vector.broadcast %32 : vector<8x1xf32> to vector<8x8xf32>
    %34 = arith.subf %30, %33 : vector<8x8xf32>
    %35 = math.exp %34 : vector<8x8xf32>
    %cst_22 = arith.constant dense<0.000000e+00> : vector<8xf32>
    %36 = vector.multi_reduction <add>, %35, %cst_22 [1] : vector<8x8xf32> to vector<8xf32>
    %37 = vector.shape_cast %36 : vector<8xf32> to vector<8x1xf32>
    %38 = vector.extract_strided_slice %24 {offsets = [0, 0], sizes = [8, 16], strides = [1, 1]} : vector<8x32xf32> to vector<8x16xf32>
    %cst_23 = arith.constant dense<0.000000e+00> : vector<8x16xf32>
    %39 = tpu.matmul %35, %38, %cst_23 {dimension_numbers = #tpu.dot_dimension_numbers<[1], [0], [0], [1], [0, 0, 1, 1], [], []>} : vector<8x8xf32>, vector<8x16xf32>, vector<8x16xf32> -> vector<8x16xf32>
    %40 = tpu.reciprocal %37 {approx = true} : vector<8x1xf32> -> vector<8x1xf32>
    %41 = vector.broadcast %40 : vector<8x1xf32> to vector<8x16xf32>
    %42 = arith.mulf %39, %41 : vector<8x16xf32>
    %43 = vector.extract_strided_slice %22 {offsets = [0, 16], sizes = [8, 16], strides = [1, 1]} : vector<8x32xf32> to vector<8x16xf32>
    %44 = vector.extract_strided_slice %23 {offsets = [0, 16], sizes = [8, 16], strides = [1, 1]} : vector<8x32xf32> to vector<8x16xf32>
    %45 = tpu.transpose %44, [1, 0] : vector<8x16xf32> -> vector<16x8xf32>
    %cst_24 = arith.constant dense<0.000000e+00> : vector<8x8xf32>
    %46 = tpu.matmul %43, %45, %cst_24 {dimension_numbers = #tpu.dot_dimension_numbers<[1], [0], [0], [1], [0, 0, 1, 1], [], []>} : vector<8x16xf32>, vector<16x8xf32>, vector<8x8xf32> -> vector<8x8xf32>
    %cst_25 = arith.constant 2.500000e-01 : f32
    %47 = vector.broadcast %cst_25 : f32 to vector<8x8xf32>
    %48 = arith.mulf %46, %47 : vector<8x8xf32>
    %cst_26 = arith.constant dense<0xFF800000> : vector<8xf32>
    %49 = vector.multi_reduction <maximumf>, %48, %cst_26 [1] : vector<8x8xf32> to vector<8xf32>
    %50 = vector.shape_cast %49 : vector<8xf32> to vector<8x1xf32>
    %51 = vector.broadcast %50 : vector<8x1xf32> to vector<8x8xf32>
    %52 = arith.subf %48, %51 : vector<8x8xf32>
    %53 = math.exp %52 : vector<8x8xf32>
    %cst_27 = arith.constant dense<0.000000e+00> : vector<8xf32>
    %54 = vector.multi_reduction <add>, %53, %cst_27 [1] : vector<8x8xf32> to vector<8xf32>
    %55 = vector.shape_cast %54 : vector<8xf32> to vector<8x1xf32>
    %56 = vector.extract_strided_slice %24 {offsets = [0, 16], sizes = [8, 16], strides = [1, 1]} : vector<8x32xf32> to vector<8x16xf32>
    %cst_28 = arith.constant dense<0.000000e+00> : vector<8x16xf32>
    %57 = tpu.matmul %53, %56, %cst_28 {dimension_numbers = #tpu.dot_dimension_numbers<[1], [0], [0], [1], [0, 0, 1, 1], [], []>} : vector<8x8xf32>, vector<8x16xf32>, vector<8x16xf32> -> vector<8x16xf32>
    %58 = tpu.reciprocal %55 {approx = true} : vector<8x1xf32> -> vector<8x1xf32>
    %59 = vector.broadcast %58 : vector<8x1xf32> to vector<8x16xf32>
    %60 = arith.mulf %57, %59 : vector<8x16xf32>
    %61 = tpu.concatenate %42, %60 in 1 : vector<8x16xf32>, vector<8x16xf32> -> vector<8x32xf32>
    %62 = vector.extract_strided_slice %20 {offsets = [8, 0], sizes = [8, 96], strides = [1, 1]} : vector<16x96xf32> to vector<8x96xf32>
    %63 = vector.extract_strided_slice %62 {offsets = [0, 0], sizes = [8, 32], strides = [1, 1]} : vector<8x96xf32> to vector<8x32xf32>
    %64 = vector.extract_strided_slice %62 {offsets = [0, 32], sizes = [8, 32], strides = [1, 1]} : vector<8x96xf32> to vector<8x32xf32>
    %65 = vector.extract_strided_slice %62 {offsets = [0, 64], sizes = [8, 32], strides = [1, 1]} : vector<8x96xf32> to vector<8x32xf32>
    %66 = vector.extract_strided_slice %63 {offsets = [0, 0], sizes = [8, 16], strides = [1, 1]} : vector<8x32xf32> to vector<8x16xf32>
    %67 = vector.extract_strided_slice %64 {offsets = [0, 0], sizes = [8, 16], strides = [1, 1]} : vector<8x32xf32> to vector<8x16xf32>
    %68 = tpu.transpose %67, [1, 0] : vector<8x16xf32> -> vector<16x8xf32>
    %cst_29 = arith.constant dense<0.000000e+00> : vector<8x8xf32>
    %69 = tpu.matmul %66, %68, %cst_29 {dimension_numbers = #tpu.dot_dimension_numbers<[1], [0], [0], [1], [0, 0, 1, 1], [], []>} : vector<8x16xf32>, vector<16x8xf32>, vector<8x8xf32> -> vector<8x8xf32>
    %cst_30 = arith.constant 2.500000e-01 : f32
    %70 = vector.broadcast %cst_30 : f32 to vector<8x8xf32>
    %71 = arith.mulf %69, %70 : vector<8x8xf32>
    %cst_31 = arith.constant dense<0xFF800000> : vector<8xf32>
    %72 = vector.multi_reduction <maximumf>, %71, %cst_31 [1] : vector<8x8xf32> to vector<8xf32>
    %73 = vector.shape_cast %72 : vector<8xf32> to vector<8x1xf32>
    %74 = vector.broadcast %73 : vector<8x1xf32> to vector<8x8xf32>
    %75 = arith.subf %71, %74 : vector<8x8xf32>
    %76 = math.exp %75 : vector<8x8xf32>
    %cst_32 = arith.constant dense<0.000000e+00> : vector<8xf32>
    %77 = vector.multi_reduction <add>, %76, %cst_32 [1] : vector<8x8xf32> to vector<8xf32>
    %78 = vector.shape_cast %77 : vector<8xf32> to vector<8x1xf32>
    %79 = vector.extract_strided_slice %65 {offsets = [0, 0], sizes = [8, 16], strides = [1, 1]} : vector<8x32xf32> to vector<8x16xf32>
    %cst_33 = arith.constant dense<0.000000e+00> : vector<8x16xf32>
    %80 = tpu.matmul %76, %79, %cst_33 {dimension_numbers = #tpu.dot_dimension_numbers<[1], [0], [0], [1], [0, 0, 1, 1], [], []>} : vector<8x8xf32>, vector<8x16xf32>, vector<8x16xf32> -> vector<8x16xf32>
    %81 = tpu.reciprocal %78 {approx = true} : vector<8x1xf32> -> vector<8x1xf32>
    %82 = vector.broadcast %81 : vector<8x1xf32> to vector<8x16xf32>
    %83 = arith.mulf %80, %82 : vector<8x16xf32>
    %84 = vector.extract_strided_slice %63 {offsets = [0, 16], sizes = [8, 16], strides = [1, 1]} : vector<8x32xf32> to vector<8x16xf32>
    %85 = vector.extract_strided_slice %64 {offsets = [0, 16], sizes = [8, 16], strides = [1, 1]} : vector<8x32xf32> to vector<8x16xf32>
    %86 = tpu.transpose %85, [1, 0] : vector<8x16xf32> -> vector<16x8xf32>
    %cst_34 = arith.constant dense<0.000000e+00> : vector<8x8xf32>
    %87 = tpu.matmul %84, %86, %cst_34 {dimension_numbers = #tpu.dot_dimension_numbers<[1], [0], [0], [1], [0, 0, 1, 1], [], []>} : vector<8x16xf32>, vector<16x8xf32>, vector<8x8xf32> -> vector<8x8xf32>
    %cst_35 = arith.constant 2.500000e-01 : f32
    %88 = vector.broadcast %cst_35 : f32 to vector<8x8xf32>
    %89 = arith.mulf %87, %88 : vector<8x8xf32>
    %cst_36 = arith.constant dense<0xFF800000> : vector<8xf32>
    %90 = vector.multi_reduction <maximumf>, %89, %cst_36 [1] : vector<8x8xf32> to vector<8xf32>
    %91 = vector.shape_cast %90 : vector<8xf32> to vector<8x1xf32>
    %92 = vector.broadcast %91 : vector<8x1xf32> to vector<8x8xf32>
    %93 = arith.subf %89, %92 : vector<8x8xf32>
    %94 = math.exp %93 : vector<8x8xf32>
    %cst_37 = arith.constant dense<0.000000e+00> : vector<8xf32>
    %95 = vector.multi_reduction <add>, %94, %cst_37 [1] : vector<8x8xf32> to vector<8xf32>
    %96 = vector.shape_cast %95 : vector<8xf32> to vector<8x1xf32>
    %97 = vector.extract_strided_slice %65 {offsets = [0, 16], sizes = [8, 16], strides = [1, 1]} : vector<8x32xf32> to vector<8x16xf32>
    %cst_38 = arith.constant dense<0.000000e+00> : vector<8x16xf32>
    %98 = tpu.matmul %94, %97, %cst_38 {dimension_numbers = #tpu.dot_dimension_numbers<[1], [0], [0], [1], [0, 0, 1, 1], [], []>} : vector<8x8xf32>, vector<8x16xf32>, vector<8x16xf32> -> vector<8x16xf32>
    %99 = tpu.reciprocal %96 {approx = true} : vector<8x1xf32> -> vector<8x1xf32>
    %100 = vector.broadcast %99 : vector<8x1xf32> to vector<8x16xf32>
    %101 = arith.mulf %98, %100 : vector<8x16xf32>
    %102 = tpu.concatenate %83, %101 in 1 : vector<8x16xf32>, vector<8x16xf32> -> vector<8x32xf32>
    %103 = tpu.concatenate %61, %102 in 0 : vector<8x32xf32>, vector<8x32xf32> -> vector<16x32xf32>
    %104 = arith.truncf %103 : vector<16x32xf32> to vector<16x32xbf16>
    %105 = vector.extract_strided_slice %6 {offsets = [0, 96], sizes = [32, 32], strides = [1, 1]} : vector<32x128xbf16> to vector<32x32xbf16>
    %cst_39 = arith.constant dense<0.000000e+00> : vector<16x32xf32>
    %106 = tpu.matmul %104, %105, %cst_39 {dimension_numbers = #tpu.dot_dimension_numbers<[1], [0], [0], [1], [0, 0, 1, 1], [], []>} : vector<16x32xbf16>, vector<32x32xbf16>, vector<16x32xf32> -> vector<16x32xf32>
    %107 = vector.extract_strided_slice %8 {offsets = [0, 96], sizes = [1, 32], strides = [1, 1]} : vector<1x128xf32> to vector<1x32xf32>
    %108 = vector.broadcast %107 : vector<1x32xf32> to vector<16x32xf32>
    %109 = arith.addf %106, %108 : vector<16x32xf32>
    %110 = arith.addf %3, %109 : vector<16x32xf32>
    %111 = vector.extract_strided_slice %14 {offsets = [0, 0], sizes = [1, 32], strides = [1, 1]} : vector<7x32xf32> to vector<1x32xf32>
    %112 = vector.extract_strided_slice %14 {offsets = [1, 0], sizes = [1, 32], strides = [1, 1]} : vector<7x32xf32> to vector<1x32xf32>
    %cst_40 = arith.constant dense<0.000000e+00> : vector<16xf32>
    %113 = vector.multi_reduction <add>, %110, %cst_40 [1] : vector<16x32xf32> to vector<16xf32>
    %114 = vector.shape_cast %113 : vector<16xf32> to vector<16x1xf32>
    %cst_41 = arith.constant 3.200000e+01 : f32
    %115 = vector.broadcast %cst_41 : f32 to vector<16x1xf32>
    %116 = arith.divf %114, %115 : vector<16x1xf32>
    %117 = vector.broadcast %116 : vector<16x1xf32> to vector<16x32xf32>
    %118 = arith.subf %110, %117 : vector<16x32xf32>
    %119 = arith.mulf %118, %118 : vector<16x32xf32>
    %cst_42 = arith.constant dense<0.000000e+00> : vector<16xf32>
    %120 = vector.multi_reduction <add>, %119, %cst_42 [1] : vector<16x32xf32> to vector<16xf32>
    %121 = vector.shape_cast %120 : vector<16xf32> to vector<16x1xf32>
    %cst_43 = arith.constant 3.200000e+01 : f32
    %122 = vector.broadcast %cst_43 : f32 to vector<16x1xf32>
    %123 = arith.divf %121, %122 : vector<16x1xf32>
    %cst_44 = arith.constant 9.99999974E-6 : f32
    %124 = vector.broadcast %cst_44 : f32 to vector<16x1xf32>
    %125 = arith.addf %123, %124 : vector<16x1xf32>
    %126 = math.rsqrt %125 : vector<16x1xf32>
    %127 = vector.broadcast %126 : vector<16x1xf32> to vector<16x32xf32>
    %128 = arith.mulf %118, %127 : vector<16x32xf32>
    %129 = vector.broadcast %111 : vector<1x32xf32> to vector<16x32xf32>
    %130 = arith.mulf %128, %129 : vector<16x32xf32>
    %131 = vector.broadcast %112 : vector<1x32xf32> to vector<16x32xf32>
    %132 = arith.addf %130, %131 : vector<16x32xf32>
    %133 = arith.truncf %132 : vector<16x32xf32> to vector<16x32xbf16>
    %134 = vector.extract_strided_slice %10 {offsets = [0, 0], sizes = [32, 32], strides = [1, 1]} : vector<32x128xbf16> to vector<32x32xbf16>
    %cst_45 = arith.constant dense<0.000000e+00> : vector<16x32xf32>
    %135 = tpu.matmul %133, %134, %cst_45 {dimension_numbers = #tpu.dot_dimension_numbers<[1], [0], [0], [1], [0, 0, 1, 1], [], []>} : vector<16x32xbf16>, vector<32x32xbf16>, vector<16x32xf32> -> vector<16x32xf32>
    %136 = vector.extract_strided_slice %12 {offsets = [0, 0], sizes = [1, 32], strides = [1, 1]} : vector<1x128xf32> to vector<1x32xf32>
    %137 = vector.broadcast %136 : vector<1x32xf32> to vector<16x32xf32>
    %138 = arith.addf %135, %137 : vector<16x32xf32>
    %139 = arith.truncf %4 : vector<12x32xf32> to vector<12x32xbf16>
    %140 = vector.extract_strided_slice %10 {offsets = [0, 32], sizes = [32, 64], strides = [1, 1]} : vector<32x128xbf16> to vector<32x64xbf16>
    %cst_46 = arith.constant dense<0.000000e+00> : vector<12x64xf32>
    %141 = tpu.matmul %139, %140, %cst_46 {dimension_numbers = #tpu.dot_dimension_numbers<[1], [0], [0], [1], [0, 0, 1, 1], [], []>} : vector<12x32xbf16>, vector<32x64xbf16>, vector<12x64xf32> -> vector<12x64xf32>
    %142 = vector.extract_strided_slice %12 {offsets = [0, 32], sizes = [1, 64], strides = [1, 1]} : vector<1x128xf32> to vector<1x64xf32>
    %143 = vector.broadcast %142 : vector<1x64xf32> to vector<12x64xf32>
    %144 = arith.addf %141, %143 : vector<12x64xf32>
    %145 = vector.extract_strided_slice %138 {offsets = [0, 0], sizes = [8, 32], strides = [1, 1]} : vector<16x32xf32> to vector<8x32xf32>
    %146 = vector.extract_strided_slice %144 {offsets = [0, 0], sizes = [6, 64], strides = [1, 1]} : vector<12x64xf32> to vector<6x64xf32>
    %147 = vector.extract_strided_slice %146 {offsets = [0, 0], sizes = [6, 32], strides = [1, 1]} : vector<6x64xf32> to vector<6x32xf32>
    %148 = vector.extract_strided_slice %146 {offsets = [0, 32], sizes = [6, 32], strides = [1, 1]} : vector<6x64xf32> to vector<6x32xf32>
    %c0_47 = arith.constant 0 : index
    %c0_48 = arith.constant 0 : index
    %c0_49 = arith.constant 0 : index
    %149 = vector.load %arg3[%c0_47, %c0_48, %c0_49] : memref<2x8x6xf32, #tpu.memory_space<vmem>>, vector<1x8x6xf32>
    %150 = vector.shape_cast %149 : vector<1x8x6xf32> to vector<8x6xf32>
    %151 = vector.extract_strided_slice %145 {offsets = [0, 0], sizes = [8, 16], strides = [1, 1]} : vector<8x32xf32> to vector<8x16xf32>
    %152 = vector.extract_strided_slice %147 {offsets = [0, 0], sizes = [6, 16], strides = [1, 1]} : vector<6x32xf32> to vector<6x16xf32>
    %153 = tpu.transpose %152, [1, 0] : vector<6x16xf32> -> vector<16x6xf32>
    %cst_50 = arith.constant dense<0.000000e+00> : vector<8x6xf32>
    %154 = tpu.matmul %151, %153, %cst_50 {dimension_numbers = #tpu.dot_dimension_numbers<[1], [0], [0], [1], [0, 0, 1, 1], [], []>} : vector<8x16xf32>, vector<16x6xf32>, vector<8x6xf32> -> vector<8x6xf32>
    %cst_51 = arith.constant 2.500000e-01 : f32
    %155 = vector.broadcast %cst_51 : f32 to vector<8x6xf32>
    %156 = arith.mulf %154, %155 : vector<8x6xf32>
    %157 = arith.addf %156, %150 : vector<8x6xf32>
    %cst_52 = arith.constant dense<0xFF800000> : vector<8xf32>
    %158 = vector.multi_reduction <maximumf>, %157, %cst_52 [1] : vector<8x6xf32> to vector<8xf32>
    %159 = vector.shape_cast %158 : vector<8xf32> to vector<8x1xf32>
    %160 = vector.broadcast %159 : vector<8x1xf32> to vector<8x6xf32>
    %161 = arith.subf %157, %160 : vector<8x6xf32>
    %162 = math.exp %161 : vector<8x6xf32>
    %cst_53 = arith.constant dense<0.000000e+00> : vector<8xf32>
    %163 = vector.multi_reduction <add>, %162, %cst_53 [1] : vector<8x6xf32> to vector<8xf32>
    %164 = vector.shape_cast %163 : vector<8xf32> to vector<8x1xf32>
    %165 = vector.extract_strided_slice %148 {offsets = [0, 0], sizes = [6, 16], strides = [1, 1]} : vector<6x32xf32> to vector<6x16xf32>
    %cst_54 = arith.constant dense<0.000000e+00> : vector<8x16xf32>
    %166 = tpu.matmul %162, %165, %cst_54 {dimension_numbers = #tpu.dot_dimension_numbers<[1], [0], [0], [1], [0, 0, 1, 1], [], []>} : vector<8x6xf32>, vector<6x16xf32>, vector<8x16xf32> -> vector<8x16xf32>
    %167 = tpu.reciprocal %164 {approx = true} : vector<8x1xf32> -> vector<8x1xf32>
    %168 = vector.broadcast %167 : vector<8x1xf32> to vector<8x16xf32>
    %169 = arith.mulf %166, %168 : vector<8x16xf32>
    %170 = vector.extract_strided_slice %145 {offsets = [0, 16], sizes = [8, 16], strides = [1, 1]} : vector<8x32xf32> to vector<8x16xf32>
    %171 = vector.extract_strided_slice %147 {offsets = [0, 16], sizes = [6, 16], strides = [1, 1]} : vector<6x32xf32> to vector<6x16xf32>
    %172 = tpu.transpose %171, [1, 0] : vector<6x16xf32> -> vector<16x6xf32>
    %cst_55 = arith.constant dense<0.000000e+00> : vector<8x6xf32>
    %173 = tpu.matmul %170, %172, %cst_55 {dimension_numbers = #tpu.dot_dimension_numbers<[1], [0], [0], [1], [0, 0, 1, 1], [], []>} : vector<8x16xf32>, vector<16x6xf32>, vector<8x6xf32> -> vector<8x6xf32>
    %cst_56 = arith.constant 2.500000e-01 : f32
    %174 = vector.broadcast %cst_56 : f32 to vector<8x6xf32>
    %175 = arith.mulf %173, %174 : vector<8x6xf32>
    %176 = arith.addf %175, %150 : vector<8x6xf32>
    %cst_57 = arith.constant dense<0xFF800000> : vector<8xf32>
    %177 = vector.multi_reduction <maximumf>, %176, %cst_57 [1] : vector<8x6xf32> to vector<8xf32>
    %178 = vector.shape_cast %177 : vector<8xf32> to vector<8x1xf32>
    %179 = vector.broadcast %178 : vector<8x1xf32> to vector<8x6xf32>
    %180 = arith.subf %176, %179 : vector<8x6xf32>
    %181 = math.exp %180 : vector<8x6xf32>
    %cst_58 = arith.constant dense<0.000000e+00> : vector<8xf32>
    %182 = vector.multi_reduction <add>, %181, %cst_58 [1] : vector<8x6xf32> to vector<8xf32>
    %183 = vector.shape_cast %182 : vector<8xf32> to vector<8x1xf32>
    %184 = vector.extract_strided_slice %148 {offsets = [0, 16], sizes = [6, 16], strides = [1, 1]} : vector<6x32xf32> to vector<6x16xf32>
    %cst_59 = arith.constant dense<0.000000e+00> : vector<8x16xf32>
    %185 = tpu.matmul %181, %184, %cst_59 {dimension_numbers = #tpu.dot_dimension_numbers<[1], [0], [0], [1], [0, 0, 1, 1], [], []>} : vector<8x6xf32>, vector<6x16xf32>, vector<8x16xf32> -> vector<8x16xf32>
    %186 = tpu.reciprocal %183 {approx = true} : vector<8x1xf32> -> vector<8x1xf32>
    %187 = vector.broadcast %186 : vector<8x1xf32> to vector<8x16xf32>
    %188 = arith.mulf %185, %187 : vector<8x16xf32>
    %189 = tpu.concatenate %169, %188 in 1 : vector<8x16xf32>, vector<8x16xf32> -> vector<8x32xf32>
    %190 = vector.extract_strided_slice %138 {offsets = [8, 0], sizes = [8, 32], strides = [1, 1]} : vector<16x32xf32> to vector<8x32xf32>
    %191 = vector.extract_strided_slice %144 {offsets = [6, 0], sizes = [6, 64], strides = [1, 1]} : vector<12x64xf32> to vector<6x64xf32>
    %192 = vector.extract_strided_slice %191 {offsets = [0, 0], sizes = [6, 32], strides = [1, 1]} : vector<6x64xf32> to vector<6x32xf32>
    %193 = vector.extract_strided_slice %191 {offsets = [0, 32], sizes = [6, 32], strides = [1, 1]} : vector<6x64xf32> to vector<6x32xf32>
    %c1 = arith.constant 1 : index
    %c0_60 = arith.constant 0 : index
    %c0_61 = arith.constant 0 : index
    %194 = vector.load %arg3[%c1, %c0_60, %c0_61] : memref<2x8x6xf32, #tpu.memory_space<vmem>>, vector<1x8x6xf32>
    %195 = vector.shape_cast %194 : vector<1x8x6xf32> to vector<8x6xf32>
    %196 = vector.extract_strided_slice %190 {offsets = [0, 0], sizes = [8, 16], strides = [1, 1]} : vector<8x32xf32> to vector<8x16xf32>
    %197 = vector.extract_strided_slice %192 {offsets = [0, 0], sizes = [6, 16], strides = [1, 1]} : vector<6x32xf32> to vector<6x16xf32>
    %198 = tpu.transpose %197, [1, 0] : vector<6x16xf32> -> vector<16x6xf32>
    %cst_62 = arith.constant dense<0.000000e+00> : vector<8x6xf32>
    %199 = tpu.matmul %196, %198, %cst_62 {dimension_numbers = #tpu.dot_dimension_numbers<[1], [0], [0], [1], [0, 0, 1, 1], [], []>} : vector<8x16xf32>, vector<16x6xf32>, vector<8x6xf32> -> vector<8x6xf32>
    %cst_63 = arith.constant 2.500000e-01 : f32
    %200 = vector.broadcast %cst_63 : f32 to vector<8x6xf32>
    %201 = arith.mulf %199, %200 : vector<8x6xf32>
    %202 = arith.addf %201, %195 : vector<8x6xf32>
    %cst_64 = arith.constant dense<0xFF800000> : vector<8xf32>
    %203 = vector.multi_reduction <maximumf>, %202, %cst_64 [1] : vector<8x6xf32> to vector<8xf32>
    %204 = vector.shape_cast %203 : vector<8xf32> to vector<8x1xf32>
    %205 = vector.broadcast %204 : vector<8x1xf32> to vector<8x6xf32>
    %206 = arith.subf %202, %205 : vector<8x6xf32>
    %207 = math.exp %206 : vector<8x6xf32>
    %cst_65 = arith.constant dense<0.000000e+00> : vector<8xf32>
    %208 = vector.multi_reduction <add>, %207, %cst_65 [1] : vector<8x6xf32> to vector<8xf32>
    %209 = vector.shape_cast %208 : vector<8xf32> to vector<8x1xf32>
    %210 = vector.extract_strided_slice %193 {offsets = [0, 0], sizes = [6, 16], strides = [1, 1]} : vector<6x32xf32> to vector<6x16xf32>
    %cst_66 = arith.constant dense<0.000000e+00> : vector<8x16xf32>
    %211 = tpu.matmul %207, %210, %cst_66 {dimension_numbers = #tpu.dot_dimension_numbers<[1], [0], [0], [1], [0, 0, 1, 1], [], []>} : vector<8x6xf32>, vector<6x16xf32>, vector<8x16xf32> -> vector<8x16xf32>
    %212 = tpu.reciprocal %209 {approx = true} : vector<8x1xf32> -> vector<8x1xf32>
    %213 = vector.broadcast %212 : vector<8x1xf32> to vector<8x16xf32>
    %214 = arith.mulf %211, %213 : vector<8x16xf32>
    %215 = vector.extract_strided_slice %190 {offsets = [0, 16], sizes = [8, 16], strides = [1, 1]} : vector<8x32xf32> to vector<8x16xf32>
    %216 = vector.extract_strided_slice %192 {offsets = [0, 16], sizes = [6, 16], strides = [1, 1]} : vector<6x32xf32> to vector<6x16xf32>
    %217 = tpu.transpose %216, [1, 0] : vector<6x16xf32> -> vector<16x6xf32>
    %cst_67 = arith.constant dense<0.000000e+00> : vector<8x6xf32>
    %218 = tpu.matmul %215, %217, %cst_67 {dimension_numbers = #tpu.dot_dimension_numbers<[1], [0], [0], [1], [0, 0, 1, 1], [], []>} : vector<8x16xf32>, vector<16x6xf32>, vector<8x6xf32> -> vector<8x6xf32>
    %cst_68 = arith.constant 2.500000e-01 : f32
    %219 = vector.broadcast %cst_68 : f32 to vector<8x6xf32>
    %220 = arith.mulf %218, %219 : vector<8x6xf32>
    %221 = arith.addf %220, %195 : vector<8x6xf32>
    %cst_69 = arith.constant dense<0xFF800000> : vector<8xf32>
    %222 = vector.multi_reduction <maximumf>, %221, %cst_69 [1] : vector<8x6xf32> to vector<8xf32>
    %223 = vector.shape_cast %222 : vector<8xf32> to vector<8x1xf32>
    %224 = vector.broadcast %223 : vector<8x1xf32> to vector<8x6xf32>
    %225 = arith.subf %221, %224 : vector<8x6xf32>
    %226 = math.exp %225 : vector<8x6xf32>
    %cst_70 = arith.constant dense<0.000000e+00> : vector<8xf32>
    %227 = vector.multi_reduction <add>, %226, %cst_70 [1] : vector<8x6xf32> to vector<8xf32>
    %228 = vector.shape_cast %227 : vector<8xf32> to vector<8x1xf32>
    %229 = vector.extract_strided_slice %193 {offsets = [0, 16], sizes = [6, 16], strides = [1, 1]} : vector<6x32xf32> to vector<6x16xf32>
    %cst_71 = arith.constant dense<0.000000e+00> : vector<8x16xf32>
    %230 = tpu.matmul %226, %229, %cst_71 {dimension_numbers = #tpu.dot_dimension_numbers<[1], [0], [0], [1], [0, 0, 1, 1], [], []>} : vector<8x6xf32>, vector<6x16xf32>, vector<8x16xf32> -> vector<8x16xf32>
    %231 = tpu.reciprocal %228 {approx = true} : vector<8x1xf32> -> vector<8x1xf32>
    %232 = vector.broadcast %231 : vector<8x1xf32> to vector<8x16xf32>
    %233 = arith.mulf %230, %232 : vector<8x16xf32>
    %234 = tpu.concatenate %214, %233 in 1 : vector<8x16xf32>, vector<8x16xf32> -> vector<8x32xf32>
    %235 = tpu.concatenate %189, %234 in 0 : vector<8x32xf32>, vector<8x32xf32> -> vector<16x32xf32>
    %236 = arith.truncf %235 : vector<16x32xf32> to vector<16x32xbf16>
    %237 = vector.extract_strided_slice %10 {offsets = [0, 96], sizes = [32, 32], strides = [1, 1]} : vector<32x128xbf16> to vector<32x32xbf16>
    %cst_72 = arith.constant dense<0.000000e+00> : vector<16x32xf32>
    %238 = tpu.matmul %236, %237, %cst_72 {dimension_numbers = #tpu.dot_dimension_numbers<[1], [0], [0], [1], [0, 0, 1, 1], [], []>} : vector<16x32xbf16>, vector<32x32xbf16>, vector<16x32xf32> -> vector<16x32xf32>
    %239 = vector.extract_strided_slice %12 {offsets = [0, 96], sizes = [1, 32], strides = [1, 1]} : vector<1x128xf32> to vector<1x32xf32>
    %240 = vector.broadcast %239 : vector<1x32xf32> to vector<16x32xf32>
    %241 = arith.addf %238, %240 : vector<16x32xf32>
    %242 = arith.addf %132, %241 : vector<16x32xf32>
    %243 = vector.extract_strided_slice %14 {offsets = [2, 0], sizes = [1, 32], strides = [1, 1]} : vector<7x32xf32> to vector<1x32xf32>
    %244 = vector.extract_strided_slice %14 {offsets = [3, 0], sizes = [1, 32], strides = [1, 1]} : vector<7x32xf32> to vector<1x32xf32>
    %cst_73 = arith.constant dense<0.000000e+00> : vector<16xf32>
    %245 = vector.multi_reduction <add>, %242, %cst_73 [1] : vector<16x32xf32> to vector<16xf32>
    %246 = vector.shape_cast %245 : vector<16xf32> to vector<16x1xf32>
    %cst_74 = arith.constant 3.200000e+01 : f32
    %247 = vector.broadcast %cst_74 : f32 to vector<16x1xf32>
    %248 = arith.divf %246, %247 : vector<16x1xf32>
    %249 = vector.broadcast %248 : vector<16x1xf32> to vector<16x32xf32>
    %250 = arith.subf %242, %249 : vector<16x32xf32>
    %251 = arith.mulf %250, %250 : vector<16x32xf32>
    %cst_75 = arith.constant dense<0.000000e+00> : vector<16xf32>
    %252 = vector.multi_reduction <add>, %251, %cst_75 [1] : vector<16x32xf32> to vector<16xf32>
    %253 = vector.shape_cast %252 : vector<16xf32> to vector<16x1xf32>
    %cst_76 = arith.constant 3.200000e+01 : f32
    %254 = vector.broadcast %cst_76 : f32 to vector<16x1xf32>
    %255 = arith.divf %253, %254 : vector<16x1xf32>
    %cst_77 = arith.constant 9.99999974E-6 : f32
    %256 = vector.broadcast %cst_77 : f32 to vector<16x1xf32>
    %257 = arith.addf %255, %256 : vector<16x1xf32>
    %258 = math.rsqrt %257 : vector<16x1xf32>
    %259 = vector.broadcast %258 : vector<16x1xf32> to vector<16x32xf32>
    %260 = arith.mulf %250, %259 : vector<16x32xf32>
    %261 = vector.broadcast %243 : vector<1x32xf32> to vector<16x32xf32>
    %262 = arith.mulf %260, %261 : vector<16x32xf32>
    %263 = vector.broadcast %244 : vector<1x32xf32> to vector<16x32xf32>
    %264 = arith.addf %262, %263 : vector<16x32xf32>
    %265 = arith.truncf %264 : vector<16x32xf32> to vector<16x32xbf16>
    %c0_78 = arith.constant 0 : index
    %c0_79 = arith.constant 0 : index
    %c0_80 = arith.constant 0 : index
    %266 = vector.load %arg8[%c0_78, %c0_79, %c0_80] : memref<1x32x2048xbf16, #tpu.memory_space<vmem>>, vector<1x32x2048xbf16>
    %267 = vector.shape_cast %266 : vector<1x32x2048xbf16> to vector<32x2048xbf16>
    %cst_81 = arith.constant dense<0.000000e+00> : vector<16x2048xf32>
    %268 = tpu.matmul %265, %267, %cst_81 {dimension_numbers = #tpu.dot_dimension_numbers<[1], [0], [0], [1], [0, 0, 1, 1], [], []>} : vector<16x32xbf16>, vector<32x2048xbf16>, vector<16x2048xf32> -> vector<16x2048xf32>
    %c0_82 = arith.constant 0 : index
    %c0_83 = arith.constant 0 : index
    %c0_84 = arith.constant 0 : index
    %269 = vector.load %arg9[%c0_82, %c0_83, %c0_84] : memref<1x1x2048xf32, #tpu.memory_space<vmem>>, vector<1x1x2048xf32>
    %270 = vector.shape_cast %269 : vector<1x1x2048xf32> to vector<1x2048xf32>
    %271 = vector.broadcast %270 : vector<1x2048xf32> to vector<16x2048xf32>
    %272 = arith.addf %268, %271 : vector<16x2048xf32>
    %cst_85 = arith.constant 0.000000e+00 : f32
    %273 = vector.broadcast %cst_85 : f32 to vector<16x2048xf32>
    %274 = arith.maximumf %272, %273 : vector<16x2048xf32>
    %275 = arith.truncf %274 : vector<16x2048xf32> to vector<16x2048xbf16>
    %c0_86 = arith.constant 0 : index
    %c0_87 = arith.constant 0 : index
    %c0_88 = arith.constant 0 : index
    %276 = vector.load %arg10[%c0_86, %c0_87, %c0_88] : memref<1x2048x32xbf16, #tpu.memory_space<vmem>>, vector<1x2048x32xbf16>
    %277 = vector.shape_cast %276 : vector<1x2048x32xbf16> to vector<2048x32xbf16>
    %cst_89 = arith.constant dense<0.000000e+00> : vector<16x32xf32>
    %278 = tpu.matmul %275, %277, %cst_89 {dimension_numbers = #tpu.dot_dimension_numbers<[1], [0], [0], [1], [0, 0, 1, 1], [], []>} : vector<16x2048xbf16>, vector<2048x32xbf16>, vector<16x32xf32> -> vector<16x32xf32>
    %279 = vector.extract_strided_slice %14 {offsets = [6, 0], sizes = [1, 32], strides = [1, 1]} : vector<7x32xf32> to vector<1x32xf32>
    %280 = vector.broadcast %279 : vector<1x32xf32> to vector<16x32xf32>
    %281 = arith.addf %278, %280 : vector<16x32xf32>
    %282 = arith.addf %264, %281 : vector<16x32xf32>
    %283 = vector.extract_strided_slice %14 {offsets = [4, 0], sizes = [1, 32], strides = [1, 1]} : vector<7x32xf32> to vector<1x32xf32>
    %284 = vector.extract_strided_slice %14 {offsets = [5, 0], sizes = [1, 32], strides = [1, 1]} : vector<7x32xf32> to vector<1x32xf32>
    %cst_90 = arith.constant dense<0.000000e+00> : vector<16xf32>
    %285 = vector.multi_reduction <add>, %282, %cst_90 [1] : vector<16x32xf32> to vector<16xf32>
    %286 = vector.shape_cast %285 : vector<16xf32> to vector<16x1xf32>
    %cst_91 = arith.constant 3.200000e+01 : f32
    %287 = vector.broadcast %cst_91 : f32 to vector<16x1xf32>
    %288 = arith.divf %286, %287 : vector<16x1xf32>
    %289 = vector.broadcast %288 : vector<16x1xf32> to vector<16x32xf32>
    %290 = arith.subf %282, %289 : vector<16x32xf32>
    %291 = arith.mulf %290, %290 : vector<16x32xf32>
    %cst_92 = arith.constant dense<0.000000e+00> : vector<16xf32>
    %292 = vector.multi_reduction <add>, %291, %cst_92 [1] : vector<16x32xf32> to vector<16xf32>
    %293 = vector.shape_cast %292 : vector<16xf32> to vector<16x1xf32>
    %cst_93 = arith.constant 3.200000e+01 : f32
    %294 = vector.broadcast %cst_93 : f32 to vector<16x1xf32>
    %295 = arith.divf %293, %294 : vector<16x1xf32>
    %cst_94 = arith.constant 9.99999974E-6 : f32
    %296 = vector.broadcast %cst_94 : f32 to vector<16x1xf32>
    %297 = arith.addf %295, %296 : vector<16x1xf32>
    %298 = math.rsqrt %297 : vector<16x1xf32>
    %299 = vector.broadcast %298 : vector<16x1xf32> to vector<16x32xf32>
    %300 = arith.mulf %290, %299 : vector<16x32xf32>
    %301 = vector.broadcast %283 : vector<1x32xf32> to vector<16x32xf32>
    %302 = arith.mulf %300, %301 : vector<16x32xf32>
    %303 = vector.broadcast %284 : vector<1x32xf32> to vector<16x32xf32>
    %304 = arith.addf %302, %303 : vector<16x32xf32>
    %c0_95 = arith.constant 0 : index
    %c0_96 = arith.constant 0 : index
    %305 = vector.load %arg14[%c0_95, %c0_96] : memref<16x32xf32, #tpu.memory_space<vmem>>, vector<16x32xf32>
    tpu.vector_store %arg14[%c0_95, %c0_96], %304 {strides = array<i32>} : memref<16x32xf32, #tpu.memory_space<vmem>>, vector<16x32xf32>,
    %c1_i32 = arith.constant 1 : i32
    %306 = arith.cmpi eq, %arg0, %c1_i32 : i32
    %307 = arith.extui %306 : i1 to i32
    %c0_i32_97 = arith.constant 0 : i32
    %308 = arith.cmpi ne, %307, %c0_i32_97 : i32
    scf.if %308 {
      %c0_98 = arith.constant 0 : index
      %c0_99 = arith.constant 0 : index
      %309 = vector.load %arg12[%c0_98, %c0_99] : memref<2x32xf32, #tpu.memory_space<vmem>>, vector<2x32xf32>
      %310 = vector.extract_strided_slice %309 {offsets = [0, 0], sizes = [1, 32], strides = [1, 1]} : vector<2x32xf32> to vector<1x32xf32>
      %311 = vector.extract_strided_slice %309 {offsets = [1, 0], sizes = [1, 32], strides = [1, 1]} : vector<2x32xf32> to vector<1x32xf32>
      %cst_100 = arith.constant dense<0.000000e+00> : vector<16xf32>
      %312 = vector.multi_reduction <add>, %304, %cst_100 [1] : vector<16x32xf32> to vector<16xf32>
      %313 = vector.shape_cast %312 : vector<16xf32> to vector<16x1xf32>
      %cst_101 = arith.constant 3.200000e+01 : f32
      %314 = vector.broadcast %cst_101 : f32 to vector<16x1xf32>
      %315 = arith.divf %313, %314 : vector<16x1xf32>
      %316 = vector.broadcast %315 : vector<16x1xf32> to vector<16x32xf32>
      %317 = arith.subf %304, %316 : vector<16x32xf32>
      %318 = arith.mulf %317, %317 : vector<16x32xf32>
      %cst_102 = arith.constant dense<0.000000e+00> : vector<16xf32>
      %319 = vector.multi_reduction <add>, %318, %cst_102 [1] : vector<16x32xf32> to vector<16xf32>
      %320 = vector.shape_cast %319 : vector<16xf32> to vector<16x1xf32>
      %cst_103 = arith.constant 3.200000e+01 : f32
      %321 = vector.broadcast %cst_103 : f32 to vector<16x1xf32>
      %322 = arith.divf %320, %321 : vector<16x1xf32>
      %cst_104 = arith.constant 9.99999974E-6 : f32
      %323 = vector.broadcast %cst_104 : f32 to vector<16x1xf32>
      %324 = arith.addf %322, %323 : vector<16x1xf32>
      %325 = math.rsqrt %324 : vector<16x1xf32>
      %326 = vector.broadcast %325 : vector<16x1xf32> to vector<16x32xf32>
      %327 = arith.mulf %317, %326 : vector<16x32xf32>
      %328 = vector.broadcast %310 : vector<1x32xf32> to vector<16x32xf32>
      %329 = arith.mulf %327, %328 : vector<16x32xf32>
      %330 = vector.broadcast %311 : vector<1x32xf32> to vector<16x32xf32>
      %331 = arith.addf %329, %330 : vector<16x32xf32>
      %c0_105 = arith.constant 0 : index
      %c0_106 = arith.constant 0 : index
      %332 = vector.load %arg13[%c0_105, %c0_106] : memref<16x32xf32, #tpu.memory_space<vmem>>, vector<16x32xf32>
      tpu.vector_store %arg13[%c0_105, %c0_106], %331 {strides = array<i32>} : memref<16x32xf32, #tpu.memory_space<vmem>>, vector<16x32xf32>,
    } else {
    }
    return
  }
  func.func @transform_0(%arg0: i32) -> (i32, i32) {
    %c0_i32 = arith.constant 0 : i32
    %c0_i32_0 = arith.constant 0 : i32
    %c0_i32_1 = arith.constant 0 : i32
    return %c0_i32, %c0_i32_0 : i32, i32
  }
  func.func @transform_1(%arg0: i32) -> (i32, i32) {
    %c0_i32 = arith.constant 0 : i32
    %c0_i32_0 = arith.constant 0 : i32
    %c0_i32_1 = arith.constant 0 : i32
    return %c0_i32, %c0_i32_0 : i32, i32
  }
  func.func @transform_2(%arg0: i32) -> (i32, i32, i32) {
    %c0_i32 = arith.constant 0 : i32
    %c0_i32_0 = arith.constant 0 : i32
    %c0_i32_1 = arith.constant 0 : i32
    %c0_i32_2 = arith.constant 0 : i32
    return %c0_i32, %c0_i32_0, %c0_i32_1 : i32, i32, i32
  }
  func.func @transform_3(%arg0: i32) -> (i32, i32, i32) {
    %c0_i32 = arith.constant 0 : i32
    %c0_i32_0 = arith.constant 0 : i32
    %c0_i32_1 = arith.constant 0 : i32
    return %arg0, %c0_i32, %c0_i32_0 : i32, i32, i32
  }
  func.func @transform_4(%arg0: i32) -> (i32, i32, i32) {
    %c0_i32 = arith.constant 0 : i32
    %c0_i32_0 = arith.constant 0 : i32
    %c0_i32_1 = arith.constant 0 : i32
    return %arg0, %c0_i32, %c0_i32_0 : i32, i32, i32
  }
  func.func @transform_5(%arg0: i32) -> (i32, i32, i32) {
    %c0_i32 = arith.constant 0 : i32
    %c0_i32_0 = arith.constant 0 : i32
    %c0_i32_1 = arith.constant 0 : i32
    return %arg0, %c0_i32, %c0_i32_0 : i32, i32, i32
  }
  func.func @transform_6(%arg0: i32) -> (i32, i32, i32) {
    %c0_i32 = arith.constant 0 : i32
    %c0_i32_0 = arith.constant 0 : i32
    %c0_i32_1 = arith.constant 0 : i32
    return %arg0, %c0_i32, %c0_i32_0 : i32, i32, i32
  }
  func.func @transform_7(%arg0: i32) -> (i32, i32, i32) {
    %c0_i32 = arith.constant 0 : i32
    %c0_i32_0 = arith.constant 0 : i32
    %c0_i32_1 = arith.constant 0 : i32
    return %arg0, %c0_i32, %c0_i32_0 : i32, i32, i32
  }
  func.func @transform_8(%arg0: i32) -> (i32, i32, i32) {
    %c0_i32 = arith.constant 0 : i32
    %c0_i32_0 = arith.constant 0 : i32
    %c0_i32_1 = arith.constant 0 : i32
    return %arg0, %c0_i32, %c0_i32_0 : i32, i32, i32
  }
  func.func @transform_9(%arg0: i32) -> (i32, i32, i32) {
    %c0_i32 = arith.constant 0 : i32
    %c0_i32_0 = arith.constant 0 : i32
    %c0_i32_1 = arith.constant 0 : i32
    return %arg0, %c0_i32, %c0_i32_0 : i32, i32, i32
  }
  func.func @transform_10(%arg0: i32) -> (i32, i32, i32) {
    %c0_i32 = arith.constant 0 : i32
    %c0_i32_0 = arith.constant 0 : i32
    %c0_i32_1 = arith.constant 0 : i32
    return %arg0, %c0_i32, %c0_i32_0 : i32, i32, i32
  }
  func.func @transform_11(%arg0: i32) -> (i32, i32) {
    %c0_i32 = arith.constant 0 : i32
    %c0_i32_0 = arith.constant 0 : i32
    %c0_i32_1 = arith.constant 0 : i32
    return %c0_i32, %c0_i32_0 : i32, i32
  }
  func.func @transform_12(%arg0: i32) -> (i32, i32) {
    %c0_i32 = arith.constant 0 : i32
    %c0_i32_0 = arith.constant 0 : i32
    %c0_i32_1 = arith.constant 0 : i32
    return %c0_i32, %c0_i32_0 : i32, i32
  }
}

</mosaic_0001>

<bundles_post_ra>
// kernel: dual_branch_forward.6
= control target key start
LH: loop header
LB: loop body
LE: loop exit
PB: predicated region body
PF: predicated region fallthrough
CT: control target
= control target key end

     0   :  { %s4133_s27 = smov 0   ;;  %s4622_s0 = inlined_call_operand.vmem [shape: f32[16,32], index: 0, kind: input, shape index: {}]   ;;  %s4623_s1 = inlined_call_operand.vmem [shape: bf16[2,32,128], index: 1, kind: input, shape index: {}]   ;;  %s4624_s2 = inlined_call_operand.vmem [shape: f32[2,1,128], index: 2, kind: input, shape index: {}]   ;;  %s4625_s3 = inlined_call_operand.vmem [shape: bf16[2,32,2048], index: 3, kind: input, shape index: {}]   ;;  %s4626_s4 = inlined_call_operand.vmem [shape: f32[2,1,2048], index: 4, kind: input, shape index: {}]   ;;  %s4627_s5 = inlined_call_operand.vmem [shape: bf16[2,2048,32], index: 5, kind: input, shape index: {}]   ;;  %s4628_s6 = inlined_call_operand.vmem [shape: f32[2,5,32], index: 6, kind: input, shape index: {}]   ;;  %s4629_s7 = inlined_call_operand.vmem [shape: f32[2,32], index: 7, kind: input, shape index: {}]   ;;  %s4630_s8 = inlined_call_operand.vmem [shape: f32[16,32], index: 8, kind: output, shape index: {}]  }
   0x1 LB: > { %s4139_s28 = sadd.s32 4294967295, %s4076_s27   ;;  %p3433_p0 = scmp.ge.s32.totalorder %s4076_s27, 1  ;;  %s4076_s27 = sphi %s4133_s27, %s18_s27  }
   0x2   : > { %p303_p1 = scmp.lt.s32.totalorder %s4076_s27, 3 }
   0x4   : > { %p304_p2 = pnand %p3433_p0, %p303_p1 }
   0x5   : > { %p353_p3 = scmp.lt.s32.totalorder (!%p304_p2), %s4139_s28, 1  ;;  %p3442_p4 = scmp.ne.s32.totalorder (!%p304_p2), %s4139_s28, 0 }
   0x6   : > { %307 = sbr.rel (%p304_p2) target bundleno = 3022 (0xbce), region = 52 }
   0xb   : > { %s4145_s29 = scalar_select %p353_p3, %s4139_s28, 1 }
   0xd   : > { %s3631_s30 = sshll.u32 %s4145_s29, 4  ;;  %s360_s11 = scalar_lea.vmem %s4624_s2, %s4145_s29 }
   0xe   : > { %s357_s14 = scalar_lea.vmem %s4623_s1, %s3631_s30  ;;  %s3632_s15 = sshll.u32 %s4145_s29, 8 }
   0xf   : > { %s4159_s18 = scalar_lea.vmem %s4625_s3, %s3632_s15  ;;  %s4164_s21 = scalar_lea.vmem %s4626_s4, %s3631_s30 }
  0x10   : > { %s3633_s22 = sshll.u32 %s4145_s29, 10  ;;  %s3441_s23 = sshll.u32 %s4145_s29, 3 }
  0x11   : > { %s4171_s26 = scalar_lea.vmem %s4627_s5, %s3633_s22  ;;  %s4176_s12 = scalar_lea.vmem %s4628_s6, %s3441_s23 }
  0x12   : > { %383 = sbr.rel (%p3442_p4) target bundleno = 25 (0x19), region = 56 }
  0x17   : > { %v384_v0 = vld [vmem:[%s4622_s0] sm:$0xff]  ;;  %vm386_vm0 = vcmask 261120   ;;  %v385_v1 = vld [vmem:[%s4622_s0 + $0x8] sm:$0xff] }
  0x18   : > { %387 = vst.msk [vmem:[#allocation2] sm:$0xff] %vm386_vm0, %v384_v0  ;;  %388 = vst.msk [vmem:[#allocation2 + $0x8] sm:$0xff] %vm386_vm0, %v385_v1 }
  0x19 PF: > { %v4185_v2 = vld [vmem:[%s357_s14 + $0x8] sm:$0xff]   ;;  %v4078_v3 = vmov 0.0   ;;  %v4190_v4 = vld [vmem:[%s357_s14] sm:$0xff]   ;;  %vm4079_vm1 = vmmov 0   ;;  %vm416_vm2 = vcmask 261120   ;;  %s4080_s19 = smov 64  }
  0x1a   : > { %3832 = vmatprep.subr.bf16.mxu0 %v4078_v3  ;;  %3840 = vmatprep.subr.mxu1 %v4078_v3  ;;  %v4213_v8 = vld [vmem:[%s360_s11] ss:$0 sm:$0xff]  ;;  %s4081_s20 = smov 96   ;;  %s4082_s22 = smov 80   ;;  %vm464_vm3 = vcmask 130048   ;;  %vm540_vm4 = vcmask 64512  }
  0x1b   : > { %3833 = vmatpush3.bf16.msra.mxu0 %v4185_v2  ;;  %3836 = vmatprep.mubr.msk.bf16.mxu0 %vm4079_vm1, %v4078_v3  ;;  %s4083_s23 = smov 112   ;;  %s4084_s29 = smov 48  }
  0x1c   : > { %3834 = vmatprep.subr.bf16.mxu0 %v4078_v3  ;;  %3842 = vmatprep.mubr.msk.f32.mxu1 %vm4079_vm1, %v4078_v3  ;;  %s4085_s11 = smov 32   ;;  %s4086_s24 = smov 16  }
  0x1d   : > { %p3628_p5 = scmp.ne.s32.totalorder %s4139_s28, 1 }
  0x1f   : > { %v4194_v5 = vld [vmem:[#allocation2] sm:$0xff]  ;;  %v4196_v6 = vld [vmem:[#allocation2 + $0x8] sm:$0xff]  ;;  %3835 = vmatpush3.bf16.msra.mxu0 %v4190_v4 }
  0x20   : > { %v397_v7 = vpack.c.bf16 %v4196_v6, %v4194_v5  ;;  %3855 = vmatprep.subr.mxu0 %v4078_v3 }
  0x22   : > { %3837 = vmatmul.mubr.msk.bf16.vlgmr.msra.gmra.mxu0 %vm416_vm2, %v397_v7 }
  0x23   : > { %3857 = vmatprep.mubr.msk.f32.mxu0 %vm4079_vm1, %v4078_v3 }
  0xe2   : > { %v454_v9 = vpop.f32.mrf.mxu0 }
  0xe3   : > { %v455_v10 = vadd.f32 %v4213_v8, %v454_v9 }
  0xe4   : > { %v3838_v11 = vpop.f32.mrf.mxu0 }
  0xe5   : > { %550 = vrot.lane.b32.xlu1 %v455_v10, %s4080_s19  ;;  %462 = vrot.lane.b32.xlu0 %v455_v10, %s4081_s20 }
  0xe6   : > { %v457_v12 = vpop.f32.mrf.mxu0 }
  0xe7   : > { %v4218_v14 = vadd.f32 %v4213_v8, %v457_v12 }
  0xe8   : > { %v3839_v13 = vpop.f32.mrf.mxu0 }
  0xe9   : > { %630 = vrot.lane.b32.xlu1 %v455_v10, %s4082_s22 }
  0xed   : > { %628 = vrot.lane.b32.xlu1 %v455_v10, %s4083_s23 }
  0xf1   : > { %800 = vrot.lane.b32.xlu1 %v4218_v14, %s4081_s20 }
  0xf5   : > { %966 = vrot.lane.b32.xlu1 %v4218_v14, %s4082_s22 }
  0xf9   : > { %964 = vrot.lane.b32.xlu1 %v4218_v14, %s4083_s23 }
 0x157   : > { %v463_v15 = vpop.permute.xlu0 %462  ;;  %v551_v16 = vpop.permute.xlu1 %550 }
 0x158   : > { %3841 = vmatpush3.xpose.msk.msra.mxu1 %vm464_vm3, %v463_v15 }
 0x159   : > { %3845 = vmatprep.subr.mxu1 %v4078_v3 }
 0x15b   : > { %3843 = vmatmul.mubr.msk.f32.vlgmr.msra.gmra.mxu1 %vm464_vm3, %v455_v10  ;;  %v631_v25 = vpop.permute.xlu1 %630 }
 0x15c   : > { %3846 = vmatpush3.msra.mxu1 %v551_v16  ;;  %3847 = vmatprep.mubr.msk.f32.mxu1 %vm4079_vm1, %v4078_v3 }
 0x15d   : > { %3850 = vmatprep.subr.mxu1 %v4078_v3 }
 0x15f   : > { %v629_v26 = vpop.permute.xlu1 %628 }
 0x163   : > { %v801_v28 = vpop.permute.xlu1 %800 }
 0x167   : > { %v967_v29 = vpop.permute.xlu1 %966 }
 0x16b   : > { %v965_v30 = vpop.permute.xlu1 %964 }
 0x21b   : > { %v535_v17 = vpop.f32.mrf.mxu1 }
 0x21c   : > { %v539_v18 = vmul.f32 0.25, %v535_v17 }
 0x21d   : > { %v3844_v19 = vpop.f32.mrf.mxu1 }
 0x21e   : > { %v541_v20 = vsel %vm540_vm4, %v539_v18, -inf }
 0x21f   : > { %542 = vmax.xlane.f32.xlu0 %v541_v20 }
 0x235   : > { %716 = vrot.lane.b32.xlu0 %v455_v10, %s4084_s29 }
 0x2a8   : > { %v543_v21 = vpop.xlane.xlu0 %542 }
 0x2a9   : > { %v544_v22 = vsub.f32 %v539_v18, %v543_v21 }
 0x2ab   : > { %v545_v23 = vmul.f32 1.442695, %v544_v22 }
 0x2ac   : > { %v717_v24 = vpop.permute.xlu0 %716 }
 0x2ad   : > { %4041 = vpow2.f32 %v545_v23  ;;  %3856 = vmatpush3.msra.mxu0 %v717_v24 }
 0x2ae   : > { %3865 = vmatprep.subr.mxu0 %v4078_v3 }
 0x2ba   : > { %v4042_v27 = vpop.eup %4041 }
 0x2bb   : > { %3848 = vmatmul.mubr.msk.f32.vlgmr.msra.gmra.mxu1 %vm540_vm4, %v4042_v27  ;;  %v547_v59 = vsel %vm540_vm4, %v4042_v27, 0.0 }
 0x2bc   : > { %3851 = vmatpush3.xpose.msk.msra.mxu1 %vm464_vm3, %v631_v25  ;;  %3852 = vmatprep.mubr.msk.f32.mxu1 %vm4079_vm1, %v4078_v3 }
 0x2bd   : > { %3860 = vmatprep.subr.mxu1 %v4078_v3 }
 0x2bf   : > { %3853 = vmatmul.mubr.msk.f32.vlgmr.msra.gmra.mxu1 %vm464_vm3, %v629_v26 }
 0x2c0   : > { %3861 = vmatpush3.xpose.msk.msra.mxu1 %vm464_vm3, %v801_v28  ;;  %3862 = vmatprep.mubr.msk.f32.mxu1 %vm4079_vm1, %v4078_v3 }
 0x2c1   : > { %3870 = vmatprep.subr.mxu1 %v4078_v3 }
 0x2c3   : > { %3863 = vmatmul.mubr.msk.f32.vlgmr.msra.gmra.mxu1 %vm464_vm3, %v4218_v14 }
 0x2c4   : > { %3871 = vmatpush3.xpose.msk.msra.mxu1 %vm464_vm3, %v967_v29  ;;  %3872 = vmatprep.mubr.msk.f32.mxu1 %vm4079_vm1, %v4078_v3 }
 0x2c5   : > { %3880 = vmatprep.subr.bf16.mxu1 %v4078_v3 }
 0x2c7   : > { %3873 = vmatmul.mubr.msk.f32.vlgmr.msra.gmra.mxu1 %vm464_vm3, %v965_v30 }
 0x2c8   : > { %3884 = vmatprep.mubr.msk.bf16.mxu1 %vm4079_vm1, %v4078_v3 }
 0x37b   : > { %v4251_v31 = vpop.f32.mrf.mxu1 }
 0x37d   : > { %v3849_v32 = vpop.f32.mrf.mxu1 }
 0x37f   : > { %v702_v33 = vpop.f32.mrf.mxu1 }
 0x380   : > { %v706_v34 = vmul.f32 0.25, %v702_v33 }
 0x381   : > { %v3854_v35 = vpop.f32.mrf.mxu1 }
 0x382   : > { %v707_v36 = vsel %vm540_vm4, %v706_v34, -inf }
 0x383   : > { %708 = vmax.xlane.f32.xlu1 %v707_v36  ;;  %v872_v37 = vpop.f32.mrf.mxu1 }
 0x384   : > { %v876_v38 = vmul.f32 0.25, %v872_v37 }
 0x385   : > { %v3864_v39 = vpop.f32.mrf.mxu1 }
 0x386   : > { %v877_v40 = vsel %vm540_vm4, %v876_v38, -inf }
 0x387   : > { %878 = vmax.xlane.f32.xlu0 %v877_v40  ;;  %v1038_v41 = vpop.f32.mrf.mxu1 }
 0x388   : > { %v1042_v42 = vmul.f32 0.25, %v1038_v41 }
 0x389   : > { %v3874_v43 = vpop.f32.mrf.mxu1 }
 0x38a   : > { %v1043_v44 = vsel %vm540_vm4, %v1042_v42, -inf }
 0x38b   : > { %1044 = vmax.xlane.f32.xlu0 %v1043_v44 }
 0x394   : > { %886 = vrot.lane.b32.xlu1 %v4218_v14, %s4080_s19 }
 0x3a1   : > { %1052 = vrot.lane.b32.xlu0 %v4218_v14, %s4084_s29 }
 0x40c   : > { %v709_v45 = vpop.xlane.xlu1 %708 }
 0x40d   : > { %v710_v46 = vsub.f32 %v706_v34, %v709_v45 }
 0x40f   : > { %v711_v47 = vmul.f32 1.442695, %v710_v46 }
 0x410   : > { %v879_v48 = vpop.xlane.xlu0 %878  ;;  %v887_v55 = vpop.permute.xlu1 %886 }
 0x411   : > { %4043 = vpow2.f32 %v711_v47  ;;  %v880_v49 = vsub.f32 %v876_v38, %v879_v48  ;;  %v1247_v47 = vld [vmem:[%s4159_s18 + $0x80] sm:$0xff] }
 0x412   : > { %v1255_v48 = vld [vmem:[%s4159_s18 + $0xc0] sm:$0xff] }
 0x413   : > { %v881_v50 = vmul.f32 1.442695, %v880_v49  ;;  %v1248_v49 = vld [vmem:[%s4159_s18 + $0x88] sm:$0xff] }
 0x414   : > { %v1045_v51 = vpop.xlane.xlu0 %1044 }
 0x415   : > { %4045 = vpow2.f32 %v881_v50  ;;  %v1046_v52 = vsub.f32 %v1042_v42, %v1045_v51  ;;  %v3477_v50 = vcombine.high %v1247_v47, %v1255_v48  ;;  %v1256_v51 = vld [vmem:[%s4159_s18 + $0xc8] sm:$0xff] }
 0x417   : > { %v1047_v53 = vmul.f32 1.442695, %v1046_v52  ;;  %v3476_v52 = vcombine.low %v1247_v47, %v1255_v48  ;;  %v1244_v47 = vld [vmem:[%s4159_s18 + $0x68] sm:$0xff] }
 0x418   : > { %v1053_v58 = vpop.permute.xlu0 %1052 }
 0x419   : > { %4047 = vpow2.f32 %v1047_v53  ;;  %v3478_v53 = vcombine.low %v1248_v49, %v1256_v51 }
 0x41e   : > { %v4044_v54 = vpop.eup %4043 }
 0x41f   : > { %3858 = vmatmul.mubr.msk.f32.vlgmr.msra.gmra.mxu0 %vm540_vm4, %v4044_v54  ;;  %v713_v56 = vsel %vm540_vm4, %v4044_v54, 0.0  ;;  %v3479_v54 = vcombine.high %v1248_v49, %v1256_v51 }
 0x420   : > { %3866 = vmatpush3.msra.mxu0 %v887_v55  ;;  %714 = vadd.xlane.f32.xlu0 %v713_v56  ;;  %v1231_v55 = vld [vmem:[%s4159_s18] sm:$0xff] }
 0x421   : > { %3867 = vmatprep.mubr.msk.f32.mxu0 %vm4079_vm1, %v4078_v3  ;;  %3875 = vmatprep.subr.mxu0 %v4078_v3  ;;  %v1239_v56 = vld [vmem:[%s4159_s18 + $0x40] sm:$0xff] }
 0x422   : > { %v4046_v57 = vpop.eup %4045 }
 0x423   : > { %3868 = vmatmul.mubr.msk.f32.vlgmr.msra.gmra.mxu0 %vm540_vm4, %v4046_v57  ;;  %v883_v62 = vsel %vm540_vm4, %v4046_v57, 0.0  ;;  %v1232_v57 = vld [vmem:[%s4159_s18 + $0x8] sm:$0xff] }
 0x424   : > { %3876 = vmatpush3.msra.mxu0 %v1053_v58  ;;  %548 = vadd.xlane.f32.xlu0 %v547_v59  ;;  %v3461_v58 = vcombine.high %v1231_v55, %v1239_v56  ;;  %v1240_v59 = vld [vmem:[%s4159_s18 + $0x48] sm:$0xff] }
 0x425   : > { %3877 = vmatprep.mubr.msk.f32.mxu0 %vm4079_vm1, %v4078_v3  ;;  %1522 = vmatprep.subr.bf16.mxu0 %v3477_v50 }
 0x426   : > { %v4048_v60 = vpop.eup %4047 }
 0x427   : > { %3878 = vmatmul.mubr.msk.f32.vlgmr.msra.gmra.mxu0 %vm540_vm4, %v4048_v60  ;;  %v1049_v61 = vsel %vm540_vm4, %v4048_v60, 0.0  ;;  %v3460_v60 = vcombine.low %v1231_v55, %v1239_v56  ;;  %v1262_v55 = vld [vmem:[%s4159_s18 + $0xf8] sm:$0xff] }
 0x428   : > { %1050 = vadd.xlane.f32.xlu1 %v1049_v61  ;;  %884 = vadd.xlane.f32.xlu0 %v883_v62  ;;  %v3462_v61 = vcombine.low %v1232_v57, %v1240_v59  ;;  %v3463_v62 = vcombine.high %v1232_v57, %v1240_v59 }
 0x429   : > { %1523 = vmatpush1.bf16.msra.mxu0 %v3476_v52  ;;  %v1253_v52 = vld [vmem:[%s4159_s18 + $0xb0] sm:$0xff] }
 0x42a   : > { %1524 = vmatprep.subr.bf16.mxu0 %v3461_v58 }
 0x42d   : > { %1525 = vmatpush1.bf16.msra.mxu0 %v3460_v60  ;;  %v1237_v60 = vld [vmem:[%s4159_s18 + $0x30] sm:$0xff] }
 0x43e   : > { %1138 = vrot.lane.b32.xlu0 %v4185_v2, %s4085_s11 }
 0x442   : > { %1136 = vrot.lane.b32.xlu0 %v4190_v4, %s4085_s11 }
 0x4a9   : > { %v715_v63 = vpop.xlane.xlu0 %714 }
 0x4ad   : > { %v549_v0 = vpop.xlane.xlu0 %548 }
 0x4b1   : > { %v885_v1 = vpop.xlane.xlu0 %884  ;;  %v1051_v7 = vpop.xlane.xlu1 %1050 }
 0x4b2   : > { %4049 = vrcp.f32 %v885_v1  ;;  %v1250_v1 = vld [vmem:[%s4159_s18 + $0x98] sm:$0xff] }
 0x4b3   : > { %4051 = vrcp.f32 %v715_v63  ;;  %v1249_v63 = vld [vmem:[%s4159_s18 + $0x90] sm:$0xff] }
 0x4b4   : > { %4053 = vrcp.f32 %v1051_v7  ;;  %v4087_v7 = vmov 0  }
 0x4b5   : > { %v1139_v9 = vpop.permute.xlu0 %1138  ;;  %4055 = vrcp.f32 %v549_v0  ;;  %v1257_v0 = vld [vmem:[%s4159_s18 + $0xd0] sm:$0xff]  ;;  %1542 = vmatprep.mubr.bf16.mxu0 %v4087_v7 }
 0x4b6   : > { %3881 = vmatpush3.bf16.msra.mxu1 %v1139_v9  ;;  %v3481_v9 = vcombine.high %v1249_v63, %v1257_v0 }
 0x4b7   : > { %3882 = vmatprep.subr.bf16.mxu1 %v4078_v3 }
 0x4b8   : > { %1608 = vmatprep.subr.bf16.mxu0 %v3481_v9 }
 0x4b9   : > { %v1137_v12 = vpop.permute.xlu0 %1136 }
 0x4ba   : > { %3883 = vmatpush3.bf16.msra.mxu1 %v1137_v12 }
 0x4bb   : > { %1565 = vmatprep.subr.bf16.mxu1 %v3479_v54  ;;  %v1254_v54 = vld [vmem:[%s4159_s18 + $0xb8] sm:$0xff] }
 0x4bc   : > { %v3491_v59 = vcombine.high %v1254_v54, %v1262_v55 }
 0x4bf   : > { %v4050_v13 = vpop.eup %4049 }
 0x4c0   : > { %v4052_v4 = vpop.eup %4051 }
 0x4c1   : > { %v4054_v16 = vpop.eup %4053 }
 0x4c2   : > { %v4056_v3 = vpop.eup %4055 }
 0x4c3   : > { %v627_v23 = vmul.f32 %v4056_v3, %v4251_v31 }
 0x4df   : > { %v788_v10 = vpop.f32.mrf.mxu0 }
 0x4e0   : > { %v793_v18 = vmul.f32 %v4052_v4, %v788_v10  ;;  %v1258_v10 = vld [vmem:[%s4159_s18 + $0xd8] sm:$0xff] }
 0x4e1   : > { %v3859_v11 = vpop.f32.mrf.mxu0  ;;  %v3482_v12 = vcombine.low %v1250_v1, %v1258_v10 }
 0x4e2   : > { %v3480_v11 = vcombine.low %v1249_v63, %v1257_v0  ;;  %v1246_v63 = vld [vmem:[%s4159_s18 + $0x78] sm:$0xff] }
 0x4e3   : > { %v958_v2 = vpop.f32.mrf.mxu0 }
 0x4e4   : > { %v963_v14 = vmul.f32 %v4050_v13, %v958_v2  ;;  %v3483_v13 = vcombine.high %v1250_v1, %v1258_v10  ;;  %v3490_v1 = vcombine.low %v1254_v54, %v1262_v55 }
 0x4e5   : > { %v3869_v15 = vpop.f32.mrf.mxu0 }
 0x4e7   : > { %v1124_v17 = vpop.f32.mrf.mxu0 }
 0x4e8   : > { %v1129_v19 = vmul.f32 %v4054_v16, %v1124_v17  ;;  %v1218_v17 = vlaneseq }
 0x4e9   : > { %v3879_v20 = vpop.f32.mrf.mxu0 }
 0x4ea   : > { %v3906_v21 = vpack.i.bf16 %v1129_v19, %v793_v18  ;;  %v4303_v19 = vshrl.u32 %v1218_v17, 7  ;;  %v3920_v17 = vld [vmem:[%s4171_s26 + $0xb0] sm:$0xff]  }
 0x4ec   : > { %3907 = vrot.lane.b32.xlu1 %v3906_v21, %s4086_s24  ;;  %v4306_v20 = vsub.s32 0, %v4303_v19  ;;  %v396_v21 = vld [vmem:[%s4176_s12] sm:$0x1f] }
 0x4f0   : > { %1142 = vrot.lane.b32.xlu1 %v4213_v8, %s4085_s11 }
 0x55e   : > { %v3908_v22 = vpop.permute.xlu1 %3907 }
 0x55f   : > { %v3910_v24 = vunpack.i.h.bf16 %v3908_v22  ;;  %v3909_v25 = vunpack.i.l.bf16 %v3908_v22  ;;  %v1221_v22 = vrot.slane %v396_v21, %v4306_v20 }
 0x561   : > { %v1134_v26 = vsel %vm464_vm3, %v963_v14, %v3910_v24  ;;  %v798_v27 = vsel %vm464_vm3, %v627_v23, %v3909_v25  ;;  %v4311_v23 = vsub.s32 1, %v4303_v19 }
 0x562   : > { %v1135_v28 = vpack.c.bf16 %v1134_v26, %v798_v27  ;;  %v1143_v29 = vpop.permute.xlu1 %1142 }
 0x563   : > { %v1227_v26 = vrot.slane %v396_v21, %v4311_v23  ;;  %v3922_v21 = vld [vmem:[%s4171_s26 + $0xe8] sm:$0xff]  }
 0x564   : > { %3885 = vmatmul.mubr.msk.bf16.vlgmr.msra.gmra.mxu1 %vm416_vm2, %v1135_v28 }
 0x565   : > { %1566 = vmatpush1.bf16.msra.mxu1 %v3478_v53  ;;  %1585 = vmatprep.mubr.bf16.mxu1 %v4087_v7  ;;  %v1261_v53 = vld [vmem:[%s4159_s18 + $0xf0] sm:$0xff] }
 0x566   : > { %1567 = vmatprep.subr.bf16.mxu1 %v3463_v62  ;;  %v3489_v58 = vcombine.high %v1253_v52, %v1261_v53  ;;  %v1238_v62 = vld [vmem:[%s4159_s18 + $0x38] sm:$0xff]  ;;  %v3488_v0 = vcombine.low %v1253_v52, %v1261_v53 }
 0x567   : > { %v3475_v10 = vcombine.high %v1238_v62, %v1246_v63 }
 0x569   : > { %1568 = vmatpush1.bf16.msra.mxu1 %v3462_v61  ;;  %v1245_v61 = vld [vmem:[%s4159_s18 + $0x70] sm:$0xff] }
 0x56a   : > { %1651 = vmatprep.subr.bf16.mxu1 %v3483_v13  ;;  %v3473_v9 = vcombine.high %v1237_v60, %v1245_v61  ;;  %v3913_v13 = vld [vmem:[%s4171_s26 + $0x78] sm:$0xff]  }
 0x624   : > { %v1182_v30 = vpop.f32.mrf.mxu1 }
 0x625   : > { %v1183_v32 = vadd.f32 %v1182_v30, %v1143_v29  ;;  %v1233_v30 = vld [vmem:[%s4159_s18 + $0x10] sm:$0xff] }
 0x626   : > { %v3886_v33 = vpop.f32.mrf.mxu1 }
 0x627   : > { %v1189_v8 = vadd.f32 %v1183_v32, %v4194_v5  ;;  %v1241_v32 = vld [vmem:[%s4159_s18 + $0x50] sm:$0xff]  ;;  %v1234_v33 = vld [vmem:[%s4159_s18 + $0x18] sm:$0xff] }
 0x628   : > { %v1185_v34 = vpop.f32.mrf.mxu1 }
 0x629   : > { %v1186_v35 = vadd.f32 %v1185_v34, %v1143_v29  ;;  %v1191_v36 = vsel %vm416_vm2, %v1189_v8, 0.0 }
 0x62a   : > { %1192 = vadd.xlane.f32.xlu0 %v1191_v36  ;;  %v3887_v31 = vpop.f32.mrf.mxu1 }
 0x62b   : > { %v1190_v37 = vadd.f32 %v1186_v35, %v4196_v6  ;;  %v3465_v31 = vcombine.high %v1233_v30, %v1241_v32 }
 0x62d   : > { %v1194_v38 = vsel %vm416_vm2, %v1190_v37, 0.0 }
 0x62e   : > { %1195 = vadd.xlane.f32.xlu1 %v1194_v38  ;;  %v1251_v38 = vld [vmem:[%s4159_s18 + $0xa0] sm:$0xff] }
 0x6b3   : > { %v1193_v39 = vpop.xlane.xlu0 %1192 }
 0x6b4   : > { %v1198_v40 = vmul.f32 0.03125, %v1193_v39  ;;  %v1259_v39 = vld [vmem:[%s4159_s18 + $0xe0] sm:$0xff] }
 0x6b5   : > { %v3484_v48 = vcombine.low %v1251_v38, %v1259_v39 }
 0x6b6   : > { %v1200_v41 = vsub.f32 %v1189_v8, %v1198_v40  ;;  %v1242_v8 = vld [vmem:[%s4159_s18 + $0x58] sm:$0xff]  ;;  %v1252_v40 = vld [vmem:[%s4159_s18 + $0xa8] sm:$0xff] }
 0x6b7   : > { %v1196_v42 = vpop.xlane.xlu1 %1195 }
 0x6b8   : > { %v1199_v5 = vmul.f32 0.03125, %v1196_v42  ;;  %v1202_v43 = vmul.f32 %v1200_v41, %v1200_v41  ;;  %v3464_v42 = vcombine.low %v1233_v30, %v1241_v32  ;;  %v3931_v30 = vld [vmem:[%s4171_s26 + $0x18] sm:$0xff]  }
 0x6b9   : > { %v3932_v32 = vld [vmem:[%s4171_s26 + $0x98] sm:$0xff]  }
 0x6ba   : > { %v1201_v44 = vsub.f32 %v1190_v37, %v1199_v5  ;;  %v1204_v45 = vsel %vm416_vm2, %v1202_v43, 0.0  ;;  %v3467_v37 = vcombine.high %v1234_v33, %v1242_v8  ;;  %v3466_v5 = vcombine.low %v1234_v33, %v1242_v8  ;;  %v3933_v33 = vld [vmem:[%s4171_s26 + $0x50] sm:$0xff]  }
 0x6bb   : > { %1205 = vadd.xlane.f32.xlu0 %v1204_v45  ;;  %v3485_v43 = vcombine.high %v1251_v38, %v1259_v39  ;;  %v1235_v45 = vld [vmem:[%s4159_s18 + $0x20] sm:$0xff]  ;;  %v3934_v8 = vld [vmem:[%s4171_s26 + $0xd0] sm:$0xff]   ;;  %v3938_v38 = vld [vmem:[%s4171_s26 + $0xc8] sm:$0xff]  }
 0x6bc   : > { %v1203_v46 = vmul.f32 %v1201_v44, %v1201_v44  ;;  %v3939_v39 = vld [vmem:[%s4171_s26 + $0x8] sm:$0xff]  }
 0x6be   : > { %v1207_v6 = vsel %vm416_vm2, %v1203_v46, 0.0  ;;  %v1243_v46 = vld [vmem:[%s4159_s18 + $0x60] sm:$0xff] }
 0x6bf   : > { %1208 = vadd.xlane.f32.xlu0 %v1207_v6  ;;  %v1236_v6 = vld [vmem:[%s4159_s18 + $0x28] sm:$0xff]  ;;  %v3469_v50 = vcombine.high %v1235_v45, %v1243_v46  ;;  %v3468_v56 = vcombine.low %v1235_v45, %v1243_v46  ;;  %v3946_v45 = vld [vmem:[%s4171_s26 + $0x1f8] sm:$0xff]   ;;  %v4399_v46 = vsub.s32 3, %v4303_v19 }
 0x6c0   : > { %v3471_v51 = vcombine.high %v1236_v6, %v1244_v47  ;;  %v3470_v57 = vcombine.low %v1236_v6, %v1244_v47  ;;  %v4402_v6 = vsub.s32 2, %v4303_v19  ;;  %v4405_v47 = vld [vmem:[%s4164_s21] sm:$0xff] }
 0x6c1   : > { %v1270_v52 = vrot.slane %v4405_v47, %v4306_v20 }
 0x6c2   : > { %v1278_v53 = vrot.slane %v4405_v47, %v4402_v6 }
 0x744   : > { %v1206_v2 = vpop.xlane.xlu0 %1205 }
 0x745   : > { %v1210_v14 = vmul.f32 0.03125, %v1206_v2  ;;  %v3914_v2 = vld [vmem:[%s4171_s26 + $0xf8] sm:$0xff]  }
 0x747   : > { %v1212_v15 = vadd.f32 1e-05, %v1210_v14  ;;  %v3915_v14 = vld [vmem:[%s4171_s26 + $0x38] sm:$0xff]  }
 0x748   : > { %v1209_v4 = vpop.xlane.xlu0 %1208 }
 0x749   : > { %4057 = vrsqrt.f32 %v1212_v15  ;;  %v1211_v16 = vmul.f32 0.03125, %v1209_v4  ;;  %v3916_v15 = vld [vmem:[%s4171_s26 + $0xb8] sm:$0xff]   ;;  %v3917_v4 = vld [vmem:[%s4171_s26 + $0x70] sm:$0xff]  }
 0x74b   : > { %v1213_v18 = vadd.f32 1e-05, %v1211_v16  ;;  %v3918_v16 = vld [vmem:[%s4171_s26 + $0xf0] sm:$0xff]  }
 0x74d   : > { %4059 = vrsqrt.f32 %v1213_v18  ;;  %v3921_v18 = vld [vmem:[%s4171_s26 + $0x68] sm:$0xff]  }
 0x756   : > { %v4058_v3 = vpop.eup %4057 }
 0x757   : > { %v1216_v24 = vmul.f32 %v4058_v3, %v1200_v41  ;;  %v1260_v41 = vld [vmem:[%s4159_s18 + $0xe8] sm:$0xff] }
 0x758   : > { %v3486_v49 = vcombine.low %v1252_v40, %v1260_v41  ;;  %v3923_v3 = vld [vmem:[%s4171_s26 + $0x28] sm:$0xff]  }
 0x759   : > { %v1222_v27 = vmul.f32 %v1221_v22, %v1216_v24  ;;  %v3925_v24 = vld [vmem:[%s4171_s26 + $0x60] sm:$0xff]  }
 0x75a   : > { %v4060_v25 = vpop.eup %4059 }
 0x75b   : > { %v1217_v28 = vmul.f32 %v4060_v25, %v1201_v44  ;;  %v4318_v34 = vadd.f32 %v1227_v26, %v1222_v27  ;;  %v3487_v44 = vcombine.high %v1252_v40, %v1260_v41  ;;  %v3926_v25 = vld [vmem:[%s4171_s26 + $0xe0] sm:$0xff]   ;;  %v3940_v40 = vld [vmem:[%s4171_s26 + $0x88] sm:$0xff]  }
 0x75c   : > { %v3928_v27 = vld [vmem:[%s4171_s26 + $0xa0] sm:$0xff]  }
 0x75d   : > { %v1223_v29 = vmul.f32 %v1221_v22, %v1217_v28  ;;  %v3924_v22 = vld [vmem:[%s4171_s26 + $0xa8] sm:$0xff]   ;;  %v3929_v28 = vld [vmem:[%s4171_s26 + $0x58] sm:$0xff]   ;;  %v3941_v41 = vld [vmem:[%s4171_s26 + $0x40] sm:$0xff]  }
 0x75f   : > { %v4320_v35 = vadd.f32 %v1227_v26, %v1223_v29  ;;  %v3927_v26 = vld [vmem:[%s4171_s26 + $0x20] sm:$0xff]   ;;  %v3930_v29 = vld [vmem:[%s4171_s26 + $0xd8] sm:$0xff]  }
 0x761   : > { %v4324_v36 = vpack.c.bf16 %v4320_v35, %v4318_v34 }
 0x763   : > { %3492 = vmatmul.mubr.msk.bf16.vlgmr.msra.gmra.mxu0 %vm416_vm2, %v4324_v36  ;;  %3493 = vmatmul.mubr.msk.bf16.vlgmr.msra.gmra.mxu1 %vm416_vm2, %v4324_v36 }
 0x764   : > { %1609 = vmatpush1.bf16.msra.mxu0 %v3480_v11  ;;  %1652 = vmatpush1.bf16.msra.mxu1 %v3482_v12  ;;  %v3472_v11 = vcombine.low %v1237_v60, %v1245_v61  ;;  %v3474_v12 = vcombine.low %v1238_v62, %v1246_v63 }
 0x765   : > { %1610 = vmatprep.subr.bf16.mxu0 %v3465_v31  ;;  %1653 = vmatprep.subr.bf16.mxu1 %v3467_v37  ;;  %v3936_v31 = vld [vmem:[%s4171_s26 + $0x90] sm:$0xff]   ;;  %v3937_v37 = vld [vmem:[%s4171_s26 + $0x48] sm:$0xff]  }
 0x766   : > { %1628 = vmatprep.mubr.bf16.mxu0 %v4087_v7  ;;  %1671 = vmatprep.mubr.bf16.mxu1 %v4087_v7 }
 0x768   : > { %1611 = vmatpush1.bf16.msra.mxu0 %v3464_v42  ;;  %1654 = vmatpush1.bf16.msra.mxu1 %v3466_v5  ;;  %v3942_v42 = vld [vmem:[%s4171_s26 + $0xc0] sm:$0xff]  }
 0x769   : > { %1694 = vmatprep.subr.bf16.mxu0 %v3485_v43  ;;  %1737 = vmatprep.subr.bf16.mxu1 %v3487_v44  ;;  %v3943_v5 = vld [vmem:[%s4171_s26] sm:$0xff]   ;;  %v3945_v44 = vld [vmem:[%s4171_s26 + $0x178] sm:$0xff]  }
 0x76a   : > { %v3944_v43 = vld [vmem:[%s4171_s26 + $0x80] sm:$0xff]  }
 0x76b   : > { %3494 = vmatmul.mubr.msk.bf16.vlgmr.msra.gmra.mxu0 %vm416_vm2, %v4324_v36  ;;  %3495 = vmatmul.mubr.msk.bf16.vlgmr.msra.gmra.mxu1 %vm416_vm2, %v4324_v36 }
 0x76c   : > { %1695 = vmatpush1.bf16.msra.mxu0 %v3484_v48  ;;  %1738 = vmatpush1.bf16.msra.mxu1 %v3486_v49 }
 0x76d   : > { %1696 = vmatprep.subr.bf16.mxu0 %v3469_v50  ;;  %1739 = vmatprep.subr.bf16.mxu1 %v3471_v51  ;;  %v1274_v50 = vrot.slane %v4405_v47, %v4311_v23  ;;  %v1282_v51 = vrot.slane %v4405_v47, %v4399_v46 }
 0x76e   : > { %1714 = vmatprep.mubr.bf16.mxu0 %v4087_v7  ;;  %1757 = vmatprep.mubr.bf16.mxu1 %v4087_v7 }
 0x770   : > { %1697 = vmatpush1.bf16.msra.mxu0 %v3468_v56  ;;  %1740 = vmatpush1.bf16.msra.mxu1 %v3470_v57 }
 0x771   : > { %1780 = vmatprep.subr.bf16.mxu0 %v3489_v58  ;;  %1823 = vmatprep.subr.bf16.mxu1 %v3491_v59  ;;  %v1289_v58 = vsub.s32 5, %v4303_v19  ;;  %v1297_v59 = vsub.s32 7, %v4303_v19 }
 0x773   : > { %3496 = vmatmul.mubr.msk.bf16.vlgmr.msra.gmra.mxu0 %vm416_vm2, %v4324_v36  ;;  %3497 = vmatmul.mubr.msk.bf16.vlgmr.msra.gmra.mxu1 %vm416_vm2, %v4324_v36 }
 0x774   : > { %1781 = vmatpush1.bf16.msra.mxu0 %v3488_v0  ;;  %1824 = vmatpush1.bf16.msra.mxu1 %v3490_v1 }
 0x775   : > { %1782 = vmatprep.subr.bf16.mxu0 %v3473_v9  ;;  %1825 = vmatprep.subr.bf16.mxu1 %v3475_v10 }
 0x776   : > { %1800 = vmatprep.mubr.bf16.mxu0 %v4087_v7  ;;  %1843 = vmatprep.mubr.bf16.mxu1 %v4087_v7  ;;  %v3919_v7 = vld [vmem:[%s4171_s26 + $0x30] sm:$0xff]  }
 0x778   : > { %1783 = vmatpush1.bf16.msra.mxu0 %v3472_v11  ;;  %1826 = vmatpush1.bf16.msra.mxu1 %v3474_v12 }
 0x779   : > { %3656 = vmatprep.subr.bf16.mxu0 %v3913_v13  ;;  %3678 = vmatprep.subr.bf16.mxu1 %v3914_v2 }
 0x77b   : > { %3498 = vmatmul.mubr.msk.bf16.vlgmr.msra.gmra.mxu0 %vm416_vm2, %v4324_v36  ;;  %3499 = vmatmul.mubr.msk.bf16.vlgmr.msra.gmra.mxu1 %vm416_vm2, %v4324_v36  ;;  %v3935_v36 = vld [vmem:[%s4171_s26 + $0x10] sm:$0xff]  }
 0x77c   : > { %3657 = vmatpush3.bf16.msra.mxu0 %v3915_v14  ;;  %3679 = vmatpush3.bf16.msra.mxu1 %v3916_v15 }
 0x77d   : > { %3658 = vmatprep.subr.bf16.mxu0 %v3917_v4  ;;  %3680 = vmatprep.subr.bf16.mxu1 %v3918_v16  ;;  %v1290_v4 = vrot.slane %v4405_v47, %v1289_v58  ;;  %v1298_v16 = vrot.slane %v4405_v47, %v1297_v59 }
 0x780   : > { %3659 = vmatpush3.bf16.msra.mxu0 %v3919_v7  ;;  %3681 = vmatpush3.bf16.msra.mxu1 %v3920_v17 }
 0x781   : > { %3660 = vmatprep.subr.bf16.mxu0 %v3921_v18  ;;  %3682 = vmatprep.subr.bf16.mxu1 %v3922_v21 }
 0x784   : > { %3661 = vmatpush3.bf16.msra.mxu0 %v3923_v3  ;;  %3683 = vmatpush3.bf16.msra.mxu1 %v3924_v22 }
 0x785   : > { %3662 = vmatprep.subr.bf16.mxu0 %v3925_v24  ;;  %3684 = vmatprep.subr.bf16.mxu1 %v3926_v25 }
 0x788   : > { %3663 = vmatpush3.bf16.msra.mxu0 %v3927_v26  ;;  %3685 = vmatpush3.bf16.msra.mxu1 %v3928_v27 }
 0x789   : > { %3664 = vmatprep.subr.bf16.mxu0 %v3929_v28  ;;  %3686 = vmatprep.subr.bf16.mxu1 %v3930_v29  ;;  %v3947_v28 = vld [vmem:[%s4171_s26 + $0x138] sm:$0xff]  }
 0x78a   : > { %v3948_v29 = vld [vmem:[%s4171_s26 + $0x1b8] sm:$0xff]  }
 0x78c   : > { %3665 = vmatpush3.bf16.msra.mxu0 %v3931_v30  ;;  %3687 = vmatpush3.bf16.msra.mxu1 %v3932_v32 }
 0x78d   : > { %3666 = vmatprep.subr.bf16.mxu0 %v3933_v33  ;;  %3688 = vmatprep.subr.bf16.mxu1 %v3934_v8 }
 0x790   : > { %3667 = vmatpush3.bf16.msra.mxu0 %v3935_v36  ;;  %3689 = vmatpush3.bf16.msra.mxu1 %v3936_v31  ;;  %v3949_v36 = vld [vmem:[%s4171_s26 + $0x170] sm:$0xff]  }
 0x791   : > { %3668 = vmatprep.subr.bf16.mxu0 %v3937_v37  ;;  %3690 = vmatprep.subr.bf16.mxu1 %v3938_v38  ;;  %v3950_v31 = vld [vmem:[%s4171_s26 + $0x1f0] sm:$0xff]  }
 0x794   : > { %3669 = vmatpush3.bf16.msra.mxu0 %v3939_v39  ;;  %3691 = vmatpush3.bf16.msra.mxu1 %v3940_v40 }
 0x795   : > { %3670 = vmatprep.subr.bf16.mxu0 %v3941_v41  ;;  %3692 = vmatprep.subr.bf16.mxu1 %v3942_v42 }
 0x798   : > { %3671 = vmatpush3.bf16.msra.mxu0 %v3943_v5  ;;  %3693 = vmatpush3.bf16.msra.mxu1 %v3944_v43  ;;  %v3951_v5 = vld [vmem:[%s4171_s26 + $0x130] sm:$0xff]  }
 0x799   : > { %3700 = vmatprep.subr.bf16.mxu0 %v3945_v44  ;;  %3722 = vmatprep.subr.bf16.mxu1 %v3946_v45  ;;  %v3952_v43 = vld [vmem:[%s4171_s26 + $0x1b0] sm:$0xff]   ;;  %v3953_v44 = vld [vmem:[%s4171_s26 + $0x168] sm:$0xff]  }
 0x823   : > { %v1544_v48 = vpop.f32.mrf.mxu0  ;;  %v1587_v49 = vpop.f32.mrf.mxu1 }
 0x824   : > { %v1545_v0 = vadd.f32 %v1544_v48, %v1270_v52  ;;  %v1588_v1 = vadd.f32 %v1587_v49, %v1278_v53 }
 0x825   : > { %v1546_v54 = vpop.f32.mrf.mxu0  ;;  %v1589_v55 = vpop.f32.mrf.mxu1 }
 0x826   : > { %v1547_v60 = vadd.f32 %v1546_v54, %v1274_v50  ;;  %v1590_v61 = vadd.f32 %v1589_v55, %v1282_v51  ;;  %v1854_v3 = vmax.f32 %v1545_v0, 0.0  ;;  %v1856_v22 = vmax.f32 %v1588_v1, 0.0  ;;  %v3955_v54 = vld [vmem:[%s4171_s26 + $0x128] sm:$0xff]   ;;  %v3961_v0 = vld [vmem:[%s4171_s26 + $0x158] sm:$0xff]  }
 0x827   : > { %v1548_v56 = vpop.f32.mrf.mxu0  ;;  %v1591_v57 = vpop.f32.mrf.mxu1  ;;  %v3956_v55 = vld [vmem:[%s4171_s26 + $0x1a8] sm:$0xff]   ;;  %v3962_v1 = vld [vmem:[%s4171_s26 + $0x1d8] sm:$0xff]  }
 0x828   : > { %v1549_v62 = vadd.f32 %v1548_v56, %v1270_v52  ;;  %v1592_v63 = vadd.f32 %v1591_v57, %v1278_v53  ;;  %v1855_v7 = vmax.f32 %v1547_v60, 0.0  ;;  %v1857_v17 = vmax.f32 %v1590_v61, 0.0  ;;  %v3957_v56 = vld [vmem:[%s4171_s26 + $0x160] sm:$0xff]  }
 0x829   : > { %v1550_v9 = vpop.f32.mrf.mxu0  ;;  %v1593_v10 = vpop.f32.mrf.mxu1  ;;  %v3958_v57 = vld [vmem:[%s4171_s26 + $0x1e0] sm:$0xff]  }
 0x82a   : > { %v1551_v11 = vadd.f32 %v1550_v9, %v1274_v50  ;;  %v1594_v12 = vadd.f32 %v1593_v10, %v1282_v51  ;;  %v1870_v13 = vmax.f32 %v1549_v62, 0.0  ;;  %v1872_v2 = vmax.f32 %v1592_v63, 0.0  ;;  %v3954_v51 = vld [vmem:[%s4171_s26 + $0x1e8] sm:$0xff]   ;;  %v3959_v61 = vld [vmem:[%s4171_s26 + $0x120] sm:$0xff]   ;;  %v3963_v10 = vld [vmem:[%s4171_s26 + $0x118] sm:$0xff]  }
 0x82b   : > { %v4417_v14 = vpop.f32.mrf.mxu0  ;;  %v4419_v15 = vpop.f32.mrf.mxu1  ;;  %v3960_v63 = vld [vmem:[%s4171_s26 + $0x1a0] sm:$0xff]  }
 0x82c   : > { %v1871_v18 = vmax.f32 %v1551_v11, 0.0  ;;  %v1873_v21 = vmax.f32 %v1594_v12, 0.0  ;;  %v1886_v30 = vpack.c.bf16 %v1870_v13, %v1854_v3  ;;  %v1888_v32 = vpack.c.bf16 %v1872_v2, %v1856_v22  ;;  %v3964_v12 = vld [vmem:[%s4171_s26 + $0x198] sm:$0xff]   ;;  %v3965_v13 = vld [vmem:[%s4171_s26 + $0x150] sm:$0xff]   ;;  %v3969_v3 = vld [vmem:[%s4171_s26 + $0x148] sm:$0xff]  }
 0x82d   : > { %v1632_v24 = vpop.f32.mrf.mxu0  ;;  %v1675_v25 = vpop.f32.mrf.mxu1  ;;  %v3966_v2 = vld [vmem:[%s4171_s26 + $0x1d0] sm:$0xff]   ;;  %v3970_v22 = vld [vmem:[%s4171_s26 + $0x1c8] sm:$0xff]  }
 0x82e   : > { %v1887_v26 = vpack.c.bf16 %v1871_v18, %v1855_v7  ;;  %v1889_v27 = vpack.c.bf16 %v1873_v21, %v1857_v17  ;;  %v1633_v37 = vadd.f32 %v1632_v24, %v1290_v4  ;;  %v1676_v38 = vadd.f32 %v1675_v25, %v1298_v16  ;;  %v3967_v17 = vld [vmem:[%s4171_s26 + $0x110] sm:$0xff]  }
 0x82f   : > { %v4429_v33 = vpop.f32.mrf.mxu0  ;;  %v4431_v8 = vpop.f32.mrf.mxu1  ;;  %v3968_v21 = vld [vmem:[%s4171_s26 + $0x190] sm:$0xff]  }
 0x830   : > { %2962 = vmatprep.mubr.bf16.mxu0 %v1887_v26  ;;  %3003 = vmatprep.mubr.bf16.mxu1 %v1889_v27  ;;  %v1859_v45 = vmax.f32 %v1633_v37, 0.0  ;;  %v1861_v48 = vmax.f32 %v1676_v38, 0.0  ;;  %v4473_v26 = vld [vmem:[%s4164_s21 + $0x8] sm:$0xff]  ;;  %v3974_v38 = vld [vmem:[%s4171_s26 + $0x1c0] sm:$0xff]  }
 0x831   : > { %v1636_v39 = vpop.f32.mrf.mxu0  ;;  %v1679_v40 = vpop.f32.mrf.mxu1  ;;  %2963 = vmatmul.mubr.bf16.vlgmr.msra.gmra.mxu0 %v1886_v30  ;;  %3004 = vmatmul.mubr.bf16.vlgmr.msra.gmra.mxu1 %v1888_v32  ;;  %v1306_v30 = vrot.slane %v4473_v26, %v4311_v23  ;;  %v1314_v37 = vrot.slane %v4473_v26, %v4399_v46 }
 0x832   : > { %v1637_v41 = vadd.f32 %v1636_v39, %v1290_v4  ;;  %v1680_v42 = vadd.f32 %v1679_v40, %v1298_v16  ;;  %3701 = vmatpush3.bf16.msra.mxu0 %v3947_v28  ;;  %3723 = vmatpush3.bf16.msra.mxu1 %v3948_v29  ;;  %v4456_v4 = vsub.s32 4, %v4303_v19  ;;  %v1293_v16 = vsub.s32 6, %v4303_v19  ;;  %v3971_v28 = vld [vmem:[%s4171_s26 + $0x108] sm:$0xff]   ;;  %v4039_v19 = vld [vmem:[%s4171_s26 + $0x300] sm:$0xff]  }
 0x833   : > { %3702 = vmatprep.subr.bf16.mxu0 %v3949_v36  ;;  %3724 = vmatprep.subr.bf16.mxu1 %v3950_v31  ;;  %v4443_v60 = vpop.f32.mrf.mxu0  ;;  %v4446_v62 = vpop.f32.mrf.mxu1  ;;  %v3972_v36 = vld [vmem:[%s4171_s26 + $0x188] sm:$0xff]   ;;  %v3973_v31 = vld [vmem:[%s4171_s26 + $0x140] sm:$0xff]  }
 0x834   : > { %v1875_v49 = vmax.f32 %v1637_v41, 0.0  ;;  %v1877_v50 = vmax.f32 %v1680_v42, 0.0  ;;  %v1286_v24 = vrot.slane %v4405_v47, %v4456_v4  ;;  %v1294_v25 = vrot.slane %v4405_v47, %v1293_v16  ;;  %v3975_v42 = vld [vmem:[%s4171_s26 + $0x100] sm:$0xff]  }
 0x835   : > { %v1718_v9 = vpop.f32.mrf.mxu0  ;;  %v1761_v11 = vpop.f32.mrf.mxu1 }
 0x836   : > { %v1891_v52 = vpack.c.bf16 %v1875_v49, %v1859_v45  ;;  %v1893_v53 = vpack.c.bf16 %v1877_v50, %v1861_v48  ;;  %3703 = vmatpush3.bf16.msra.mxu0 %v3951_v5  ;;  %3725 = vmatpush3.bf16.msra.mxu1 %v3952_v43  ;;  %v1635_v29 = vadd.f32 %v4429_v33, %v1286_v24  ;;  %v3978_v49 = vld [vmem:[%s4171_s26 + $0x2f8] sm:$0xff]  }
 0x837   : > { %3704 = vmatprep.subr.bf16.mxu0 %v3953_v44  ;;  %3726 = vmatprep.subr.bf16.mxu1 %v3954_v51  ;;  %v4459_v7 = vpop.f32.mrf.mxu0  ;;  %v4462_v18 = vpop.f32.mrf.mxu1  ;;  %v1678_v47 = vadd.f32 %v4431_v8, %v1294_v25  ;;  %v1631_v33 = vadd.f32 %v4417_v14, %v1286_v24  ;;  %v1674_v40 = vadd.f32 %v4419_v15, %v1294_v25  ;;  %v3976_v8 = vld [vmem:[%s4171_s26 + $0x180] sm:$0xff]   ;;  %v3977_v44 = vld [vmem:[%s4171_s26 + $0x278] sm:$0xff]  }
 0x838   : > { %3044 = vmatprep.mubr.bf16.mxu0 %v1891_v52  ;;  %3085 = vmatprep.mubr.bf16.mxu1 %v1893_v53  ;;  %v1874_v5 = vmax.f32 %v1635_v29, 0.0  ;;  %v1719_v43 = vadd.f32 %v1718_v9, %v1306_v30  ;;  %v1762_v48 = vadd.f32 %v1761_v11, %v1314_v37  ;;  %v3979_v52 = vld [vmem:[%s4171_s26 + $0x238] sm:$0xff]   ;;  %v3983_v9 = vld [vmem:[%s4171_s26 + $0x230] sm:$0xff]   ;;  %v3985_v11 = vld [vmem:[%s4171_s26 + $0x268] sm:$0xff]  }
 0x839   : > { %v1722_v27 = vpop.f32.mrf.mxu0  ;;  %v1765_v32 = vpop.f32.mrf.mxu1  ;;  %v1876_v45 = vmax.f32 %v1678_v47, 0.0  ;;  %v1858_v14 = vmax.f32 %v1631_v33, 0.0  ;;  %v1860_v15 = vmax.f32 %v1674_v40, 0.0  ;;  %v3992_v25 = vld [vmem:[%s4171_s26 + $0x2a0] sm:$0xff]   ;;  %v3998_v47 = vld [vmem:[%s4171_s26 + $0x2d0] sm:$0xff]   ;;  %v4001_v40 = vld [vmem:[%s4171_s26 + $0x248] sm:$0xff]  }
 0x83a   : > { %3705 = vmatpush3.bf16.msra.mxu0 %v3955_v54  ;;  %3727 = vmatpush3.bf16.msra.mxu1 %v3956_v55  ;;  %v1723_v39 = vadd.f32 %v1722_v27, %v1306_v30  ;;  %v1766_v41 = vadd.f32 %v1765_v32, %v1314_v37  ;;  %v1863_v54 = vmax.f32 %v1719_v43, 0.0  ;;  %v3980_v55 = vld [vmem:[%s4171_s26 + $0x2b8] sm:$0xff]  }
 0x83b   : > { %3706 = vmatprep.subr.bf16.mxu0 %v3957_v56  ;;  %3728 = vmatprep.subr.bf16.mxu1 %v3958_v57  ;;  %v1890_v53 = vpack.c.bf16 %v1874_v5, %v1858_v14  ;;  %v1892_v56 = vpack.c.bf16 %v1876_v45, %v1860_v15  ;;  %v1865_v57 = vmax.f32 %v1762_v48, 0.0  ;;  %v4506_v24 = vpop.f32.mrf.mxu1  ;;  %v3993_v27 = vld [vmem:[%s4171_s26 + $0x258] sm:$0xff]   ;;  %v1310_v5 = vrot.slane %v4473_v26, %v4402_v6  ;;  %v4005_v14 = vld [vmem:[%s4171_s26 + $0x240] sm:$0xff]  }
 0x83c   : > { %v1879_v50 = vmax.f32 %v1723_v39, 0.0  ;;  %v1881_v51 = vmax.f32 %v1766_v41, 0.0  ;;  %v3995_v30 = vld [vmem:[%s4171_s26 + $0x218] sm:$0xff]   ;;  %v4000_v39 = vld [vmem:[%s4171_s26 + $0x290] sm:$0xff]   ;;  %v4002_v41 = vld [vmem:[%s4171_s26 + $0x2c8] sm:$0xff]   ;;  %v1322_v45 = vrot.slane %v4473_v26, %v1289_v58  ;;  %v1330_v15 = vrot.slane %v4473_v26, %v1297_v59 }
 0x83d   : > { %v1847_v32 = vpop.f32.mrf.mxu1  ;;  %v1760_v58 = vadd.f32 %v4446_v62, %v1310_v5 }
 0x83e   : > { %3707 = vmatpush3.bf16.msra.mxu0 %v3959_v61  ;;  %3729 = vmatpush3.bf16.msra.mxu1 %v3960_v63  ;;  %v3981_v61 = vld [vmem:[%s4171_s26 + $0x270] sm:$0xff]   ;;  %v1895_v63 = vpack.c.bf16 %v1879_v50, %v1863_v54  ;;  %v1764_v50 = vadd.f32 %v4462_v18, %v1310_v5  ;;  %v4007_v54 = vld [vmem:[%s4171_s26 + $0x200] sm:$0xff]   ;;  %v4028_v5 = vld [vmem:[%s4171_s26 + $0x398] sm:$0xff]  }
 0x83f   : > { %3708 = vmatprep.subr.bf16.mxu0 %v3961_v0  ;;  %3730 = vmatprep.subr.bf16.mxu1 %v3962_v1  ;;  %v3982_v0 = vld [vmem:[%s4171_s26 + $0x2f0] sm:$0xff]   ;;  %v1897_v1 = vpack.c.bf16 %v1881_v51, %v1865_v57  ;;  %v4518_v33 = vpop.f32.mrf.mxu1  ;;  %v4008_v18 = vld [vmem:[%s4171_s26 + $0x280] sm:$0xff]   ;;  %v4009_v57 = vld [vmem:[%s4171_s26 + $0x378] sm:$0xff]   ;;  %v1864_v62 = vmax.f32 %v1760_v58, 0.0 }
 0x840   : > { %v1880_v59 = vmax.f32 %v1764_v50, 0.0  ;;  %v1326_v50 = vrot.slane %v4473_v26, %v1293_v16 }
 0x841   : > { %v1851_v48 = vpop.f32.mrf.mxu1 }
 0x842   : > { %3709 = vmatpush3.bf16.msra.mxu0 %v3963_v10  ;;  %3731 = vmatpush3.bf16.msra.mxu1 %v3964_v12  ;;  %v3984_v10 = vld [vmem:[%s4171_s26 + $0x2b0] sm:$0xff]   ;;  %v3986_v12 = vld [vmem:[%s4171_s26 + $0x2e8] sm:$0xff]   ;;  %v1850_v58 = vadd.f32 %v4518_v33, %v1326_v50 }
 0x843   : > { %3710 = vmatprep.subr.bf16.mxu0 %v3965_v13  ;;  %3732 = vmatprep.subr.bf16.mxu1 %v3966_v2  ;;  %v3987_v13 = vld [vmem:[%s4171_s26 + $0x228] sm:$0xff]  }
 0x844   : > { %v3988_v2 = vld [vmem:[%s4171_s26 + $0x2a8] sm:$0xff]  }
 0x846   : > { %3711 = vmatpush3.bf16.msra.mxu0 %v3967_v17  ;;  %3733 = vmatpush3.bf16.msra.mxu1 %v3968_v21  ;;  %v3989_v17 = vld [vmem:[%s4171_s26 + $0x260] sm:$0xff]  }
 0x847   : > { %3712 = vmatprep.subr.bf16.mxu0 %v3969_v3  ;;  %3734 = vmatprep.subr.bf16.mxu1 %v3970_v22  ;;  %v3990_v21 = vld [vmem:[%s4171_s26 + $0x2e0] sm:$0xff]   ;;  %v4503_v3 = vpop.f32.mrf.mxu0 }
 0x848   : > { %v3991_v22 = vld [vmem:[%s4171_s26 + $0x220] sm:$0xff]  }
 0x849   : > { %v1804_v29 = vpop.f32.mrf.mxu0 }
 0x84a   : > { %3713 = vmatpush3.bf16.msra.mxu0 %v3971_v28  ;;  %3735 = vmatpush3.bf16.msra.mxu1 %v3972_v36  ;;  %v3994_v28 = vld [vmem:[%s4171_s26 + $0x2d8] sm:$0xff]  }
 0x84b   : > { %3714 = vmatprep.subr.bf16.mxu0 %v3973_v31  ;;  %3736 = vmatprep.subr.bf16.mxu1 %v3974_v38  ;;  %v3996_v36 = vld [vmem:[%s4171_s26 + $0x298] sm:$0xff]   ;;  %v3997_v31 = vld [vmem:[%s4171_s26 + $0x250] sm:$0xff]   ;;  %v4515_v37 = vpop.f32.mrf.mxu0 }
 0x84c   : > { %v3999_v38 = vld [vmem:[%s4171_s26 + $0x210] sm:$0xff]  }
 0x84d   : > { %v1808_v43 = vpop.f32.mrf.mxu0 }
 0x84e   : > { %3715 = vmatpush3.bf16.msra.mxu0 %v3975_v42  ;;  %3737 = vmatpush3.bf16.msra.mxu1 %v3976_v8  ;;  %v1302_v42 = vrot.slane %v4473_v26, %v4306_v20  ;;  %v4003_v8 = vld [vmem:[%s4171_s26 + $0x208] sm:$0xff]  }
 0x84f   : > { %3744 = vmatprep.subr.bf16.mxu0 %v3977_v44  ;;  %3766 = vmatprep.subr.bf16.mxu1 %v3978_v49  ;;  %v4004_v49 = vld [vmem:[%s4171_s26 + $0x288] sm:$0xff]  }
 0x850   : > { %v1721_v44 = vadd.f32 %v4459_v7, %v1302_v42  ;;  %v4006_v7 = vld [vmem:[%s4171_s26 + $0x2c0] sm:$0xff]   ;;  %v1717_v51 = vadd.f32 %v4443_v60, %v1302_v42  ;;  %v4027_v42 = vld [vmem:[%s4171_s26 + $0x318] sm:$0xff]  }
 0x851   : > { %3045 = vmatmul.mubr.bf16.vlgmr.msra.gmra.mxu0 %v1890_v53  ;;  %3086 = vmatmul.mubr.bf16.vlgmr.msra.gmra.mxu1 %v1892_v56  ;;  %v1852_v53 = vadd.f32 %v1851_v48, %v1330_v15  ;;  %v1805_v56 = vadd.f32 %v1804_v29, %v1322_v45  ;;  %v4017_v29 = vld [vmem:[%s4171_s26 + $0x368] sm:$0xff]  }
 0x852   : > { %3745 = vmatpush3.bf16.msra.mxu0 %v3979_v52  ;;  %3126 = vmatprep.mubr.bf16.mxu0 %v1895_v63  ;;  %v1809_v52 = vadd.f32 %v1808_v43, %v1322_v45  ;;  %v4010_v63 = vld [vmem:[%s4171_s26 + $0x3f8] sm:$0xff]   ;;  %v1862_v60 = vmax.f32 %v1717_v51, 0.0  ;;  %v4029_v43 = vld [vmem:[%s4171_s26 + $0x350] sm:$0xff]   ;;  %v4033_v48 = vld [vmem:[%s4171_s26 + $0x348] sm:$0xff]  }
 0x853   : > { %3767 = vmatpush3.bf16.msra.mxu1 %v3980_v55  ;;  %3167 = vmatprep.mubr.bf16.mxu1 %v1897_v1  ;;  %v1878_v55 = vmax.f32 %v1721_v44, 0.0  ;;  %v1885_v1 = vmax.f32 %v1852_v53, 0.0  ;;  %v4031_v44 = vld [vmem:[%s4171_s26 + $0x310] sm:$0xff]   ;;  %v4036_v51 = vld [vmem:[%s4171_s26 + $0x388] sm:$0xff]   ;;  %v4038_v53 = vld [vmem:[%s4171_s26 + $0x3c0] sm:$0xff]  }
 0x854   : > { %3746 = vmatprep.subr.bf16.mxu0 %v3981_v61  ;;  %3768 = vmatprep.subr.bf16.mxu1 %v3982_v0  ;;  %v1848_v61 = vadd.f32 %v1847_v32, %v1330_v15  ;;  %v1883_v0 = vmax.f32 %v1809_v52, 0.0  ;;  %v4019_v32 = vld [vmem:[%s4171_s26 + $0x328] sm:$0xff]   ;;  %v4032_v45 = vld [vmem:[%s4171_s26 + $0x390] sm:$0xff]   ;;  %v4037_v52 = vld [vmem:[%s4171_s26 + $0x340] sm:$0xff]  }
 0x855   : > { %v4035_v15 = vld [vmem:[%s4171_s26 + $0x308] sm:$0xff]  }
 0x856   : > { %3747 = vmatpush3.bf16.msra.mxu0 %v3983_v9  ;;  %v4011_v9 = vld [vmem:[%s4171_s26 + $0x338] sm:$0xff]  }
 0x857   : > { %3769 = vmatpush3.bf16.msra.mxu1 %v3984_v10  ;;  %3748 = vmatprep.subr.bf16.mxu0 %v3985_v11  ;;  %v1894_v10 = vpack.c.bf16 %v1878_v55, %v1862_v60  ;;  %v1867_v11 = vmax.f32 %v1805_v56, 0.0  ;;  %v1846_v55 = vadd.f32 %v4506_v24, %v1326_v50  ;;  %v1884_v56 = vmax.f32 %v1850_v58, 0.0 }
 0x858   : > { %3770 = vmatprep.subr.bf16.mxu1 %v3986_v12  ;;  %v4012_v12 = vld [vmem:[%s4171_s26 + $0x3b8] sm:$0xff]  }
 0x85a   : > { %3749 = vmatpush3.bf16.msra.mxu0 %v3987_v13  ;;  %v1896_v13 = vpack.c.bf16 %v1880_v59, %v1864_v62 }
 0x85b   : > { %3771 = vmatpush3.bf16.msra.mxu1 %v3988_v2  ;;  %3750 = vmatprep.subr.bf16.mxu0 %v3989_v17  ;;  %v1869_v2 = vmax.f32 %v1848_v61, 0.0  ;;  %v4013_v17 = vld [vmem:[%s4171_s26 + $0x370] sm:$0xff]  }
 0x85c   : > { %3772 = vmatprep.subr.bf16.mxu1 %v3990_v21  ;;  %v1899_v21 = vpack.c.bf16 %v1883_v0, %v1867_v11 }
 0x85e   : > { %3751 = vmatpush3.bf16.msra.mxu0 %v3991_v22  ;;  %v4014_v22 = vld [vmem:[%s4171_s26 + $0x3f0] sm:$0xff]  }
 0x85f   : > { %3773 = vmatpush3.bf16.msra.mxu1 %v3992_v25  ;;  %3752 = vmatprep.subr.bf16.mxu0 %v3993_v27  ;;  %v1901_v25 = vpack.c.bf16 %v1885_v1, %v1869_v2  ;;  %v4015_v27 = vld [vmem:[%s4171_s26 + $0x330] sm:$0xff]  }
 0x860   : > { %3774 = vmatprep.subr.bf16.mxu1 %v3994_v28  ;;  %v4016_v28 = vld [vmem:[%s4171_s26 + $0x3b0] sm:$0xff]  }
 0x862   : > { %3753 = vmatpush3.bf16.msra.mxu0 %v3995_v30  ;;  %v4018_v30 = vld [vmem:[%s4171_s26 + $0x3e8] sm:$0xff]  }
 0x863   : > { %3775 = vmatpush3.bf16.msra.mxu1 %v3996_v36  ;;  %3754 = vmatprep.subr.bf16.mxu0 %v3997_v31  ;;  %v4020_v36 = vld [vmem:[%s4171_s26 + $0x3a8] sm:$0xff]   ;;  %v4021_v31 = vld [vmem:[%s4171_s26 + $0x360] sm:$0xff]  }
 0x864   : > { %3776 = vmatprep.subr.bf16.mxu1 %v3998_v47  ;;  %v4022_v47 = vld [vmem:[%s4171_s26 + $0x3e0] sm:$0xff]  }
 0x866   : > { %3755 = vmatpush3.bf16.msra.mxu0 %v3999_v38  ;;  %v4023_v38 = vld [vmem:[%s4171_s26 + $0x320] sm:$0xff]  }
 0x867   : > { %3777 = vmatpush3.bf16.msra.mxu1 %v4000_v39  ;;  %3756 = vmatprep.subr.bf16.mxu0 %v4001_v40  ;;  %v4024_v39 = vld [vmem:[%s4171_s26 + $0x3a0] sm:$0xff]   ;;  %v4025_v40 = vld [vmem:[%s4171_s26 + $0x358] sm:$0xff]  }
 0x868   : > { %3778 = vmatprep.subr.bf16.mxu1 %v4002_v41  ;;  %v4026_v41 = vld [vmem:[%s4171_s26 + $0x3d8] sm:$0xff]  }
 0x86a   : > { %3757 = vmatpush3.bf16.msra.mxu0 %v4003_v8  ;;  %v4030_v8 = vld [vmem:[%s4171_s26 + $0x3d0] sm:$0xff]  }
 0x86b   : > { %3779 = vmatpush3.bf16.msra.mxu1 %v4004_v49  ;;  %3758 = vmatprep.subr.bf16.mxu0 %v4005_v14  ;;  %v4034_v49 = vld [vmem:[%s4171_s26 + $0x3c8] sm:$0xff]   ;;  %v1318_v14 = vrot.slane %v4473_v26, %v4456_v4  ;;  %v4040_v26 = vld [vmem:[%s4171_s26 + $0x380] sm:$0xff]  }
 0x86c   : > { %3780 = vmatprep.subr.bf16.mxu1 %v4006_v7 }
 0x86d   : > { %v1807_v7 = vadd.f32 %v4515_v37, %v1318_v14 }
 0x86e   : > { %3759 = vmatpush3.bf16.msra.mxu0 %v4007_v54  ;;  %v1803_v54 = vadd.f32 %v4503_v3, %v1318_v14 }
 0x86f   : > { %3781 = vmatpush3.bf16.msra.mxu1 %v4008_v18  ;;  %3788 = vmatprep.subr.bf16.mxu0 %v4009_v57  ;;  %v1882_v16 = vmax.f32 %v1807_v7, 0.0  ;;  %v1868_v18 = vmax.f32 %v1846_v55, 0.0 }
 0x870   : > { %3810 = vmatprep.subr.bf16.mxu1 %v4010_v63  ;;  %v1866_v37 = vmax.f32 %v1803_v54, 0.0 }
 0x871   : > { %3127 = vmatmul.mubr.bf16.vlgmr.msra.gmra.mxu0 %v1894_v10  ;;  %v1900_v33 = vpack.c.bf16 %v1884_v56, %v1868_v18 }
 0x872   : > { %3168 = vmatmul.mubr.bf16.vlgmr.msra.gmra.mxu1 %v1896_v13  ;;  %3789 = vmatpush3.bf16.msra.mxu0 %v4011_v9  ;;  %v1898_v57 = vpack.c.bf16 %v1882_v16, %v1866_v37 }
 0x873   : > { %3208 = vmatprep.mubr.bf16.mxu0 %v1899_v21  ;;  %3811 = vmatpush3.bf16.msra.mxu1 %v4012_v12 }
 0x874   : > { %3249 = vmatprep.mubr.bf16.mxu1 %v1901_v25  ;;  %3790 = vmatprep.subr.bf16.mxu0 %v4013_v17  ;;  %v4585_v17 = vld [vmem:[%s4176_s12] sm:$0x1f] }
 0x875   : > { %3812 = vmatprep.subr.bf16.mxu1 %v4014_v22  ;;  %v2161_v21 = vrot.slane %v4585_v17, %v4456_v4 }
 0x876   : > { %3791 = vmatpush3.bf16.msra.mxu0 %v4015_v27 }
 0x877   : > { %3813 = vmatpush3.bf16.msra.mxu1 %v4016_v28  ;;  %3792 = vmatprep.subr.bf16.mxu0 %v4017_v29 }
 0x878   : > { %3814 = vmatprep.subr.bf16.mxu1 %v4018_v30 }
 0x87a   : > { %3793 = vmatpush3.bf16.msra.mxu0 %v4019_v32 }
 0x87b   : > { %3815 = vmatpush3.bf16.msra.mxu1 %v4020_v36  ;;  %3794 = vmatprep.subr.bf16.mxu0 %v4021_v31 }
 0x87c   : > { %3816 = vmatprep.subr.bf16.mxu1 %v4022_v47 }
 0x87e   : > { %3795 = vmatpush3.bf16.msra.mxu0 %v4023_v38 }
 0x87f   : > { %3817 = vmatpush3.bf16.msra.mxu1 %v4024_v39  ;;  %3796 = vmatprep.subr.bf16.mxu0 %v4025_v40 }
 0x880   : > { %3818 = vmatprep.subr.bf16.mxu1 %v4026_v41 }
 0x882   : > { %3797 = vmatpush3.bf16.msra.mxu0 %v4027_v42 }
 0x883   : > { %3819 = vmatpush3.bf16.msra.mxu1 %v4028_v5  ;;  %3798 = vmatprep.subr.bf16.mxu0 %v4029_v43 }
 0x884   : > { %3820 = vmatprep.subr.bf16.mxu1 %v4030_v8 }
 0x886   : > { %3799 = vmatpush3.bf16.msra.mxu0 %v4031_v44 }
 0x887   : > { %3821 = vmatpush3.bf16.msra.mxu1 %v4032_v45  ;;  %3800 = vmatprep.subr.bf16.mxu0 %v4033_v48 }
 0x888   : > { %3822 = vmatprep.subr.bf16.mxu1 %v4034_v49 }
 0x88a   : > { %3801 = vmatpush3.bf16.msra.mxu0 %v4035_v15 }
 0x88b   : > { %3823 = vmatpush3.bf16.msra.mxu1 %v4036_v51  ;;  %3802 = vmatprep.subr.bf16.mxu0 %v4037_v52 }
 0x88c   : > { %3824 = vmatprep.subr.bf16.mxu1 %v4038_v53 }
 0x88e   : > { %3803 = vmatpush3.bf16.msra.mxu0 %v4039_v19 }
 0x88f   : > { %3825 = vmatpush3.bf16.msra.mxu1 %v4040_v26 }
 0x891   : > { %3209 = vmatmul.mubr.bf16.vlgmr.msra.gmra.mxu0 %v1898_v57 }
 0x892   : > { %3250 = vmatmul.mubr.bf16.vlgmr.msra.gmra.mxu1 %v1900_v33 }
 0x8f1   : > { %v3672_v3 = vpop.f32.mrf.mxu0  ;;  %v3694_v59 = vpop.f32.mrf.mxu1 }
 0x8f3   : > { %v3673_v24 = vpop.f32.mrf.mxu0  ;;  %v3695_v61 = vpop.f32.mrf.mxu1 }
 0x8f4   : > { %v3674_v22 = vadd.f32 %v3673_v24, %v3672_v3  ;;  %v3696_v36 = vadd.f32 %v3695_v61, %v3694_v59 }
 0x8f5   : > { %v3675_v63 = vpop.f32.mrf.mxu0  ;;  %v3697_v60 = vpop.f32.mrf.mxu1 }
 0x8f6   : > { %v2965_v28 = vadd.f32 %v3674_v22, %v2161_v21 }
 0x8f7   : > { %v3676_v0 = vpop.f32.mrf.mxu0  ;;  %v3698_v1 = vpop.f32.mrf.mxu1 }
 0x8f8   : > { %v3677_v29 = vadd.f32 %v3676_v0, %v3675_v63  ;;  %v3006_v47 = vadd.f32 %v3696_v36, %v2965_v28  ;;  %v3699_v41 = vadd.f32 %v3698_v1, %v3697_v60 }
 0x8fa   : > { %v2968_v38 = vadd.f32 %v3677_v29, %v2161_v21 }
 0x8fc   : > { %v3009_v43 = vadd.f32 %v3699_v41, %v2968_v38  ;;  %v3289_v38 = vrot.slane %v4585_v17, %v4402_v6 }
 0x911   : > { %v3716_v62 = vpop.f32.mrf.mxu0  ;;  %v3738_v9 = vpop.f32.mrf.mxu1 }
 0x913   : > { %v3717_v10 = vpop.f32.mrf.mxu0  ;;  %v3739_v11 = vpop.f32.mrf.mxu1 }
 0x914   : > { %v3718_v31 = vadd.f32 %v3717_v10, %v3716_v62  ;;  %v3740_v8 = vadd.f32 %v3739_v11, %v3738_v9 }
 0x915   : > { %v3719_v12 = vpop.f32.mrf.mxu0  ;;  %v3741_v13 = vpop.f32.mrf.mxu1 }
 0x916   : > { %v3047_v42 = vadd.f32 %v3718_v31, %v3006_v47 }
 0x917   : > { %v3720_v2 = vpop.f32.mrf.mxu0  ;;  %v3742_v27 = vpop.f32.mrf.mxu1 }
 0x918   : > { %v3721_v5 = vadd.f32 %v3720_v2, %v3719_v12  ;;  %v3088_v48 = vadd.f32 %v3740_v8, %v3047_v42  ;;  %v3743_v14 = vadd.f32 %v3742_v27, %v3741_v13 }
 0x91a   : > { %v3050_v49 = vadd.f32 %v3721_v5, %v3009_v43 }
 0x91c   : > { %v3091_v52 = vadd.f32 %v3743_v14, %v3050_v49 }
 0x931   : > { %v3760_v25 = vpop.f32.mrf.mxu0 }
 0x932   : > { %v3782_v30 = vpop.f32.mrf.mxu1 }
 0x933   : > { %v3761_v32 = vpop.f32.mrf.mxu0 }
 0x934   : > { %v3783_v39 = vpop.f32.mrf.mxu1  ;;  %v3762_v44 = vadd.f32 %v3761_v32, %v3760_v25 }
 0x935   : > { %v3763_v40 = vpop.f32.mrf.mxu0  ;;  %v3784_v58 = vadd.f32 %v3783_v39, %v3782_v30 }
 0x936   : > { %v3785_v4 = vpop.f32.mrf.mxu1  ;;  %v3129_v50 = vadd.f32 %v3762_v44, %v3088_v48 }
 0x937   : > { %v3764_v45 = vpop.f32.mrf.mxu0 }
 0x938   : > { %v3765_v15 = vadd.f32 %v3764_v45, %v3763_v40  ;;  %v3786_v7 = vpop.f32.mrf.mxu1  ;;  %v3170_v55 = vadd.f32 %v3784_v58, %v3129_v50  ;;  %v3295_v40 = vrot.slane %v4585_v17, %v4399_v46 }
 0x939   : > { %v3787_v37 = vadd.f32 %v3786_v7, %v3785_v4 }
 0x93a   : > { %v3132_v19 = vadd.f32 %v3765_v15, %v3091_v52 }
 0x93c   : > { %v3173_v59 = vadd.f32 %v3787_v37, %v3132_v19 }
 0x951   : > { %v3804_v51 = vpop.f32.mrf.mxu0 }
 0x952   : > { %v3826_v53 = vpop.f32.mrf.mxu1 }
 0x953   : > { %v3805_v54 = vpop.f32.mrf.mxu0 }
 0x954   : > { %v3806_v16 = vadd.f32 %v3805_v54, %v3804_v51  ;;  %v3827_v26 = vpop.f32.mrf.mxu1 }
 0x955   : > { %v3807_v56 = vpop.f32.mrf.mxu0  ;;  %v3828_v57 = vadd.f32 %v3827_v26, %v3826_v53 }
 0x956   : > { %v3211_v18 = vadd.f32 %v3806_v16, %v3170_v55  ;;  %v3829_v33 = vpop.f32.mrf.mxu1 }
 0x957   : > { %v3808_v3 = vpop.f32.mrf.mxu0 }
 0x958   : > { %v3252_v24 = vadd.f32 %v3828_v57, %v3211_v18  ;;  %v3809_v61 = vadd.f32 %v3808_v3, %v3807_v56  ;;  %v3830_v63 = vpop.f32.mrf.mxu1 }
 0x959   : > { %v3831_v0 = vadd.f32 %v3830_v63, %v3829_v33 }
 0x95a   : > { %v3214_v60 = vadd.f32 %v3809_v61, %v3173_v59  ;;  %v3258_v62 = vadd.f32 %v3252_v24, %v4318_v34 }
 0x95c   : > { %v3255_v1 = vadd.f32 %v3831_v0, %v3214_v60  ;;  %v3260_v9 = vsel %vm416_vm2, %v3258_v62, 0.0 }
 0x95d   : > { %3261 = vadd.xlane.f32.xlu1 %v3260_v9 }
 0x95e   : > { %v3259_v10 = vadd.f32 %v3255_v1, %v4320_v35 }
 0x960   : > { %v3263_v11 = vsel %vm416_vm2, %v3259_v10, 0.0 }
 0x961   : > { %3264 = vadd.xlane.f32.xlu0 %v3263_v11 }
 0x9e6   : > { %v3262_v12 = vpop.xlane.xlu1 %3261 }
 0x9e7   : > { %v3266_v13 = vmul.f32 0.03125, %v3262_v12 }
 0x9e9   : > { %v3268_v2 = vsub.f32 %v3258_v62, %v3266_v13 }
 0x9ea   : > { %v3265_v21 = vpop.xlane.xlu0 %3264 }
 0x9eb   : > { %v3267_v22 = vmul.f32 0.03125, %v3265_v21  ;;  %v3270_v25 = vmul.f32 %v3268_v2, %v3268_v2 }
 0x9ed   : > { %v3269_v27 = vsub.f32 %v3259_v10, %v3267_v22  ;;  %v3272_v28 = vsel %vm416_vm2, %v3270_v25, 0.0 }
 0x9ee   : > { %3273 = vadd.xlane.f32.xlu1 %v3272_v28 }
 0x9ef   : > { %v3271_v34 = vmul.f32 %v3269_v27, %v3269_v27 }
 0x9f1   : > { %v3275_v29 = vsel %vm416_vm2, %v3271_v34, 0.0 }
 0x9f2   : > { %3276 = vadd.xlane.f32.xlu0 %v3275_v29 }
 0xa77   : > { %v3274_v30 = vpop.xlane.xlu1 %3273 }
 0xa78   : > { %v3278_v32 = vmul.f32 0.03125, %v3274_v30 }
 0xa7a   : > { %v3280_v35 = vadd.f32 1e-05, %v3278_v32 }
 0xa7b   : > { %v3277_v36 = vpop.xlane.xlu0 %3276 }
 0xa7c   : > { %4061 = vrsqrt.f32 %v3280_v35  ;;  %v3279_v31 = vmul.f32 0.03125, %v3277_v36 }
 0xa7e   : > { %v3281_v47 = vadd.f32 1e-05, %v3279_v31 }
 0xa80   : > { %4063 = vrsqrt.f32 %v3281_v47 }
 0xa89   : > { %v4062_v39 = vpop.eup %4061 }
 0xa8a   : > { %v3284_v41 = vmul.f32 %v4062_v39, %v3268_v2 }
 0xa8c   : > { %v3290_v42 = vmul.f32 %v3289_v38, %v3284_v41 }
 0xa8d   : > { %v4064_v5 = vpop.eup %4063 }
 0xa8e   : > { %v3296_v43 = vadd.f32 %v3295_v40, %v3290_v42  ;;  %v3285_v8 = vmul.f32 %v4064_v5, %v3269_v27 }
 0xa90   : > { %3298 = vst.msk [vmem:[#allocation2] sm:$0xff] %vm416_vm2, %v3296_v43  ;;  %v3291_v44 = vmul.f32 %v3289_v38, %v3285_v8  ;;  %3303 = sbr.rel (%p3628_p5) target bundleno = 3022 (0xbce), region = 60 }
 0xa92   : > { %v3297_v4 = vadd.f32 %v3295_v40, %v3291_v44 }
 0xa94   : > { %3299 = vst.msk [vmem:[#allocation2 + $0x8] sm:$0xff] %vm416_vm2, %v3297_v4 }
 0xa95   : > { %v3305_v6 = vsel %vm416_vm2, %v3296_v43, 0.0  ;;  %v3308_v45 = vsel %vm416_vm2, %v3297_v4, 0.0  ;;  %v3304_v26 = vld [vmem:[%s4629_s7] sm:$0x3] }
 0xa96   : > { %3306 = vadd.xlane.f32.xlu0 %v3305_v6  ;;  %v3334_v56 = vrot.slane %v3304_v26, %v4306_v20  ;;  %v3340_v57 = vrot.slane %v3304_v26, %v4311_v23 }
 0xa9a   : > { %3309 = vadd.xlane.f32.xlu0 %v3308_v45 }
 0xb1f   : > { %v3307_v46 = vpop.xlane.xlu0 %3306 }
 0xb20   : > { %v3311_v17 = vmul.f32 0.03125, %v3307_v46 }
 0xb22   : > { %v3313_v48 = vsub.f32 %v3296_v43, %v3311_v17 }
 0xb23   : > { %v3310_v49 = vpop.xlane.xlu0 %3309 }
 0xb24   : > { %v3312_v14 = vmul.f32 0.03125, %v3310_v49  ;;  %v3315_v50 = vmul.f32 %v3313_v48, %v3313_v48 }
 0xb26   : > { %v3314_v15 = vsub.f32 %v3297_v4, %v3312_v14  ;;  %v3317_v7 = vsel %vm416_vm2, %v3315_v50, 0.0 }
 0xb27   : > { %3318 = vadd.xlane.f32.xlu1 %v3317_v7 }
 0xb28   : > { %v3316_v51 = vmul.f32 %v3314_v15, %v3314_v15 }
 0xb2a   : > { %v3320_v52 = vsel %vm416_vm2, %v3316_v51, 0.0 }
 0xb2b   : > { %3321 = vadd.xlane.f32.xlu1 %v3320_v52 }
 0xbb0   : > { %v3319_v58 = vpop.xlane.xlu1 %3318 }
 0xbb1   : > { %v3323_v53 = vmul.f32 0.03125, %v3319_v58 }
 0xbb3   : > { %v3325_v54 = vadd.f32 1e-05, %v3323_v53 }
 0xbb4   : > { %v3322_v55 = vpop.xlane.xlu1 %3321 }
 0xbb5   : > { %4066 = vrsqrt.f32 %v3325_v54  ;;  %v3324_v19 = vmul.f32 0.03125, %v3322_v55 }
 0xbb7   : > { %v3326_v16 = vadd.f32 1e-05, %v3324_v19 }
 0xbb9   : > { %4068 = vrsqrt.f32 %v3326_v16 }
 0xbc2   : > { %v4067_v37 = vpop.eup %4066 }
 0xbc3   : > { %v3329_v18 = vmul.f32 %v4067_v37, %v3313_v48 }
 0xbc5   : > { %v3335_v33 = vmul.f32 %v3334_v56, %v3329_v18 }
 0xbc6   : > { %v4069_v3 = vpop.eup %4068 }
 0xbc7   : > { %v3341_v59 = vadd.f32 %v3340_v57, %v3335_v33  ;;  %v3330_v24 = vmul.f32 %v4069_v3, %v3314_v15 }
 0xbc9   : > { %3343 = vst.msk [vmem:[%s4630_s8] sm:$0xff] %vm416_vm2, %v3341_v59  ;;  %v3336_v61 = vmul.f32 %v3334_v56, %v3330_v24 }
 0xbcb   : > { %v3342_v63 = vadd.f32 %v3340_v57, %v3336_v61 }
 0xbcd   : > { %3344 = vst.msk [vmem:[%s4630_s8 + $0x8] sm:$0xff] %vm416_vm2, %v3342_v63 }
 0xbce PF: > { %s18_s27 = sadd.s32 1, %s4076_s27  }
 0xbcf   : > { %p15_p6 = scmp.ge.s32.totalorder %s18_s27, 4  }
 0xbd1   :  { %17 = sbr.rel (!%p15_p6) target bundleno = 1 (0x1), region = 101 }

// kernel: dual_branch_forward.7
= control target key start
LH: loop header
LB: loop body
LE: loop exit
PB: predicated region body
PF: predicated region fallthrough
CT: control target
= control target key end

     0   :  { %s5378_s21 = smov 0   ;;  %s6032_s0 = inlined_call_operand.vmem [shape: f32[12,32], index: 0, kind: input, shape index: {}]   ;;  %s6033_s1 = inlined_call_operand.vmem [shape: f32[16,32], index: 1, kind: input, shape index: {}]   ;;  %s6034_s2 = inlined_call_operand.vmem [shape: f32[2,6,8], index: 2, kind: input, shape index: {}]   ;;  %s6035_s3 = inlined_call_operand.vmem [shape: bf16[2,32,128], index: 3, kind: input, shape index: {}]   ;;  %s6036_s4 = inlined_call_operand.vmem [shape: f32[2,1,128], index: 4, kind: input, shape index: {}]   ;;  %s6037_s5 = inlined_call_operand.vmem [shape: bf16[2,32,128], index: 5, kind: input, shape index: {}]   ;;  %s6038_s6 = inlined_call_operand.vmem [shape: f32[2,1,128], index: 6, kind: input, shape index: {}]   ;;  %s6039_s7 = inlined_call_operand.vmem [shape: bf16[2,32,2048], index: 7, kind: input, shape index: {}]   ;;  %s6040_s8 = inlined_call_operand.vmem [shape: f32[2,1,2048], index: 8, kind: input, shape index: {}]   ;;  %s6041_s9 = inlined_call_operand.vmem [shape: bf16[2,2048,32], index: 9, kind: input, shape index: {}]   ;;  %s6042_s10 = inlined_call_operand.vmem [shape: f32[2,7,32], index: 10, kind: input, shape index: {}]   ;;  %s6043_s11 = inlined_call_operand.vmem [shape: f32[2,32], index: 11, kind: input, shape index: {}]   ;;  %s6044_s12 = inlined_call_operand.vmem [shape: f32[12,32], index: 12, kind: output, shape index: {}]  }
   0x1   :  { %6047 = sst [smem:[#allocation4_spill]] %s6035_s3 }
   0x2   :  { %6048 = sst [smem:[#allocation5_spill]] %s6044_s12 }
   0x3 LB: > { %6049 = sst [smem:[#allocation3_spill]] %s5301_s21  ;;  %s5384_s22 = sadd.s32 4294967295, %s5301_s21   ;;  %s5301_s21 = sphi %s5378_s21, %s22_s21  }
   0x4   : > { %p4516_p0 = scmp.ge.s32.totalorder %s5301_s21, 1  ;;  %p421_p1 = scmp.lt.s32.totalorder %s5301_s21, 3 }
   0x6   : > { %p422_p2 = pnand %p4516_p0, %p421_p1 }
   0x7   : > { %p487_p3 = scmp.lt.s32.totalorder (!%p422_p2), %s5384_s22, 1  ;;  %s6050_s3 = sld [smem:[#allocation4_spill]] (!%p422_p2) }
   0x8   : > { %425 = sbr.rel (%p422_p2) target bundleno = 4531 (0x11b3), region = 68  ;;  %p4527_p4 = scmp.ne.s32.totalorder (!%p422_p2), %s5384_s22, 0 }
   0xd   : > { %s5390_s23 = scalar_select %p487_p3, %s5384_s22, 1 }
   0xf   : > { %s4739_s24 = sshll.u32 %s5390_s23, 4  ;;  %s4741_s19 = sshll.u32 %s5390_s23, 8 }
  0x10   : > { %s491_s30 = scalar_lea.vmem %s6050_s3, %s4739_s24  ;;  %s5403_s15 = scalar_lea.vmem %s6037_s5, %s4739_s24 }
  0x11   : > { %s5413_s12 = scalar_lea.vmem %s6039_s7, %s4741_s19  ;;  %s5418_s28 = scalar_lea.vmem %s6040_s8, %s4739_s24 }
  0x12   : > { %s4742_s29 = sshll.u32 %s5390_s23, 10  ;;  %s4526_s27 = sshll.u32 %s5390_s23, 3 }
  0x13   : > { %s5425_s3 = scalar_lea.vmem %s6041_s9, %s4742_s29  ;;  %s5430_s18 = scalar_lea.vmem %s6042_s10, %s4526_s27 }
  0x14   : > { %525 = sbr.rel (%p4527_p4) target bundleno = 28 (0x1c), region = 72 }
  0x19   : > { %v526_v0 = vld [vmem:[%s6032_s0] sm:$0xff]  ;;  %vm528_vm0 = vcmask 261120   ;;  %v527_v1 = vld [vmem:[%s6032_s0 + $0x8] sm:$0xf]  ;;  %vm530_vm1 = vcmask 257024  }
  0x1a   : > { %529 = vst.msk [vmem:[#allocation2] sm:$0xff] %vm528_vm0, %v526_v0 }
  0x1b   : > { %531 = vst.msk [vmem:[#allocation2 + $0x8] sm:$0xf] %vm530_vm1, %v527_v1 }
  0x1c PF: > { %v5439_v2 = vld [vmem:[%s491_s30 + $0x8] sm:$0xff]   ;;  %v5303_v3 = vmov 0.0   ;;  %v5444_v4 = vld [vmem:[%s491_s30] sm:$0xff]   ;;  %vm5304_vm2 = vmmov 0   ;;  %vm566_vm3 = vcmask 261120   ;;  %s6051_s25 = scalar_lea.vmem %s6036_s4, %s5390_s23  ;;  %s5305_s26 = smov 64  }
  0x1d   : > { %4966 = vmatprep.subr.bf16.mxu0 %v5303_v3  ;;  %4974 = vmatprep.subr.mxu1 %v5303_v3  ;;  %v5467_v8 = vld [vmem:[%s6051_s25] ss:$0 sm:$0xff]  ;;  %s5306_s29 = smov 96   ;;  %s5307_s13 = smov 80   ;;  %vm954_vm4 = vcmask 1041408   ;;  %vm614_vm5 = vcmask 130048  }
  0x1e   : > { %4967 = vmatpush3.bf16.msra.mxu0 %v5439_v2  ;;  %4970 = vmatprep.mubr.msk.bf16.mxu0 %vm5304_vm2, %v5303_v3  ;;  %s5308_s14 = smov 112   ;;  %vm706_vm6 = vcmask 1045504   ;;  %vm690_vm7 = vcmask 46080   ;;  %s5309_s16 = smov 48   ;;  %vm702_vm8 = vcmask 48128   ;;  %vm1358_vm9 = vcmask 257024  }
  0x1f   : > { %4968 = vmatprep.subr.bf16.mxu0 %v5303_v3  ;;  %4976 = vmatprep.mubr.msk.f32.mxu1 %vm5304_vm2, %v5303_v3  ;;  %s5310_s17 = smov 32   ;;  %s5311_s21 = smov 16   ;;  %vm1591_vm10 = vcmask 62464   ;;  %vm1604_vm11 = vcmask 64512  }
  0x20   : > { %s6052_s24 = scalar_lea.vmem %s6038_s6, %s5390_s23  ;;  %p4736_p5 = scmp.ne.s32.totalorder %s5384_s22, 1 }
  0x21   : > { %v5448_v5 = vld [vmem:[#allocation2] sm:$0xff] }
  0x22   : > { %v5450_v6 = vld [vmem:[#allocation2 + $0x8] sm:$0xf]  ;;  %4969 = vmatpush3.bf16.msra.mxu0 %v5444_v4 }
  0x23   : > { %v547_v7 = vpack.c.bf16 %v5450_v6, %v5448_v5  ;;  %4989 = vmatprep.subr.mxu0 %v5303_v3 }
  0x25   : > { %4971 = vmatmul.mubr.msk.bf16.vlgmr.msra.gmra.mxu0 %vm566_vm3, %v547_v7 }
  0x26   : > { %4991 = vmatprep.mubr.msk.f32.mxu0 %vm5304_vm2, %v5303_v3 }
  0xe5   : > { %v604_v9 = vpop.f32.mrf.mxu0 }
  0xe6   : > { %v605_v10 = vadd.f32 %v5467_v8, %v604_v9 }
  0xe7   : > { %v4972_v11 = vpop.f32.mrf.mxu0 }
  0xe8   : > { %700 = vrot.lane.b32.xlu1 %v605_v10, %s5305_s26  ;;  %612 = vrot.lane.b32.xlu0 %v605_v10, %s5306_s29  ;;  %v955_v16 = vrot.slane %v605_v10, 6 }
  0xe9   : > { %v607_v12 = vpop.f32.mrf.mxu0 }
  0xea   : > { %v608_v13 = vadd.f32 %v5467_v8, %v607_v12 }
  0xeb   : > { %v4973_v14 = vpop.f32.mrf.mxu0 }
  0xec   : > { %783 = vrot.lane.b32.xlu1 %v605_v10, %s5307_s13  ;;  %v956_v15 = vrot.slane %v608_v13, 6 }
  0xee   : > { %v5476_v17 = vsel %vm954_vm4, %v955_v16, %v956_v15 }
  0xf0   : > { %781 = vrot.lane.b32.xlu1 %v605_v10, %s5308_s14 }
  0xf4   : > { %958 = vrot.lane.b32.xlu1 %v5476_v17, %s5306_s29 }
  0xf8   : > { %1125 = vrot.lane.b32.xlu1 %v5476_v17, %s5307_s13 }
  0xfc   : > { %1123 = vrot.lane.b32.xlu1 %v5476_v17, %s5308_s14 }
 0x15a   : > { %v613_v18 = vpop.permute.xlu0 %612  ;;  %v701_v19 = vpop.permute.xlu1 %700 }
 0x15b   : > { %4975 = vmatpush3.xpose.msk.msra.mxu1 %vm614_vm5, %v613_v18 }
 0x15c   : > { %4979 = vmatprep.subr.mxu1 %v5303_v3 }
 0x15e   : > { %4977 = vmatmul.mubr.msk.f32.vlgmr.msra.gmra.mxu1 %vm614_vm5, %v605_v10  ;;  %v784_v28 = vpop.permute.xlu1 %783 }
 0x15f   : > { %4980 = vmatpush3.msk.msra.mxu1 %vm706_vm6, %v701_v19  ;;  %4981 = vmatprep.mubr.msk.f32.mxu1 %vm5304_vm2, %v5303_v3 }
 0x160   : > { %4984 = vmatprep.subr.mxu1 %v5303_v3 }
 0x162   : > { %v782_v29 = vpop.permute.xlu1 %781 }
 0x166   : > { %v959_v31 = vpop.permute.xlu1 %958 }
 0x16a   : > { %v1126_v32 = vpop.permute.xlu1 %1125 }
 0x16e   : > { %v1124_v33 = vpop.permute.xlu1 %1123 }
 0x21e   : > { %v685_v20 = vpop.f32.mrf.mxu1 }
 0x21f   : > { %v689_v21 = vmul.f32 0.25, %v685_v20 }
 0x220   : > { %v4978_v22 = vpop.f32.mrf.mxu1 }
 0x221   : > { %v691_v23 = vsel %vm690_vm7, %v689_v21, -inf }
 0x222   : > { %692 = vmax.xlane.f32.xlu0 %v691_v23 }
 0x238   : > { %869 = vrot.lane.b32.xlu0 %v605_v10, %s5309_s16 }
 0x2ab   : > { %v693_v24 = vpop.xlane.xlu0 %692 }
 0x2ac   : > { %v694_v25 = vsub.f32 %v689_v21, %v693_v24 }
 0x2ae   : > { %v695_v26 = vmul.f32 1.442695, %v694_v25 }
 0x2af   : > { %v870_v27 = vpop.permute.xlu0 %869 }
 0x2b0   : > { %5246 = vpow2.f32 %v695_v26  ;;  %4990 = vmatpush3.msk.msra.mxu0 %vm706_vm6, %v870_v27 }
 0x2b1   : > { %4999 = vmatprep.subr.mxu0 %v5303_v3 }
 0x2bd   : > { %v5495_v30 = vpop.eup %5246 }
 0x2be   : > { %4982 = vmatmul.mubr.msk.f32.vlgmr.msra.gmra.mxu1 %vm702_vm8, %v5495_v30  ;;  %v697_v1 = vsel %vm690_vm7, %v5495_v30, 0.0 }
 0x2bf   : > { %4985 = vmatpush3.xpose.msk.msra.mxu1 %vm614_vm5, %v784_v28  ;;  %4986 = vmatprep.mubr.msk.f32.mxu1 %vm5304_vm2, %v5303_v3 }
 0x2c0   : > { %4994 = vmatprep.subr.mxu1 %v5303_v3 }
 0x2c2   : > { %4987 = vmatmul.mubr.msk.f32.vlgmr.msra.gmra.mxu1 %vm614_vm5, %v782_v29 }
 0x2c3   : > { %4995 = vmatpush3.xpose.msk.msra.mxu1 %vm614_vm5, %v959_v31  ;;  %4996 = vmatprep.mubr.msk.f32.mxu1 %vm5304_vm2, %v5303_v3 }
 0x2c4   : > { %5004 = vmatprep.subr.mxu1 %v5303_v3 }
 0x2c6   : > { %4997 = vmatmul.mubr.msk.f32.vlgmr.msra.gmra.mxu1 %vm614_vm5, %v5476_v17 }
 0x2c7   : > { %5005 = vmatpush3.xpose.msk.msra.mxu1 %vm614_vm5, %v1126_v32  ;;  %5006 = vmatprep.mubr.msk.f32.mxu1 %vm5304_vm2, %v5303_v3 }
 0x2c8   : > { %5014 = vmatprep.subr.bf16.mxu1 %v5303_v3 }
 0x2ca   : > { %5007 = vmatmul.mubr.msk.f32.vlgmr.msra.gmra.mxu1 %vm614_vm5, %v1124_v33 }
 0x2cb   : > { %5018 = vmatprep.mubr.msk.bf16.mxu1 %vm5304_vm2, %v5303_v3 }
 0x37e   : > { %v5517_v34 = vpop.f32.mrf.mxu1 }
 0x380   : > { %v4983_v35 = vpop.f32.mrf.mxu1 }
 0x382   : > { %v855_v36 = vpop.f32.mrf.mxu1 }
 0x383   : > { %v859_v37 = vmul.f32 0.25, %v855_v36 }
 0x384   : > { %v4988_v38 = vpop.f32.mrf.mxu1 }
 0x385   : > { %v860_v39 = vsel %vm690_vm7, %v859_v37, -inf }
 0x386   : > { %861 = vmax.xlane.f32.xlu1 %v860_v39  ;;  %v1030_v40 = vpop.f32.mrf.mxu1 }
 0x387   : > { %v1034_v41 = vmul.f32 0.25, %v1030_v40 }
 0x388   : > { %v4998_v42 = vpop.f32.mrf.mxu1 }
 0x389   : > { %v1035_v43 = vsel %vm690_vm7, %v1034_v41, -inf }
 0x38a   : > { %1036 = vmax.xlane.f32.xlu0 %v1035_v43  ;;  %v1197_v44 = vpop.f32.mrf.mxu1 }
 0x38b   : > { %v1201_v45 = vmul.f32 0.25, %v1197_v44 }
 0x38c   : > { %v5008_v46 = vpop.f32.mrf.mxu1 }
 0x38d   : > { %v1202_v47 = vsel %vm690_vm7, %v1201_v45, -inf }
 0x38e   : > { %1203 = vmax.xlane.f32.xlu0 %v1202_v47 }
 0x397   : > { %1044 = vrot.lane.b32.xlu1 %v5476_v17, %s5305_s26 }
 0x3a4   : > { %1211 = vrot.lane.b32.xlu0 %v5476_v17, %s5309_s16 }
 0x40f   : > { %v862_v48 = vpop.xlane.xlu1 %861 }
 0x410   : > { %v863_v49 = vsub.f32 %v859_v37, %v862_v48 }
 0x412   : > { %v864_v50 = vmul.f32 1.442695, %v863_v49 }
 0x413   : > { %v1037_v51 = vpop.xlane.xlu0 %1036  ;;  %v1045_v58 = vpop.permute.xlu1 %1044 }
 0x414   : > { %5248 = vpow2.f32 %v864_v50  ;;  %v1038_v52 = vsub.f32 %v1034_v41, %v1037_v51 }
 0x416   : > { %v1039_v53 = vmul.f32 1.442695, %v1038_v52 }
 0x417   : > { %v1204_v54 = vpop.xlane.xlu0 %1203 }
 0x418   : > { %5250 = vpow2.f32 %v1039_v53  ;;  %v1205_v55 = vsub.f32 %v1201_v45, %v1204_v54  ;;  %v5565_v45 = vld [vmem:[%s5403_s15 + $0x8] sm:$0xff]  }
 0x41a   : > { %v1206_v56 = vmul.f32 1.442695, %v1205_v55 }
 0x41b   : > { %v1212_v61 = vpop.permute.xlu0 %1211 }
 0x41c   : > { %5252 = vpow2.f32 %v1206_v56  ;;  %v5586_v56 = vld [vmem:[%s6052_s24] ss:$0 sm:$0xff] }
 0x421   : > { %v5249_v57 = vpop.eup %5248 }
 0x422   : > { %4992 = vmatmul.mubr.msk.f32.vlgmr.msra.gmra.mxu0 %vm702_vm8, %v5249_v57  ;;  %v866_v59 = vsel %vm690_vm7, %v5249_v57, 0.0 }
 0x423   : > { %5000 = vmatpush3.msk.msra.mxu0 %vm706_vm6, %v1045_v58  ;;  %867 = vadd.xlane.f32.xlu1 %v866_v59 }
 0x424   : > { %5001 = vmatprep.mubr.msk.f32.mxu0 %vm5304_vm2, %v5303_v3  ;;  %5009 = vmatprep.subr.mxu0 %v5303_v3 }
 0x425   : > { %v5251_v60 = vpop.eup %5250 }
 0x426   : > { %5002 = vmatmul.mubr.msk.f32.vlgmr.msra.gmra.mxu0 %vm702_vm8, %v5251_v60  ;;  %v1041_v0 = vsel %vm690_vm7, %v5251_v60, 0.0 }
 0x427   : > { %5010 = vmatpush3.msk.msra.mxu0 %vm706_vm6, %v1212_v61  ;;  %5011 = vmatprep.mubr.msk.f32.mxu0 %vm5304_vm2, %v5303_v3 }
 0x428   : > { %5022 = vmatprep.subr.bf16.mxu0 %v5303_v3 }
 0x429   : > { %v5253_v62 = vpop.eup %5252 }
 0x42a   : > { %5012 = vmatmul.mubr.msk.f32.vlgmr.msra.gmra.mxu0 %vm702_vm8, %v5253_v62  ;;  %v1208_v63 = vsel %vm690_vm7, %v5253_v62, 0.0  ;;  %v534_v62 = vld [vmem:[%s6033_s1] sm:$0xff] }
 0x42b   : > { %1209 = vadd.xlane.f32.xlu0 %v1208_v63  ;;  %5026 = vmatprep.mubr.msk.bf16.mxu0 %vm5304_vm2, %v5303_v3  ;;  %v535_v63 = vld [vmem:[%s6033_s1 + $0x8] sm:$0xff] }
 0x42c   : > { %5023 = vmatpush3.bf16.msra.mxu0 %v5565_v45 }
 0x42d   : > { %5024 = vmatprep.subr.bf16.mxu0 %v5303_v3 }
 0x42f   : > { %1042 = vadd.xlane.f32.xlu0 %v1041_v0 }
 0x433   : > { %698 = vadd.xlane.f32.xlu0 %v697_v1  ;;  %v1383_v1 = vlaneseq }
 0x449   : > { %1302 = vrot.lane.b32.xlu0 %v5439_v2, %s5310_s17 }
 0x44d   : > { %1300 = vrot.lane.b32.xlu0 %v5444_v4, %s5310_s17 }
 0x4ac   : > { %v868_v10 = vpop.xlane.xlu1 %867 }
 0x4b4   : > { %v1210_v7 = vpop.xlane.xlu0 %1209 }
 0x4b8   : > { %v1043_v9 = vpop.xlane.xlu0 %1042 }
 0x4b9   : > { %5254 = vrcp.f32 %v1043_v9  ;;  %v1458_v9 = vpack.c.bf16 %v535_v63, %v534_v62 }
 0x4ba   : > { %5256 = vrcp.f32 %v868_v10  ;;  %v5597_v10 = vshrl.u32 %v1383_v1, 7 }
 0x4bb   : > { %5258 = vrcp.f32 %v1210_v7 }
 0x4bc   : > { %v699_v11 = vpop.xlane.xlu0 %698 }
 0x4bd   : > { %5260 = vrcp.f32 %v699_v11  ;;  %v5603_v11 = vsub.s32 0, %v5597_v10 }
 0x4c0   : > { %v1303_v13 = vpop.permute.xlu0 %1302 }
 0x4c1   : > { %5015 = vmatpush3.bf16.msra.mxu1 %v1303_v13 }
 0x4c2   : > { %5016 = vmatprep.subr.bf16.mxu1 %v5303_v3 }
 0x4c4   : > { %v1301_v2 = vpop.permute.xlu0 %1300 }
 0x4c5   : > { %5017 = vmatpush3.bf16.msra.mxu1 %v1301_v2 }
 0x4c6   : > { %v5255_v15 = vpop.eup %5254  ;;  %5030 = vmatprep.subr.bf16.mxu1 %v5303_v3 }
 0x4c7   : > { %v5257_v4 = vpop.eup %5256 }
 0x4c8   : > { %v5259_v19 = vpop.eup %5258 }
 0x4ca   : > { %v5261_v25 = vpop.eup %5260 }
 0x4cb   : > { %v780_v29 = vmul.f32 %v5261_v25, %v5517_v34 }
 0x4e2   : > { %v942_v12 = vpop.f32.mrf.mxu0 }
 0x4e3   : > { %v947_v21 = vmul.f32 %v5257_v4, %v942_v12  ;;  %v5606_v12 = vld [vmem:[%s5430_s18] sm:$0x7f] }
 0x4e4   : > { %v4993_v14 = vpop.f32.mrf.mxu0 }
 0x4e6   : > { %v1117_v16 = vpop.f32.mrf.mxu0 }
 0x4e7   : > { %v1122_v17 = vmul.f32 %v5255_v15, %v1117_v16  ;;  %v1386_v15 = vrot.slane %v5606_v12, %v5603_v11  ;;  %v5611_v16 = vsub.s32 1, %v5597_v10 }
 0x4e8   : > { %v5003_v18 = vpop.f32.mrf.mxu0 }
 0x4e9   : > { %v1392_v4 = vrot.slane %v5606_v12, %v5611_v16 }
 0x4ea   : > { %v1284_v20 = vpop.f32.mrf.mxu0 }
 0x4eb   : > { %v1289_v22 = vmul.f32 %v5259_v19, %v1284_v20 }
 0x4ec   : > { %v5013_v23 = vpop.f32.mrf.mxu0 }
 0x4ed   : > { %v5104_v24 = vpack.i.bf16 %v947_v21, %v1289_v22 }
 0x4ef   : > { %5105 = vrot.lane.b32.xlu1 %v5104_v24, %s5311_s21 }
 0x4f3   : > { %1306 = vrot.lane.b32.xlu1 %v5467_v8, %s5310_s17 }
 0x561   : > { %v5106_v26 = vpop.permute.xlu1 %5105 }
 0x562   : > { %v5108_v27 = vunpack.i.h.bf16 %v5106_v26  ;;  %v5107_v28 = vunpack.i.l.bf16 %v5106_v26 }
 0x564   : > { %v1294_v30 = vsel %vm614_vm5, %v1122_v17, %v5107_v28  ;;  %v952_v32 = vsel %vm614_vm5, %v780_v29, %v5108_v27 }
 0x565   : > { %v1296_v31 = vrot.slane %v1294_v30, 2  ;;  %v1307_v8 = vpop.permute.xlu1 %1306 }
 0x567   : > { %v1298_v33 = vsel %vm706_vm6, %v952_v32, %v1296_v31 }
 0x568   : > { %v1299_v35 = vpack.c.bf16 %v1296_v31, %v1298_v33 }
 0x56a   : > { %5019 = vmatmul.mubr.msk.bf16.vlgmr.msra.gmra.mxu1 %vm566_vm3, %v1299_v35 }
 0x56b   : > { %5034 = vmatprep.mubr.msk.bf16.mxu1 %vm5304_vm2, %v5303_v3 }
 0x62a   : > { %v1346_v36 = vpop.f32.mrf.mxu1 }
 0x62b   : > { %v1347_v37 = vadd.f32 %v1346_v36, %v1307_v8 }
 0x62c   : > { %v5020_v38 = vpop.f32.mrf.mxu1 }
 0x62d   : > { %v1353_v34 = vadd.f32 %v1347_v37, %v5448_v5  ;;  %v5572_v5 = vld [vmem:[%s5403_s15] sm:$0xff]  }
 0x62e   : > { %v1349_v39 = vpop.f32.mrf.mxu1  ;;  %5025 = vmatpush3.bf16.msra.mxu0 %v5572_v5 }
 0x62f   : > { %v1350_v40 = vadd.f32 %v1349_v39, %v1307_v8  ;;  %v1355_v41 = vsel %vm566_vm3, %v1353_v34, 0.0  ;;  %5038 = vmatprep.subr.mxu0 %v5303_v3 }
 0x630   : > { %1356 = vadd.xlane.f32.xlu0 %v1355_v41  ;;  %v5021_v42 = vpop.f32.mrf.mxu1 }
 0x631   : > { %v1354_v43 = vadd.f32 %v1350_v40, %v5450_v6 }
 0x633   : > { %v1359_v44 = vsel %vm1358_vm9, %v1354_v43, 0.0 }
 0x634   : > { %1360 = vadd.xlane.f32.xlu1 %v1359_v44 }
 0x645   : > { %1461 = vrot.lane.b32.xlu1 %v5565_v45, %s5306_s29 }
 0x649   : > { %1465 = vrot.lane.b32.xlu1 %v5586_v56, %s5306_s29 }
 0x6b9   : > { %v1357_v46 = vpop.xlane.xlu0 %1356 }
 0x6ba   : > { %v1363_v6 = vmul.f32 0.03125, %v1357_v46 }
 0x6bc   : > { %v1365_v47 = vsub.f32 %v1353_v34, %v1363_v6 }
 0x6bd   : > { %v1361_v48 = vpop.xlane.xlu1 %1360 }
 0x6be   : > { %v1364_v49 = vmul.f32 0.03125, %v1361_v48  ;;  %v1367_v50 = vmul.f32 %v1365_v47, %v1365_v47 }
 0x6c0   : > { %v1366_v51 = vsub.f32 %v1354_v43, %v1364_v49  ;;  %v1369_v52 = vsel %vm566_vm3, %v1367_v50, 0.0  ;;  %v1512_v43 = vld [vmem:[%s6034_s2] sm:$0x3f] }
 0x6c1   : > { %1370 = vadd.xlane.f32.xlu0 %v1369_v52  ;;  %v1462_v55 = vpop.permute.xlu1 %1461 }
 0x6c2   : > { %v1368_v53 = vmul.f32 %v1366_v51, %v1366_v51  ;;  %5031 = vmatpush3.bf16.msra.mxu1 %v1462_v55 }
 0x6c3   : > { %5032 = vmatprep.subr.bf16.mxu1 %v5303_v3 }
 0x6c4   : > { %v1372_v54 = vsel %vm1358_vm9, %v1368_v53, 0.0  ;;  %v4560_v53 = vld [vmem:[%s6034_s2 + $0x8] sm:$0x3f] }
 0x6c5   : > { %1373 = vadd.xlane.f32.xlu0 %v1372_v54  ;;  %v1466_v23 = vpop.permute.xlu1 %1465 }
 0x6db   : > { %1459 = vrot.lane.b32.xlu0 %v5572_v5, %s5306_s29 }
 0x74a   : > { %v1371_v57 = vpop.xlane.xlu0 %1370 }
 0x74b   : > { %v1375_v58 = vmul.f32 0.03125, %v1371_v57 }
 0x74d   : > { %v1377_v59 = vadd.f32 1e-05, %v1375_v58 }
 0x74e   : > { %v1374_v60 = vpop.xlane.xlu0 %1373 }
 0x74f   : > { %5262 = vrsqrt.f32 %v1377_v59  ;;  %v1376_v61 = vmul.f32 0.03125, %v1374_v60 }
 0x751   : > { %v1378_v0 = vadd.f32 1e-05, %v1376_v61 }
 0x752   : > { %v1460_v7 = vpop.permute.xlu0 %1459 }
 0x753   : > { %5264 = vrsqrt.f32 %v1378_v0  ;;  %5033 = vmatpush3.bf16.msra.mxu1 %v1460_v7 }
 0x754   : > { %5048 = vmatprep.subr.mxu1 %v5303_v3 }
 0x756   : > { %5035 = vmatmul.mubr.msk.bf16.vlgmr.msra.gmra.mxu1 %vm566_vm3, %v1458_v9 }
 0x757   : > { %5050 = vmatprep.mubr.msk.f32.mxu1 %vm5304_vm2, %v5303_v3 }
 0x75c   : > { %v5263_v13 = vpop.eup %5262 }
 0x75d   : > { %v1381_v14 = vmul.f32 %v5263_v13, %v1365_v47 }
 0x75f   : > { %v1387_v18 = vmul.f32 %v1386_v15, %v1381_v14 }
 0x760   : > { %v5265_v17 = vpop.eup %5264 }
 0x761   : > { %v1382_v2 = vmul.f32 %v5265_v17, %v1366_v51  ;;  %v5615_v20 = vadd.f32 %v1392_v4, %v1387_v18 }
 0x763   : > { %v1388_v19 = vmul.f32 %v1386_v15, %v1382_v2 }
 0x765   : > { %v5617_v21 = vadd.f32 %v1392_v4, %v1388_v19 }
 0x767   : > { %v1395_v22 = vpack.c.bf16 %v5617_v21, %v5615_v20 }
 0x769   : > { %5027 = vmatmul.mubr.msk.bf16.vlgmr.msra.gmra.mxu0 %vm566_vm3, %v1395_v22 }
 0x76a   : > { %5040 = vmatprep.mubr.msk.f32.mxu0 %vm5304_vm2, %v5303_v3 }
 0x816   : > { %v1505_v24 = vpop.f32.mrf.mxu1 }
 0x817   : > { %v5624_v25 = vadd.f32 %v1505_v24, %v1466_v23 }
 0x818   : > { %v5036_v26 = vpop.f32.mrf.mxu1 }
 0x819   : > { %1682 = vrot.lane.b32.xlu1 %v5624_v25, %s5308_s14  ;;  %5039 = vmatpush3.xpose.msk.msra.mxu0 %vm614_vm5, %v5624_v25 }
 0x81a   : > { %v1508_v27 = vpop.f32.mrf.mxu1  ;;  %5043 = vmatprep.subr.mxu0 %v5303_v3 }
 0x81b   : > { %v1509_v28 = vadd.f32 %v1508_v27, %v1466_v23 }
 0x81c   : > { %v5037_v29 = vpop.f32.mrf.mxu1 }
 0x81d   : > { %2024 = vrot.lane.b32.xlu1 %v1509_v28, %s5308_s14 }
 0x829   : > { %v1451_v30 = vpop.f32.mrf.mxu0 }
 0x82a   : > { %v1452_v31 = vadd.f32 %v5586_v56, %v1451_v30 }
 0x82b   : > { %v5028_v32 = vpop.f32.mrf.mxu0 }
 0x82c   : > { %1680 = vrot.lane.b32.xlu0 %v1452_v31, %s5308_s14  ;;  %5041 = vmatmul.mubr.msk.f32.vlgmr.msra.gmra.mxu0 %vm614_vm5, %v1452_v31  ;;  %v1855_v36 = vrot.slane %v1452_v31, 6 }
 0x82d   : > { %v1454_v33 = vpop.f32.mrf.mxu0  ;;  %5045 = vmatprep.mubr.msk.f32.mxu0 %vm5304_vm2, %v5303_v3 }
 0x82e   : > { %v1455_v35 = vadd.f32 %v5586_v56, %v1454_v33 }
 0x82f   : > { %v5029_v8 = vpop.f32.mrf.mxu0 }
 0x830   : > { %v1856_v37 = vrot.slane %v1455_v35, 6 }
 0x832   : > { %v1857_v38 = vsel %vm954_vm4, %v1855_v36, %v1856_v37 }
 0x833   : > { %2022 = vrot.lane.b32.xlu0 %v1857_v38, %s5308_s14 }
 0x88b   : > { %v1683_v34 = vpop.permute.xlu1 %1682 }
 0x88c   : > { %5049 = vmatpush3.xpose.msk.msra.mxu1 %vm614_vm5, %v1683_v34 }
 0x88d   : > { %5058 = vmatprep.subr.mxu1 %v5303_v3 }
 0x88f   : > { %v2025_v40 = vpop.permute.xlu1 %2024 }
 0x89e   : > { %v1681_v39 = vpop.permute.xlu0 %1680 }
 0x89f   : > { %5051 = vmatmul.mubr.msk.f32.vlgmr.msra.gmra.mxu1 %vm614_vm5, %v1681_v39 }
 0x8a0   : > { %5059 = vmatpush3.xpose.msk.msra.mxu1 %vm614_vm5, %v1509_v28  ;;  %5060 = vmatprep.mubr.msk.f32.mxu1 %vm5304_vm2, %v5303_v3 }
 0x8a1   : > { %5068 = vmatprep.subr.mxu1 %v5303_v3 }
 0x8a3   : > { %5061 = vmatmul.mubr.msk.f32.vlgmr.msra.gmra.mxu1 %vm614_vm5, %v1857_v38 }
 0x8a4   : > { %5069 = vmatpush3.xpose.msk.msra.mxu1 %vm614_vm5, %v2025_v40  ;;  %5070 = vmatprep.mubr.msk.f32.mxu1 %vm5304_vm2, %v5303_v3 }
 0x8a5   : > { %v2023_v41 = vpop.permute.xlu0 %2022  ;;  %5078 = vmatprep.subr.bf16.mxu1 %v5303_v3 }
 0x8a7   : > { %5071 = vmatmul.mubr.msk.f32.vlgmr.msra.gmra.mxu1 %vm614_vm5, %v2023_v41 }
 0x8a8   : > { %5082 = vmatprep.mubr.msk.bf16.mxu1 %vm5304_vm2, %v5303_v3 }
 0x8ec   : > { %v1585_v42 = vpop.f32.mrf.mxu0 }
 0x8ed   : > { %v1589_v44 = vmul.f32 0.25, %v1585_v42 }
 0x8ee   : > { %v5042_v46 = vpop.f32.mrf.mxu0 }
 0x8ef   : > { %v1590_v6 = vadd.f32 %v1589_v44, %v1512_v43 }
 0x8f1   : > { %v1592_v47 = vsel %vm1591_vm10, %v1590_v6, -inf }
 0x8f2   : > { %1593 = vmax.xlane.f32.xlu1 %v1592_v47 }
 0x903   : > { %1769 = vrot.lane.b32.xlu1 %v5624_v25, %s5307_s13 }
 0x95f   : > { %v1754_v48 = vpop.f32.mrf.mxu1 }
 0x960   : > { %v1758_v49 = vmul.f32 0.25, %v1754_v48 }
 0x961   : > { %v5052_v50 = vpop.f32.mrf.mxu1 }
 0x962   : > { %v1759_v51 = vadd.f32 %v1758_v49, %v1512_v43 }
 0x963   : > { %v1929_v52 = vpop.f32.mrf.mxu1 }
 0x964   : > { %v1933_v54 = vmul.f32 0.25, %v1929_v52  ;;  %v1760_v55 = vsel %vm1591_vm10, %v1759_v51, -inf }
 0x965   : > { %1761 = vmax.xlane.f32.xlu0 %v1760_v55  ;;  %v5062_v57 = vpop.f32.mrf.mxu1 }
 0x966   : > { %v1934_v58 = vadd.f32 %v4560_v53, %v1933_v54 }
 0x967   : > { %v2096_v59 = vpop.f32.mrf.mxu1 }
 0x968   : > { %v2100_v60 = vmul.f32 0.25, %v2096_v59  ;;  %v1935_v61 = vsel %vm1591_vm10, %v1934_v58, -inf }
 0x969   : > { %1936 = vmax.xlane.f32.xlu0 %v1935_v61  ;;  %v5072_v62 = vpop.f32.mrf.mxu1 }
 0x96a   : > { %v2101_v63 = vadd.f32 %v4560_v53, %v2100_v60 }
 0x96c   : > { %v2102_v0 = vsel %vm1591_vm10, %v2101_v63, -inf }
 0x96d   : > { %2103 = vmax.xlane.f32.xlu1 %v2102_v0 }
 0x97b   : > { %v1594_v1 = vpop.xlane.xlu1 %1593 }
 0x97c   : > { %v1595_v7 = vsub.f32 %v1590_v6, %v1594_v1 }
 0x97e   : > { %1944 = vrot.lane.b32.xlu1 %v1509_v28, %s5306_s29  ;;  %v1596_v9 = vmul.f32 1.442695, %v1595_v7 }
 0x97f   : > { %1601 = vrot.lane.b32.xlu0 %v5624_v25, %s5306_s29  ;;  %v1770_v17 = vpop.permute.xlu1 %1769 }
 0x980   : > { %5266 = vpow2.f32 %v1596_v9 }
 0x983   : > { %2111 = vrot.lane.b32.xlu0 %v1509_v28, %s5307_s13 }
 0x98d   : > { %v5267_v23 = vpop.eup %5266 }
 0x98e   : > { %v1598_v35 = vsel %vm1591_vm10, %v5267_v23, 0.0 }
 0x9ee   : > { %v1762_v13 = vpop.xlane.xlu0 %1761 }
 0x9ef   : > { %v1763_v14 = vsub.f32 %v1759_v51, %v1762_v13 }
 0x9f1   : > { %v1764_v15 = vmul.f32 1.442695, %v1763_v14 }
 0x9f2   : > { %v1937_v2 = vpop.xlane.xlu0 %1936 }
 0x9f3   : > { %5268 = vpow2.f32 %v1764_v15  ;;  %v1938_v18 = vsub.f32 %v1934_v58, %v1937_v2 }
 0x9f5   : > { %v1939_v4 = vmul.f32 1.442695, %v1938_v18 }
 0x9f6   : > { %v1602_v19 = vpop.permute.xlu0 %1601  ;;  %v2104_v22 = vpop.xlane.xlu1 %2103 }
 0x9f7   : > { %5270 = vpow2.f32 %v1939_v4  ;;  %v2105_v24 = vsub.f32 %v2101_v63, %v2104_v22  ;;  %5044 = vmatpush3.msra.mxu0 %v1602_v19 }
 0x9f8   : > { %5046 = vmatmul.mubr.msk.f32.vlgmr.msra.gmra.mxu0 %vm1604_vm11, %v5267_v23  ;;  %5053 = vmatprep.subr.mxu0 %v5303_v3 }
 0x9f9   : > { %v2106_v25 = vmul.f32 1.442695, %v2105_v24  ;;  %5054 = vmatpush3.msra.mxu0 %v1770_v17  ;;  %5055 = vmatprep.mubr.msk.f32.mxu0 %vm5304_vm2, %v5303_v3 }
 0x9fa   : > { %5063 = vmatprep.subr.mxu0 %v5303_v3  ;;  %v1945_v27 = vpop.permute.xlu1 %1944  ;;  %v2112_v30 = vpop.permute.xlu0 %2111 }
 0x9fb   : > { %5272 = vpow2.f32 %v2106_v25 }
 0xa00   : > { %v5269_v26 = vpop.eup %5268 }
 0xa01   : > { %5056 = vmatmul.mubr.msk.f32.vlgmr.msra.gmra.mxu0 %vm1604_vm11, %v5269_v26  ;;  %v1766_v28 = vsel %vm1591_vm10, %v5269_v26, 0.0 }
 0xa02   : > { %5064 = vmatpush3.msra.mxu0 %v1945_v27  ;;  %1767 = vadd.xlane.f32.xlu0 %v1766_v28  ;;  %v2309_v27 = vld [vmem:[%s5413_s12 + $0x80] sm:$0xff] }
 0xa03   : > { %5065 = vmatprep.mubr.msk.f32.mxu0 %vm5304_vm2, %v5303_v3  ;;  %5073 = vmatprep.subr.mxu0 %v5303_v3  ;;  %v2317_v28 = vld [vmem:[%s5413_s12 + $0xc0] sm:$0xff] }
 0xa04   : > { %v5271_v29 = vpop.eup %5270 }
 0xa05   : > { %5066 = vmatmul.mubr.msk.f32.vlgmr.msra.gmra.mxu0 %vm1604_vm11, %v5271_v29  ;;  %v1941_v31 = vsel %vm1591_vm10, %v5271_v29, 0.0  ;;  %v2310_v29 = vld [vmem:[%s5413_s12 + $0x88] sm:$0xff] }
 0xa06   : > { %5074 = vmatpush3.msra.mxu0 %v2112_v30  ;;  %1942 = vadd.xlane.f32.xlu0 %v1941_v31  ;;  %v4585_v30 = vcombine.high %v2309_v27, %v2317_v28  ;;  %v2318_v31 = vld [vmem:[%s5413_s12 + $0xc8] sm:$0xff] }
 0xa07   : > { %5075 = vmatprep.mubr.msk.f32.mxu0 %vm5304_vm2, %v5303_v3 }
 0xa08   : > { %v5273_v32 = vpop.eup %5272  ;;  %2584 = vmatprep.subr.bf16.mxu0 %v4585_v30 }
 0xa09   : > { %5076 = vmatmul.mubr.msk.f32.vlgmr.msra.gmra.mxu0 %vm1604_vm11, %v5273_v32  ;;  %v2108_v33 = vsel %vm1591_vm10, %v5273_v32, 0.0  ;;  %v4584_v32 = vcombine.low %v2309_v27, %v2317_v28  ;;  %v2306_v27 = vld [vmem:[%s5413_s12 + $0x68] sm:$0xff] }
 0xa0a   : > { %2109 = vadd.xlane.f32.xlu1 %v2108_v33  ;;  %v4586_v33 = vcombine.low %v2310_v29, %v2318_v31 }
 0xa0b   : > { %2585 = vmatpush1.bf16.msra.mxu0 %v4584_v32  ;;  %v2315_v32 = vld [vmem:[%s5413_s12 + $0xb0] sm:$0xff] }
 0xa0e   : > { %1599 = vadd.xlane.f32.xlu1 %v1598_v35  ;;  %v4587_v35 = vcombine.high %v2310_v29, %v2318_v31 }
 0xa1c   : > { %2201 = vrot.lane.b32.xlu0 %v5565_v45, %s5310_s17 }
 0xa20   : > { %2205 = vrot.lane.b32.xlu0 %v5586_v56, %s5310_s17 }
 0xa8b   : > { %v1768_v8 = vpop.xlane.xlu0 %1767 }
 0xa8f   : > { %v1943_v36 = vpop.xlane.xlu0 %1942 }
 0xa90   : > { %5274 = vrcp.f32 %v1943_v36  ;;  %v2301_v36 = vld [vmem:[%s5413_s12 + $0x40] sm:$0xff] }
 0xa91   : > { %5276 = vrcp.f32 %v1768_v8  ;;  %v2293_v8 = vld [vmem:[%s5413_s12] sm:$0xff] }
 0xa93   : > { %v2110_v38 = vpop.xlane.xlu1 %2109  ;;  %v2202_v40 = vpop.permute.xlu0 %2201 }
 0xa94   : > { %5278 = vrcp.f32 %v2110_v38  ;;  %5079 = vmatpush3.bf16.msra.mxu1 %v2202_v40  ;;  %v4569_v38 = vcombine.high %v2293_v8, %v2301_v36 }
 0xa95   : > { %5080 = vmatprep.subr.bf16.mxu1 %v5303_v3 }
 0xa96   : > { %2586 = vmatprep.subr.bf16.mxu0 %v4569_v38 }
 0xa97   : > { %v1600_v51 = vpop.xlane.xlu1 %1599 }
 0xa98   : > { %5280 = vrcp.f32 %v1600_v51 }
 0xa9d   : > { %v5275_v42 = vpop.eup %5274 }
 0xa9e   : > { %v5277_v46 = vpop.eup %5276 }
 0xaa1   : > { %v5279_v56 = vpop.eup %5278 }
 0xaa5   : > { %v5281_v54 = vpop.eup %5280 }
 0xab8   : > { %v1674_v37 = vpop.f32.mrf.mxu0 }
 0xab9   : > { %v1679_v55 = vmul.f32 %v5281_v54, %v1674_v37  ;;  %v2294_v37 = vld [vmem:[%s5413_s12 + $0x8] sm:$0xff]  ;;  %v5721_v54 = vsub.s32 2, %v5597_v10 }
 0xaba   : > { %v5047_v34 = vpop.f32.mrf.mxu0 }
 0xabb   : > { %v2302_v34 = vld [vmem:[%s5413_s12 + $0x48] sm:$0xff] }
 0xabc   : > { %v4570_v40 = vcombine.low %v2294_v37, %v2302_v34 }
 0xac1   : > { %v1841_v39 = vpop.f32.mrf.mxu0 }
 0xac2   : > { %v1846_v47 = vmul.f32 %v5277_v46, %v1841_v39  ;;  %v4568_v39 = vcombine.low %v2293_v8, %v2301_v36  ;;  %v2324_v8 = vld [vmem:[%s5413_s12 + $0xf8] sm:$0xff] }
 0xac3   : > { %v5057_v41 = vpop.f32.mrf.mxu0 }
 0xac4   : > { %v4571_v41 = vcombine.high %v2294_v37, %v2302_v34  ;;  %2587 = vmatpush1.bf16.msra.mxu0 %v4568_v39  ;;  %v2299_v39 = vld [vmem:[%s5413_s12 + $0x30] sm:$0xff] }
 0xac5   : > { %v2016_v43 = vpop.f32.mrf.mxu0 }
 0xac6   : > { %v2021_v45 = vmul.f32 %v5275_v42, %v2016_v43  ;;  %v2311_v42 = vld [vmem:[%s5413_s12 + $0x90] sm:$0xff] }
 0xac7   : > { %v5067_v44 = vpop.f32.mrf.mxu0  ;;  %v2319_v43 = vld [vmem:[%s5413_s12 + $0xd0] sm:$0xff] }
 0xac8   : > { %v5312_v44 = vmov 0   ;;  %v4589_v46 = vcombine.high %v2311_v42, %v2319_v43 }
 0xac9   : > { %v2183_v6 = vpop.f32.mrf.mxu0  ;;  %2604 = vmatprep.mubr.bf16.mxu0 %v5312_v44 }
 0xaca   : > { %v2188_v48 = vmul.f32 %v5279_v56, %v2183_v6  ;;  %v2320_v56 = vld [vmem:[%s5413_s12 + $0xd8] sm:$0xff]  ;;  %v4588_v6 = vcombine.low %v2311_v42, %v2319_v43  ;;  %2670 = vmatprep.subr.bf16.mxu0 %v4589_v46 }
 0xacb   : > { %v5077_v49 = vpop.f32.mrf.mxu0  ;;  %v2308_v42 = vld [vmem:[%s5413_s12 + $0x78] sm:$0xff] }
 0xacc   : > { %v5109_v50 = vpack.i.bf16 %v1846_v47, %v2188_v48 }
 0xace   : > { %5110 = vrot.lane.b32.xlu1 %v5109_v50, %s5311_s21 }
 0xad2   : > { %2199 = vrot.lane.b32.xlu1 %v5572_v5, %s5310_s17  ;;  %v2206_v5 = vpop.permute.xlu0 %2205 }
 0xb40   : > { %v5111_v52 = vpop.permute.xlu1 %5110 }
 0xb41   : > { %v5113_v3 = vunpack.i.h.bf16 %v5111_v52  ;;  %v5112_v53 = vunpack.i.l.bf16 %v5111_v52 }
 0xb43   : > { %v2193_v57 = vsel %vm614_vm5, %v2021_v45, %v5112_v53  ;;  %v1851_v60 = vsel %vm614_vm5, %v1679_v55, %v5113_v3  ;;  %v2312_v45 = vld [vmem:[%s5413_s12 + $0x98] sm:$0xff] }
 0xb44   : > { %v2195_v58 = vrot.slane %v2193_v57, 2  ;;  %v2200_v59 = vpop.permute.xlu1 %2199  ;;  %v4590_v47 = vcombine.low %v2312_v45, %v2320_v56  ;;  %v4591_v48 = vcombine.high %v2312_v45, %v2320_v56  ;;  %v2283_v57 = vrot.slane %v5606_v12, %v5721_v54 }
 0xb45   : > { %5081 = vmatpush3.bf16.msra.mxu1 %v2200_v59 }
 0xb46   : > { %v2197_v61 = vsel %vm706_vm6, %v1851_v60, %v2195_v58  ;;  %2627 = vmatprep.subr.bf16.mxu1 %v4587_v35  ;;  %v2316_v35 = vld [vmem:[%s5413_s12 + $0xb8] sm:$0xff] }
 0xb47   : > { %v2198_v62 = vpack.c.bf16 %v2195_v58, %v2197_v61  ;;  %v5726_v58 = vsub.s32 3, %v5597_v10  ;;  %v4599_v34 = vcombine.high %v2316_v35, %v2324_v8  ;;  %v4598_v45 = vcombine.low %v2316_v35, %v2324_v8 }
 0xb49   : > { %5083 = vmatmul.mubr.msk.bf16.vlgmr.msra.gmra.mxu1 %vm566_vm3, %v2198_v62  ;;  %v2289_v61 = vrot.slane %v5606_v12, %v5726_v58  ;;  %v2313_v12 = vld [vmem:[%s5413_s12 + $0xa0] sm:$0xff] }
 0xb4a   : > { %2628 = vmatpush1.bf16.msra.mxu1 %v4586_v33  ;;  %2647 = vmatprep.mubr.bf16.mxu1 %v5312_v44  ;;  %v2323_v33 = vld [vmem:[%s5413_s12 + $0xf0] sm:$0xff] }
 0xb4b   : > { %2629 = vmatprep.subr.bf16.mxu1 %v4571_v41  ;;  %v4597_v38 = vcombine.high %v2315_v32, %v2323_v33  ;;  %v2300_v41 = vld [vmem:[%s5413_s12 + $0x38] sm:$0xff]  ;;  %v4596_v43 = vcombine.low %v2315_v32, %v2323_v33 }
 0xb4c   : > { %v4583_v56 = vcombine.high %v2300_v41, %v2308_v42 }
 0xb4e   : > { %2630 = vmatpush1.bf16.msra.mxu1 %v4570_v40  ;;  %v2307_v40 = vld [vmem:[%s5413_s12 + $0x70] sm:$0xff] }
 0xb4f   : > { %2713 = vmatprep.subr.bf16.mxu1 %v4591_v48  ;;  %v4581_v46 = vcombine.high %v2299_v39, %v2307_v40  ;;  %v5118_v48 = vld [vmem:[%s5425_s3 + $0x78] sm:$0xff]  }
 0xc09   : > { %v2245_v63 = vpop.f32.mrf.mxu1 }
 0xc0a   : > { %v2246_v0 = vadd.f32 %v2245_v63, %v2206_v5 }
 0xc0b   : > { %v5084_v1 = vpop.f32.mrf.mxu1 }
 0xc0c   : > { %v2252_v7 = vadd.f32 %v2246_v0, %v5615_v20  ;;  %v2295_v0 = vld [vmem:[%s5413_s12 + $0x10] sm:$0xff] }
 0xc0d   : > { %v2248_v9 = vpop.f32.mrf.mxu1  ;;  %v2303_v1 = vld [vmem:[%s5413_s12 + $0x50] sm:$0xff] }
 0xc0e   : > { %v2249_v13 = vadd.f32 %v2248_v9, %v2206_v5  ;;  %v2254_v14 = vsel %vm566_vm3, %v2252_v7, 0.0  ;;  %v2304_v9 = vld [vmem:[%s5413_s12 + $0x58] sm:$0xff] }
 0xc0f   : > { %2255 = vadd.xlane.f32.xlu1 %v2254_v14  ;;  %v5085_v15 = vpop.f32.mrf.mxu1 }
 0xc10   : > { %v2253_v17 = vadd.f32 %v2249_v13, %v5617_v21 }
 0xc12   : > { %v2257_v2 = vsel %vm1358_vm9, %v2253_v17, 0.0 }
 0xc13   : > { %2258 = vadd.xlane.f32.xlu0 %v2257_v2 }
 0xc98   : > { %v2256_v18 = vpop.xlane.xlu1 %2255 }
 0xc99   : > { %v2260_v4 = vmul.f32 0.03125, %v2256_v18  ;;  %v2321_v18 = vld [vmem:[%s5413_s12 + $0xe0] sm:$0xff] }
 0xc9a   : > { %v4592_v28 = vcombine.low %v2313_v12, %v2321_v18 }
 0xc9b   : > { %v2262_v19 = vsub.f32 %v2252_v7, %v2260_v4  ;;  %v2296_v7 = vld [vmem:[%s5413_s12 + $0x18] sm:$0xff]  ;;  %v2314_v4 = vld [vmem:[%s5413_s12 + $0xa8] sm:$0xff] }
 0xc9c   : > { %v2259_v22 = vpop.xlane.xlu0 %2258  ;;  %v4575_v2 = vcombine.high %v2296_v7, %v2304_v9 }
 0xc9d   : > { %v2261_v20 = vmul.f32 0.03125, %v2259_v22  ;;  %v2264_v23 = vmul.f32 %v2262_v19, %v2262_v19  ;;  %v4572_v22 = vcombine.low %v2295_v0, %v2303_v1 }
 0xc9f   : > { %v2263_v24 = vsub.f32 %v2253_v17, %v2261_v20  ;;  %v2266_v25 = vsel %vm566_vm3, %v2264_v23, 0.0  ;;  %v4573_v17 = vcombine.high %v2295_v0, %v2303_v1  ;;  %v4574_v20 = vcombine.low %v2296_v7, %v2304_v9  ;;  %v5134_v0 = vld [vmem:[%s5425_s3 + $0x58] sm:$0xff]  }
 0xca0   : > { %2267 = vadd.xlane.f32.xlu0 %v2266_v25  ;;  %v4593_v23 = vcombine.high %v2313_v12, %v2321_v18  ;;  %v2297_v25 = vld [vmem:[%s5413_s12 + $0x20] sm:$0xff]  ;;  %v5135_v1 = vld [vmem:[%s5425_s3 + $0xd8] sm:$0xff]   ;;  %v5141_v12 = vld [vmem:[%s5425_s3 + $0x90] sm:$0xff]  }
 0xca1   : > { %v2265_v26 = vmul.f32 %v2263_v24, %v2263_v24  ;;  %v5136_v7 = vld [vmem:[%s5425_s3 + $0x18] sm:$0xff]   ;;  %v5142_v18 = vld [vmem:[%s5425_s3 + $0x48] sm:$0xff]  }
 0xca2   : > { %v5137_v9 = vld [vmem:[%s5425_s3 + $0x98] sm:$0xff]  }
 0xca3   : > { %v2269_v21 = vsel %vm1358_vm9, %v2265_v26, 0.0  ;;  %v2305_v26 = vld [vmem:[%s5413_s12 + $0x60] sm:$0xff] }
 0xca4   : > { %2270 = vadd.xlane.f32.xlu1 %v2269_v21  ;;  %v2298_v21 = vld [vmem:[%s5413_s12 + $0x28] sm:$0xff]  ;;  %v4577_v30 = vcombine.high %v2297_v25, %v2305_v26  ;;  %v4576_v36 = vcombine.low %v2297_v25, %v2305_v26  ;;  %v5149_v25 = vld [vmem:[%s5425_s3 + $0x80] sm:$0xff]   ;;  %v5150_v26 = vld [vmem:[%s5425_s3 + $0x178] sm:$0xff]  }
 0xca5   : > { %v4579_v31 = vcombine.high %v2298_v21, %v2306_v27  ;;  %v4578_v37 = vcombine.low %v2298_v21, %v2306_v27  ;;  %v5151_v21 = vld [vmem:[%s5425_s3 + $0x1f8] sm:$0xff]   ;;  %v5815_v27 = vld [vmem:[%s5418_s28] sm:$0xff] }
 0xca6   : > { %v2332_v32 = vrot.slane %v5815_v27, %v5603_v11  ;;  %v2340_v33 = vrot.slane %v5815_v27, %v5721_v54 }
 0xd29   : > { %v2268_v49 = vpop.xlane.xlu0 %2267 }
 0xd2a   : > { %v2272_v50 = vmul.f32 0.03125, %v2268_v49  ;;  %v5119_v49 = vld [vmem:[%s5425_s3 + $0xf8] sm:$0xff]  }
 0xd2c   : > { %v2274_v51 = vadd.f32 1e-05, %v2272_v50  ;;  %v5120_v50 = vld [vmem:[%s5425_s3 + $0x38] sm:$0xff]  }
 0xd2d   : > { %v2271_v52 = vpop.xlane.xlu1 %2270 }
 0xd2e   : > { %5282 = vrsqrt.f32 %v2274_v51  ;;  %v2273_v3 = vmul.f32 0.03125, %v2271_v52  ;;  %v5121_v51 = vld [vmem:[%s5425_s3 + $0xb8] sm:$0xff]   ;;  %v5122_v52 = vld [vmem:[%s5425_s3 + $0x70] sm:$0xff]  }
 0xd30   : > { %v2275_v53 = vadd.f32 1e-05, %v2273_v3  ;;  %v5123_v3 = vld [vmem:[%s5425_s3 + $0xf0] sm:$0xff]  }
 0xd32   : > { %5284 = vrsqrt.f32 %v2275_v53  ;;  %v5125_v53 = vld [vmem:[%s5425_s3 + $0xb0] sm:$0xff]  }
 0xd3b   : > { %v5283_v55 = vpop.eup %5282 }
 0xd3c   : > { %v2278_v59 = vmul.f32 %v5283_v55, %v2262_v19  ;;  %v2322_v19 = vld [vmem:[%s5413_s12 + $0xe8] sm:$0xff] }
 0xd3d   : > { %v4594_v29 = vcombine.low %v2314_v4, %v2322_v19  ;;  %v5126_v55 = vld [vmem:[%s5425_s3 + $0x68] sm:$0xff]  }
 0xd3e   : > { %v2284_v62 = vmul.f32 %v2283_v57, %v2278_v59  ;;  %v5128_v59 = vld [vmem:[%s5425_s3 + $0x28] sm:$0xff]  }
 0xd3f   : > { %v5285_v60 = vpop.eup %5284 }
 0xd40   : > { %v2279_v5 = vmul.f32 %v5285_v60, %v2263_v24  ;;  %v5734_v13 = vadd.f32 %v2289_v61, %v2284_v62  ;;  %v4595_v24 = vcombine.high %v2314_v4, %v2322_v19  ;;  %v5129_v60 = vld [vmem:[%s5425_s3 + $0xa8] sm:$0xff]   ;;  %v5131_v62 = vld [vmem:[%s5425_s3 + $0xe0] sm:$0xff]  }
 0xd41   : > { %v5143_v4 = vld [vmem:[%s5425_s3 + $0xc8] sm:$0xff]  }
 0xd42   : > { %v2285_v63 = vmul.f32 %v2283_v57, %v2279_v5  ;;  %v5127_v57 = vld [vmem:[%s5425_s3 + $0xe8] sm:$0xff]   ;;  %v5132_v5 = vld [vmem:[%s5425_s3 + $0x20] sm:$0xff]  }
 0xd43   : > { %v5144_v19 = vld [vmem:[%s5425_s3 + $0x8] sm:$0xff]  }
 0xd44   : > { %v5736_v14 = vadd.f32 %v2289_v61, %v2285_v63  ;;  %v5130_v61 = vld [vmem:[%s5425_s3 + $0x60] sm:$0xff]  }
 0xd45   : > { %v5133_v63 = vld [vmem:[%s5425_s3 + $0xa0] sm:$0xff]  }
 0xd46   : > { %v5740_v15 = vpack.c.bf16 %v5736_v14, %v5734_v13 }
 0xd48   : > { %4600 = vmatmul.mubr.msk.bf16.vlgmr.msra.gmra.mxu0 %vm566_vm3, %v5740_v15  ;;  %4601 = vmatmul.mubr.msk.bf16.vlgmr.msra.gmra.mxu1 %vm566_vm3, %v5740_v15 }
 0xd49   : > { %2671 = vmatpush1.bf16.msra.mxu0 %v4588_v6  ;;  %2714 = vmatpush1.bf16.msra.mxu1 %v4590_v47  ;;  %v4580_v6 = vcombine.low %v2299_v39, %v2307_v40  ;;  %v4582_v47 = vcombine.low %v2300_v41, %v2308_v42 }
 0xd4a   : > { %2672 = vmatprep.subr.bf16.mxu0 %v4573_v17  ;;  %2715 = vmatprep.subr.bf16.mxu1 %v4575_v2  ;;  %v5139_v17 = vld [vmem:[%s5425_s3 + $0xd0] sm:$0xff]  }
 0xd4b   : > { %2690 = vmatprep.mubr.bf16.mxu0 %v5312_v44  ;;  %2733 = vmatprep.mubr.bf16.mxu1 %v5312_v44  ;;  %v5140_v2 = vld [vmem:[%s5425_s3 + $0x10] sm:$0xff]  }
 0xd4d   : > { %2673 = vmatpush1.bf16.msra.mxu0 %v4572_v22  ;;  %2716 = vmatpush1.bf16.msra.mxu1 %v4574_v20  ;;  %v5145_v22 = vld [vmem:[%s5425_s3 + $0x88] sm:$0xff]   ;;  %v5146_v20 = vld [vmem:[%s5425_s3 + $0x40] sm:$0xff]  }
 0xd4e   : > { %2756 = vmatprep.subr.bf16.mxu0 %v4593_v23  ;;  %2799 = vmatprep.subr.bf16.mxu1 %v4595_v24  ;;  %v5147_v23 = vld [vmem:[%s5425_s3 + $0xc0] sm:$0xff]  }
 0xd4f   : > { %v5148_v24 = vld [vmem:[%s5425_s3] sm:$0xff]  }
 0xd50   : > { %4602 = vmatmul.mubr.msk.bf16.vlgmr.msra.gmra.mxu0 %vm566_vm3, %v5740_v15  ;;  %4603 = vmatmul.mubr.msk.bf16.vlgmr.msra.gmra.mxu1 %vm566_vm3, %v5740_v15 }
 0xd51   : > { %2757 = vmatpush1.bf16.msra.mxu0 %v4592_v28  ;;  %2800 = vmatpush1.bf16.msra.mxu1 %v4594_v29 }
 0xd52   : > { %2758 = vmatprep.subr.bf16.mxu0 %v4577_v30  ;;  %2801 = vmatprep.subr.bf16.mxu1 %v4579_v31  ;;  %v2336_v30 = vrot.slane %v5815_v27, %v5611_v16  ;;  %v2344_v31 = vrot.slane %v5815_v27, %v5726_v58 }
 0xd53   : > { %2776 = vmatprep.mubr.bf16.mxu0 %v5312_v44  ;;  %2819 = vmatprep.mubr.bf16.mxu1 %v5312_v44 }
 0xd55   : > { %2759 = vmatpush1.bf16.msra.mxu0 %v4576_v36  ;;  %2802 = vmatpush1.bf16.msra.mxu1 %v4578_v37 }
 0xd56   : > { %2842 = vmatprep.subr.bf16.mxu0 %v4597_v38  ;;  %2885 = vmatprep.subr.bf16.mxu1 %v4599_v34  ;;  %v5826_v38 = vsub.s32 5, %v5597_v10  ;;  %v2359_v34 = vsub.s32 7, %v5597_v10 }
 0xd58   : > { %4604 = vmatmul.mubr.msk.bf16.vlgmr.msra.gmra.mxu0 %vm566_vm3, %v5740_v15  ;;  %4605 = vmatmul.mubr.msk.bf16.vlgmr.msra.gmra.mxu1 %vm566_vm3, %v5740_v15 }
 0xd59   : > { %2843 = vmatpush1.bf16.msra.mxu0 %v4596_v43  ;;  %2886 = vmatpush1.bf16.msra.mxu1 %v4598_v45 }
 0xd5a   : > { %2844 = vmatprep.subr.bf16.mxu0 %v4581_v46  ;;  %2887 = vmatprep.subr.bf16.mxu1 %v4583_v56 }
 0xd5b   : > { %2862 = vmatprep.mubr.bf16.mxu0 %v5312_v44  ;;  %2905 = vmatprep.mubr.bf16.mxu1 %v5312_v44  ;;  %v5124_v44 = vld [vmem:[%s5425_s3 + $0x30] sm:$0xff]  }
 0xd5d   : > { %2845 = vmatpush1.bf16.msra.mxu0 %v4580_v6  ;;  %2888 = vmatpush1.bf16.msra.mxu1 %v4582_v47 }
 0xd5e   : > { %4790 = vmatprep.subr.bf16.mxu0 %v5118_v48  ;;  %4812 = vmatprep.subr.bf16.mxu1 %v5119_v49 }
 0xd60   : > { %4606 = vmatmul.mubr.msk.bf16.vlgmr.msra.gmra.mxu0 %vm566_vm3, %v5740_v15  ;;  %4607 = vmatmul.mubr.msk.bf16.vlgmr.msra.gmra.mxu1 %vm566_vm3, %v5740_v15  ;;  %v5138_v15 = vld [vmem:[%s5425_s3 + $0x50] sm:$0xff]  }
 0xd61   : > { %4791 = vmatpush3.bf16.msra.mxu0 %v5120_v50  ;;  %4813 = vmatpush3.bf16.msra.mxu1 %v5121_v51 }
 0xd62   : > { %4792 = vmatprep.subr.bf16.mxu0 %v5122_v52  ;;  %4814 = vmatprep.subr.bf16.mxu1 %v5123_v3  ;;  %v2352_v52 = vrot.slane %v5815_v27, %v5826_v38  ;;  %v2360_v3 = vrot.slane %v5815_v27, %v2359_v34 }
 0xd65   : > { %4793 = vmatpush3.bf16.msra.mxu0 %v5124_v44  ;;  %4815 = vmatpush3.bf16.msra.mxu1 %v5125_v53 }
 0xd66   : > { %4794 = vmatprep.subr.bf16.mxu0 %v5126_v55  ;;  %4816 = vmatprep.subr.bf16.mxu1 %v5127_v57 }
 0xd69   : > { %4795 = vmatpush3.bf16.msra.mxu0 %v5128_v59  ;;  %4817 = vmatpush3.bf16.msra.mxu1 %v5129_v60 }
 0xd6a   : > { %4796 = vmatprep.subr.bf16.mxu0 %v5130_v61  ;;  %4818 = vmatprep.subr.bf16.mxu1 %v5131_v62 }
 0xd6d   : > { %4797 = vmatpush3.bf16.msra.mxu0 %v5132_v5  ;;  %4819 = vmatpush3.bf16.msra.mxu1 %v5133_v63 }
 0xd6e   : > { %4798 = vmatprep.subr.bf16.mxu0 %v5134_v0  ;;  %4820 = vmatprep.subr.bf16.mxu1 %v5135_v1  ;;  %v5152_v0 = vld [vmem:[%s5425_s3 + $0x138] sm:$0xff]  }
 0xd6f   : > { %v5153_v1 = vld [vmem:[%s5425_s3 + $0x1b8] sm:$0xff]  }
 0xd71   : > { %4799 = vmatpush3.bf16.msra.mxu0 %v5136_v7  ;;  %4821 = vmatpush3.bf16.msra.mxu1 %v5137_v9 }
 0xd72   : > { %4800 = vmatprep.subr.bf16.mxu0 %v5138_v15  ;;  %4822 = vmatprep.subr.bf16.mxu1 %v5139_v17 }
 0xd75   : > { %4801 = vmatpush3.bf16.msra.mxu0 %v5140_v2  ;;  %4823 = vmatpush3.bf16.msra.mxu1 %v5141_v12  ;;  %v5154_v2 = vld [vmem:[%s5425_s3 + $0x170] sm:$0xff]  }
 0xd76   : > { %4802 = vmatprep.subr.bf16.mxu0 %v5142_v18  ;;  %4824 = vmatprep.subr.bf16.mxu1 %v5143_v4  ;;  %v5155_v12 = vld [vmem:[%s5425_s3 + $0x1f0] sm:$0xff]  }
 0xd79   : > { %4803 = vmatpush3.bf16.msra.mxu0 %v5144_v19  ;;  %4825 = vmatpush3.bf16.msra.mxu1 %v5145_v22 }
 0xd7a   : > { %4804 = vmatprep.subr.bf16.mxu0 %v5146_v20  ;;  %4826 = vmatprep.subr.bf16.mxu1 %v5147_v23 }
 0xd7d   : > { %4805 = vmatpush3.bf16.msra.mxu0 %v5148_v24  ;;  %4827 = vmatpush3.bf16.msra.mxu1 %v5149_v25  ;;  %v5156_v24 = vld [vmem:[%s5425_s3 + $0x130] sm:$0xff]  }
 0xd7e   : > { %4834 = vmatprep.subr.bf16.mxu0 %v5150_v26  ;;  %4856 = vmatprep.subr.bf16.mxu1 %v5151_v21  ;;  %v5157_v25 = vld [vmem:[%s5425_s3 + $0x1b0] sm:$0xff]   ;;  %v5158_v26 = vld [vmem:[%s5425_s3 + $0x168] sm:$0xff]  }
 0xe08   : > { %v2606_v28 = vpop.f32.mrf.mxu0  ;;  %v2649_v29 = vpop.f32.mrf.mxu1 }
 0xe09   : > { %v2607_v43 = vadd.f32 %v2606_v28, %v2332_v32  ;;  %v2650_v45 = vadd.f32 %v2649_v29, %v2340_v33 }
 0xe0a   : > { %v2608_v35 = vpop.f32.mrf.mxu0  ;;  %v2651_v8 = vpop.f32.mrf.mxu1 }
 0xe0b   : > { %v2609_v39 = vadd.f32 %v2608_v35, %v2336_v30  ;;  %v2652_v40 = vadd.f32 %v2651_v8, %v2344_v31  ;;  %v2916_v59 = vmax.f32 %v2607_v43, 0.0  ;;  %v2918_v60 = vmax.f32 %v2650_v45, 0.0  ;;  %v5160_v35 = vld [vmem:[%s5425_s3 + $0x128] sm:$0xff]   ;;  %v5166_v43 = vld [vmem:[%s5425_s3 + $0x158] sm:$0xff]  }
 0xe0c   : > { %v2610_v36 = vpop.f32.mrf.mxu0  ;;  %v2653_v37 = vpop.f32.mrf.mxu1  ;;  %v5161_v8 = vld [vmem:[%s5425_s3 + $0x1a8] sm:$0xff]   ;;  %v5167_v45 = vld [vmem:[%s5425_s3 + $0x1d8] sm:$0xff]  }
 0xe0d   : > { %v2611_v41 = vadd.f32 %v2610_v36, %v2332_v32  ;;  %v2654_v42 = vadd.f32 %v2653_v37, %v2340_v33  ;;  %v2917_v44 = vmax.f32 %v2609_v39, 0.0  ;;  %v2919_v53 = vmax.f32 %v2652_v40, 0.0  ;;  %v5162_v36 = vld [vmem:[%s5425_s3 + $0x160] sm:$0xff]  }
 0xe0e   : > { %v2612_v46 = vpop.f32.mrf.mxu0  ;;  %v2655_v56 = vpop.f32.mrf.mxu1  ;;  %v5163_v37 = vld [vmem:[%s5425_s3 + $0x1e0] sm:$0xff]  }
 0xe0f   : > { %v2613_v6 = vadd.f32 %v2612_v46, %v2336_v30  ;;  %v2656_v47 = vadd.f32 %v2655_v56, %v2344_v31  ;;  %v2932_v48 = vmax.f32 %v2611_v41, 0.0  ;;  %v2934_v49 = vmax.f32 %v2654_v42, 0.0  ;;  %v5159_v31 = vld [vmem:[%s5425_s3 + $0x1e8] sm:$0xff]   ;;  %v5164_v40 = vld [vmem:[%s5425_s3 + $0x120] sm:$0xff]   ;;  %v5168_v56 = vld [vmem:[%s5425_s3 + $0x118] sm:$0xff]  }
 0xe10   : > { %v5829_v50 = vpop.f32.mrf.mxu0  ;;  %v5831_v51 = vpop.f32.mrf.mxu1  ;;  %v5165_v42 = vld [vmem:[%s5425_s3 + $0x1a0] sm:$0xff]  }
 0xe11   : > { %v2933_v55 = vmax.f32 %v2613_v6, 0.0  ;;  %v2935_v57 = vmax.f32 %v2656_v47, 0.0  ;;  %v2948_v7 = vpack.c.bf16 %v2932_v48, %v2916_v59  ;;  %v2950_v9 = vpack.c.bf16 %v2934_v49, %v2918_v60  ;;  %v5169_v47 = vld [vmem:[%s5425_s3 + $0x198] sm:$0xff]   ;;  %v5170_v48 = vld [vmem:[%s5425_s3 + $0x150] sm:$0xff]   ;;  %v5174_v59 = vld [vmem:[%s5425_s3 + $0x148] sm:$0xff]  }
 0xe12   : > { %v2694_v61 = vpop.f32.mrf.mxu0  ;;  %v2737_v62 = vpop.f32.mrf.mxu1  ;;  %v5171_v49 = vld [vmem:[%s5425_s3 + $0x1d0] sm:$0xff]   ;;  %v5175_v60 = vld [vmem:[%s5425_s3 + $0x1c8] sm:$0xff]  }
 0xe13   : > { %v2949_v5 = vpack.c.bf16 %v2933_v55, %v2917_v44  ;;  %v2951_v63 = vpack.c.bf16 %v2935_v57, %v2919_v53  ;;  %v2695_v18 = vadd.f32 %v2694_v61, %v2352_v52  ;;  %v2738_v4 = vadd.f32 %v2737_v62, %v2360_v3  ;;  %v5172_v53 = vld [vmem:[%s5425_s3 + $0x110] sm:$0xff]  }
 0xe14   : > { %v5840_v15 = vpop.f32.mrf.mxu0  ;;  %v5842_v17 = vpop.f32.mrf.mxu1  ;;  %v5173_v57 = vld [vmem:[%s5425_s3 + $0x190] sm:$0xff]  }
 0xe15   : > { %4024 = vmatprep.mubr.bf16.mxu0 %v2949_v5  ;;  %4065 = vmatprep.mubr.bf16.mxu1 %v2951_v63  ;;  %v2921_v21 = vmax.f32 %v2695_v18, 0.0  ;;  %v2923_v28 = vmax.f32 %v2738_v4, 0.0  ;;  %v5885_v5 = vld [vmem:[%s5418_s28 + $0x8] sm:$0xff]  ;;  %v5179_v4 = vld [vmem:[%s5425_s3 + $0x1c0] sm:$0xff]   ;;  %s6053_s28 = sld [smem:[#allocation5_spill]] (!%p4736_p5) }
 0xe16   : > { %v2698_v19 = vpop.f32.mrf.mxu0  ;;  %v2741_v22 = vpop.f32.mrf.mxu1  ;;  %4025 = vmatmul.mubr.bf16.vlgmr.msra.gmra.mxu0 %v2948_v7  ;;  %4066 = vmatmul.mubr.bf16.vlgmr.msra.gmra.mxu1 %v2950_v9  ;;  %v2368_v7 = vrot.slane %v5885_v5, %v5611_v16  ;;  %v2376_v18 = vrot.slane %v5885_v5, %v5726_v58 }
 0xe17   : > { %v2699_v20 = vadd.f32 %v2698_v19, %v2352_v52  ;;  %v2742_v23 = vadd.f32 %v2741_v22, %v2360_v3  ;;  %4835 = vmatpush3.bf16.msra.mxu0 %v5152_v0  ;;  %4857 = vmatpush3.bf16.msra.mxu1 %v5153_v1  ;;  %v5867_v52 = vsub.s32 4, %v5597_v10  ;;  %v5870_v3 = vsub.s32 6, %v5597_v10  ;;  %v5176_v0 = vld [vmem:[%s5425_s3 + $0x108] sm:$0xff]   ;;  %v5214_v10 = vld [vmem:[%s5425_s3 + $0x378] sm:$0xff]  }
 0xe18   : > { %4836 = vmatprep.subr.bf16.mxu0 %v5154_v2  ;;  %4858 = vmatprep.subr.bf16.mxu1 %v5155_v12  ;;  %v5854_v39 = vpop.f32.mrf.mxu0  ;;  %v5857_v41 = vpop.f32.mrf.mxu1  ;;  %v5177_v2 = vld [vmem:[%s5425_s3 + $0x188] sm:$0xff]   ;;  %v5178_v12 = vld [vmem:[%s5425_s3 + $0x140] sm:$0xff]  }
 0xe19   : > { %v2937_v29 = vmax.f32 %v2699_v20, 0.0  ;;  %v2939_v30 = vmax.f32 %v2742_v23, 0.0  ;;  %v2348_v61 = vrot.slane %v5815_v27, %v5867_v52  ;;  %v2356_v62 = vrot.slane %v5815_v27, %v5870_v3  ;;  %v5180_v23 = vld [vmem:[%s5425_s3 + $0x100] sm:$0xff]  }
 0xe1a   : > { %v2780_v46 = vpop.f32.mrf.mxu0  ;;  %v2823_v6 = vpop.f32.mrf.mxu1 }
 0xe1b   : > { %v2953_v32 = vpack.c.bf16 %v2937_v29, %v2921_v21  ;;  %v2955_v33 = vpack.c.bf16 %v2939_v30, %v2923_v28  ;;  %4837 = vmatpush3.bf16.msra.mxu0 %v5156_v24  ;;  %4859 = vmatpush3.bf16.msra.mxu1 %v5157_v25  ;;  %v2697_v1 = vadd.f32 %v5840_v15, %v2348_v61  ;;  %v5183_v28 = vld [vmem:[%s5425_s3 + $0x2f8] sm:$0xff]  }
 0xe1c   : > { %4838 = vmatprep.subr.bf16.mxu0 %v5158_v26  ;;  %4860 = vmatprep.subr.bf16.mxu1 %v5159_v31  ;;  %v5872_v44 = vpop.f32.mrf.mxu0  ;;  %v5875_v55 = vpop.f32.mrf.mxu1  ;;  %v2740_v27 = vadd.f32 %v5842_v17, %v2356_v62  ;;  %v2693_v15 = vadd.f32 %v5829_v50, %v2348_v61  ;;  %v2736_v22 = vadd.f32 %v5831_v51, %v2356_v62  ;;  %v5181_v17 = vld [vmem:[%s5425_s3 + $0x180] sm:$0xff]   ;;  %v5182_v26 = vld [vmem:[%s5425_s3 + $0x278] sm:$0xff]  }
 0xe1d   : > { %4106 = vmatprep.mubr.bf16.mxu0 %v2953_v32  ;;  %4147 = vmatprep.mubr.bf16.mxu1 %v2955_v33  ;;  %v2936_v24 = vmax.f32 %v2697_v1, 0.0  ;;  %v2781_v25 = vadd.f32 %v2780_v46, %v2368_v7  ;;  %v2824_v21 = vadd.f32 %v2823_v6, %v2376_v18  ;;  %v5184_v31 = vld [vmem:[%s5425_s3 + $0x238] sm:$0xff]   ;;  %v5189_v46 = vld [vmem:[%s5425_s3 + $0x2b0] sm:$0xff]   ;;  %v5191_v6 = vld [vmem:[%s5425_s3 + $0x2e8] sm:$0xff]  }
 0xe1e   : > { %v2784_v63 = vpop.f32.mrf.mxu0  ;;  %v2827_v9 = vpop.f32.mrf.mxu1  ;;  %v2938_v58 = vmax.f32 %v2740_v27, 0.0  ;;  %v2920_v50 = vmax.f32 %v2693_v15, 0.0  ;;  %v2922_v51 = vmax.f32 %v2736_v22, 0.0  ;;  %v5197_v61 = vld [vmem:[%s5425_s3 + $0x2a0] sm:$0xff]   ;;  %v5198_v62 = vld [vmem:[%s5425_s3 + $0x258] sm:$0xff]   ;;  %v5205_v15 = vld [vmem:[%s5425_s3 + $0x290] sm:$0xff]  }
 0xe1f   : > { %4839 = vmatpush3.bf16.msra.mxu0 %v5160_v35  ;;  %4861 = vmatpush3.bf16.msra.mxu1 %v5161_v8  ;;  %v2785_v19 = vadd.f32 %v2784_v63, %v2368_v7  ;;  %v2828_v20 = vadd.f32 %v2827_v9, %v2376_v18  ;;  %v2925_v33 = vmax.f32 %v2781_v25, 0.0  ;;  %v5185_v35 = vld [vmem:[%s5425_s3 + $0x2b8] sm:$0xff]   ;;  %v5204_v18 = vld [vmem:[%s5425_s3 + $0x210] sm:$0xff]   ;;  %v5207_v22 = vld [vmem:[%s5425_s3 + $0x2c8] sm:$0xff]  }
 0xe20   : > { %4840 = vmatprep.subr.bf16.mxu0 %v5162_v36  ;;  %4862 = vmatprep.subr.bf16.mxu1 %v5163_v37  ;;  %v2952_v32 = vpack.c.bf16 %v2936_v24, %v2920_v50  ;;  %v2954_v8 = vpack.c.bf16 %v2938_v58, %v2922_v51  ;;  %v2927_v36 = vmax.f32 %v2824_v21, 0.0  ;;  %v5186_v37 = vld [vmem:[%s5425_s3 + $0x270] sm:$0xff]   ;;  %v5199_v63 = vld [vmem:[%s5425_s3 + $0x2d8] sm:$0xff]   ;;  %v5208_v25 = vld [vmem:[%s5425_s3 + $0x208] sm:$0xff]  }
 0xe21   : > { %v2941_v29 = vmax.f32 %v2785_v19, 0.0  ;;  %v2943_v30 = vmax.f32 %v2828_v20, 0.0  ;;  %v5200_v1 = vld [vmem:[%s5425_s3 + $0x218] sm:$0xff]   ;;  %v5206_v19 = vld [vmem:[%s5425_s3 + $0x248] sm:$0xff]   ;;  %v2364_v20 = vrot.slane %v5885_v5, %v5603_v11 }
 0xe22   : > { %v5201_v9 = vld [vmem:[%s5425_s3 + $0x298] sm:$0xff]   ;;  %v5209_v21 = vld [vmem:[%s5425_s3 + $0x288] sm:$0xff]  }
 0xe23   : > { %4841 = vmatpush3.bf16.msra.mxu0 %v5164_v40  ;;  %4863 = vmatpush3.bf16.msra.mxu1 %v5165_v42  ;;  %v2957_v40 = vpack.c.bf16 %v2941_v29, %v2925_v33  ;;  %v5187_v42 = vld [vmem:[%s5425_s3 + $0x2f0] sm:$0xff]   ;;  %v5211_v29 = vld [vmem:[%s5425_s3 + $0x2c0] sm:$0xff]  }
 0xe24   : > { %4842 = vmatprep.subr.bf16.mxu0 %v5166_v43  ;;  %4864 = vmatprep.subr.bf16.mxu1 %v5167_v45  ;;  %v2959_v43 = vpack.c.bf16 %v2943_v30, %v2927_v36  ;;  %v5188_v45 = vld [vmem:[%s5425_s3 + $0x230] sm:$0xff]   ;;  %v5215_v36 = vld [vmem:[%s5425_s3 + $0x3f8] sm:$0xff]  }
 0xe27   : > { %4843 = vmatpush3.bf16.msra.mxu0 %v5168_v56  ;;  %4865 = vmatpush3.bf16.msra.mxu1 %v5169_v47  ;;  %v5190_v56 = vld [vmem:[%s5425_s3 + $0x268] sm:$0xff]  }
 0xe28   : > { %4844 = vmatprep.subr.bf16.mxu0 %v5170_v48  ;;  %4866 = vmatprep.subr.bf16.mxu1 %v5171_v49  ;;  %v5192_v47 = vld [vmem:[%s5425_s3 + $0x228] sm:$0xff]   ;;  %v5194_v49 = vld [vmem:[%s5425_s3 + $0x260] sm:$0xff]  }
 0xe29   : > { %v5193_v48 = vld [vmem:[%s5425_s3 + $0x2a8] sm:$0xff]  }
 0xe2b   : > { %4845 = vmatpush3.bf16.msra.mxu0 %v5172_v53  ;;  %4867 = vmatpush3.bf16.msra.mxu1 %v5173_v57  ;;  %v5195_v53 = vld [vmem:[%s5425_s3 + $0x2e0] sm:$0xff]   ;;  %v5915_v57 = vpop.f32.mrf.mxu0 }
 0xe2c   : > { %4846 = vmatprep.subr.bf16.mxu0 %v5174_v59  ;;  %4868 = vmatprep.subr.bf16.mxu1 %v5175_v60  ;;  %v5196_v59 = vld [vmem:[%s5425_s3 + $0x220] sm:$0xff]   ;;  %v5918_v60 = vpop.f32.mrf.mxu1 }
 0xe2e   : > { %v2909_v7 = vpop.f32.mrf.mxu1 }
 0xe2f   : > { %4847 = vmatpush3.bf16.msra.mxu0 %v5176_v0  ;;  %4869 = vmatpush3.bf16.msra.mxu1 %v5177_v2  ;;  %v2866_v0 = vpop.f32.mrf.mxu0  ;;  %v5202_v2 = vld [vmem:[%s5425_s3 + $0x250] sm:$0xff]  }
 0xe30   : > { %4848 = vmatprep.subr.bf16.mxu0 %v5178_v12  ;;  %4870 = vmatprep.subr.bf16.mxu1 %v5179_v4  ;;  %v5203_v12 = vld [vmem:[%s5425_s3 + $0x2d0] sm:$0xff]   ;;  %v5930_v4 = vpop.f32.mrf.mxu1 }
 0xe31   : > { %v5927_v27 = vpop.f32.mrf.mxu0 }
 0xe32   : > { %v2913_v58 = vpop.f32.mrf.mxu1 }
 0xe33   : > { %4849 = vmatpush3.bf16.msra.mxu0 %v5180_v23  ;;  %4871 = vmatpush3.bf16.msra.mxu1 %v5181_v17  ;;  %v2372_v23 = vrot.slane %v5885_v5, %v5721_v54  ;;  %v2870_v24 = vpop.f32.mrf.mxu0  ;;  %v2783_v17 = vadd.f32 %v5872_v44, %v2364_v20  ;;  %v2392_v54 = vrot.slane %v5885_v5, %v2359_v34 }
 0xe34   : > { %4878 = vmatprep.subr.bf16.mxu0 %v5182_v26  ;;  %4900 = vmatprep.subr.bf16.mxu1 %v5183_v28  ;;  %v2384_v26 = vrot.slane %v5885_v5, %v5826_v38  ;;  %v5210_v28 = vld [vmem:[%s5425_s3 + $0x240] sm:$0xff]   ;;  %v2779_v44 = vadd.f32 %v5854_v39, %v2364_v20  ;;  %v5234_v20 = vld [vmem:[%s5425_s3 + $0x350] sm:$0xff]  }
 0xe35   : > { %v2826_v50 = vadd.f32 %v5875_v55, %v2372_v23  ;;  %v2822_v30 = vadd.f32 %v5857_v41, %v2372_v23  ;;  %v2940_v33 = vmax.f32 %v2783_v17, 0.0  ;;  %v5213_v55 = vld [vmem:[%s5425_s3 + $0x280] sm:$0xff]   ;;  %v5235_v23 = vld [vmem:[%s5425_s3 + $0x3d0] sm:$0xff]   ;;  %v5238_v17 = vld [vmem:[%s5425_s3 + $0x348] sm:$0xff]  }
 0xe36   : > { %4107 = vmatmul.mubr.bf16.vlgmr.msra.gmra.mxu0 %v2952_v32  ;;  %4148 = vmatmul.mubr.bf16.vlgmr.msra.gmra.mxu1 %v2954_v8  ;;  %v2871_v51 = vadd.f32 %v2870_v24, %v2384_v26  ;;  %v5212_v32 = vld [vmem:[%s5425_s3 + $0x200] sm:$0xff]   ;;  %v2910_v8 = vadd.f32 %v2909_v7, %v2392_v54  ;;  %v2924_v39 = vmax.f32 %v2779_v44, 0.0  ;;  %v5236_v24 = vld [vmem:[%s5425_s3 + $0x310] sm:$0xff]  }
 0xe37   : > { %4879 = vmatpush3.bf16.msra.mxu0 %v5184_v31  ;;  %4188 = vmatprep.mubr.bf16.mxu0 %v2957_v40  ;;  %v2914_v31 = vadd.f32 %v2913_v58, %v2392_v54  ;;  %v2942_v34 = vmax.f32 %v2826_v50, 0.0  ;;  %v2926_v41 = vmax.f32 %v2822_v30, 0.0  ;;  %v5226_v7 = vld [vmem:[%s5425_s3 + $0x360] sm:$0xff]   ;;  %v2380_v58 = vrot.slane %v5885_v5, %v5867_v52  ;;  %v5241_v54 = vld [vmem:[%s5425_s3 + $0x388] sm:$0xff]  }
 0xe38   : > { %4901 = vmatpush3.bf16.msra.mxu1 %v5185_v35  ;;  %4229 = vmatprep.mubr.bf16.mxu1 %v2959_v43  ;;  %v2867_v35 = vadd.f32 %v2866_v0, %v2384_v26  ;;  %v2956_v43 = vpack.c.bf16 %v2940_v33, %v2924_v39  ;;  %v5224_v0 = vld [vmem:[%s5425_s3 + $0x328] sm:$0xff]   ;;  %v5245_v33 = vld [vmem:[%s5425_s3 + $0x380] sm:$0xff]  }
 0xe39   : > { %4880 = vmatprep.subr.bf16.mxu0 %v5186_v37  ;;  %4902 = vmatprep.subr.bf16.mxu1 %v5187_v42  ;;  %v2945_v37 = vmax.f32 %v2871_v51, 0.0  ;;  %v2947_v40 = vmax.f32 %v2914_v31, 0.0  ;;  %v5216_v42 = vld [vmem:[%s5425_s3 + $0x338] sm:$0xff]   ;;  %v5239_v26 = vld [vmem:[%s5425_s3 + $0x3c8] sm:$0xff]   ;;  %v2869_v50 = vadd.f32 %v5927_v27, %v2380_v58  ;;  %v5243_v51 = vld [vmem:[%s5425_s3 + $0x3c0] sm:$0xff]   ;;  %v2865_v30 = vadd.f32 %v5915_v57, %v2380_v58 }
 0xe3b   : > { %4881 = vmatpush3.bf16.msra.mxu0 %v5188_v45  ;;  %v2929_v45 = vmax.f32 %v2867_v35, 0.0  ;;  %v2928_v27 = vmax.f32 %v2865_v30, 0.0 }
 0xe3c   : > { %4903 = vmatpush3.bf16.msra.mxu1 %v5189_v46  ;;  %4882 = vmatprep.subr.bf16.mxu0 %v5190_v56  ;;  %v5217_v46 = vld [vmem:[%s5425_s3 + $0x3b8] sm:$0xff]   ;;  %v2958_v56 = vpack.c.bf16 %v2942_v34, %v2926_v41 }
 0xe3d   : > { %4904 = vmatprep.subr.bf16.mxu1 %v5191_v6  ;;  %v2931_v6 = vmax.f32 %v2910_v8, 0.0 }
 0xe3f   : > { %4883 = vmatpush3.bf16.msra.mxu0 %v5192_v47  ;;  %v5218_v47 = vld [vmem:[%s5425_s3 + $0x370] sm:$0xff]  }
 0xe40   : > { %4905 = vmatpush3.bf16.msra.mxu1 %v5193_v48  ;;  %4884 = vmatprep.subr.bf16.mxu0 %v5194_v49  ;;  %v2961_v48 = vpack.c.bf16 %v2945_v37, %v2929_v45  ;;  %v5219_v49 = vld [vmem:[%s5425_s3 + $0x3f0] sm:$0xff]  }
 0xe41   : > { %4906 = vmatprep.subr.bf16.mxu1 %v5195_v53  ;;  %v2963_v53 = vpack.c.bf16 %v2947_v40, %v2931_v6 }
 0xe43   : > { %4885 = vmatpush3.bf16.msra.mxu0 %v5196_v59  ;;  %v5220_v59 = vld [vmem:[%s5425_s3 + $0x330] sm:$0xff]  }
 0xe44   : > { %4907 = vmatpush3.bf16.msra.mxu1 %v5197_v61  ;;  %4886 = vmatprep.subr.bf16.mxu0 %v5198_v62  ;;  %v5221_v61 = vld [vmem:[%s5425_s3 + $0x3b0] sm:$0xff]   ;;  %v5222_v62 = vld [vmem:[%s5425_s3 + $0x368] sm:$0xff]  }
 0xe45   : > { %4908 = vmatprep.subr.bf16.mxu1 %v5199_v63  ;;  %v5223_v63 = vld [vmem:[%s5425_s3 + $0x3e8] sm:$0xff]  }
 0xe47   : > { %4887 = vmatpush3.bf16.msra.mxu0 %v5200_v1  ;;  %v5225_v1 = vld [vmem:[%s5425_s3 + $0x3a8] sm:$0xff]  }
 0xe48   : > { %4909 = vmatpush3.bf16.msra.mxu1 %v5201_v9  ;;  %4888 = vmatprep.subr.bf16.mxu0 %v5202_v2  ;;  %v5227_v9 = vld [vmem:[%s5425_s3 + $0x3e0] sm:$0xff]  }
 0xe49   : > { %4910 = vmatprep.subr.bf16.mxu1 %v5203_v12  ;;  %v5228_v2 = vld [vmem:[%s5425_s3 + $0x320] sm:$0xff]  }
 0xe4a   : > { %v5229_v12 = vld [vmem:[%s5425_s3 + $0x3a0] sm:$0xff]  }
 0xe4b   : > { %4889 = vmatpush3.bf16.msra.mxu0 %v5204_v18  ;;  %v5230_v18 = vld [vmem:[%s5425_s3 + $0x358] sm:$0xff]  }
 0xe4c   : > { %4911 = vmatpush3.bf16.msra.mxu1 %v5205_v15  ;;  %4890 = vmatprep.subr.bf16.mxu0 %v5206_v19  ;;  %v5231_v15 = vld [vmem:[%s5425_s3 + $0x3d8] sm:$0xff]  }
 0xe4d   : > { %4912 = vmatprep.subr.bf16.mxu1 %v5207_v22  ;;  %v5232_v19 = vld [vmem:[%s5425_s3 + $0x318] sm:$0xff]  }
 0xe4e   : > { %v5233_v22 = vld [vmem:[%s5425_s3 + $0x398] sm:$0xff]  }
 0xe4f   : > { %4891 = vmatpush3.bf16.msra.mxu0 %v5208_v25  ;;  %v5237_v25 = vld [vmem:[%s5425_s3 + $0x390] sm:$0xff]  }
 0xe50   : > { %4913 = vmatpush3.bf16.msra.mxu1 %v5209_v21  ;;  %4892 = vmatprep.subr.bf16.mxu0 %v5210_v28  ;;  %v2388_v21 = vrot.slane %v5885_v5, %v5870_v3  ;;  %v5240_v28 = vld [vmem:[%s5425_s3 + $0x308] sm:$0xff]   ;;  %v2944_v5 = vmax.f32 %v2869_v50, 0.0 }
 0xe51   : > { %4914 = vmatprep.subr.bf16.mxu1 %v5211_v29  ;;  %v5242_v29 = vld [vmem:[%s5425_s3 + $0x340] sm:$0xff]  }
 0xe52   : > { %v2912_v44 = vadd.f32 %v5930_v4, %v2388_v21  ;;  %v2908_v31 = vadd.f32 %v5918_v60, %v2388_v21 }
 0xe53   : > { %4893 = vmatpush3.bf16.msra.mxu0 %v5212_v32  ;;  %v5244_v32 = vld [vmem:[%s5425_s3 + $0x300] sm:$0xff]  }
 0xe54   : > { %4915 = vmatpush3.bf16.msra.mxu1 %v5213_v55  ;;  %4922 = vmatprep.subr.bf16.mxu0 %v5214_v10  ;;  %v2946_v35 = vmax.f32 %v2912_v44, 0.0  ;;  %v2930_v55 = vmax.f32 %v2908_v31, 0.0  ;;  %v2960_v10 = vpack.c.bf16 %v2944_v5, %v2928_v27 }
 0xe55   : > { %4944 = vmatprep.subr.bf16.mxu1 %v5215_v36 }
 0xe56   : > { %4189 = vmatmul.mubr.bf16.vlgmr.msra.gmra.mxu0 %v2956_v43  ;;  %v2962_v4 = vpack.c.bf16 %v2946_v35, %v2930_v55 }
 0xe57   : > { %4230 = vmatmul.mubr.bf16.vlgmr.msra.gmra.mxu1 %v2958_v56  ;;  %4923 = vmatpush3.bf16.msra.mxu0 %v5216_v42 }
 0xe58   : > { %4270 = vmatprep.mubr.bf16.mxu0 %v2961_v48  ;;  %4945 = vmatpush3.bf16.msra.mxu1 %v5217_v46 }
 0xe59   : > { %4311 = vmatprep.mubr.bf16.mxu1 %v2963_v53  ;;  %4924 = vmatprep.subr.bf16.mxu0 %v5218_v47  ;;  %v5995_v47 = vld [vmem:[%s5430_s18] sm:$0x7f] }
 0xe5a   : > { %4946 = vmatprep.subr.bf16.mxu1 %v5219_v49  ;;  %v3223_v48 = vrot.slane %v5995_v47, %v5870_v3 }
 0xe5b   : > { %4925 = vmatpush3.bf16.msra.mxu0 %v5220_v59 }
 0xe5c   : > { %4947 = vmatpush3.bf16.msra.mxu1 %v5221_v61  ;;  %4926 = vmatprep.subr.bf16.mxu0 %v5222_v62 }
 0xe5d   : > { %4948 = vmatprep.subr.bf16.mxu1 %v5223_v63 }
 0xe5f   : > { %4927 = vmatpush3.bf16.msra.mxu0 %v5224_v0 }
 0xe60   : > { %4949 = vmatpush3.bf16.msra.mxu1 %v5225_v1  ;;  %4928 = vmatprep.subr.bf16.mxu0 %v5226_v7 }
 0xe61   : > { %4950 = vmatprep.subr.bf16.mxu1 %v5227_v9 }
 0xe63   : > { %4929 = vmatpush3.bf16.msra.mxu0 %v5228_v2 }
 0xe64   : > { %4951 = vmatpush3.bf16.msra.mxu1 %v5229_v12  ;;  %4930 = vmatprep.subr.bf16.mxu0 %v5230_v18 }
 0xe65   : > { %4952 = vmatprep.subr.bf16.mxu1 %v5231_v15 }
 0xe67   : > { %4931 = vmatpush3.bf16.msra.mxu0 %v5232_v19 }
 0xe68   : > { %4953 = vmatpush3.bf16.msra.mxu1 %v5233_v22  ;;  %4932 = vmatprep.subr.bf16.mxu0 %v5234_v20 }
 0xe69   : > { %4954 = vmatprep.subr.bf16.mxu1 %v5235_v23 }
 0xe6b   : > { %4933 = vmatpush3.bf16.msra.mxu0 %v5236_v24 }
 0xe6c   : > { %4955 = vmatpush3.bf16.msra.mxu1 %v5237_v25  ;;  %4934 = vmatprep.subr.bf16.mxu0 %v5238_v17 }
 0xe6d   : > { %4956 = vmatprep.subr.bf16.mxu1 %v5239_v26 }
 0xe6f   : > { %4935 = vmatpush3.bf16.msra.mxu0 %v5240_v28 }
 0xe70   : > { %4957 = vmatpush3.bf16.msra.mxu1 %v5241_v54  ;;  %4936 = vmatprep.subr.bf16.mxu0 %v5242_v29 }
 0xe71   : > { %4958 = vmatprep.subr.bf16.mxu1 %v5243_v51 }
 0xe73   : > { %4937 = vmatpush3.bf16.msra.mxu0 %v5244_v32 }
 0xe74   : > { %4959 = vmatpush3.bf16.msra.mxu1 %v5245_v33 }
 0xe76   : > { %4271 = vmatmul.mubr.bf16.vlgmr.msra.gmra.mxu0 %v2960_v10 }
 0xe77   : > { %4312 = vmatmul.mubr.bf16.vlgmr.msra.gmra.mxu1 %v2962_v4 }
 0xed6   : > { %v4806_v57 = vpop.f32.mrf.mxu0  ;;  %v4828_v34 = vpop.f32.mrf.mxu1 }
 0xed8   : > { %v4807_v60 = vpop.f32.mrf.mxu0  ;;  %v4829_v8 = vpop.f32.mrf.mxu1 }
 0xed9   : > { %v4808_v49 = vadd.f32 %v4807_v60, %v4806_v57  ;;  %v4830_v1 = vadd.f32 %v4829_v8, %v4828_v34 }
 0xeda   : > { %v4809_v36 = vpop.f32.mrf.mxu0  ;;  %v4831_v39 = vpop.f32.mrf.mxu1 }
 0xedb   : > { %v4027_v61 = vadd.f32 %v4808_v49, %v3223_v48 }
 0xedc   : > { %v4810_v37 = vpop.f32.mrf.mxu0  ;;  %v4832_v40 = vpop.f32.mrf.mxu1 }
 0xedd   : > { %v4811_v62 = vadd.f32 %v4810_v37, %v4809_v36  ;;  %v4068_v9 = vadd.f32 %v4830_v1, %v4027_v61  ;;  %v4833_v15 = vadd.f32 %v4832_v40, %v4831_v39 }
 0xedf   : > { %v4030_v2 = vadd.f32 %v4811_v62, %v3223_v48 }
 0xee1   : > { %v4071_v20 = vadd.f32 %v4833_v15, %v4030_v2  ;;  %v4351_v2 = vrot.slane %v5995_v47, %v5867_v52 }
 0xef6   : > { %v4850_v41 = vpop.f32.mrf.mxu0  ;;  %v4872_v42 = vpop.f32.mrf.mxu1 }
 0xef8   : > { %v4851_v43 = vpop.f32.mrf.mxu0  ;;  %v4873_v45 = vpop.f32.mrf.mxu1 }
 0xef9   : > { %v4852_v7 = vadd.f32 %v4851_v43, %v4850_v41  ;;  %v4874_v23 = vadd.f32 %v4873_v45, %v4872_v42 }
 0xefa   : > { %v4853_v46 = vpop.f32.mrf.mxu0  ;;  %v4875_v56 = vpop.f32.mrf.mxu1 }
 0xefb   : > { %v4109_v19 = vadd.f32 %v4852_v7, %v4068_v9 }
 0xefc   : > { %v4854_v6 = vpop.f32.mrf.mxu0  ;;  %v4876_v59 = vpop.f32.mrf.mxu1 }
 0xefd   : > { %v4855_v22 = vadd.f32 %v4854_v6, %v4853_v46  ;;  %v4150_v17 = vadd.f32 %v4874_v23, %v4109_v19  ;;  %v4877_v58 = vadd.f32 %v4876_v59, %v4875_v56 }
 0xeff   : > { %v4112_v26 = vadd.f32 %v4855_v22, %v4071_v20 }
 0xf01   : > { %v4153_v29 = vadd.f32 %v4877_v58, %v4112_v26 }
 0xf16   : > { %v4894_v53 = vpop.f32.mrf.mxu0 }
 0xf17   : > { %v4916_v63 = vpop.f32.mrf.mxu1 }
 0xf18   : > { %v4895_v0 = vpop.f32.mrf.mxu0 }
 0xf19   : > { %v4917_v12 = vpop.f32.mrf.mxu1  ;;  %v4896_v24 = vadd.f32 %v4895_v0, %v4894_v53 }
 0xf1a   : > { %v4897_v18 = vpop.f32.mrf.mxu0  ;;  %v4918_v44 = vadd.f32 %v4917_v12, %v4916_v63 }
 0xf1b   : > { %v4919_v3 = vpop.f32.mrf.mxu1  ;;  %v4191_v21 = vadd.f32 %v4896_v24, %v4150_v17 }
 0xf1c   : > { %v4898_v25 = vpop.f32.mrf.mxu0 }
 0xf1d   : > { %v4899_v28 = vadd.f32 %v4898_v25, %v4897_v18  ;;  %v4920_v50 = vpop.f32.mrf.mxu1  ;;  %v4232_v31 = vadd.f32 %v4918_v44, %v4191_v21  ;;  %v4357_v18 = vrot.slane %v5995_v47, %v5826_v38 }
 0xf1e   : > { %v4921_v27 = vadd.f32 %v4920_v50, %v4919_v3 }
 0xf1f   : > { %v4194_v32 = vadd.f32 %v4899_v28, %v4153_v29 }
 0xf21   : > { %v4235_v34 = vadd.f32 %v4921_v27, %v4194_v32 }
 0xf36   : > { %v4938_v54 = vpop.f32.mrf.mxu0 }
 0xf37   : > { %v4960_v51 = vpop.f32.mrf.mxu1 }
 0xf38   : > { %v4939_v30 = vpop.f32.mrf.mxu0 }
 0xf39   : > { %v4940_v5 = vadd.f32 %v4939_v30, %v4938_v54  ;;  %v4961_v33 = vpop.f32.mrf.mxu1 }
 0xf3a   : > { %v4941_v35 = vpop.f32.mrf.mxu0  ;;  %v4962_v10 = vadd.f32 %v4961_v33, %v4960_v51 }
 0xf3b   : > { %v4273_v55 = vadd.f32 %v4940_v5, %v4232_v31  ;;  %v4963_v4 = vpop.f32.mrf.mxu1 }
 0xf3c   : > { %v4942_v57 = vpop.f32.mrf.mxu0 }
 0xf3d   : > { %v4314_v60 = vadd.f32 %v4962_v10, %v4273_v55  ;;  %v4943_v8 = vadd.f32 %v4942_v57, %v4941_v35  ;;  %v4964_v36 = vpop.f32.mrf.mxu1 }
 0xf3e   : > { %v4965_v37 = vadd.f32 %v4964_v36, %v4963_v4 }
 0xf3f   : > { %v4276_v39 = vadd.f32 %v4943_v8, %v4235_v34  ;;  %v4320_v41 = vadd.f32 %v4314_v60, %v5734_v13 }
 0xf41   : > { %v4317_v40 = vadd.f32 %v4965_v37, %v4276_v39  ;;  %v4322_v42 = vsel %vm566_vm3, %v4320_v41, 0.0 }
 0xf42   : > { %4323 = vadd.xlane.f32.xlu0 %v4322_v42 }
 0xf43   : > { %v4321_v43 = vadd.f32 %v4317_v40, %v5736_v14 }
 0xf45   : > { %v4325_v45 = vsel %vm1358_vm9, %v4321_v43, 0.0 }
 0xf46   : > { %4326 = vadd.xlane.f32.xlu1 %v4325_v45 }
 0xfcb   : > { %v4324_v46 = vpop.xlane.xlu0 %4323 }
 0xfcc   : > { %v4328_v56 = vmul.f32 0.03125, %v4324_v46 }
 0xfce   : > { %v4330_v6 = vsub.f32 %v4320_v41, %v4328_v56 }
 0xfcf   : > { %v4327_v48 = vpop.xlane.xlu1 %4326 }
 0xfd0   : > { %v4329_v49 = vmul.f32 0.03125, %v4327_v48  ;;  %v4332_v53 = vmul.f32 %v4330_v6, %v4330_v6 }
 0xfd2   : > { %v4331_v59 = vsub.f32 %v4321_v43, %v4329_v49  ;;  %v4334_v61 = vsel %vm566_vm3, %v4332_v53, 0.0 }
 0xfd3   : > { %4335 = vadd.xlane.f32.xlu0 %v4334_v61 }
 0xfd4   : > { %v4333_v13 = vmul.f32 %v4331_v59, %v4331_v59 }
 0xfd6   : > { %v4337_v62 = vsel %vm1358_vm9, %v4333_v13, 0.0 }
 0xfd7   : > { %4338 = vadd.xlane.f32.xlu1 %v4337_v62 }
0x105c   : > { %v4336_v63 = vpop.xlane.xlu0 %4335 }
0x105d   : > { %v4340_v0 = vmul.f32 0.03125, %v4336_v63 }
0x105f   : > { %v4342_v14 = vadd.f32 1e-05, %v4340_v0 }
0x1060   : > { %v4339_v1 = vpop.xlane.xlu1 %4338 }
0x1061   : > { %5286 = vrsqrt.f32 %v4342_v14  ;;  %v4341_v7 = vmul.f32 0.03125, %v4339_v1 }
0x1063   : > { %v4343_v9 = vadd.f32 1e-05, %v4341_v7 }
0x1065   : > { %5288 = vrsqrt.f32 %v4343_v9 }
0x106e   : > { %v5287_v12 = vpop.eup %5286 }
0x106f   : > { %v4346_v15 = vmul.f32 %v5287_v12, %v4330_v6 }
0x1071   : > { %v4352_v19 = vmul.f32 %v4351_v2, %v4346_v15 }
0x1072   : > { %v5289_v22 = vpop.eup %5288 }
0x1073   : > { %v4358_v20 = vadd.f32 %v4357_v18, %v4352_v19  ;;  %v4347_v23 = vmul.f32 %v5289_v22, %v4331_v59 }
0x1075   : > { %4360 = vst.msk [vmem:[#allocation2] sm:$0xff] %vm566_vm3, %v4358_v20  ;;  %v4353_v24 = vmul.f32 %v4351_v2, %v4347_v23  ;;  %4365 = sbr.rel (%p4736_p5) target bundleno = 4531 (0x11b3), region = 76 }
0x1077   : > { %v4359_v3 = vadd.f32 %v4357_v18, %v4353_v24 }
0x1079   : > { %4361 = vst.msk [vmem:[#allocation2 + $0x8] sm:$0xf] %vm1358_vm9, %v4359_v3 }
0x107a   : > { %v4367_v52 = vsel %vm566_vm3, %v4358_v20, 0.0  ;;  %v4370_v25 = vsel %vm1358_vm9, %v4359_v3, 0.0  ;;  %v4366_v33 = vld [vmem:[%s6043_s11] sm:$0x3] }
0x107b   : > { %4368 = vadd.xlane.f32.xlu0 %v4367_v52  ;;  %v4396_v35 = vrot.slane %v4366_v33, %v5603_v11  ;;  %v4402_v10 = vrot.slane %v4366_v33, %v5611_v16 }
0x107f   : > { %4371 = vadd.xlane.f32.xlu0 %v4370_v25 }
0x1104   : > { %v4369_v38 = vpop.xlane.xlu0 %4368 }
0x1105   : > { %v4373_v47 = vmul.f32 0.03125, %v4369_v38 }
0x1107   : > { %v4375_v17 = vsub.f32 %v4358_v20, %v4373_v47 }
0x1108   : > { %v4372_v26 = vpop.xlane.xlu0 %4371 }
0x1109   : > { %v4374_v58 = vmul.f32 0.03125, %v4372_v26  ;;  %v4377_v21 = vmul.f32 %v4375_v17, %v4375_v17 }
0x110b   : > { %v4376_v28 = vsub.f32 %v4359_v3, %v4374_v58  ;;  %v4379_v50 = vsel %vm566_vm3, %v4377_v21, 0.0 }
0x110c   : > { %4380 = vadd.xlane.f32.xlu1 %v4379_v50 }
0x110d   : > { %v4378_v54 = vmul.f32 %v4376_v28, %v4376_v28 }
0x110f   : > { %v4382_v29 = vsel %vm1358_vm9, %v4378_v54, 0.0 }
0x1110   : > { %4383 = vadd.xlane.f32.xlu1 %v4382_v29 }
0x1195   : > { %v4381_v44 = vpop.xlane.xlu1 %4380 }
0x1196   : > { %v4385_v51 = vmul.f32 0.03125, %v4381_v44 }
0x1198   : > { %v4387_v30 = vadd.f32 1e-05, %v4385_v51 }
0x1199   : > { %v4384_v31 = vpop.xlane.xlu1 %4383 }
0x119a   : > { %5291 = vrsqrt.f32 %v4387_v30  ;;  %v4386_v32 = vmul.f32 0.03125, %v4384_v31 }
0x119c   : > { %v4388_v5 = vadd.f32 1e-05, %v4386_v32 }
0x119e   : > { %5293 = vrsqrt.f32 %v4388_v5 }
0x11a7   : > { %v5292_v27 = vpop.eup %5291 }
0x11a8   : > { %v4391_v55 = vmul.f32 %v5292_v27, %v4375_v17 }
0x11aa   : > { %v4397_v4 = vmul.f32 %v4396_v35, %v4391_v55 }
0x11ab   : > { %v5294_v57 = vpop.eup %5293 }
0x11ac   : > { %v4403_v34 = vadd.f32 %v4402_v10, %v4397_v4  ;;  %v4392_v60 = vmul.f32 %v5294_v57, %v4376_v28 }
0x11ae   : > { %4405 = vst.msk [vmem:[%s6053_s28] sm:$0xff] %vm566_vm3, %v4403_v34  ;;  %v4398_v8 = vmul.f32 %v4396_v35, %v4392_v60 }
0x11b0   : > { %v4404_v36 = vadd.f32 %v4402_v10, %v4398_v8 }
0x11b2   : > { %4406 = vst.msk [vmem:[%s6053_s28 + $0x8] sm:$0xf] %vm1358_vm9, %v4404_v36 }
0x11b3 PF: > { %s6054_s17 = sld [smem:[#allocation3_spill]] }
0x11b9   : > { %s22_s21 = sadd.s32 1, %s6054_s17  }
0x11ba   : > { %p19_p6 = scmp.ge.s32.totalorder %s22_s21, 4  }
0x11bc   :  { %21 = sbr.rel (!%p19_p6) target bundleno = 3 (0x3), region = 124 }

// kernel: dual_branch_forward.4
= control target key start
LH: loop header
LB: loop body
LE: loop exit
PB: predicated region body
PF: predicated region fallthrough
CT: control target
= control target key end

     0   :  { %s4153_s27 = smov 0   ;;  %s4651_s0 = inlined_call_operand.vmem [shape: f32[12,32], index: 0, kind: input, shape index: {}]   ;;  %s4652_s1 = inlined_call_operand.vmem [shape: bf16[2,32,128], index: 1, kind: input, shape index: {}]   ;;  %s4653_s2 = inlined_call_operand.vmem [shape: f32[2,1,128], index: 2, kind: input, shape index: {}]   ;;  %s4654_s3 = inlined_call_operand.vmem [shape: bf16[2,32,2048], index: 3, kind: input, shape index: {}]   ;;  %s4655_s4 = inlined_call_operand.vmem [shape: f32[2,1,2048], index: 4, kind: input, shape index: {}]   ;;  %s4656_s5 = inlined_call_operand.vmem [shape: bf16[2,2048,32], index: 5, kind: input, shape index: {}]   ;;  %s4657_s6 = inlined_call_operand.vmem [shape: f32[2,5,32], index: 6, kind: input, shape index: {}]   ;;  %s4658_s7 = inlined_call_operand.vmem [shape: f32[2,32], index: 7, kind: input, shape index: {}]   ;;  %s4659_s8 = inlined_call_operand.vmem [shape: f32[12,32], index: 8, kind: output, shape index: {}]  }
   0x1 LB: > { %s4159_s28 = sadd.s32 4294967295, %s4096_s27   ;;  %p3449_p0 = scmp.ge.s32.totalorder %s4096_s27, 1  ;;  %s4096_s27 = sphi %s4153_s27, %s18_s27  }
   0x2   : > { %p303_p1 = scmp.lt.s32.totalorder %s4096_s27, 3 }
   0x4   : > { %p304_p2 = pnand %p3449_p0, %p303_p1 }
   0x5   : > { %p353_p3 = scmp.lt.s32.totalorder (!%p304_p2), %s4159_s28, 1  ;;  %p3458_p4 = scmp.ne.s32.totalorder (!%p304_p2), %s4159_s28, 0 }
   0x6   : > { %307 = sbr.rel (%p304_p2) target bundleno = 3026 (0xbd2), region = 52 }
   0xb   : > { %s4165_s29 = scalar_select %p353_p3, %s4159_s28, 1 }
   0xd   : > { %s3651_s30 = sshll.u32 %s4165_s29, 4  ;;  %s360_s11 = scalar_lea.vmem %s4653_s2, %s4165_s29 }
   0xe   : > { %s357_s14 = scalar_lea.vmem %s4652_s1, %s3651_s30  ;;  %s3652_s15 = sshll.u32 %s4165_s29, 8 }
   0xf   : > { %s4179_s18 = scalar_lea.vmem %s4654_s3, %s3652_s15  ;;  %s4184_s21 = scalar_lea.vmem %s4655_s4, %s3651_s30 }
  0x10   : > { %s3653_s22 = sshll.u32 %s4165_s29, 10  ;;  %s3457_s23 = sshll.u32 %s4165_s29, 3 }
  0x11   : > { %s4191_s26 = scalar_lea.vmem %s4656_s5, %s3653_s22  ;;  %s4196_s12 = scalar_lea.vmem %s4657_s6, %s3457_s23 }
  0x12   : > { %383 = sbr.rel (%p3458_p4) target bundleno = 26 (0x1a), region = 56 }
  0x17   : > { %v384_v0 = vld [vmem:[%s4651_s0] sm:$0xff]  ;;  %vm386_vm0 = vcmask 261120   ;;  %v385_v1 = vld [vmem:[%s4651_s0 + $0x8] sm:$0xf]  ;;  %vm388_vm1 = vcmask 257024  }
  0x18   : > { %387 = vst.msk [vmem:[#allocation2] sm:$0xff] %vm386_vm0, %v384_v0 }
  0x19   : > { %389 = vst.msk [vmem:[#allocation2 + $0x8] sm:$0xf] %vm388_vm1, %v385_v1 }
  0x1a PF: > { %v4205_v2 = vld [vmem:[%s357_s14 + $0x8] sm:$0xff]   ;;  %v4098_v3 = vmov 0.0   ;;  %v4210_v4 = vld [vmem:[%s357_s14] sm:$0xff]   ;;  %vm4099_vm2 = vmmov 0   ;;  %vm417_vm3 = vcmask 261120   ;;  %s4100_s19 = smov 64  }
  0x1b   : > { %3852 = vmatprep.subr.bf16.mxu0 %v4098_v3  ;;  %3860 = vmatprep.subr.mxu1 %v4098_v3  ;;  %v4233_v8 = vld [vmem:[%s360_s11] ss:$0 sm:$0xff]  ;;  %s4101_s20 = smov 96   ;;  %s4102_s22 = smov 80   ;;  %vm805_vm4 = vcmask 1041408   ;;  %vm465_vm5 = vcmask 130048  }
  0x1c   : > { %3853 = vmatpush3.bf16.msra.mxu0 %v4205_v2  ;;  %3856 = vmatprep.mubr.msk.bf16.mxu0 %vm4099_vm2, %v4098_v3  ;;  %s4103_s29 = smov 112   ;;  %vm557_vm6 = vcmask 1045504   ;;  %vm541_vm7 = vcmask 46080   ;;  %s4104_s11 = smov 48   ;;  %vm553_vm8 = vcmask 48128   ;;  %vm1209_vm9 = vcmask 257024  }
  0x1d   : > { %3854 = vmatprep.subr.bf16.mxu0 %v4098_v3  ;;  %3862 = vmatprep.mubr.msk.f32.mxu1 %vm4099_vm2, %v4098_v3  ;;  %s4105_s23 = smov 32   ;;  %s4106_s24 = smov 16  }
  0x1e   : > { %p3648_p5 = scmp.ne.s32.totalorder %s4159_s28, 1 }
  0x1f   : > { %v4214_v5 = vld [vmem:[#allocation2] sm:$0xff] }
  0x20   : > { %v4216_v6 = vld [vmem:[#allocation2 + $0x8] sm:$0xf]  ;;  %3855 = vmatpush3.bf16.msra.mxu0 %v4210_v4 }
  0x21   : > { %v398_v7 = vpack.c.bf16 %v4216_v6, %v4214_v5  ;;  %3875 = vmatprep.subr.mxu0 %v4098_v3 }
  0x23   : > { %3857 = vmatmul.mubr.msk.bf16.vlgmr.msra.gmra.mxu0 %vm417_vm3, %v398_v7 }
  0x24   : > { %3877 = vmatprep.mubr.msk.f32.mxu0 %vm4099_vm2, %v4098_v3 }
  0xe3   : > { %v455_v9 = vpop.f32.mrf.mxu0 }
  0xe4   : > { %v456_v10 = vadd.f32 %v4233_v8, %v455_v9 }
  0xe5   : > { %v3858_v11 = vpop.f32.mrf.mxu0 }
  0xe6   : > { %551 = vrot.lane.b32.xlu1 %v456_v10, %s4100_s19  ;;  %463 = vrot.lane.b32.xlu0 %v456_v10, %s4101_s20  ;;  %v806_v16 = vrot.slane %v456_v10, 6 }
  0xe7   : > { %v458_v12 = vpop.f32.mrf.mxu0 }
  0xe8   : > { %v459_v13 = vadd.f32 %v4233_v8, %v458_v12 }
  0xe9   : > { %v3859_v14 = vpop.f32.mrf.mxu0 }
  0xea   : > { %634 = vrot.lane.b32.xlu1 %v456_v10, %s4102_s22  ;;  %v807_v15 = vrot.slane %v459_v13, 6 }
  0xec   : > { %v4238_v17 = vsel %vm805_vm4, %v806_v16, %v807_v15 }
  0xee   : > { %632 = vrot.lane.b32.xlu1 %v456_v10, %s4103_s29 }
  0xf2   : > { %809 = vrot.lane.b32.xlu1 %v4238_v17, %s4101_s20 }
  0xf6   : > { %976 = vrot.lane.b32.xlu1 %v4238_v17, %s4102_s22 }
  0xfa   : > { %974 = vrot.lane.b32.xlu1 %v4238_v17, %s4103_s29 }
 0x158   : > { %v464_v18 = vpop.permute.xlu0 %463  ;;  %v552_v19 = vpop.permute.xlu1 %551 }
 0x159   : > { %3861 = vmatpush3.xpose.msk.msra.mxu1 %vm465_vm5, %v464_v18 }
 0x15a   : > { %3865 = vmatprep.subr.mxu1 %v4098_v3 }
 0x15c   : > { %3863 = vmatmul.mubr.msk.f32.vlgmr.msra.gmra.mxu1 %vm465_vm5, %v456_v10  ;;  %v635_v28 = vpop.permute.xlu1 %634 }
 0x15d   : > { %3866 = vmatpush3.msk.msra.mxu1 %vm557_vm6, %v552_v19  ;;  %3867 = vmatprep.mubr.msk.f32.mxu1 %vm4099_vm2, %v4098_v3 }
 0x15e   : > { %3870 = vmatprep.subr.mxu1 %v4098_v3 }
 0x160   : > { %v633_v29 = vpop.permute.xlu1 %632 }
 0x164   : > { %v810_v31 = vpop.permute.xlu1 %809 }
 0x168   : > { %v977_v32 = vpop.permute.xlu1 %976 }
 0x16c   : > { %v975_v33 = vpop.permute.xlu1 %974 }
 0x21c   : > { %v536_v20 = vpop.f32.mrf.mxu1 }
 0x21d   : > { %v540_v21 = vmul.f32 0.25, %v536_v20 }
 0x21e   : > { %v3864_v22 = vpop.f32.mrf.mxu1 }
 0x21f   : > { %v542_v23 = vsel %vm541_vm7, %v540_v21, -inf }
 0x220   : > { %543 = vmax.xlane.f32.xlu0 %v542_v23 }
 0x236   : > { %720 = vrot.lane.b32.xlu0 %v456_v10, %s4104_s11 }
 0x2a9   : > { %v544_v24 = vpop.xlane.xlu0 %543 }
 0x2aa   : > { %v545_v25 = vsub.f32 %v540_v21, %v544_v24 }
 0x2ac   : > { %v546_v26 = vmul.f32 1.442695, %v545_v25 }
 0x2ad   : > { %v721_v27 = vpop.permute.xlu0 %720 }
 0x2ae   : > { %4061 = vpow2.f32 %v546_v26  ;;  %3876 = vmatpush3.msk.msra.mxu0 %vm557_vm6, %v721_v27 }
 0x2af   : > { %3885 = vmatprep.subr.mxu0 %v4098_v3 }
 0x2bb   : > { %v4254_v30 = vpop.eup %4061 }
 0x2bc   : > { %3868 = vmatmul.mubr.msk.f32.vlgmr.msra.gmra.mxu1 %vm553_vm8, %v4254_v30  ;;  %v548_v1 = vsel %vm541_vm7, %v4254_v30, 0.0 }
 0x2bd   : > { %3871 = vmatpush3.xpose.msk.msra.mxu1 %vm465_vm5, %v635_v28  ;;  %3872 = vmatprep.mubr.msk.f32.mxu1 %vm4099_vm2, %v4098_v3 }
 0x2be   : > { %3880 = vmatprep.subr.mxu1 %v4098_v3 }
 0x2c0   : > { %3873 = vmatmul.mubr.msk.f32.vlgmr.msra.gmra.mxu1 %vm465_vm5, %v633_v29 }
 0x2c1   : > { %3881 = vmatpush3.xpose.msk.msra.mxu1 %vm465_vm5, %v810_v31  ;;  %3882 = vmatprep.mubr.msk.f32.mxu1 %vm4099_vm2, %v4098_v3 }
 0x2c2   : > { %3890 = vmatprep.subr.mxu1 %v4098_v3 }
 0x2c4   : > { %3883 = vmatmul.mubr.msk.f32.vlgmr.msra.gmra.mxu1 %vm465_vm5, %v4238_v17 }
 0x2c5   : > { %3891 = vmatpush3.xpose.msk.msra.mxu1 %vm465_vm5, %v977_v32  ;;  %3892 = vmatprep.mubr.msk.f32.mxu1 %vm4099_vm2, %v4098_v3 }
 0x2c6   : > { %3900 = vmatprep.subr.bf16.mxu1 %v4098_v3 }
 0x2c8   : > { %3893 = vmatmul.mubr.msk.f32.vlgmr.msra.gmra.mxu1 %vm465_vm5, %v975_v33 }
 0x2c9   : > { %3904 = vmatprep.mubr.msk.bf16.mxu1 %vm4099_vm2, %v4098_v3 }
 0x37c   : > { %v4276_v34 = vpop.f32.mrf.mxu1 }
 0x37e   : > { %v3869_v35 = vpop.f32.mrf.mxu1 }
 0x380   : > { %v706_v36 = vpop.f32.mrf.mxu1 }
 0x381   : > { %v710_v37 = vmul.f32 0.25, %v706_v36 }
 0x382   : > { %v3874_v38 = vpop.f32.mrf.mxu1 }
 0x383   : > { %v711_v39 = vsel %vm541_vm7, %v710_v37, -inf }
 0x384   : > { %712 = vmax.xlane.f32.xlu1 %v711_v39  ;;  %v881_v40 = vpop.f32.mrf.mxu1 }
 0x385   : > { %v885_v41 = vmul.f32 0.25, %v881_v40 }
 0x386   : > { %v3884_v42 = vpop.f32.mrf.mxu1 }
 0x387   : > { %v886_v43 = vsel %vm541_vm7, %v885_v41, -inf }
 0x388   : > { %887 = vmax.xlane.f32.xlu0 %v886_v43  ;;  %v1048_v44 = vpop.f32.mrf.mxu1 }
 0x389   : > { %v1052_v45 = vmul.f32 0.25, %v1048_v44 }
 0x38a   : > { %v3894_v46 = vpop.f32.mrf.mxu1 }
 0x38b   : > { %v1053_v47 = vsel %vm541_vm7, %v1052_v45, -inf }
 0x38c   : > { %1054 = vmax.xlane.f32.xlu0 %v1053_v47 }
 0x395   : > { %895 = vrot.lane.b32.xlu1 %v4238_v17, %s4100_s19 }
 0x3a2   : > { %1062 = vrot.lane.b32.xlu0 %v4238_v17, %s4104_s11 }
 0x40d   : > { %v713_v48 = vpop.xlane.xlu1 %712 }
 0x40e   : > { %v714_v49 = vsub.f32 %v710_v37, %v713_v48 }
 0x410   : > { %v715_v50 = vmul.f32 1.442695, %v714_v49 }
 0x411   : > { %v888_v51 = vpop.xlane.xlu0 %887  ;;  %v896_v58 = vpop.permute.xlu1 %895 }
 0x412   : > { %4063 = vpow2.f32 %v715_v50  ;;  %v889_v52 = vsub.f32 %v885_v41, %v888_v51 }
 0x414   : > { %v890_v53 = vmul.f32 1.442695, %v889_v52  ;;  %v1263_v52 = vld [vmem:[%s4179_s18 + $0x80] sm:$0xff] }
 0x415   : > { %v1055_v54 = vpop.xlane.xlu0 %1054 }
 0x416   : > { %4065 = vpow2.f32 %v890_v53  ;;  %v1056_v55 = vsub.f32 %v1052_v45, %v1055_v54  ;;  %v1271_v53 = vld [vmem:[%s4179_s18 + $0xc0] sm:$0xff]  ;;  %v1264_v54 = vld [vmem:[%s4179_s18 + $0x88] sm:$0xff] }
 0x418   : > { %v1057_v56 = vmul.f32 1.442695, %v1056_v55  ;;  %v3497_v55 = vcombine.high %v1263_v52, %v1271_v53 }
 0x419   : > { %v1063_v61 = vpop.permute.xlu0 %1062 }
 0x41a   : > { %4067 = vpow2.f32 %v1057_v56  ;;  %v1272_v56 = vld [vmem:[%s4179_s18 + $0xc8] sm:$0xff] }
 0x41f   : > { %v4064_v57 = vpop.eup %4063 }
 0x420   : > { %3878 = vmatmul.mubr.msk.f32.vlgmr.msra.gmra.mxu0 %vm553_vm8, %v4064_v57  ;;  %v717_v59 = vsel %vm541_vm7, %v4064_v57, 0.0  ;;  %v3496_v57 = vcombine.low %v1263_v52, %v1271_v53  ;;  %v1260_v52 = vld [vmem:[%s4179_s18 + $0x68] sm:$0xff] }
 0x421   : > { %3886 = vmatpush3.msk.msra.mxu0 %vm557_vm6, %v896_v58  ;;  %718 = vadd.xlane.f32.xlu1 %v717_v59  ;;  %v3498_v58 = vcombine.low %v1264_v54, %v1272_v56  ;;  %v3499_v59 = vcombine.high %v1264_v54, %v1272_v56 }
 0x422   : > { %3887 = vmatprep.mubr.msk.f32.mxu0 %vm4099_vm2, %v4098_v3  ;;  %3895 = vmatprep.subr.mxu0 %v4098_v3 }
 0x423   : > { %v4066_v60 = vpop.eup %4065 }
 0x424   : > { %3888 = vmatmul.mubr.msk.f32.vlgmr.msra.gmra.mxu0 %vm553_vm8, %v4066_v60  ;;  %v892_v0 = vsel %vm541_vm7, %v4066_v60, 0.0  ;;  %v1247_v60 = vld [vmem:[%s4179_s18] sm:$0xff] }
 0x425   : > { %3896 = vmatpush3.msk.msra.mxu0 %vm557_vm6, %v1063_v61  ;;  %3897 = vmatprep.mubr.msk.f32.mxu0 %vm4099_vm2, %v4098_v3  ;;  %v1255_v61 = vld [vmem:[%s4179_s18 + $0x40] sm:$0xff] }
 0x426   : > { %1538 = vmatprep.subr.bf16.mxu0 %v3497_v55 }
 0x427   : > { %v4068_v62 = vpop.eup %4067 }
 0x428   : > { %3898 = vmatmul.mubr.msk.f32.vlgmr.msra.gmra.mxu0 %vm553_vm8, %v4068_v62  ;;  %v1059_v63 = vsel %vm541_vm7, %v4068_v62, 0.0  ;;  %v1248_v62 = vld [vmem:[%s4179_s18 + $0x8] sm:$0xff] }
 0x429   : > { %1060 = vadd.xlane.f32.xlu0 %v1059_v63  ;;  %1539 = vmatpush1.bf16.msra.mxu0 %v3496_v57  ;;  %v3481_v63 = vcombine.high %v1247_v60, %v1255_v61  ;;  %v1269_v57 = vld [vmem:[%s4179_s18 + $0xb0] sm:$0xff] }
 0x42b   : > { %1540 = vmatprep.subr.bf16.mxu0 %v3481_v63 }
 0x42d   : > { %893 = vadd.xlane.f32.xlu0 %v892_v0  ;;  %v1256_v0 = vld [vmem:[%s4179_s18 + $0x48] sm:$0xff] }
 0x431   : > { %549 = vadd.xlane.f32.xlu0 %v548_v1  ;;  %v3480_v1 = vcombine.low %v1247_v60, %v1255_v61  ;;  %v1278_v60 = vld [vmem:[%s4179_s18 + $0xf8] sm:$0xff] }
 0x433   : > { %1541 = vmatpush1.bf16.msra.mxu0 %v3480_v1  ;;  %v1253_v1 = vld [vmem:[%s4179_s18 + $0x30] sm:$0xff] }
 0x447   : > { %1153 = vrot.lane.b32.xlu0 %v4205_v2, %s4105_s23 }
 0x44b   : > { %1151 = vrot.lane.b32.xlu0 %v4210_v4, %s4105_s23 }
 0x4aa   : > { %v719_v10 = vpop.xlane.xlu1 %718 }
 0x4b2   : > { %v1061_v7 = vpop.xlane.xlu0 %1060 }
 0x4b6   : > { %v894_v9 = vpop.xlane.xlu0 %893 }
 0x4b7   : > { %4069 = vrcp.f32 %v894_v9  ;;  %v3483_v9 = vcombine.high %v1248_v62, %v1256_v0 }
 0x4b8   : > { %4071 = vrcp.f32 %v719_v10  ;;  %v1265_v10 = vld [vmem:[%s4179_s18 + $0x90] sm:$0xff] }
 0x4b9   : > { %4073 = vrcp.f32 %v1061_v7  ;;  %v3482_v7 = vcombine.low %v1248_v62, %v1256_v0 }
 0x4ba   : > { %v550_v11 = vpop.xlane.xlu0 %549 }
 0x4bb   : > { %4075 = vrcp.f32 %v550_v11  ;;  %v1273_v11 = vld [vmem:[%s4179_s18 + $0xd0] sm:$0xff] }
 0x4be   : > { %v1154_v13 = vpop.permute.xlu0 %1153 }
 0x4bf   : > { %3901 = vmatpush3.bf16.msra.mxu1 %v1154_v13  ;;  %v4107_v13 = vmov 0  }
 0x4c0   : > { %3902 = vmatprep.subr.bf16.mxu1 %v4098_v3  ;;  %1558 = vmatprep.mubr.bf16.mxu0 %v4107_v13 }
 0x4c2   : > { %v1152_v2 = vpop.permute.xlu0 %1151 }
 0x4c3   : > { %3903 = vmatpush3.bf16.msra.mxu1 %v1152_v2 }
 0x4c4   : > { %v4070_v15 = vpop.eup %4069  ;;  %1581 = vmatprep.subr.bf16.mxu1 %v3499_v59  ;;  %v1270_v59 = vld [vmem:[%s4179_s18 + $0xb8] sm:$0xff] }
 0x4c5   : > { %v4072_v4 = vpop.eup %4071  ;;  %v3511_v0 = vcombine.high %v1270_v59, %v1278_v60 }
 0x4c6   : > { %v4074_v19 = vpop.eup %4073 }
 0x4c8   : > { %v4076_v3 = vpop.eup %4075 }
 0x4c9   : > { %v631_v28 = vmul.f32 %v4076_v3, %v4276_v34 }
 0x4e0   : > { %v793_v12 = vpop.f32.mrf.mxu0 }
 0x4e1   : > { %v798_v21 = vmul.f32 %v4072_v4, %v793_v12  ;;  %v1266_v12 = vld [vmem:[%s4179_s18 + $0x98] sm:$0xff] }
 0x4e2   : > { %v3879_v14 = vpop.f32.mrf.mxu0 }
 0x4e3   : > { %v3501_v14 = vcombine.high %v1265_v10, %v1273_v11 }
 0x4e4   : > { %v968_v16 = vpop.f32.mrf.mxu0 }
 0x4e5   : > { %v973_v17 = vmul.f32 %v4070_v15, %v968_v16  ;;  %v1274_v15 = vld [vmem:[%s4179_s18 + $0xd8] sm:$0xff]  ;;  %v3500_v16 = vcombine.low %v1265_v10, %v1273_v11  ;;  %1624 = vmatprep.subr.bf16.mxu0 %v3501_v14 }
 0x4e6   : > { %v3889_v18 = vpop.f32.mrf.mxu0  ;;  %v3503_v2 = vcombine.high %v1266_v12, %v1274_v15  ;;  %v1262_v10 = vld [vmem:[%s4179_s18 + $0x78] sm:$0xff] }
 0x4e8   : > { %v1135_v20 = vpop.f32.mrf.mxu0 }
 0x4e9   : > { %v1140_v22 = vmul.f32 %v4074_v19, %v1135_v20 }
 0x4ea   : > { %v3899_v23 = vpop.f32.mrf.mxu0 }
 0x4eb   : > { %v3926_v24 = vpack.i.bf16 %v798_v21, %v1140_v22  ;;  %v1234_v22 = vlaneseq }
 0x4ed   : > { %3927 = vrot.lane.b32.xlu1 %v3926_v24, %s4106_s24  ;;  %v4332_v24 = vshrl.u32 %v1234_v22, 7  ;;  %v3940_v22 = vld [vmem:[%s4191_s26 + $0xb0] sm:$0xff]  }
 0x4ef   : > { %v4335_v3 = vsub.s32 0, %v4332_v24 }
 0x4f1   : > { %1157 = vrot.lane.b32.xlu1 %v4233_v8, %s4105_s23 }
 0x55f   : > { %v3928_v25 = vpop.permute.xlu1 %3927 }
 0x560   : > { %v3930_v26 = vunpack.i.h.bf16 %v3928_v25  ;;  %v3929_v27 = vunpack.i.l.bf16 %v3928_v25  ;;  %v397_v25 = vld [vmem:[%s4196_s12] sm:$0x1f] }
 0x562   : > { %v1145_v29 = vsel %vm465_vm5, %v973_v17, %v3929_v27  ;;  %v803_v31 = vsel %vm465_vm5, %v631_v28, %v3930_v26  ;;  %v3502_v17 = vcombine.low %v1266_v12, %v1274_v15  ;;  %v1237_v27 = vrot.slane %v397_v25, %v4335_v3 }
 0x563   : > { %v1147_v30 = vrot.slane %v1145_v29, 2  ;;  %v1158_v35 = vpop.permute.xlu1 %1157  ;;  %v4340_v28 = vsub.s32 1, %v4332_v24  ;;  %v3510_v12 = vcombine.low %v1270_v59, %v1278_v60 }
 0x565   : > { %v1149_v32 = vsel %vm557_vm6, %v803_v31, %v1147_v30  ;;  %v1243_v31 = vrot.slane %v397_v25, %v4340_v28  ;;  %v3942_v25 = vld [vmem:[%s4191_s26 + $0xe8] sm:$0xff]  }
 0x566   : > { %v1150_v33 = vpack.c.bf16 %v1147_v30, %v1149_v32 }
 0x568   : > { %3905 = vmatmul.mubr.msk.bf16.vlgmr.msra.gmra.mxu1 %vm417_vm3, %v1150_v33 }
 0x569   : > { %1582 = vmatpush1.bf16.msra.mxu1 %v3498_v58  ;;  %1601 = vmatprep.mubr.bf16.mxu1 %v4107_v13  ;;  %v1277_v58 = vld [vmem:[%s4179_s18 + $0xf0] sm:$0xff] }
 0x56a   : > { %1583 = vmatprep.subr.bf16.mxu1 %v3483_v9  ;;  %v3509_v63 = vcombine.high %v1269_v57, %v1277_v58  ;;  %v1254_v9 = vld [vmem:[%s4179_s18 + $0x38] sm:$0xff]  ;;  %v3508_v11 = vcombine.low %v1269_v57, %v1277_v58 }
 0x56b   : > { %v3495_v15 = vcombine.high %v1254_v9, %v1262_v10 }
 0x56d   : > { %1584 = vmatpush1.bf16.msra.mxu1 %v3482_v7  ;;  %v1261_v7 = vld [vmem:[%s4179_s18 + $0x70] sm:$0xff] }
 0x56e   : > { %1667 = vmatprep.subr.bf16.mxu1 %v3503_v2  ;;  %v3493_v14 = vcombine.high %v1253_v1, %v1261_v7  ;;  %v3933_v2 = vld [vmem:[%s4191_s26 + $0x78] sm:$0xff]  }
 0x628   : > { %v1197_v36 = vpop.f32.mrf.mxu1 }
 0x629   : > { %v1198_v8 = vadd.f32 %v1197_v36, %v1158_v35  ;;  %v1249_v36 = vld [vmem:[%s4179_s18 + $0x10] sm:$0xff] }
 0x62a   : > { %v3906_v37 = vpop.f32.mrf.mxu1 }
 0x62b   : > { %v1204_v38 = vadd.f32 %v1198_v8, %v4214_v5  ;;  %v1257_v8 = vld [vmem:[%s4179_s18 + $0x50] sm:$0xff]  ;;  %v1250_v37 = vld [vmem:[%s4179_s18 + $0x18] sm:$0xff] }
 0x62c   : > { %v1200_v39 = vpop.f32.mrf.mxu1 }
 0x62d   : > { %v1201_v40 = vadd.f32 %v1200_v39, %v1158_v35  ;;  %v1206_v34 = vsel %vm417_vm3, %v1204_v38, 0.0 }
 0x62e   : > { %1207 = vadd.xlane.f32.xlu0 %v1206_v34  ;;  %v3907_v41 = vpop.f32.mrf.mxu1 }
 0x62f   : > { %v1205_v42 = vadd.f32 %v1201_v40, %v4216_v6  ;;  %v3485_v41 = vcombine.high %v1249_v36, %v1257_v8 }
 0x631   : > { %v1210_v43 = vsel %vm1209_vm9, %v1205_v42, 0.0 }
 0x632   : > { %1211 = vadd.xlane.f32.xlu1 %v1210_v43  ;;  %v1267_v43 = vld [vmem:[%s4179_s18 + $0xa0] sm:$0xff] }
 0x6b7   : > { %v1208_v44 = vpop.xlane.xlu0 %1207 }
 0x6b8   : > { %v1214_v45 = vmul.f32 0.03125, %v1208_v44  ;;  %v1275_v44 = vld [vmem:[%s4179_s18 + $0xe0] sm:$0xff] }
 0x6b9   : > { %v3504_v53 = vcombine.low %v1267_v43, %v1275_v44 }
 0x6ba   : > { %v1216_v46 = vsub.f32 %v1204_v38, %v1214_v45  ;;  %v1258_v38 = vld [vmem:[%s4179_s18 + $0x58] sm:$0xff]  ;;  %v1268_v45 = vld [vmem:[%s4179_s18 + $0xa8] sm:$0xff] }
 0x6bb   : > { %v1212_v5 = vpop.xlane.xlu1 %1211 }
 0x6bc   : > { %v1215_v47 = vmul.f32 0.03125, %v1212_v5  ;;  %v1218_v48 = vmul.f32 %v1216_v46, %v1216_v46  ;;  %v3484_v5 = vcombine.low %v1249_v36, %v1257_v8  ;;  %v3951_v36 = vld [vmem:[%s4191_s26 + $0x18] sm:$0xff]  }
 0x6bd   : > { %v3952_v8 = vld [vmem:[%s4191_s26 + $0x98] sm:$0xff]  }
 0x6be   : > { %v1217_v49 = vsub.f32 %v1205_v42, %v1215_v47  ;;  %v1220_v50 = vsel %vm417_vm3, %v1218_v48, 0.0  ;;  %v3487_v42 = vcombine.high %v1250_v37, %v1258_v38  ;;  %v3486_v47 = vcombine.low %v1250_v37, %v1258_v38  ;;  %v3953_v37 = vld [vmem:[%s4191_s26 + $0x50] sm:$0xff]  }
 0x6bf   : > { %1221 = vadd.xlane.f32.xlu0 %v1220_v50  ;;  %v3505_v48 = vcombine.high %v1267_v43, %v1275_v44  ;;  %v1251_v50 = vld [vmem:[%s4179_s18 + $0x20] sm:$0xff]  ;;  %v3954_v38 = vld [vmem:[%s4191_s26 + $0xd0] sm:$0xff]   ;;  %v3958_v43 = vld [vmem:[%s4191_s26 + $0xc8] sm:$0xff]  }
 0x6c0   : > { %v1219_v51 = vmul.f32 %v1217_v49, %v1217_v49  ;;  %v3959_v44 = vld [vmem:[%s4191_s26 + $0x8] sm:$0xff]  }
 0x6c2   : > { %v1223_v6 = vsel %vm1209_vm9, %v1219_v51, 0.0  ;;  %v1259_v51 = vld [vmem:[%s4179_s18 + $0x60] sm:$0xff] }
 0x6c3   : > { %1224 = vadd.xlane.f32.xlu0 %v1223_v6  ;;  %v1252_v6 = vld [vmem:[%s4179_s18 + $0x28] sm:$0xff]  ;;  %v3489_v55 = vcombine.high %v1251_v50, %v1259_v51  ;;  %v3488_v61 = vcombine.low %v1251_v50, %v1259_v51  ;;  %v3966_v50 = vld [vmem:[%s4191_s26 + $0x1f8] sm:$0xff]   ;;  %v4428_v51 = vsub.s32 3, %v4332_v24 }
 0x6c4   : > { %v3491_v56 = vcombine.high %v1252_v6, %v1260_v52  ;;  %v3490_v62 = vcombine.low %v1252_v6, %v1260_v52  ;;  %v4431_v6 = vsub.s32 2, %v4332_v24  ;;  %v4434_v52 = vld [vmem:[%s4184_s21] sm:$0xff] }
 0x6c5   : > { %v1286_v57 = vrot.slane %v4434_v52, %v4335_v3 }
 0x6c6   : > { %v1294_v58 = vrot.slane %v4434_v52, %v4431_v6 }
 0x748   : > { %v1222_v18 = vpop.xlane.xlu0 %1221 }
 0x749   : > { %v1226_v4 = vmul.f32 0.03125, %v1222_v18  ;;  %v3934_v18 = vld [vmem:[%s4191_s26 + $0xf8] sm:$0xff]  }
 0x74b   : > { %v1228_v19 = vadd.f32 1e-05, %v1226_v4  ;;  %v3935_v4 = vld [vmem:[%s4191_s26 + $0x38] sm:$0xff]  }
 0x74c   : > { %v1225_v20 = vpop.xlane.xlu0 %1224 }
 0x74d   : > { %4077 = vrsqrt.f32 %v1228_v19  ;;  %v1227_v21 = vmul.f32 0.03125, %v1225_v20  ;;  %v3936_v19 = vld [vmem:[%s4191_s26 + $0xb8] sm:$0xff]   ;;  %v3937_v20 = vld [vmem:[%s4191_s26 + $0x70] sm:$0xff]  }
 0x74f   : > { %v1229_v23 = vadd.f32 1e-05, %v1227_v21  ;;  %v3938_v21 = vld [vmem:[%s4191_s26 + $0xf0] sm:$0xff]  }
 0x751   : > { %4079 = vrsqrt.f32 %v1229_v23  ;;  %v3941_v23 = vld [vmem:[%s4191_s26 + $0x68] sm:$0xff]  }
 0x75a   : > { %v4078_v26 = vpop.eup %4077 }
 0x75b   : > { %v1232_v29 = vmul.f32 %v4078_v26, %v1216_v46  ;;  %v1276_v46 = vld [vmem:[%s4179_s18 + $0xe8] sm:$0xff] }
 0x75c   : > { %v3506_v54 = vcombine.low %v1268_v45, %v1276_v46  ;;  %v3943_v26 = vld [vmem:[%s4191_s26 + $0x28] sm:$0xff]  }
 0x75d   : > { %v1238_v32 = vmul.f32 %v1237_v27, %v1232_v29  ;;  %v3945_v29 = vld [vmem:[%s4191_s26 + $0x60] sm:$0xff]  }
 0x75e   : > { %v4080_v30 = vpop.eup %4079 }
 0x75f   : > { %v1233_v33 = vmul.f32 %v4080_v30, %v1217_v49  ;;  %v4347_v39 = vadd.f32 %v1243_v31, %v1238_v32  ;;  %v3507_v49 = vcombine.high %v1268_v45, %v1276_v46  ;;  %v3946_v30 = vld [vmem:[%s4191_s26 + $0xe0] sm:$0xff]   ;;  %v3960_v45 = vld [vmem:[%s4191_s26 + $0x88] sm:$0xff]  }
 0x760   : > { %v3948_v32 = vld [vmem:[%s4191_s26 + $0xa0] sm:$0xff]  }
 0x761   : > { %v1239_v35 = vmul.f32 %v1237_v27, %v1233_v33  ;;  %v3944_v27 = vld [vmem:[%s4191_s26 + $0xa8] sm:$0xff]   ;;  %v3949_v33 = vld [vmem:[%s4191_s26 + $0x58] sm:$0xff]   ;;  %v3961_v46 = vld [vmem:[%s4191_s26 + $0x40] sm:$0xff]  }
 0x763   : > { %v4349_v40 = vadd.f32 %v1243_v31, %v1239_v35  ;;  %v3947_v31 = vld [vmem:[%s4191_s26 + $0x20] sm:$0xff]   ;;  %v3950_v35 = vld [vmem:[%s4191_s26 + $0xd8] sm:$0xff]  }
 0x765   : > { %v4353_v34 = vpack.c.bf16 %v4349_v40, %v4347_v39 }
 0x767   : > { %3512 = vmatmul.mubr.msk.bf16.vlgmr.msra.gmra.mxu0 %vm417_vm3, %v4353_v34  ;;  %3513 = vmatmul.mubr.msk.bf16.vlgmr.msra.gmra.mxu1 %vm417_vm3, %v4353_v34 }
 0x768   : > { %1625 = vmatpush1.bf16.msra.mxu0 %v3500_v16  ;;  %1668 = vmatpush1.bf16.msra.mxu1 %v3502_v17  ;;  %v3492_v16 = vcombine.low %v1253_v1, %v1261_v7  ;;  %v3494_v17 = vcombine.low %v1254_v9, %v1262_v10 }
 0x769   : > { %1626 = vmatprep.subr.bf16.mxu0 %v3485_v41  ;;  %1669 = vmatprep.subr.bf16.mxu1 %v3487_v42  ;;  %v3956_v41 = vld [vmem:[%s4191_s26 + $0x90] sm:$0xff]   ;;  %v3957_v42 = vld [vmem:[%s4191_s26 + $0x48] sm:$0xff]  }
 0x76a   : > { %1644 = vmatprep.mubr.bf16.mxu0 %v4107_v13  ;;  %1687 = vmatprep.mubr.bf16.mxu1 %v4107_v13 }
 0x76c   : > { %1627 = vmatpush1.bf16.msra.mxu0 %v3484_v5  ;;  %1670 = vmatpush1.bf16.msra.mxu1 %v3486_v47  ;;  %v3962_v5 = vld [vmem:[%s4191_s26 + $0xc0] sm:$0xff]  }
 0x76d   : > { %1710 = vmatprep.subr.bf16.mxu0 %v3505_v48  ;;  %1753 = vmatprep.subr.bf16.mxu1 %v3507_v49  ;;  %v3963_v47 = vld [vmem:[%s4191_s26] sm:$0xff]   ;;  %v3965_v49 = vld [vmem:[%s4191_s26 + $0x178] sm:$0xff]  }
 0x76e   : > { %v3964_v48 = vld [vmem:[%s4191_s26 + $0x80] sm:$0xff]  }
 0x76f   : > { %3514 = vmatmul.mubr.msk.bf16.vlgmr.msra.gmra.mxu0 %vm417_vm3, %v4353_v34  ;;  %3515 = vmatmul.mubr.msk.bf16.vlgmr.msra.gmra.mxu1 %vm417_vm3, %v4353_v34 }
 0x770   : > { %1711 = vmatpush1.bf16.msra.mxu0 %v3504_v53  ;;  %1754 = vmatpush1.bf16.msra.mxu1 %v3506_v54 }
 0x771   : > { %1712 = vmatprep.subr.bf16.mxu0 %v3489_v55  ;;  %1755 = vmatprep.subr.bf16.mxu1 %v3491_v56  ;;  %v1290_v55 = vrot.slane %v4434_v52, %v4340_v28  ;;  %v1298_v56 = vrot.slane %v4434_v52, %v4428_v51 }
 0x772   : > { %1730 = vmatprep.mubr.bf16.mxu0 %v4107_v13  ;;  %1773 = vmatprep.mubr.bf16.mxu1 %v4107_v13 }
 0x774   : > { %1713 = vmatpush1.bf16.msra.mxu0 %v3488_v61  ;;  %1756 = vmatpush1.bf16.msra.mxu1 %v3490_v62 }
 0x775   : > { %1796 = vmatprep.subr.bf16.mxu0 %v3509_v63  ;;  %1839 = vmatprep.subr.bf16.mxu1 %v3511_v0  ;;  %v1305_v63 = vsub.s32 5, %v4332_v24  ;;  %v1313_v0 = vsub.s32 7, %v4332_v24 }
 0x777   : > { %3516 = vmatmul.mubr.msk.bf16.vlgmr.msra.gmra.mxu0 %vm417_vm3, %v4353_v34  ;;  %3517 = vmatmul.mubr.msk.bf16.vlgmr.msra.gmra.mxu1 %vm417_vm3, %v4353_v34 }
 0x778   : > { %1797 = vmatpush1.bf16.msra.mxu0 %v3508_v11  ;;  %1840 = vmatpush1.bf16.msra.mxu1 %v3510_v12 }
 0x779   : > { %1798 = vmatprep.subr.bf16.mxu0 %v3493_v14  ;;  %1841 = vmatprep.subr.bf16.mxu1 %v3495_v15 }
 0x77a   : > { %1816 = vmatprep.mubr.bf16.mxu0 %v4107_v13  ;;  %1859 = vmatprep.mubr.bf16.mxu1 %v4107_v13  ;;  %v3939_v13 = vld [vmem:[%s4191_s26 + $0x30] sm:$0xff]  }
 0x77c   : > { %1799 = vmatpush1.bf16.msra.mxu0 %v3492_v16  ;;  %1842 = vmatpush1.bf16.msra.mxu1 %v3494_v17 }
 0x77d   : > { %3676 = vmatprep.subr.bf16.mxu0 %v3933_v2  ;;  %3698 = vmatprep.subr.bf16.mxu1 %v3934_v18 }
 0x77f   : > { %3518 = vmatmul.mubr.msk.bf16.vlgmr.msra.gmra.mxu0 %vm417_vm3, %v4353_v34  ;;  %3519 = vmatmul.mubr.msk.bf16.vlgmr.msra.gmra.mxu1 %vm417_vm3, %v4353_v34  ;;  %v3955_v34 = vld [vmem:[%s4191_s26 + $0x10] sm:$0xff]  }
 0x780   : > { %3677 = vmatpush3.bf16.msra.mxu0 %v3935_v4  ;;  %3699 = vmatpush3.bf16.msra.mxu1 %v3936_v19 }
 0x781   : > { %3678 = vmatprep.subr.bf16.mxu0 %v3937_v20  ;;  %3700 = vmatprep.subr.bf16.mxu1 %v3938_v21  ;;  %v1306_v20 = vrot.slane %v4434_v52, %v1305_v63  ;;  %v1314_v21 = vrot.slane %v4434_v52, %v1313_v0 }
 0x784   : > { %3679 = vmatpush3.bf16.msra.mxu0 %v3939_v13  ;;  %3701 = vmatpush3.bf16.msra.mxu1 %v3940_v22 }
 0x785   : > { %3680 = vmatprep.subr.bf16.mxu0 %v3941_v23  ;;  %3702 = vmatprep.subr.bf16.mxu1 %v3942_v25 }
 0x788   : > { %3681 = vmatpush3.bf16.msra.mxu0 %v3943_v26  ;;  %3703 = vmatpush3.bf16.msra.mxu1 %v3944_v27 }
 0x789   : > { %3682 = vmatprep.subr.bf16.mxu0 %v3945_v29  ;;  %3704 = vmatprep.subr.bf16.mxu1 %v3946_v30 }
 0x78c   : > { %3683 = vmatpush3.bf16.msra.mxu0 %v3947_v31  ;;  %3705 = vmatpush3.bf16.msra.mxu1 %v3948_v32 }
 0x78d   : > { %3684 = vmatprep.subr.bf16.mxu0 %v3949_v33  ;;  %3706 = vmatprep.subr.bf16.mxu1 %v3950_v35  ;;  %v3967_v33 = vld [vmem:[%s4191_s26 + $0x138] sm:$0xff]  }
 0x78e   : > { %v3968_v35 = vld [vmem:[%s4191_s26 + $0x1b8] sm:$0xff]  }
 0x790   : > { %3685 = vmatpush3.bf16.msra.mxu0 %v3951_v36  ;;  %3707 = vmatpush3.bf16.msra.mxu1 %v3952_v8 }
 0x791   : > { %3686 = vmatprep.subr.bf16.mxu0 %v3953_v37  ;;  %3708 = vmatprep.subr.bf16.mxu1 %v3954_v38 }
 0x794   : > { %3687 = vmatpush3.bf16.msra.mxu0 %v3955_v34  ;;  %3709 = vmatpush3.bf16.msra.mxu1 %v3956_v41  ;;  %v3969_v34 = vld [vmem:[%s4191_s26 + $0x170] sm:$0xff]  }
 0x795   : > { %3688 = vmatprep.subr.bf16.mxu0 %v3957_v42  ;;  %3710 = vmatprep.subr.bf16.mxu1 %v3958_v43  ;;  %v3970_v41 = vld [vmem:[%s4191_s26 + $0x1f0] sm:$0xff]  }
 0x798   : > { %3689 = vmatpush3.bf16.msra.mxu0 %v3959_v44  ;;  %3711 = vmatpush3.bf16.msra.mxu1 %v3960_v45 }
 0x799   : > { %3690 = vmatprep.subr.bf16.mxu0 %v3961_v46  ;;  %3712 = vmatprep.subr.bf16.mxu1 %v3962_v5 }
 0x79c   : > { %3691 = vmatpush3.bf16.msra.mxu0 %v3963_v47  ;;  %3713 = vmatpush3.bf16.msra.mxu1 %v3964_v48  ;;  %v3971_v47 = vld [vmem:[%s4191_s26 + $0x130] sm:$0xff]  }
 0x79d   : > { %3720 = vmatprep.subr.bf16.mxu0 %v3965_v49  ;;  %3742 = vmatprep.subr.bf16.mxu1 %v3966_v50  ;;  %v3972_v48 = vld [vmem:[%s4191_s26 + $0x1b0] sm:$0xff]   ;;  %v3973_v49 = vld [vmem:[%s4191_s26 + $0x168] sm:$0xff]  }
 0x827   : > { %v1560_v53 = vpop.f32.mrf.mxu0  ;;  %v1603_v54 = vpop.f32.mrf.mxu1 }
 0x828   : > { %v1561_v11 = vadd.f32 %v1560_v53, %v1286_v57  ;;  %v1604_v12 = vadd.f32 %v1603_v54, %v1294_v58 }
 0x829   : > { %v1562_v59 = vpop.f32.mrf.mxu0  ;;  %v1605_v60 = vpop.f32.mrf.mxu1 }
 0x82a   : > { %v1563_v1 = vadd.f32 %v1562_v59, %v1290_v55  ;;  %v1606_v7 = vadd.f32 %v1605_v60, %v1298_v56  ;;  %v1870_v26 = vmax.f32 %v1561_v11, 0.0  ;;  %v1872_v27 = vmax.f32 %v1604_v12, 0.0  ;;  %v3975_v59 = vld [vmem:[%s4191_s26 + $0x128] sm:$0xff]   ;;  %v3981_v11 = vld [vmem:[%s4191_s26 + $0x158] sm:$0xff]  }
 0x82b   : > { %v1564_v61 = vpop.f32.mrf.mxu0  ;;  %v1607_v62 = vpop.f32.mrf.mxu1  ;;  %v3976_v60 = vld [vmem:[%s4191_s26 + $0x1a8] sm:$0xff]   ;;  %v3982_v12 = vld [vmem:[%s4191_s26 + $0x1d8] sm:$0xff]  }
 0x82c   : > { %v1565_v9 = vadd.f32 %v1564_v61, %v1286_v57  ;;  %v1608_v10 = vadd.f32 %v1607_v62, %v1294_v58  ;;  %v1871_v13 = vmax.f32 %v1563_v1, 0.0  ;;  %v1873_v22 = vmax.f32 %v1606_v7, 0.0  ;;  %v3977_v61 = vld [vmem:[%s4191_s26 + $0x160] sm:$0xff]  }
 0x82d   : > { %v1566_v14 = vpop.f32.mrf.mxu0  ;;  %v1609_v15 = vpop.f32.mrf.mxu1  ;;  %v3978_v62 = vld [vmem:[%s4191_s26 + $0x1e0] sm:$0xff]  }
 0x82e   : > { %v1567_v16 = vadd.f32 %v1566_v14, %v1290_v55  ;;  %v1610_v17 = vadd.f32 %v1609_v15, %v1298_v56  ;;  %v1886_v2 = vmax.f32 %v1565_v9, 0.0  ;;  %v1888_v18 = vmax.f32 %v1608_v10, 0.0  ;;  %v3974_v56 = vld [vmem:[%s4191_s26 + $0x1e8] sm:$0xff]   ;;  %v3979_v7 = vld [vmem:[%s4191_s26 + $0x120] sm:$0xff]   ;;  %v3983_v15 = vld [vmem:[%s4191_s26 + $0x118] sm:$0xff]  }
 0x82f   : > { %v4446_v4 = vpop.f32.mrf.mxu0  ;;  %v4448_v19 = vpop.f32.mrf.mxu1  ;;  %v3980_v10 = vld [vmem:[%s4191_s26 + $0x1a0] sm:$0xff]  }
 0x830   : > { %v1887_v23 = vmax.f32 %v1567_v16, 0.0  ;;  %v1889_v25 = vmax.f32 %v1610_v17, 0.0  ;;  %v1902_v36 = vpack.c.bf16 %v1886_v2, %v1870_v26  ;;  %v1904_v8 = vpack.c.bf16 %v1888_v18, %v1872_v27  ;;  %v3984_v17 = vld [vmem:[%s4191_s26 + $0x198] sm:$0xff]   ;;  %v3985_v2 = vld [vmem:[%s4191_s26 + $0x150] sm:$0xff]   ;;  %v3989_v26 = vld [vmem:[%s4191_s26 + $0x148] sm:$0xff]  }
 0x831   : > { %v1648_v29 = vpop.f32.mrf.mxu0  ;;  %v1691_v30 = vpop.f32.mrf.mxu1  ;;  %v3986_v18 = vld [vmem:[%s4191_s26 + $0x1d0] sm:$0xff]   ;;  %v3990_v27 = vld [vmem:[%s4191_s26 + $0x1c8] sm:$0xff]  }
 0x832   : > { %v1903_v31 = vpack.c.bf16 %v1887_v23, %v1871_v13  ;;  %v1905_v32 = vpack.c.bf16 %v1889_v25, %v1873_v22  ;;  %v1649_v42 = vadd.f32 %v1648_v29, %v1306_v20  ;;  %v1692_v43 = vadd.f32 %v1691_v30, %v1314_v21  ;;  %v3987_v22 = vld [vmem:[%s4191_s26 + $0x110] sm:$0xff]  }
 0x833   : > { %v4458_v37 = vpop.f32.mrf.mxu0  ;;  %v4460_v38 = vpop.f32.mrf.mxu1  ;;  %v3988_v25 = vld [vmem:[%s4191_s26 + $0x190] sm:$0xff]  }
 0x834   : > { %2978 = vmatprep.mubr.bf16.mxu0 %v1903_v31  ;;  %3019 = vmatprep.mubr.bf16.mxu1 %v1905_v32  ;;  %v1875_v50 = vmax.f32 %v1649_v42, 0.0  ;;  %v1877_v53 = vmax.f32 %v1692_v43, 0.0  ;;  %v4502_v31 = vld [vmem:[%s4184_s21 + $0x8] sm:$0xff]  ;;  %v3994_v43 = vld [vmem:[%s4191_s26 + $0x1c0] sm:$0xff]  }
 0x835   : > { %v1652_v44 = vpop.f32.mrf.mxu0  ;;  %v1695_v45 = vpop.f32.mrf.mxu1  ;;  %2979 = vmatmul.mubr.bf16.vlgmr.msra.gmra.mxu0 %v1902_v36  ;;  %3020 = vmatmul.mubr.bf16.vlgmr.msra.gmra.mxu1 %v1904_v8  ;;  %v1322_v36 = vrot.slane %v4502_v31, %v4340_v28  ;;  %v1330_v42 = vrot.slane %v4502_v31, %v4428_v51 }
 0x836   : > { %v1653_v46 = vadd.f32 %v1652_v44, %v1306_v20  ;;  %v1696_v5 = vadd.f32 %v1695_v45, %v1314_v21  ;;  %3721 = vmatpush3.bf16.msra.mxu0 %v3967_v33  ;;  %3743 = vmatpush3.bf16.msra.mxu1 %v3968_v35  ;;  %v4485_v20 = vsub.s32 4, %v4332_v24  ;;  %v1309_v21 = vsub.s32 6, %v4332_v24  ;;  %v3991_v33 = vld [vmem:[%s4191_s26 + $0x108] sm:$0xff]   ;;  %v4059_v24 = vld [vmem:[%s4191_s26 + $0x300] sm:$0xff]  }
 0x837   : > { %3722 = vmatprep.subr.bf16.mxu0 %v3969_v34  ;;  %3744 = vmatprep.subr.bf16.mxu1 %v3970_v41  ;;  %v4472_v1 = vpop.f32.mrf.mxu0  ;;  %v4475_v9 = vpop.f32.mrf.mxu1  ;;  %v3992_v34 = vld [vmem:[%s4191_s26 + $0x188] sm:$0xff]   ;;  %v3993_v41 = vld [vmem:[%s4191_s26 + $0x140] sm:$0xff]  }
 0x838   : > { %v1891_v54 = vmax.f32 %v1653_v46, 0.0  ;;  %v1893_v55 = vmax.f32 %v1696_v5, 0.0  ;;  %v1302_v29 = vrot.slane %v4434_v52, %v4485_v20  ;;  %v1310_v30 = vrot.slane %v4434_v52, %v1309_v21  ;;  %v3995_v5 = vld [vmem:[%s4191_s26 + $0x100] sm:$0xff]  }
 0x839   : > { %v1734_v14 = vpop.f32.mrf.mxu0  ;;  %v1777_v16 = vpop.f32.mrf.mxu1 }
 0x83a   : > { %v1907_v57 = vpack.c.bf16 %v1891_v54, %v1875_v50  ;;  %v1909_v58 = vpack.c.bf16 %v1893_v55, %v1877_v53  ;;  %3723 = vmatpush3.bf16.msra.mxu0 %v3971_v47  ;;  %3745 = vmatpush3.bf16.msra.mxu1 %v3972_v48  ;;  %v1651_v35 = vadd.f32 %v4458_v37, %v1302_v29  ;;  %v3998_v54 = vld [vmem:[%s4191_s26 + $0x2f8] sm:$0xff]  }
 0x83b   : > { %3724 = vmatprep.subr.bf16.mxu0 %v3973_v49  ;;  %3746 = vmatprep.subr.bf16.mxu1 %v3974_v56  ;;  %v4488_v13 = vpop.f32.mrf.mxu0  ;;  %v4491_v23 = vpop.f32.mrf.mxu1  ;;  %v1694_v52 = vadd.f32 %v4460_v38, %v1310_v30  ;;  %v1647_v37 = vadd.f32 %v4446_v4, %v1302_v29  ;;  %v1690_v45 = vadd.f32 %v4448_v19, %v1310_v30  ;;  %v3996_v38 = vld [vmem:[%s4191_s26 + $0x180] sm:$0xff]   ;;  %v3997_v49 = vld [vmem:[%s4191_s26 + $0x278] sm:$0xff]  }
 0x83c   : > { %3060 = vmatprep.mubr.bf16.mxu0 %v1907_v57  ;;  %3101 = vmatprep.mubr.bf16.mxu1 %v1909_v58  ;;  %v1890_v47 = vmax.f32 %v1651_v35, 0.0  ;;  %v1735_v48 = vadd.f32 %v1734_v14, %v1322_v36  ;;  %v1778_v53 = vadd.f32 %v1777_v16, %v1330_v42  ;;  %v3999_v57 = vld [vmem:[%s4191_s26 + $0x238] sm:$0xff]   ;;  %v4003_v14 = vld [vmem:[%s4191_s26 + $0x230] sm:$0xff]   ;;  %v4005_v16 = vld [vmem:[%s4191_s26 + $0x268] sm:$0xff]  }
 0x83d   : > { %v1738_v32 = vpop.f32.mrf.mxu0  ;;  %v1781_v8 = vpop.f32.mrf.mxu1  ;;  %v1892_v50 = vmax.f32 %v1694_v52, 0.0  ;;  %v1874_v4 = vmax.f32 %v1647_v37, 0.0  ;;  %v1876_v19 = vmax.f32 %v1690_v45, 0.0  ;;  %v4012_v30 = vld [vmem:[%s4191_s26 + $0x2a0] sm:$0xff]   ;;  %v4018_v52 = vld [vmem:[%s4191_s26 + $0x2d0] sm:$0xff]   ;;  %v4021_v45 = vld [vmem:[%s4191_s26 + $0x248] sm:$0xff]  }
 0x83e   : > { %3725 = vmatpush3.bf16.msra.mxu0 %v3975_v59  ;;  %3747 = vmatpush3.bf16.msra.mxu1 %v3976_v60  ;;  %v1739_v44 = vadd.f32 %v1738_v32, %v1322_v36  ;;  %v1782_v46 = vadd.f32 %v1781_v8, %v1330_v42  ;;  %v1879_v59 = vmax.f32 %v1735_v48, 0.0  ;;  %v4000_v60 = vld [vmem:[%s4191_s26 + $0x2b8] sm:$0xff]  }
 0x83f   : > { %3726 = vmatprep.subr.bf16.mxu0 %v3977_v61  ;;  %3748 = vmatprep.subr.bf16.mxu1 %v3978_v62  ;;  %v1906_v58 = vpack.c.bf16 %v1890_v47, %v1874_v4  ;;  %v1908_v61 = vpack.c.bf16 %v1892_v50, %v1876_v19  ;;  %v1881_v62 = vmax.f32 %v1778_v53, 0.0  ;;  %v4535_v29 = vpop.f32.mrf.mxu1  ;;  %v4013_v32 = vld [vmem:[%s4191_s26 + $0x258] sm:$0xff]   ;;  %v1326_v47 = vrot.slane %v4502_v31, %v4431_v6  ;;  %v4025_v4 = vld [vmem:[%s4191_s26 + $0x240] sm:$0xff]  }
 0x840   : > { %v1895_v55 = vmax.f32 %v1739_v44, 0.0  ;;  %v1897_v56 = vmax.f32 %v1782_v46, 0.0  ;;  %v4015_v36 = vld [vmem:[%s4191_s26 + $0x218] sm:$0xff]   ;;  %v4020_v44 = vld [vmem:[%s4191_s26 + $0x290] sm:$0xff]   ;;  %v4022_v46 = vld [vmem:[%s4191_s26 + $0x2c8] sm:$0xff]   ;;  %v1338_v50 = vrot.slane %v4502_v31, %v1305_v63  ;;  %v1346_v19 = vrot.slane %v4502_v31, %v1313_v0 }
 0x841   : > { %v1863_v8 = vpop.f32.mrf.mxu1  ;;  %v1776_v63 = vadd.f32 %v4475_v9, %v1326_v47 }
 0x842   : > { %3727 = vmatpush3.bf16.msra.mxu0 %v3979_v7  ;;  %3749 = vmatpush3.bf16.msra.mxu1 %v3980_v10  ;;  %v4001_v7 = vld [vmem:[%s4191_s26 + $0x270] sm:$0xff]   ;;  %v1911_v10 = vpack.c.bf16 %v1895_v55, %v1879_v59  ;;  %v1780_v55 = vadd.f32 %v4491_v23, %v1326_v47  ;;  %v4027_v59 = vld [vmem:[%s4191_s26 + $0x200] sm:$0xff]   ;;  %v4048_v47 = vld [vmem:[%s4191_s26 + $0x398] sm:$0xff]  }
 0x843   : > { %3728 = vmatprep.subr.bf16.mxu0 %v3981_v11  ;;  %3750 = vmatprep.subr.bf16.mxu1 %v3982_v12  ;;  %v4002_v11 = vld [vmem:[%s4191_s26 + $0x2f0] sm:$0xff]   ;;  %v1913_v12 = vpack.c.bf16 %v1897_v56, %v1881_v62  ;;  %v4547_v37 = vpop.f32.mrf.mxu1  ;;  %v4028_v23 = vld [vmem:[%s4191_s26 + $0x280] sm:$0xff]   ;;  %v4029_v62 = vld [vmem:[%s4191_s26 + $0x378] sm:$0xff]   ;;  %v1880_v9 = vmax.f32 %v1776_v63, 0.0 }
 0x844   : > { %v1896_v0 = vmax.f32 %v1780_v55, 0.0  ;;  %v1342_v55 = vrot.slane %v4502_v31, %v1309_v21 }
 0x845   : > { %v1867_v53 = vpop.f32.mrf.mxu1 }
 0x846   : > { %3729 = vmatpush3.bf16.msra.mxu0 %v3983_v15  ;;  %3751 = vmatpush3.bf16.msra.mxu1 %v3984_v17  ;;  %v4004_v15 = vld [vmem:[%s4191_s26 + $0x2b0] sm:$0xff]   ;;  %v4006_v17 = vld [vmem:[%s4191_s26 + $0x2e8] sm:$0xff]   ;;  %v1866_v63 = vadd.f32 %v4547_v37, %v1342_v55 }
 0x847   : > { %3730 = vmatprep.subr.bf16.mxu0 %v3985_v2  ;;  %3752 = vmatprep.subr.bf16.mxu1 %v3986_v18  ;;  %v4007_v2 = vld [vmem:[%s4191_s26 + $0x228] sm:$0xff]  }
 0x848   : > { %v4008_v18 = vld [vmem:[%s4191_s26 + $0x2a8] sm:$0xff]  }
 0x84a   : > { %3731 = vmatpush3.bf16.msra.mxu0 %v3987_v22  ;;  %3753 = vmatpush3.bf16.msra.mxu1 %v3988_v25  ;;  %v4009_v22 = vld [vmem:[%s4191_s26 + $0x260] sm:$0xff]  }
 0x84b   : > { %3732 = vmatprep.subr.bf16.mxu0 %v3989_v26  ;;  %3754 = vmatprep.subr.bf16.mxu1 %v3990_v27  ;;  %v4010_v25 = vld [vmem:[%s4191_s26 + $0x2e0] sm:$0xff]   ;;  %v4532_v26 = vpop.f32.mrf.mxu0 }
 0x84c   : > { %v4011_v27 = vld [vmem:[%s4191_s26 + $0x220] sm:$0xff]  }
 0x84d   : > { %v1820_v35 = vpop.f32.mrf.mxu0 }
 0x84e   : > { %3733 = vmatpush3.bf16.msra.mxu0 %v3991_v33  ;;  %3755 = vmatpush3.bf16.msra.mxu1 %v3992_v34  ;;  %v4014_v33 = vld [vmem:[%s4191_s26 + $0x2d8] sm:$0xff]  }
 0x84f   : > { %3734 = vmatprep.subr.bf16.mxu0 %v3993_v41  ;;  %3756 = vmatprep.subr.bf16.mxu1 %v3994_v43  ;;  %v4016_v34 = vld [vmem:[%s4191_s26 + $0x298] sm:$0xff]   ;;  %v4017_v41 = vld [vmem:[%s4191_s26 + $0x250] sm:$0xff]   ;;  %v4544_v42 = vpop.f32.mrf.mxu0 }
 0x850   : > { %v4019_v43 = vld [vmem:[%s4191_s26 + $0x210] sm:$0xff]  }
 0x851   : > { %v1824_v48 = vpop.f32.mrf.mxu0 }
 0x852   : > { %3735 = vmatpush3.bf16.msra.mxu0 %v3995_v5  ;;  %3757 = vmatpush3.bf16.msra.mxu1 %v3996_v38  ;;  %v1318_v5 = vrot.slane %v4502_v31, %v4335_v3  ;;  %v4023_v38 = vld [vmem:[%s4191_s26 + $0x208] sm:$0xff]  }
 0x853   : > { %3764 = vmatprep.subr.bf16.mxu0 %v3997_v49  ;;  %3786 = vmatprep.subr.bf16.mxu1 %v3998_v54  ;;  %v4024_v54 = vld [vmem:[%s4191_s26 + $0x288] sm:$0xff]  }
 0x854   : > { %v1737_v49 = vadd.f32 %v4488_v13, %v1318_v5  ;;  %v4026_v13 = vld [vmem:[%s4191_s26 + $0x2c0] sm:$0xff]   ;;  %v1733_v56 = vadd.f32 %v4472_v1, %v1318_v5  ;;  %v4047_v5 = vld [vmem:[%s4191_s26 + $0x318] sm:$0xff]  }
 0x855   : > { %3061 = vmatmul.mubr.bf16.vlgmr.msra.gmra.mxu0 %v1906_v58  ;;  %3102 = vmatmul.mubr.bf16.vlgmr.msra.gmra.mxu1 %v1908_v61  ;;  %v1868_v58 = vadd.f32 %v1867_v53, %v1346_v19  ;;  %v1821_v61 = vadd.f32 %v1820_v35, %v1338_v50  ;;  %v4037_v35 = vld [vmem:[%s4191_s26 + $0x368] sm:$0xff]  }
 0x856   : > { %3765 = vmatpush3.bf16.msra.mxu0 %v3999_v57  ;;  %3142 = vmatprep.mubr.bf16.mxu0 %v1911_v10  ;;  %v1825_v57 = vadd.f32 %v1824_v48, %v1338_v50  ;;  %v4030_v10 = vld [vmem:[%s4191_s26 + $0x3f8] sm:$0xff]   ;;  %v1878_v1 = vmax.f32 %v1733_v56, 0.0  ;;  %v4049_v48 = vld [vmem:[%s4191_s26 + $0x350] sm:$0xff]   ;;  %v4053_v53 = vld [vmem:[%s4191_s26 + $0x348] sm:$0xff]  }
 0x857   : > { %3787 = vmatpush3.bf16.msra.mxu1 %v4000_v60  ;;  %3183 = vmatprep.mubr.bf16.mxu1 %v1913_v12  ;;  %v1894_v60 = vmax.f32 %v1737_v49, 0.0  ;;  %v1901_v12 = vmax.f32 %v1868_v58, 0.0  ;;  %v4051_v49 = vld [vmem:[%s4191_s26 + $0x310] sm:$0xff]   ;;  %v4056_v56 = vld [vmem:[%s4191_s26 + $0x388] sm:$0xff]   ;;  %v4058_v58 = vld [vmem:[%s4191_s26 + $0x3c0] sm:$0xff]  }
 0x858   : > { %3766 = vmatprep.subr.bf16.mxu0 %v4001_v7  ;;  %3788 = vmatprep.subr.bf16.mxu1 %v4002_v11  ;;  %v1864_v7 = vadd.f32 %v1863_v8, %v1346_v19  ;;  %v1899_v11 = vmax.f32 %v1825_v57, 0.0  ;;  %v4039_v8 = vld [vmem:[%s4191_s26 + $0x328] sm:$0xff]   ;;  %v4052_v50 = vld [vmem:[%s4191_s26 + $0x390] sm:$0xff]   ;;  %v4057_v57 = vld [vmem:[%s4191_s26 + $0x340] sm:$0xff]  }
 0x859   : > { %v4055_v19 = vld [vmem:[%s4191_s26 + $0x308] sm:$0xff]  }
 0x85a   : > { %3767 = vmatpush3.bf16.msra.mxu0 %v4003_v14  ;;  %v4031_v14 = vld [vmem:[%s4191_s26 + $0x338] sm:$0xff]  }
 0x85b   : > { %3789 = vmatpush3.bf16.msra.mxu1 %v4004_v15  ;;  %3768 = vmatprep.subr.bf16.mxu0 %v4005_v16  ;;  %v1910_v15 = vpack.c.bf16 %v1894_v60, %v1878_v1  ;;  %v1883_v16 = vmax.f32 %v1821_v61, 0.0  ;;  %v1862_v60 = vadd.f32 %v4535_v29, %v1342_v55  ;;  %v1900_v61 = vmax.f32 %v1866_v63, 0.0 }
 0x85c   : > { %3790 = vmatprep.subr.bf16.mxu1 %v4006_v17  ;;  %v4032_v17 = vld [vmem:[%s4191_s26 + $0x3b8] sm:$0xff]  }
 0x85e   : > { %3769 = vmatpush3.bf16.msra.mxu0 %v4007_v2  ;;  %v1912_v2 = vpack.c.bf16 %v1896_v0, %v1880_v9 }
 0x85f   : > { %3791 = vmatpush3.bf16.msra.mxu1 %v4008_v18  ;;  %3770 = vmatprep.subr.bf16.mxu0 %v4009_v22  ;;  %v1885_v18 = vmax.f32 %v1864_v7, 0.0  ;;  %v4033_v22 = vld [vmem:[%s4191_s26 + $0x370] sm:$0xff]  }
 0x860   : > { %3792 = vmatprep.subr.bf16.mxu1 %v4010_v25  ;;  %v1915_v25 = vpack.c.bf16 %v1899_v11, %v1883_v16 }
 0x862   : > { %3771 = vmatpush3.bf16.msra.mxu0 %v4011_v27  ;;  %v4034_v27 = vld [vmem:[%s4191_s26 + $0x3f0] sm:$0xff]  }
 0x863   : > { %3793 = vmatpush3.bf16.msra.mxu1 %v4012_v30  ;;  %3772 = vmatprep.subr.bf16.mxu0 %v4013_v32  ;;  %v1917_v30 = vpack.c.bf16 %v1901_v12, %v1885_v18  ;;  %v4035_v32 = vld [vmem:[%s4191_s26 + $0x330] sm:$0xff]  }
 0x864   : > { %3794 = vmatprep.subr.bf16.mxu1 %v4014_v33  ;;  %v4036_v33 = vld [vmem:[%s4191_s26 + $0x3b0] sm:$0xff]  }
 0x866   : > { %3773 = vmatpush3.bf16.msra.mxu0 %v4015_v36  ;;  %v4038_v36 = vld [vmem:[%s4191_s26 + $0x3e8] sm:$0xff]  }
 0x867   : > { %3795 = vmatpush3.bf16.msra.mxu1 %v4016_v34  ;;  %3774 = vmatprep.subr.bf16.mxu0 %v4017_v41  ;;  %v4040_v34 = vld [vmem:[%s4191_s26 + $0x3a8] sm:$0xff]   ;;  %v4041_v41 = vld [vmem:[%s4191_s26 + $0x360] sm:$0xff]  }
 0x868   : > { %3796 = vmatprep.subr.bf16.mxu1 %v4018_v52  ;;  %v4042_v52 = vld [vmem:[%s4191_s26 + $0x3e0] sm:$0xff]  }
 0x86a   : > { %3775 = vmatpush3.bf16.msra.mxu0 %v4019_v43  ;;  %v4043_v43 = vld [vmem:[%s4191_s26 + $0x320] sm:$0xff]  }
 0x86b   : > { %3797 = vmatpush3.bf16.msra.mxu1 %v4020_v44  ;;  %3776 = vmatprep.subr.bf16.mxu0 %v4021_v45  ;;  %v4044_v44 = vld [vmem:[%s4191_s26 + $0x3a0] sm:$0xff]   ;;  %v4045_v45 = vld [vmem:[%s4191_s26 + $0x358] sm:$0xff]  }
 0x86c   : > { %3798 = vmatprep.subr.bf16.mxu1 %v4022_v46  ;;  %v4046_v46 = vld [vmem:[%s4191_s26 + $0x3d8] sm:$0xff]  }
 0x86e   : > { %3777 = vmatpush3.bf16.msra.mxu0 %v4023_v38  ;;  %v4050_v38 = vld [vmem:[%s4191_s26 + $0x3d0] sm:$0xff]  }
 0x86f   : > { %3799 = vmatpush3.bf16.msra.mxu1 %v4024_v54  ;;  %3778 = vmatprep.subr.bf16.mxu0 %v4025_v4  ;;  %v4054_v54 = vld [vmem:[%s4191_s26 + $0x3c8] sm:$0xff]   ;;  %v1334_v4 = vrot.slane %v4502_v31, %v4485_v20  ;;  %v4060_v31 = vld [vmem:[%s4191_s26 + $0x380] sm:$0xff]  }
 0x870   : > { %3800 = vmatprep.subr.bf16.mxu1 %v4026_v13 }
 0x871   : > { %v1823_v13 = vadd.f32 %v4544_v42, %v1334_v4 }
 0x872   : > { %3779 = vmatpush3.bf16.msra.mxu0 %v4027_v59  ;;  %v1819_v59 = vadd.f32 %v4532_v26, %v1334_v4 }
 0x873   : > { %3801 = vmatpush3.bf16.msra.mxu1 %v4028_v23  ;;  %3808 = vmatprep.subr.bf16.mxu0 %v4029_v62  ;;  %v1898_v21 = vmax.f32 %v1823_v13, 0.0  ;;  %v1884_v23 = vmax.f32 %v1862_v60, 0.0 }
 0x874   : > { %3830 = vmatprep.subr.bf16.mxu1 %v4030_v10  ;;  %v1882_v42 = vmax.f32 %v1819_v59, 0.0 }
 0x875   : > { %3143 = vmatmul.mubr.bf16.vlgmr.msra.gmra.mxu0 %v1910_v15  ;;  %v1916_v37 = vpack.c.bf16 %v1900_v61, %v1884_v23 }
 0x876   : > { %3184 = vmatmul.mubr.bf16.vlgmr.msra.gmra.mxu1 %v1912_v2  ;;  %3809 = vmatpush3.bf16.msra.mxu0 %v4031_v14  ;;  %v1914_v62 = vpack.c.bf16 %v1898_v21, %v1882_v42 }
 0x877   : > { %3224 = vmatprep.mubr.bf16.mxu0 %v1915_v25  ;;  %3831 = vmatpush3.bf16.msra.mxu1 %v4032_v17 }
 0x878   : > { %3265 = vmatprep.mubr.bf16.mxu1 %v1917_v30  ;;  %3810 = vmatprep.subr.bf16.mxu0 %v4033_v22  ;;  %v4614_v22 = vld [vmem:[%s4196_s12] sm:$0x1f] }
 0x879   : > { %3832 = vmatprep.subr.bf16.mxu1 %v4034_v27  ;;  %v2177_v25 = vrot.slane %v4614_v22, %v4485_v20 }
 0x87a   : > { %3811 = vmatpush3.bf16.msra.mxu0 %v4035_v32 }
 0x87b   : > { %3833 = vmatpush3.bf16.msra.mxu1 %v4036_v33  ;;  %3812 = vmatprep.subr.bf16.mxu0 %v4037_v35 }
 0x87c   : > { %3834 = vmatprep.subr.bf16.mxu1 %v4038_v36 }
 0x87e   : > { %3813 = vmatpush3.bf16.msra.mxu0 %v4039_v8 }
 0x87f   : > { %3835 = vmatpush3.bf16.msra.mxu1 %v4040_v34  ;;  %3814 = vmatprep.subr.bf16.mxu0 %v4041_v41 }
 0x880   : > { %3836 = vmatprep.subr.bf16.mxu1 %v4042_v52 }
 0x882   : > { %3815 = vmatpush3.bf16.msra.mxu0 %v4043_v43 }
 0x883   : > { %3837 = vmatpush3.bf16.msra.mxu1 %v4044_v44  ;;  %3816 = vmatprep.subr.bf16.mxu0 %v4045_v45 }
 0x884   : > { %3838 = vmatprep.subr.bf16.mxu1 %v4046_v46 }
 0x886   : > { %3817 = vmatpush3.bf16.msra.mxu0 %v4047_v5 }
 0x887   : > { %3839 = vmatpush3.bf16.msra.mxu1 %v4048_v47  ;;  %3818 = vmatprep.subr.bf16.mxu0 %v4049_v48 }
 0x888   : > { %3840 = vmatprep.subr.bf16.mxu1 %v4050_v38 }
 0x88a   : > { %3819 = vmatpush3.bf16.msra.mxu0 %v4051_v49 }
 0x88b   : > { %3841 = vmatpush3.bf16.msra.mxu1 %v4052_v50  ;;  %3820 = vmatprep.subr.bf16.mxu0 %v4053_v53 }
 0x88c   : > { %3842 = vmatprep.subr.bf16.mxu1 %v4054_v54 }
 0x88e   : > { %3821 = vmatpush3.bf16.msra.mxu0 %v4055_v19 }
 0x88f   : > { %3843 = vmatpush3.bf16.msra.mxu1 %v4056_v56  ;;  %3822 = vmatprep.subr.bf16.mxu0 %v4057_v57 }
 0x890   : > { %3844 = vmatprep.subr.bf16.mxu1 %v4058_v58 }
 0x892   : > { %3823 = vmatpush3.bf16.msra.mxu0 %v4059_v24 }
 0x893   : > { %3845 = vmatpush3.bf16.msra.mxu1 %v4060_v31 }
 0x895   : > { %3225 = vmatmul.mubr.bf16.vlgmr.msra.gmra.mxu0 %v1914_v62 }
 0x896   : > { %3266 = vmatmul.mubr.bf16.vlgmr.msra.gmra.mxu1 %v1916_v37 }
 0x8f5   : > { %v3692_v26 = vpop.f32.mrf.mxu0  ;;  %v3714_v0 = vpop.f32.mrf.mxu1 }
 0x8f7   : > { %v3693_v29 = vpop.f32.mrf.mxu0  ;;  %v3715_v7 = vpop.f32.mrf.mxu1 }
 0x8f8   : > { %v3694_v27 = vadd.f32 %v3693_v29, %v3692_v26  ;;  %v3716_v34 = vadd.f32 %v3715_v7, %v3714_v0 }
 0x8f9   : > { %v3695_v10 = vpop.f32.mrf.mxu0  ;;  %v3717_v1 = vpop.f32.mrf.mxu1 }
 0x8fa   : > { %v2981_v33 = vadd.f32 %v3694_v27, %v2177_v25 }
 0x8fb   : > { %v3696_v11 = vpop.f32.mrf.mxu0  ;;  %v3718_v12 = vpop.f32.mrf.mxu1 }
 0x8fc   : > { %v3697_v35 = vadd.f32 %v3696_v11, %v3695_v10  ;;  %v3022_v52 = vadd.f32 %v3716_v34, %v2981_v33  ;;  %v3719_v46 = vadd.f32 %v3718_v12, %v3717_v1 }
 0x8fe   : > { %v2984_v43 = vadd.f32 %v3697_v35, %v2177_v25 }
 0x900   : > { %v3025_v48 = vadd.f32 %v3719_v46, %v2984_v43  ;;  %v3305_v43 = vrot.slane %v4614_v22, %v4431_v6 }
 0x915   : > { %v3736_v9 = vpop.f32.mrf.mxu0  ;;  %v3758_v14 = vpop.f32.mrf.mxu1 }
 0x917   : > { %v3737_v15 = vpop.f32.mrf.mxu0  ;;  %v3759_v16 = vpop.f32.mrf.mxu1 }
 0x918   : > { %v3738_v41 = vadd.f32 %v3737_v15, %v3736_v9  ;;  %v3760_v38 = vadd.f32 %v3759_v16, %v3758_v14 }
 0x919   : > { %v3739_v17 = vpop.f32.mrf.mxu0  ;;  %v3761_v2 = vpop.f32.mrf.mxu1 }
 0x91a   : > { %v3063_v5 = vadd.f32 %v3738_v41, %v3022_v52 }
 0x91b   : > { %v3740_v18 = vpop.f32.mrf.mxu0  ;;  %v3762_v32 = vpop.f32.mrf.mxu1 }
 0x91c   : > { %v3741_v47 = vadd.f32 %v3740_v18, %v3739_v17  ;;  %v3104_v53 = vadd.f32 %v3760_v38, %v3063_v5  ;;  %v3763_v4 = vadd.f32 %v3762_v32, %v3761_v2 }
 0x91e   : > { %v3066_v54 = vadd.f32 %v3741_v47, %v3025_v48 }
 0x920   : > { %v3107_v57 = vadd.f32 %v3763_v4, %v3066_v54 }
 0x935   : > { %v3780_v30 = vpop.f32.mrf.mxu0 }
 0x936   : > { %v3802_v36 = vpop.f32.mrf.mxu1 }
 0x937   : > { %v3781_v8 = vpop.f32.mrf.mxu0 }
 0x938   : > { %v3803_v44 = vpop.f32.mrf.mxu1  ;;  %v3782_v49 = vadd.f32 %v3781_v8, %v3780_v30 }
 0x939   : > { %v3783_v45 = vpop.f32.mrf.mxu0  ;;  %v3804_v63 = vadd.f32 %v3803_v44, %v3802_v36 }
 0x93a   : > { %v3805_v20 = vpop.f32.mrf.mxu1  ;;  %v3145_v55 = vadd.f32 %v3782_v49, %v3104_v53 }
 0x93b   : > { %v3784_v50 = vpop.f32.mrf.mxu0 }
 0x93c   : > { %v3785_v19 = vadd.f32 %v3784_v50, %v3783_v45  ;;  %v3806_v13 = vpop.f32.mrf.mxu1  ;;  %v3186_v60 = vadd.f32 %v3804_v63, %v3145_v55  ;;  %v3311_v45 = vrot.slane %v4614_v22, %v4428_v51 }
 0x93d   : > { %v3807_v42 = vadd.f32 %v3806_v13, %v3805_v20 }
 0x93e   : > { %v3148_v24 = vadd.f32 %v3785_v19, %v3107_v57 }
 0x940   : > { %v3189_v0 = vadd.f32 %v3807_v42, %v3148_v24 }
 0x955   : > { %v3824_v56 = vpop.f32.mrf.mxu0 }
 0x956   : > { %v3846_v58 = vpop.f32.mrf.mxu1 }
 0x957   : > { %v3825_v59 = vpop.f32.mrf.mxu0 }
 0x958   : > { %v3826_v21 = vadd.f32 %v3825_v59, %v3824_v56  ;;  %v3847_v31 = vpop.f32.mrf.mxu1 }
 0x959   : > { %v3827_v61 = vpop.f32.mrf.mxu0  ;;  %v3848_v62 = vadd.f32 %v3847_v31, %v3846_v58 }
 0x95a   : > { %v3227_v23 = vadd.f32 %v3826_v21, %v3186_v60  ;;  %v3849_v37 = vpop.f32.mrf.mxu1 }
 0x95b   : > { %v3828_v26 = vpop.f32.mrf.mxu0 }
 0x95c   : > { %v3268_v29 = vadd.f32 %v3848_v62, %v3227_v23  ;;  %v3829_v7 = vadd.f32 %v3828_v26, %v3827_v61  ;;  %v3850_v10 = vpop.f32.mrf.mxu1 }
 0x95d   : > { %v3851_v11 = vadd.f32 %v3850_v10, %v3849_v37 }
 0x95e   : > { %v3230_v1 = vadd.f32 %v3829_v7, %v3189_v0  ;;  %v3274_v9 = vadd.f32 %v3268_v29, %v4347_v39 }
 0x960   : > { %v3271_v12 = vadd.f32 %v3851_v11, %v3230_v1  ;;  %v3276_v14 = vsel %vm417_vm3, %v3274_v9, 0.0 }
 0x961   : > { %3277 = vadd.xlane.f32.xlu1 %v3276_v14 }
 0x962   : > { %v3275_v15 = vadd.f32 %v3271_v12, %v4349_v40 }
 0x964   : > { %v3279_v16 = vsel %vm1209_vm9, %v3275_v15, 0.0 }
 0x965   : > { %3280 = vadd.xlane.f32.xlu0 %v3279_v16 }
 0x9ea   : > { %v3278_v17 = vpop.xlane.xlu1 %3277 }
 0x9eb   : > { %v3282_v2 = vmul.f32 0.03125, %v3278_v17 }
 0x9ed   : > { %v3284_v18 = vsub.f32 %v3274_v9, %v3282_v2 }
 0x9ee   : > { %v3281_v25 = vpop.xlane.xlu0 %3280 }
 0x9ef   : > { %v3283_v27 = vmul.f32 0.03125, %v3281_v25  ;;  %v3286_v30 = vmul.f32 %v3284_v18, %v3284_v18 }
 0x9f1   : > { %v3285_v32 = vsub.f32 %v3275_v15, %v3283_v27  ;;  %v3288_v33 = vsel %vm417_vm3, %v3286_v30, 0.0 }
 0x9f2   : > { %3289 = vadd.xlane.f32.xlu1 %v3288_v33 }
 0x9f3   : > { %v3287_v39 = vmul.f32 %v3285_v32, %v3285_v32 }
 0x9f5   : > { %v3291_v35 = vsel %vm1209_vm9, %v3287_v39, 0.0 }
 0x9f6   : > { %3292 = vadd.xlane.f32.xlu0 %v3291_v35 }
 0xa7b   : > { %v3290_v36 = vpop.xlane.xlu1 %3289 }
 0xa7c   : > { %v3294_v8 = vmul.f32 0.03125, %v3290_v36 }
 0xa7e   : > { %v3296_v40 = vadd.f32 1e-05, %v3294_v8 }
 0xa7f   : > { %v3293_v34 = vpop.xlane.xlu0 %3292 }
 0xa80   : > { %4081 = vrsqrt.f32 %v3296_v40  ;;  %v3295_v41 = vmul.f32 0.03125, %v3293_v34 }
 0xa82   : > { %v3297_v52 = vadd.f32 1e-05, %v3295_v41 }
 0xa84   : > { %4083 = vrsqrt.f32 %v3297_v52 }
 0xa8d   : > { %v4082_v44 = vpop.eup %4081 }
 0xa8e   : > { %v3300_v46 = vmul.f32 %v4082_v44, %v3284_v18 }
 0xa90   : > { %v3306_v5 = vmul.f32 %v3305_v43, %v3300_v46 }
 0xa91   : > { %v4084_v47 = vpop.eup %4083 }
 0xa92   : > { %v3312_v48 = vadd.f32 %v3311_v45, %v3306_v5  ;;  %v3301_v38 = vmul.f32 %v4084_v47, %v3285_v32 }
 0xa94   : > { %3314 = vst.msk [vmem:[#allocation2] sm:$0xff] %vm417_vm3, %v3312_v48  ;;  %v3307_v49 = vmul.f32 %v3305_v43, %v3301_v38  ;;  %3319 = sbr.rel (%p3648_p5) target bundleno = 3026 (0xbd2), region = 60 }
 0xa96   : > { %v3313_v20 = vadd.f32 %v3311_v45, %v3307_v49 }
 0xa98   : > { %3315 = vst.msk [vmem:[#allocation2 + $0x8] sm:$0xf] %vm1209_vm9, %v3313_v20 }
 0xa99   : > { %v3321_v6 = vsel %vm417_vm3, %v3312_v48, 0.0  ;;  %v3324_v50 = vsel %vm1209_vm9, %v3313_v20, 0.0  ;;  %v3320_v31 = vld [vmem:[%s4658_s7] sm:$0x3] }
 0xa9a   : > { %3322 = vadd.xlane.f32.xlu0 %v3321_v6  ;;  %v3350_v61 = vrot.slane %v3320_v31, %v4335_v3  ;;  %v3356_v62 = vrot.slane %v3320_v31, %v4340_v28 }
 0xa9e   : > { %3325 = vadd.xlane.f32.xlu0 %v3324_v50 }
 0xb23   : > { %v3323_v51 = vpop.xlane.xlu0 %3322 }
 0xb24   : > { %v3327_v22 = vmul.f32 0.03125, %v3323_v51 }
 0xb26   : > { %v3329_v53 = vsub.f32 %v3312_v48, %v3327_v22 }
 0xb27   : > { %v3326_v54 = vpop.xlane.xlu0 %3325 }
 0xb28   : > { %v3328_v4 = vmul.f32 0.03125, %v3326_v54  ;;  %v3331_v55 = vmul.f32 %v3329_v53, %v3329_v53 }
 0xb2a   : > { %v3330_v19 = vsub.f32 %v3313_v20, %v3328_v4  ;;  %v3333_v13 = vsel %vm417_vm3, %v3331_v55, 0.0 }
 0xb2b   : > { %3334 = vadd.xlane.f32.xlu1 %v3333_v13 }
 0xb2c   : > { %v3332_v56 = vmul.f32 %v3330_v19, %v3330_v19 }
 0xb2e   : > { %v3336_v57 = vsel %vm1209_vm9, %v3332_v56, 0.0 }
 0xb2f   : > { %3337 = vadd.xlane.f32.xlu1 %v3336_v57 }
 0xbb4   : > { %v3335_v63 = vpop.xlane.xlu1 %3334 }
 0xbb5   : > { %v3339_v58 = vmul.f32 0.03125, %v3335_v63 }
 0xbb7   : > { %v3341_v59 = vadd.f32 1e-05, %v3339_v58 }
 0xbb8   : > { %v3338_v60 = vpop.xlane.xlu1 %3337 }
 0xbb9   : > { %4086 = vrsqrt.f32 %v3341_v59  ;;  %v3340_v24 = vmul.f32 0.03125, %v3338_v60 }
 0xbbb   : > { %v3342_v21 = vadd.f32 1e-05, %v3340_v24 }
 0xbbd   : > { %4088 = vrsqrt.f32 %v3342_v21 }
 0xbc6   : > { %v4087_v42 = vpop.eup %4086 }
 0xbc7   : > { %v3345_v23 = vmul.f32 %v4087_v42, %v3329_v53 }
 0xbc9   : > { %v3351_v37 = vmul.f32 %v3350_v61, %v3345_v23 }
 0xbca   : > { %v4089_v26 = vpop.eup %4088 }
 0xbcb   : > { %v3357_v0 = vadd.f32 %v3356_v62, %v3351_v37  ;;  %v3346_v29 = vmul.f32 %v4089_v26, %v3330_v19 }
 0xbcd   : > { %3359 = vst.msk [vmem:[%s4659_s8] sm:$0xff] %vm417_vm3, %v3357_v0  ;;  %v3352_v7 = vmul.f32 %v3350_v61, %v3346_v29 }
 0xbcf   : > { %v3358_v10 = vadd.f32 %v3356_v62, %v3352_v7 }
 0xbd1   : > { %3360 = vst.msk [vmem:[%s4659_s8 + $0x8] sm:$0xf] %vm1209_vm9, %v3358_v10 }
 0xbd2 PF: > { %s18_s27 = sadd.s32 1, %s4096_s27  }
 0xbd3   : > { %p15_p6 = scmp.ge.s32.totalorder %s18_s27, 4  }
 0xbd5   :  { %17 = sbr.rel (!%p15_p6) target bundleno = 1 (0x1), region = 101 }

// kernel: dual_branch_forward.5
= control target key start
LH: loop header
LB: loop body
LE: loop exit
PB: predicated region body
PF: predicated region fallthrough
CT: control target
= control target key end

     0   :  { %s5363_s21 = smov 0   ;;  %s6010_s0 = inlined_call_operand.vmem [shape: f32[16,32], index: 0, kind: input, shape index: {}]   ;;  %s6011_s1 = inlined_call_operand.vmem [shape: f32[12,32], index: 1, kind: input, shape index: {}]   ;;  %s6012_s2 = inlined_call_operand.vmem [shape: f32[2,8,6], index: 2, kind: input, shape index: {}]   ;;  %s6013_s3 = inlined_call_operand.vmem [shape: bf16[2,32,128], index: 3, kind: input, shape index: {}]   ;;  %s6014_s4 = inlined_call_operand.vmem [shape: f32[2,1,128], index: 4, kind: input, shape index: {}]   ;;  %s6015_s5 = inlined_call_operand.vmem [shape: bf16[2,32,128], index: 5, kind: input, shape index: {}]   ;;  %s6016_s6 = inlined_call_operand.vmem [shape: f32[2,1,128], index: 6, kind: input, shape index: {}]   ;;  %s6017_s7 = inlined_call_operand.vmem [shape: bf16[2,32,2048], index: 7, kind: input, shape index: {}]   ;;  %s6018_s8 = inlined_call_operand.vmem [shape: f32[2,1,2048], index: 8, kind: input, shape index: {}]   ;;  %s6019_s9 = inlined_call_operand.vmem [shape: bf16[2,2048,32], index: 9, kind: input, shape index: {}]   ;;  %s6020_s10 = inlined_call_operand.vmem [shape: f32[2,7,32], index: 10, kind: input, shape index: {}]   ;;  %s6021_s11 = inlined_call_operand.vmem [shape: f32[2,32], index: 11, kind: input, shape index: {}]   ;;  %s6022_s12 = inlined_call_operand.vmem [shape: f32[16,32], index: 12, kind: output, shape index: {}]  }
   0x1   :  { %6025 = sst [smem:[#allocation4_spill]] %s6013_s3 }
   0x2   :  { %6026 = sst [smem:[#allocation5_spill]] %s6022_s12 }
   0x3 LB: > { %6027 = sst [smem:[#allocation3_spill]] %s5286_s21  ;;  %s5369_s22 = sadd.s32 4294967295, %s5286_s21   ;;  %s5286_s21 = sphi %s5363_s21, %s22_s21  }
   0x4   : > { %p4501_p0 = scmp.ge.s32.totalorder %s5286_s21, 1  ;;  %p421_p1 = scmp.lt.s32.totalorder %s5286_s21, 3 }
   0x6   : > { %p422_p2 = pnand %p4501_p0, %p421_p1 }
   0x7   : > { %p487_p3 = scmp.lt.s32.totalorder (!%p422_p2), %s5369_s22, 1  ;;  %s6028_s3 = sld [smem:[#allocation4_spill]] (!%p422_p2) }
   0x8   : > { %425 = sbr.rel (%p422_p2) target bundleno = 4526 (0x11ae), region = 68  ;;  %p4512_p4 = scmp.ne.s32.totalorder (!%p422_p2), %s5369_s22, 0 }
   0xd   : > { %s5375_s23 = scalar_select %p487_p3, %s5369_s22, 1 }
   0xf   : > { %s4724_s24 = sshll.u32 %s5375_s23, 4  ;;  %s4726_s19 = sshll.u32 %s5375_s23, 8 }
  0x10   : > { %s491_s30 = scalar_lea.vmem %s6028_s3, %s4724_s24  ;;  %s5388_s15 = scalar_lea.vmem %s6015_s5, %s4724_s24 }
  0x11   : > { %s5398_s12 = scalar_lea.vmem %s6017_s7, %s4726_s19  ;;  %s5403_s28 = scalar_lea.vmem %s6018_s8, %s4724_s24 }
  0x12   : > { %s4727_s29 = sshll.u32 %s5375_s23, 10  ;;  %s4511_s27 = sshll.u32 %s5375_s23, 3 }
  0x13   : > { %s5410_s3 = scalar_lea.vmem %s6019_s9, %s4727_s29  ;;  %s5415_s18 = scalar_lea.vmem %s6020_s10, %s4511_s27 }
  0x14   : > { %525 = sbr.rel (%p4512_p4) target bundleno = 27 (0x1b), region = 72 }
  0x19   : > { %v526_v0 = vld [vmem:[%s6010_s0] sm:$0xff]  ;;  %vm528_vm0 = vcmask 261120   ;;  %v527_v1 = vld [vmem:[%s6010_s0 + $0x8] sm:$0xff] }
  0x1a   : > { %529 = vst.msk [vmem:[#allocation2] sm:$0xff] %vm528_vm0, %v526_v0  ;;  %530 = vst.msk [vmem:[#allocation2 + $0x8] sm:$0xff] %vm528_vm0, %v527_v1 }
  0x1b PF: > { %v5424_v2 = vld [vmem:[%s491_s30 + $0x8] sm:$0xff]   ;;  %v5288_v3 = vmov 0.0   ;;  %v5429_v4 = vld [vmem:[%s491_s30] sm:$0xff]   ;;  %vm5289_vm1 = vmmov 0   ;;  %vm565_vm2 = vcmask 261120   ;;  %s6029_s25 = scalar_lea.vmem %s6014_s4, %s5375_s23  ;;  %s5290_s26 = smov 64  }
  0x1c   : > { %4951 = vmatprep.subr.bf16.mxu0 %v5288_v3  ;;  %4959 = vmatprep.subr.mxu1 %v5288_v3  ;;  %v5452_v8 = vld [vmem:[%s6029_s25] ss:$0 sm:$0xff]  ;;  %s5291_s29 = smov 96   ;;  %s5292_s13 = smov 80   ;;  %vm613_vm3 = vcmask 130048   ;;  %vm689_vm4 = vcmask 64512  }
  0x1d   : > { %4952 = vmatpush3.bf16.msra.mxu0 %v5424_v2  ;;  %4955 = vmatprep.mubr.msk.bf16.mxu0 %vm5289_vm1, %v5288_v3  ;;  %s5293_s14 = smov 112   ;;  %s5294_s16 = smov 48   ;;  %vm1841_vm5 = vcmask 1041408   ;;  %vm1575_vm6 = vcmask 48128   ;;  %vm1590_vm7 = vcmask 1045504  }
  0x1e   : > { %4953 = vmatprep.subr.bf16.mxu0 %v5288_v3  ;;  %4961 = vmatprep.mubr.msk.f32.mxu1 %vm5289_vm1, %v5288_v3  ;;  %s5295_s17 = smov 32   ;;  %s5296_s21 = smov 16  }
  0x1f   : > { %s6030_s24 = scalar_lea.vmem %s6016_s6, %s5375_s23  ;;  %p4721_p5 = scmp.ne.s32.totalorder %s5369_s22, 1 }
  0x21   : > { %v5433_v5 = vld [vmem:[#allocation2] sm:$0xff]  ;;  %v5435_v6 = vld [vmem:[#allocation2 + $0x8] sm:$0xff]  ;;  %4954 = vmatpush3.bf16.msra.mxu0 %v5429_v4 }
  0x22   : > { %v546_v7 = vpack.c.bf16 %v5435_v6, %v5433_v5  ;;  %4974 = vmatprep.subr.mxu0 %v5288_v3 }
  0x24   : > { %4956 = vmatmul.mubr.msk.bf16.vlgmr.msra.gmra.mxu0 %vm565_vm2, %v546_v7 }
  0x25   : > { %4976 = vmatprep.mubr.msk.f32.mxu0 %vm5289_vm1, %v5288_v3 }
  0xe4   : > { %v603_v9 = vpop.f32.mrf.mxu0 }
  0xe5   : > { %v604_v10 = vadd.f32 %v5452_v8, %v603_v9 }
  0xe6   : > { %v4957_v11 = vpop.f32.mrf.mxu0 }
  0xe7   : > { %699 = vrot.lane.b32.xlu1 %v604_v10, %s5290_s26  ;;  %611 = vrot.lane.b32.xlu0 %v604_v10, %s5291_s29 }
  0xe8   : > { %v606_v12 = vpop.f32.mrf.mxu0 }
  0xe9   : > { %v5460_v14 = vadd.f32 %v5452_v8, %v606_v12 }
  0xea   : > { %v4958_v13 = vpop.f32.mrf.mxu0 }
  0xeb   : > { %779 = vrot.lane.b32.xlu1 %v604_v10, %s5292_s13 }
  0xef   : > { %777 = vrot.lane.b32.xlu1 %v604_v10, %s5293_s14 }
  0xf3   : > { %949 = vrot.lane.b32.xlu1 %v5460_v14, %s5291_s29 }
  0xf7   : > { %1115 = vrot.lane.b32.xlu1 %v5460_v14, %s5292_s13 }
  0xfb   : > { %1113 = vrot.lane.b32.xlu1 %v5460_v14, %s5293_s14 }
 0x159   : > { %v612_v15 = vpop.permute.xlu0 %611  ;;  %v700_v16 = vpop.permute.xlu1 %699 }
 0x15a   : > { %4960 = vmatpush3.xpose.msk.msra.mxu1 %vm613_vm3, %v612_v15 }
 0x15b   : > { %4964 = vmatprep.subr.mxu1 %v5288_v3 }
 0x15d   : > { %4962 = vmatmul.mubr.msk.f32.vlgmr.msra.gmra.mxu1 %vm613_vm3, %v604_v10  ;;  %v780_v25 = vpop.permute.xlu1 %779 }
 0x15e   : > { %4965 = vmatpush3.msra.mxu1 %v700_v16  ;;  %4966 = vmatprep.mubr.msk.f32.mxu1 %vm5289_vm1, %v5288_v3 }
 0x15f   : > { %4969 = vmatprep.subr.mxu1 %v5288_v3 }
 0x161   : > { %v778_v26 = vpop.permute.xlu1 %777 }
 0x165   : > { %v950_v28 = vpop.permute.xlu1 %949 }
 0x169   : > { %v1116_v29 = vpop.permute.xlu1 %1115 }
 0x16d   : > { %v1114_v30 = vpop.permute.xlu1 %1113 }
 0x21d   : > { %v684_v17 = vpop.f32.mrf.mxu1 }
 0x21e   : > { %v688_v18 = vmul.f32 0.25, %v684_v17 }
 0x21f   : > { %v4963_v19 = vpop.f32.mrf.mxu1 }
 0x220   : > { %v690_v20 = vsel %vm689_vm4, %v688_v18, -inf }
 0x221   : > { %691 = vmax.xlane.f32.xlu0 %v690_v20 }
 0x237   : > { %865 = vrot.lane.b32.xlu0 %v604_v10, %s5294_s16 }
 0x2aa   : > { %v692_v21 = vpop.xlane.xlu0 %691 }
 0x2ab   : > { %v693_v22 = vsub.f32 %v688_v18, %v692_v21 }
 0x2ad   : > { %v694_v23 = vmul.f32 1.442695, %v693_v22 }
 0x2ae   : > { %v866_v24 = vpop.permute.xlu0 %865 }
 0x2af   : > { %5231 = vpow2.f32 %v694_v23  ;;  %4975 = vmatpush3.msra.mxu0 %v866_v24 }
 0x2b0   : > { %4984 = vmatprep.subr.mxu0 %v5288_v3 }
 0x2bc   : > { %v5232_v27 = vpop.eup %5231 }
 0x2bd   : > { %4967 = vmatmul.mubr.msk.f32.vlgmr.msra.gmra.mxu1 %vm689_vm4, %v5232_v27  ;;  %v696_v59 = vsel %vm689_vm4, %v5232_v27, 0.0 }
 0x2be   : > { %4970 = vmatpush3.xpose.msk.msra.mxu1 %vm613_vm3, %v780_v25  ;;  %4971 = vmatprep.mubr.msk.f32.mxu1 %vm5289_vm1, %v5288_v3 }
 0x2bf   : > { %4979 = vmatprep.subr.mxu1 %v5288_v3 }
 0x2c1   : > { %4972 = vmatmul.mubr.msk.f32.vlgmr.msra.gmra.mxu1 %vm613_vm3, %v778_v26 }
 0x2c2   : > { %4980 = vmatpush3.xpose.msk.msra.mxu1 %vm613_vm3, %v950_v28  ;;  %4981 = vmatprep.mubr.msk.f32.mxu1 %vm5289_vm1, %v5288_v3 }
 0x2c3   : > { %4989 = vmatprep.subr.mxu1 %v5288_v3 }
 0x2c5   : > { %4982 = vmatmul.mubr.msk.f32.vlgmr.msra.gmra.mxu1 %vm613_vm3, %v5460_v14 }
 0x2c6   : > { %4990 = vmatpush3.xpose.msk.msra.mxu1 %vm613_vm3, %v1116_v29  ;;  %4991 = vmatprep.mubr.msk.f32.mxu1 %vm5289_vm1, %v5288_v3 }
 0x2c7   : > { %4999 = vmatprep.subr.bf16.mxu1 %v5288_v3 }
 0x2c9   : > { %4992 = vmatmul.mubr.msk.f32.vlgmr.msra.gmra.mxu1 %vm613_vm3, %v1114_v30 }
 0x2ca   : > { %5003 = vmatprep.mubr.msk.bf16.mxu1 %vm5289_vm1, %v5288_v3 }
 0x37d   : > { %v5496_v31 = vpop.f32.mrf.mxu1 }
 0x37f   : > { %v4968_v32 = vpop.f32.mrf.mxu1 }
 0x381   : > { %v851_v33 = vpop.f32.mrf.mxu1 }
 0x382   : > { %v855_v34 = vmul.f32 0.25, %v851_v33 }
 0x383   : > { %v4973_v35 = vpop.f32.mrf.mxu1 }
 0x384   : > { %v856_v36 = vsel %vm689_vm4, %v855_v34, -inf }
 0x385   : > { %857 = vmax.xlane.f32.xlu1 %v856_v36  ;;  %v1021_v37 = vpop.f32.mrf.mxu1 }
 0x386   : > { %v1025_v38 = vmul.f32 0.25, %v1021_v37 }
 0x387   : > { %v4983_v39 = vpop.f32.mrf.mxu1 }
 0x388   : > { %v1026_v40 = vsel %vm689_vm4, %v1025_v38, -inf }
 0x389   : > { %1027 = vmax.xlane.f32.xlu0 %v1026_v40  ;;  %v1187_v41 = vpop.f32.mrf.mxu1  ;;  %v5540_v40 = vld [vmem:[%s5388_s15 + $0x8] sm:$0xff]  }
 0x38a   : > { %v1191_v42 = vmul.f32 0.25, %v1187_v41 }
 0x38b   : > { %v4993_v43 = vpop.f32.mrf.mxu1 }
 0x38c   : > { %v1192_v44 = vsel %vm689_vm4, %v1191_v42, -inf }
 0x38d   : > { %1193 = vmax.xlane.f32.xlu0 %v1192_v44 }
 0x396   : > { %1035 = vrot.lane.b32.xlu1 %v5460_v14, %s5290_s26 }
 0x3a3   : > { %1201 = vrot.lane.b32.xlu0 %v5460_v14, %s5294_s16 }
 0x40e   : > { %v858_v45 = vpop.xlane.xlu1 %857 }
 0x40f   : > { %v859_v46 = vsub.f32 %v855_v34, %v858_v45 }
 0x411   : > { %v860_v47 = vmul.f32 1.442695, %v859_v46 }
 0x412   : > { %v1028_v48 = vpop.xlane.xlu0 %1027  ;;  %v1036_v55 = vpop.permute.xlu1 %1035 }
 0x413   : > { %5233 = vpow2.f32 %v860_v47  ;;  %v1029_v49 = vsub.f32 %v1025_v38, %v1028_v48 }
 0x415   : > { %v1030_v50 = vmul.f32 1.442695, %v1029_v49 }
 0x416   : > { %v1194_v51 = vpop.xlane.xlu0 %1193 }
 0x417   : > { %5235 = vpow2.f32 %v1030_v50  ;;  %v1195_v52 = vsub.f32 %v1191_v42, %v1194_v51  ;;  %v5561_v51 = vld [vmem:[%s6030_s24] ss:$0 sm:$0xff] }
 0x419   : > { %v1196_v53 = vmul.f32 1.442695, %v1195_v52 }
 0x41a   : > { %v1202_v58 = vpop.permute.xlu0 %1201 }
 0x41b   : > { %5237 = vpow2.f32 %v1196_v53 }
 0x420   : > { %v5234_v54 = vpop.eup %5233 }
 0x421   : > { %4977 = vmatmul.mubr.msk.f32.vlgmr.msra.gmra.mxu0 %vm689_vm4, %v5234_v54  ;;  %v862_v56 = vsel %vm689_vm4, %v5234_v54, 0.0 }
 0x422   : > { %4985 = vmatpush3.msra.mxu0 %v1036_v55  ;;  %863 = vadd.xlane.f32.xlu0 %v862_v56 }
 0x423   : > { %4986 = vmatprep.mubr.msk.f32.mxu0 %vm5289_vm1, %v5288_v3  ;;  %4994 = vmatprep.subr.mxu0 %v5288_v3 }
 0x424   : > { %v5236_v57 = vpop.eup %5235 }
 0x425   : > { %4987 = vmatmul.mubr.msk.f32.vlgmr.msra.gmra.mxu0 %vm689_vm4, %v5236_v57  ;;  %v1032_v62 = vsel %vm689_vm4, %v5236_v57, 0.0  ;;  %v533_v57 = vld [vmem:[%s6011_s1] sm:$0xff] }
 0x426   : > { %4995 = vmatpush3.msra.mxu0 %v1202_v58  ;;  %697 = vadd.xlane.f32.xlu0 %v696_v59  ;;  %v534_v58 = vld [vmem:[%s6011_s1 + $0x8] sm:$0xf] }
 0x427   : > { %4996 = vmatprep.mubr.msk.f32.mxu0 %vm5289_vm1, %v5288_v3  ;;  %5007 = vmatprep.subr.bf16.mxu0 %v5288_v3 }
 0x428   : > { %v5238_v60 = vpop.eup %5237 }
 0x429   : > { %4997 = vmatmul.mubr.msk.f32.vlgmr.msra.gmra.mxu0 %vm689_vm4, %v5238_v60  ;;  %v1198_v61 = vsel %vm689_vm4, %v5238_v60, 0.0  ;;  %v1367_v60 = vlaneseq }
 0x42a   : > { %1199 = vadd.xlane.f32.xlu1 %v1198_v61  ;;  %1033 = vadd.xlane.f32.xlu0 %v1032_v62  ;;  %v1442_v62 = vpack.c.bf16 %v534_v58, %v533_v57 }
 0x42b   : > { %5011 = vmatprep.mubr.msk.bf16.mxu0 %vm5289_vm1, %v5288_v3  ;;  %5008 = vmatpush3.bf16.msra.mxu0 %v5540_v40 }
 0x42c   : > { %5009 = vmatprep.subr.bf16.mxu0 %v5288_v3 }
 0x440   : > { %1287 = vrot.lane.b32.xlu0 %v5424_v2, %s5295_s17 }
 0x444   : > { %1285 = vrot.lane.b32.xlu0 %v5429_v4, %s5295_s17 }
 0x4ab   : > { %v864_v63 = vpop.xlane.xlu0 %863 }
 0x4af   : > { %v698_v0 = vpop.xlane.xlu0 %697 }
 0x4b3   : > { %v1034_v1 = vpop.xlane.xlu0 %1033  ;;  %v1200_v7 = vpop.xlane.xlu1 %1199 }
 0x4b4   : > { %5239 = vrcp.f32 %v1034_v1  ;;  %v5581_v1 = vld [vmem:[%s5415_s18] sm:$0x7f] }
 0x4b5   : > { %5241 = vrcp.f32 %v864_v63  ;;  %v5572_v63 = vshrl.u32 %v1367_v60, 7 }
 0x4b6   : > { %5243 = vrcp.f32 %v1200_v7 }
 0x4b7   : > { %v1288_v9 = vpop.permute.xlu0 %1287  ;;  %5245 = vrcp.f32 %v698_v0  ;;  %v5578_v0 = vsub.s32 0, %v5572_v63 }
 0x4b8   : > { %5000 = vmatpush3.bf16.msra.mxu1 %v1288_v9 }
 0x4b9   : > { %5001 = vmatprep.subr.bf16.mxu1 %v5288_v3 }
 0x4bb   : > { %v1286_v12 = vpop.permute.xlu0 %1285 }
 0x4bc   : > { %5002 = vmatpush3.bf16.msra.mxu1 %v1286_v12 }
 0x4bd   : > { %5015 = vmatprep.subr.bf16.mxu1 %v5288_v3 }
 0x4c1   : > { %v5240_v13 = vpop.eup %5239 }
 0x4c2   : > { %v5242_v15 = vpop.eup %5241 }
 0x4c3   : > { %v5244_v16 = vpop.eup %5243 }
 0x4c4   : > { %v5246_v22 = vpop.eup %5245 }
 0x4c5   : > { %v776_v24 = vmul.f32 %v5246_v22, %v5496_v31 }
 0x4e1   : > { %v937_v10 = vpop.f32.mrf.mxu0 }
 0x4e2   : > { %v942_v18 = vmul.f32 %v5242_v15, %v937_v10  ;;  %v1370_v10 = vrot.slane %v5581_v1, %v5578_v0 }
 0x4e3   : > { %v4978_v11 = vpop.f32.mrf.mxu0 }
 0x4e4   : > { %v5586_v11 = vsub.s32 1, %v5572_v63 }
 0x4e5   : > { %v1107_v2 = vpop.f32.mrf.mxu0 }
 0x4e6   : > { %v1112_v4 = vmul.f32 %v5240_v13, %v1107_v2 }
 0x4e7   : > { %v4988_v14 = vpop.f32.mrf.mxu0 }
 0x4e9   : > { %v1273_v17 = vpop.f32.mrf.mxu0 }
 0x4ea   : > { %v1278_v19 = vmul.f32 %v5244_v16, %v1273_v17 }
 0x4eb   : > { %v4998_v20 = vpop.f32.mrf.mxu0 }
 0x4ec   : > { %v5089_v21 = vpack.i.bf16 %v1278_v19, %v942_v18 }
 0x4ee   : > { %5090 = vrot.lane.b32.xlu1 %v5089_v21, %s5296_s21 }
 0x4f2   : > { %1291 = vrot.lane.b32.xlu1 %v5452_v8, %s5295_s17 }
 0x560   : > { %v5091_v23 = vpop.permute.xlu1 %5090 }
 0x561   : > { %v5093_v25 = vunpack.i.h.bf16 %v5091_v23  ;;  %v5092_v26 = vunpack.i.l.bf16 %v5091_v23 }
 0x563   : > { %v1283_v27 = vsel %vm613_vm3, %v1112_v4, %v5093_v25  ;;  %v947_v28 = vsel %vm613_vm3, %v776_v24, %v5092_v26  ;;  %v1376_v4 = vrot.slane %v5581_v1, %v5586_v11 }
 0x564   : > { %v1284_v29 = vpack.c.bf16 %v1283_v27, %v947_v28  ;;  %v1292_v30 = vpop.permute.xlu1 %1291 }
 0x566   : > { %5004 = vmatmul.mubr.msk.bf16.vlgmr.msra.gmra.mxu1 %vm565_vm2, %v1284_v29 }
 0x567   : > { %5019 = vmatprep.mubr.msk.bf16.mxu1 %vm5289_vm1, %v5288_v3 }
 0x626   : > { %v1331_v8 = vpop.f32.mrf.mxu1 }
 0x627   : > { %v1332_v32 = vadd.f32 %v1331_v8, %v1292_v30 }
 0x628   : > { %v5005_v33 = vpop.f32.mrf.mxu1 }
 0x629   : > { %v1338_v31 = vadd.f32 %v1332_v32, %v5433_v5  ;;  %v5547_v5 = vld [vmem:[%s5388_s15] sm:$0xff]  }
 0x62a   : > { %v1334_v34 = vpop.f32.mrf.mxu1  ;;  %5010 = vmatpush3.bf16.msra.mxu0 %v5547_v5 }
 0x62b   : > { %v1335_v35 = vadd.f32 %v1334_v34, %v1292_v30  ;;  %v1340_v36 = vsel %vm565_vm2, %v1338_v31, 0.0  ;;  %5023 = vmatprep.subr.mxu0 %v5288_v3 }
 0x62c   : > { %1341 = vadd.xlane.f32.xlu0 %v1340_v36  ;;  %v5006_v37 = vpop.f32.mrf.mxu1 }
 0x62d   : > { %v1339_v38 = vadd.f32 %v1335_v35, %v5435_v6 }
 0x62f   : > { %v1343_v39 = vsel %vm565_vm2, %v1339_v38, 0.0 }
 0x630   : > { %1344 = vadd.xlane.f32.xlu1 %v1343_v39 }
 0x641   : > { %1445 = vrot.lane.b32.xlu1 %v5540_v40, %s5291_s29 }
 0x645   : > { %1449 = vrot.lane.b32.xlu1 %v5561_v51, %s5291_s29 }
 0x6b5   : > { %v1342_v41 = vpop.xlane.xlu0 %1341 }
 0x6b6   : > { %v1347_v6 = vmul.f32 0.03125, %v1342_v41 }
 0x6b8   : > { %v1349_v42 = vsub.f32 %v1338_v31, %v1347_v6 }
 0x6b9   : > { %v1345_v43 = vpop.xlane.xlu1 %1344 }
 0x6ba   : > { %v1348_v44 = vmul.f32 0.03125, %v1345_v43  ;;  %v1351_v45 = vmul.f32 %v1349_v42, %v1349_v42 }
 0x6bc   : > { %v1350_v46 = vsub.f32 %v1339_v38, %v1348_v44  ;;  %v1353_v47 = vsel %vm565_vm2, %v1351_v45, 0.0  ;;  %v1496_v38 = vld [vmem:[%s6012_s2] sm:$0xff] }
 0x6bd   : > { %1354 = vadd.xlane.f32.xlu0 %v1353_v47  ;;  %v1446_v50 = vpop.permute.xlu1 %1445 }
 0x6be   : > { %v1352_v48 = vmul.f32 %v1350_v46, %v1350_v46  ;;  %5016 = vmatpush3.bf16.msra.mxu1 %v1446_v50 }
 0x6bf   : > { %5017 = vmatprep.subr.bf16.mxu1 %v5288_v3 }
 0x6c0   : > { %v1356_v49 = vsel %vm565_vm2, %v1352_v48, 0.0  ;;  %v4543_v48 = vld [vmem:[%s6012_s2 + $0x8] sm:$0xff] }
 0x6c1   : > { %1357 = vadd.xlane.f32.xlu0 %v1356_v49  ;;  %v1450_v18 = vpop.permute.xlu1 %1449 }
 0x6d7   : > { %1443 = vrot.lane.b32.xlu0 %v5547_v5, %s5291_s29 }
 0x746   : > { %v1355_v52 = vpop.xlane.xlu0 %1354 }
 0x747   : > { %v1359_v53 = vmul.f32 0.03125, %v1355_v52 }
 0x749   : > { %v1361_v54 = vadd.f32 1e-05, %v1359_v53 }
 0x74a   : > { %v1358_v55 = vpop.xlane.xlu0 %1357 }
 0x74b   : > { %5247 = vrsqrt.f32 %v1361_v54  ;;  %v1360_v56 = vmul.f32 0.03125, %v1358_v55 }
 0x74d   : > { %v1362_v59 = vadd.f32 1e-05, %v1360_v56 }
 0x74e   : > { %v1444_v61 = vpop.permute.xlu0 %1443 }
 0x74f   : > { %5249 = vrsqrt.f32 %v1362_v59  ;;  %5018 = vmatpush3.bf16.msra.mxu1 %v1444_v61 }
 0x750   : > { %5033 = vmatprep.subr.mxu1 %v5288_v3 }
 0x752   : > { %5020 = vmatmul.mubr.msk.bf16.vlgmr.msra.gmra.mxu1 %vm565_vm2, %v1442_v62 }
 0x753   : > { %5035 = vmatprep.mubr.msk.f32.mxu1 %vm5289_vm1, %v5288_v3 }
 0x758   : > { %v5248_v7 = vpop.eup %5247 }
 0x759   : > { %v1365_v9 = vmul.f32 %v5248_v7, %v1349_v42 }
 0x75b   : > { %v1371_v2 = vmul.f32 %v1370_v10, %v1365_v9 }
 0x75c   : > { %v5250_v12 = vpop.eup %5249 }
 0x75d   : > { %v1366_v13 = vmul.f32 %v5250_v12, %v1350_v46  ;;  %v5590_v15 = vadd.f32 %v1376_v4, %v1371_v2 }
 0x75f   : > { %v1372_v14 = vmul.f32 %v1370_v10, %v1366_v13 }
 0x761   : > { %v5592_v16 = vadd.f32 %v1376_v4, %v1372_v14 }
 0x763   : > { %v1379_v17 = vpack.c.bf16 %v5592_v16, %v5590_v15 }
 0x765   : > { %5012 = vmatmul.mubr.msk.bf16.vlgmr.msra.gmra.mxu0 %vm565_vm2, %v1379_v17 }
 0x766   : > { %5025 = vmatprep.mubr.msk.f32.mxu0 %vm5289_vm1, %v5288_v3 }
 0x812   : > { %v1489_v19 = vpop.f32.mrf.mxu1 }
 0x813   : > { %v5599_v20 = vadd.f32 %v1489_v19, %v1450_v18 }
 0x814   : > { %v5021_v21 = vpop.f32.mrf.mxu1 }
 0x815   : > { %1667 = vrot.lane.b32.xlu1 %v5599_v20, %s5293_s14  ;;  %5024 = vmatpush3.xpose.msk.msra.mxu0 %vm613_vm3, %v5599_v20  ;;  %v1842_v24 = vrot.slane %v5599_v20, 6 }
 0x816   : > { %v1492_v22 = vpop.f32.mrf.mxu1  ;;  %5028 = vmatprep.subr.mxu0 %v5288_v3 }
 0x817   : > { %v1493_v23 = vadd.f32 %v1492_v22, %v1450_v18 }
 0x818   : > { %v5022_v25 = vpop.f32.mrf.mxu1 }
 0x819   : > { %v1843_v26 = vrot.slane %v1493_v23, 6 }
 0x81b   : > { %v1844_v27 = vsel %vm1841_vm5, %v1842_v24, %v1843_v26 }
 0x81c   : > { %2012 = vrot.lane.b32.xlu1 %v1844_v27, %s5293_s14 }
 0x825   : > { %v1435_v28 = vpop.f32.mrf.mxu0 }
 0x826   : > { %v1436_v29 = vadd.f32 %v5561_v51, %v1435_v28 }
 0x827   : > { %v5013_v30 = vpop.f32.mrf.mxu0 }
 0x828   : > { %1665 = vrot.lane.b32.xlu0 %v1436_v29, %s5293_s14  ;;  %5026 = vmatmul.mubr.msk.f32.vlgmr.msra.gmra.mxu0 %vm613_vm3, %v1436_v29 }
 0x829   : > { %v1438_v8 = vpop.f32.mrf.mxu0  ;;  %5030 = vmatprep.mubr.msk.f32.mxu0 %vm5289_vm1, %v5288_v3 }
 0x82a   : > { %v1439_v32 = vadd.f32 %v5561_v51, %v1438_v8 }
 0x82b   : > { %v5014_v33 = vpop.f32.mrf.mxu0 }
 0x82c   : > { %2010 = vrot.lane.b32.xlu0 %v1439_v32, %s5293_s14 }
 0x887   : > { %v1668_v31 = vpop.permute.xlu1 %1667 }
 0x888   : > { %5034 = vmatpush3.xpose.msk.msra.mxu1 %vm613_vm3, %v1668_v31 }
 0x889   : > { %5043 = vmatprep.subr.mxu1 %v5288_v3 }
 0x88e   : > { %v2013_v35 = vpop.permute.xlu1 %2012 }
 0x89a   : > { %v1666_v34 = vpop.permute.xlu0 %1665 }
 0x89b   : > { %5036 = vmatmul.mubr.msk.f32.vlgmr.msra.gmra.mxu1 %vm613_vm3, %v1666_v34 }
 0x89c   : > { %5044 = vmatpush3.xpose.msk.msra.mxu1 %vm613_vm3, %v1844_v27  ;;  %5045 = vmatprep.mubr.msk.f32.mxu1 %vm5289_vm1, %v5288_v3 }
 0x89d   : > { %5053 = vmatprep.subr.mxu1 %v5288_v3 }
 0x89e   : > { %v2011_v36 = vpop.permute.xlu0 %2010 }
 0x89f   : > { %5046 = vmatmul.mubr.msk.f32.vlgmr.msra.gmra.mxu1 %vm613_vm3, %v1439_v32 }
 0x8a0   : > { %5054 = vmatpush3.xpose.msk.msra.mxu1 %vm613_vm3, %v2013_v35  ;;  %5055 = vmatprep.mubr.msk.f32.mxu1 %vm5289_vm1, %v5288_v3 }
 0x8a1   : > { %5063 = vmatprep.subr.bf16.mxu1 %v5288_v3 }
 0x8a3   : > { %5056 = vmatmul.mubr.msk.f32.vlgmr.msra.gmra.mxu1 %vm613_vm3, %v2011_v36 }
 0x8a4   : > { %5067 = vmatprep.mubr.msk.bf16.mxu1 %vm5289_vm1, %v5288_v3 }
 0x8e8   : > { %v1569_v37 = vpop.f32.mrf.mxu0 }
 0x8e9   : > { %v1573_v39 = vmul.f32 0.25, %v1569_v37 }
 0x8ea   : > { %v5027_v41 = vpop.f32.mrf.mxu0 }
 0x8eb   : > { %v1574_v6 = vadd.f32 %v1573_v39, %v1496_v38 }
 0x8ed   : > { %v1576_v42 = vsel %vm1575_vm6, %v1574_v6, -inf }
 0x8ee   : > { %1577 = vmax.xlane.f32.xlu1 %v1576_v42 }
 0x8ff   : > { %1754 = vrot.lane.b32.xlu1 %v5599_v20, %s5292_s13 }
 0x95b   : > { %v1739_v43 = vpop.f32.mrf.mxu1 }
 0x95c   : > { %v1743_v44 = vmul.f32 0.25, %v1739_v43 }
 0x95d   : > { %v5037_v45 = vpop.f32.mrf.mxu1 }
 0x95e   : > { %v1744_v46 = vadd.f32 %v1743_v44, %v1496_v38 }
 0x95f   : > { %v1916_v47 = vpop.f32.mrf.mxu1 }
 0x960   : > { %v1920_v49 = vmul.f32 0.25, %v1916_v47  ;;  %v1745_v50 = vsel %vm1575_vm6, %v1744_v46, -inf }
 0x961   : > { %1746 = vmax.xlane.f32.xlu0 %v1745_v50  ;;  %v5047_v52 = vpop.f32.mrf.mxu1 }
 0x962   : > { %v1921_v53 = vadd.f32 %v4543_v48, %v1920_v49 }
 0x963   : > { %v2084_v54 = vpop.f32.mrf.mxu1 }
 0x964   : > { %v2088_v55 = vmul.f32 0.25, %v2084_v54  ;;  %v1922_v56 = vsel %vm1575_vm6, %v1921_v53, -inf }
 0x965   : > { %1923 = vmax.xlane.f32.xlu0 %v1922_v56  ;;  %v5057_v57 = vpop.f32.mrf.mxu1 }
 0x966   : > { %v2089_v58 = vadd.f32 %v4543_v48, %v2088_v55 }
 0x968   : > { %v2090_v59 = vsel %vm1575_vm6, %v2089_v58, -inf }
 0x969   : > { %2091 = vmax.xlane.f32.xlu1 %v2090_v59 }
 0x977   : > { %v1578_v60 = vpop.xlane.xlu1 %1577 }
 0x978   : > { %v1579_v61 = vsub.f32 %v1574_v6, %v1578_v60 }
 0x97a   : > { %1931 = vrot.lane.b32.xlu1 %v1844_v27, %s5291_s29  ;;  %v1580_v62 = vmul.f32 1.442695, %v1579_v61 }
 0x97b   : > { %1585 = vrot.lane.b32.xlu0 %v5599_v20, %s5291_s29  ;;  %v1755_v12 = vpop.permute.xlu1 %1754 }
 0x97c   : > { %5251 = vpow2.f32 %v1580_v62 }
 0x97f   : > { %2099 = vrot.lane.b32.xlu0 %v1844_v27, %s5292_s13 }
 0x989   : > { %v5252_v18 = vpop.eup %5251 }
 0x98a   : > { %v1582_v29 = vsel %vm1575_vm6, %v5252_v18, 0.0 }
 0x9ea   : > { %v1747_v7 = vpop.xlane.xlu0 %1746 }
 0x9eb   : > { %v1748_v9 = vsub.f32 %v1744_v46, %v1747_v7 }
 0x9ed   : > { %v1749_v10 = vmul.f32 1.442695, %v1748_v9 }
 0x9ee   : > { %v1924_v13 = vpop.xlane.xlu0 %1923 }
 0x9ef   : > { %5253 = vpow2.f32 %v1749_v10  ;;  %v1925_v2 = vsub.f32 %v1921_v53, %v1924_v13 }
 0x9f1   : > { %v1926_v4 = vmul.f32 1.442695, %v1925_v2 }
 0x9f2   : > { %v1586_v14 = vpop.permute.xlu0 %1585  ;;  %v2092_v17 = vpop.xlane.xlu1 %2091 }
 0x9f3   : > { %5255 = vpow2.f32 %v1926_v4  ;;  %v2093_v19 = vsub.f32 %v2089_v58, %v2092_v17  ;;  %5029 = vmatpush3.msk.msra.mxu0 %vm1590_vm7, %v1586_v14 }
 0x9f4   : > { %5031 = vmatmul.mubr.msk.f32.vlgmr.msra.gmra.mxu0 %vm1575_vm6, %v5252_v18  ;;  %5038 = vmatprep.subr.mxu0 %v5288_v3 }
 0x9f5   : > { %v2094_v20 = vmul.f32 1.442695, %v2093_v19  ;;  %5039 = vmatpush3.msk.msra.mxu0 %vm1590_vm7, %v1755_v12  ;;  %5040 = vmatprep.mubr.msk.f32.mxu0 %vm5289_vm1, %v5288_v3 }
 0x9f6   : > { %5048 = vmatprep.subr.mxu0 %v5288_v3  ;;  %v1932_v22 = vpop.permute.xlu1 %1931  ;;  %v2100_v25 = vpop.permute.xlu0 %2099 }
 0x9f7   : > { %5257 = vpow2.f32 %v2094_v20  ;;  %v2294_v20 = vld [vmem:[%s5398_s12 + $0x80] sm:$0xff] }
 0x9fc   : > { %v5254_v21 = vpop.eup %5253 }
 0x9fd   : > { %5041 = vmatmul.mubr.msk.f32.vlgmr.msra.gmra.mxu0 %vm1575_vm6, %v5254_v21  ;;  %v1751_v23 = vsel %vm1575_vm6, %v5254_v21, 0.0  ;;  %v2302_v21 = vld [vmem:[%s5398_s12 + $0xc0] sm:$0xff] }
 0x9fe   : > { %5049 = vmatpush3.msk.msra.mxu0 %vm1590_vm7, %v1932_v22  ;;  %1752 = vadd.xlane.f32.xlu1 %v1751_v23  ;;  %v2295_v22 = vld [vmem:[%s5398_s12 + $0x88] sm:$0xff]  ;;  %v4570_v23 = vcombine.high %v2294_v20, %v2302_v21 }
 0x9ff   : > { %5050 = vmatprep.mubr.msk.f32.mxu0 %vm5289_vm1, %v5288_v3  ;;  %5058 = vmatprep.subr.mxu0 %v5288_v3 }
 0xa00   : > { %v5256_v24 = vpop.eup %5255 }
 0xa01   : > { %5051 = vmatmul.mubr.msk.f32.vlgmr.msra.gmra.mxu0 %vm1575_vm6, %v5256_v24  ;;  %v1928_v26 = vsel %vm1575_vm6, %v5256_v24, 0.0  ;;  %v2303_v24 = vld [vmem:[%s5398_s12 + $0xc8] sm:$0xff] }
 0xa02   : > { %5059 = vmatpush3.msk.msra.mxu0 %vm1590_vm7, %v2100_v25  ;;  %1929 = vadd.xlane.f32.xlu1 %v1928_v26  ;;  %v4569_v25 = vcombine.low %v2294_v20, %v2302_v21  ;;  %v4571_v26 = vcombine.low %v2295_v22, %v2303_v24  ;;  %v2291_v20 = vld [vmem:[%s5398_s12 + $0x68] sm:$0xff] }
 0xa03   : > { %5060 = vmatprep.mubr.msk.f32.mxu0 %vm5289_vm1, %v5288_v3  ;;  %2569 = vmatprep.subr.bf16.mxu0 %v4570_v23 }
 0xa04   : > { %v5258_v27 = vpop.eup %5257 }
 0xa05   : > { %5061 = vmatmul.mubr.msk.f32.vlgmr.msra.gmra.mxu0 %vm1575_vm6, %v5258_v27  ;;  %v2096_v28 = vsel %vm1575_vm6, %v5258_v27, 0.0  ;;  %v4572_v27 = vcombine.high %v2295_v22, %v2303_v24 }
 0xa06   : > { %2097 = vadd.xlane.f32.xlu0 %v2096_v28  ;;  %2570 = vmatpush1.bf16.msra.mxu0 %v4569_v25  ;;  %v2278_v28 = vld [vmem:[%s5398_s12] sm:$0xff]  ;;  %v2300_v25 = vld [vmem:[%s5398_s12 + $0xb0] sm:$0xff] }
 0xa0a   : > { %1583 = vadd.xlane.f32.xlu0 %v1582_v29  ;;  %v2286_v29 = vld [vmem:[%s5398_s12 + $0x40] sm:$0xff] }
 0xa20   : > { %2186 = vrot.lane.b32.xlu0 %v5540_v40, %s5295_s17 }
 0xa24   : > { %2190 = vrot.lane.b32.xlu0 %v5561_v51, %s5295_s17 }
 0xa87   : > { %v1753_v31 = vpop.xlane.xlu1 %1752 }
 0xa8f   : > { %v2098_v30 = vpop.xlane.xlu0 %2097 }
 0xa93   : > { %v1584_v8 = vpop.xlane.xlu0 %1583 }
 0xa94   : > { %5259 = vrcp.f32 %v1584_v8  ;;  %v4554_v8 = vcombine.high %v2278_v28, %v2286_v29 }
 0xa95   : > { %5261 = vrcp.f32 %v1753_v31 }
 0xa96   : > { %5263 = vrcp.f32 %v2098_v30  ;;  %v2279_v30 = vld [vmem:[%s5398_s12 + $0x8] sm:$0xff]  ;;  %2571 = vmatprep.subr.bf16.mxu0 %v4554_v8 }
 0xa97   : > { %v2187_v32 = vpop.permute.xlu0 %2186 }
 0xa98   : > { %5064 = vmatpush3.bf16.msra.mxu1 %v2187_v32  ;;  %v2287_v32 = vld [vmem:[%s5398_s12 + $0x48] sm:$0xff] }
 0xa99   : > { %5065 = vmatprep.subr.bf16.mxu1 %v5288_v3  ;;  %v1930_v3 = vpop.xlane.xlu1 %1929  ;;  %v4555_v31 = vcombine.low %v2279_v30, %v2287_v32 }
 0xa9a   : > { %5265 = vrcp.f32 %v1930_v3 }
 0xa9b   : > { %v2191_v56 = vpop.permute.xlu0 %2190 }
 0xaa1   : > { %v5260_v33 = vpop.eup %5259 }
 0xaa2   : > { %v5262_v41 = vpop.eup %5261 }
 0xaa3   : > { %v5264_v51 = vpop.eup %5263 }
 0xaa7   : > { %v5266_v46 = vpop.eup %5265 }
 0xab4   : > { %v1659_v34 = vpop.f32.mrf.mxu0 }
 0xab5   : > { %v1664_v35 = vmul.f32 %v5260_v33, %v1659_v34  ;;  %v4553_v33 = vcombine.low %v2278_v28, %v2286_v29  ;;  %v4556_v34 = vcombine.high %v2279_v30, %v2287_v32  ;;  %v2309_v28 = vld [vmem:[%s5398_s12 + $0xf8] sm:$0xff] }
 0xab6   : > { %v5032_v36 = vpop.f32.mrf.mxu0 }
 0xab7   : > { %2572 = vmatpush1.bf16.msra.mxu0 %v4553_v33  ;;  %v2304_v36 = vld [vmem:[%s5398_s12 + $0xd0] sm:$0xff] }
 0xab8   : > { %v2284_v33 = vld [vmem:[%s5398_s12 + $0x30] sm:$0xff] }
 0xabd   : > { %v1827_v37 = vpop.f32.mrf.mxu0 }
 0xabe   : > { %v1832_v42 = vmul.f32 %v5262_v41, %v1827_v37  ;;  %v2297_v37 = vld [vmem:[%s5398_s12 + $0x98] sm:$0xff] }
 0xabf   : > { %v5042_v38 = vpop.f32.mrf.mxu0 }
 0xac0   : > { %v5297_v38 = vmov 0  }
 0xac1   : > { %v2004_v40 = vpop.f32.mrf.mxu0  ;;  %2589 = vmatprep.mubr.bf16.mxu0 %v5297_v38 }
 0xac2   : > { %v2009_v48 = vmul.f32 %v5266_v46, %v2004_v40 }
 0xac3   : > { %v5052_v39 = vpop.f32.mrf.mxu0 }
 0xac4   : > { %v2305_v39 = vld [vmem:[%s5398_s12 + $0xd8] sm:$0xff] }
 0xac5   : > { %v2172_v6 = vpop.f32.mrf.mxu0 }
 0xac6   : > { %v2177_v43 = vmul.f32 %v5264_v51, %v2172_v6  ;;  %v4575_v51 = vcombine.low %v2297_v37, %v2305_v39  ;;  %v4576_v6 = vcombine.high %v2297_v37, %v2305_v39 }
 0xac7   : > { %v5062_v44 = vpop.f32.mrf.mxu0 }
 0xac8   : > { %v5094_v45 = vpack.i.bf16 %v2177_v43, %v1832_v42 }
 0xaca   : > { %5095 = vrot.lane.b32.xlu1 %v5094_v45, %s5296_s21 }
 0xace   : > { %2184 = vrot.lane.b32.xlu1 %v5547_v5, %s5295_s17 }
 0xb3c   : > { %v5096_v47 = vpop.permute.xlu1 %5095 }
 0xb3d   : > { %v5098_v49 = vunpack.i.h.bf16 %v5096_v47  ;;  %v5097_v50 = vunpack.i.l.bf16 %v5096_v47  ;;  %v5699_v47 = vsub.s32 2, %v5572_v63 }
 0xb3f   : > { %v2182_v52 = vsel %vm613_vm3, %v2009_v48, %v5098_v49  ;;  %v1837_v53 = vsel %vm613_vm3, %v1664_v35, %v5097_v50  ;;  %v2296_v35 = vld [vmem:[%s5398_s12 + $0x90] sm:$0xff]  ;;  %v2268_v49 = vrot.slane %v5581_v1, %v5699_v47  ;;  %v5704_v50 = vsub.s32 3, %v5572_v63 }
 0xb40   : > { %v2183_v54 = vpack.c.bf16 %v2182_v52, %v1837_v53  ;;  %v2185_v55 = vpop.permute.xlu1 %2184  ;;  %v4574_v40 = vcombine.high %v2296_v35, %v2304_v36  ;;  %v4573_v41 = vcombine.low %v2296_v35, %v2304_v36  ;;  %v2293_v35 = vld [vmem:[%s5398_s12 + $0x78] sm:$0xff] }
 0xb41   : > { %5066 = vmatpush3.bf16.msra.mxu1 %v2185_v55 }
 0xb42   : > { %2612 = vmatprep.subr.bf16.mxu1 %v4572_v27  ;;  %2655 = vmatprep.subr.bf16.mxu0 %v4574_v40  ;;  %v2301_v27 = vld [vmem:[%s5398_s12 + $0xb8] sm:$0xff] }
 0xb43   : > { %v4584_v32 = vcombine.high %v2301_v27, %v2309_v28  ;;  %v4583_v37 = vcombine.low %v2301_v27, %v2309_v28 }
 0xb44   : > { %5068 = vmatmul.mubr.msk.bf16.vlgmr.msra.gmra.mxu1 %vm565_vm2, %v2183_v54  ;;  %v2274_v54 = vrot.slane %v5581_v1, %v5704_v50  ;;  %v2298_v1 = vld [vmem:[%s5398_s12 + $0xa0] sm:$0xff] }
 0xb45   : > { %2613 = vmatpush1.bf16.msra.mxu1 %v4571_v26  ;;  %2632 = vmatprep.mubr.bf16.mxu1 %v5297_v38  ;;  %v2308_v26 = vld [vmem:[%s5398_s12 + $0xf0] sm:$0xff] }
 0xb46   : > { %2614 = vmatprep.subr.bf16.mxu1 %v4556_v34  ;;  %v4582_v8 = vcombine.high %v2300_v25, %v2308_v26  ;;  %v2285_v34 = vld [vmem:[%s5398_s12 + $0x38] sm:$0xff]  ;;  %v4581_v36 = vcombine.low %v2300_v25, %v2308_v26 }
 0xb47   : > { %v4568_v39 = vcombine.high %v2285_v34, %v2293_v35 }
 0xb49   : > { %2615 = vmatpush1.bf16.msra.mxu1 %v4555_v31  ;;  %v2292_v31 = vld [vmem:[%s5398_s12 + $0x70] sm:$0xff] }
 0xb4a   : > { %2698 = vmatprep.subr.bf16.mxu1 %v4576_v6  ;;  %v4566_v40 = vcombine.high %v2284_v33, %v2292_v31  ;;  %v5103_v6 = vld [vmem:[%s5410_s3 + $0x78] sm:$0xff]  }
 0xc04   : > { %v2230_v57 = vpop.f32.mrf.mxu1 }
 0xc05   : > { %v2231_v58 = vadd.f32 %v2230_v57, %v2191_v56 }
 0xc06   : > { %v5069_v5 = vpop.f32.mrf.mxu1 }
 0xc07   : > { %v2237_v59 = vadd.f32 %v2231_v58, %v5590_v15  ;;  %v2280_v58 = vld [vmem:[%s5398_s12 + $0x10] sm:$0xff] }
 0xc08   : > { %v2233_v60 = vpop.f32.mrf.mxu1  ;;  %v2288_v5 = vld [vmem:[%s5398_s12 + $0x50] sm:$0xff] }
 0xc09   : > { %v2234_v61 = vadd.f32 %v2233_v60, %v2191_v56  ;;  %v2239_v62 = vsel %vm565_vm2, %v2237_v59, 0.0  ;;  %v2289_v60 = vld [vmem:[%s5398_s12 + $0x58] sm:$0xff] }
 0xc0a   : > { %2240 = vadd.xlane.f32.xlu1 %v2239_v62  ;;  %v5070_v7 = vpop.f32.mrf.mxu1 }
 0xc0b   : > { %v2238_v9 = vadd.f32 %v2234_v61, %v5592_v16 }
 0xc0d   : > { %v2242_v10 = vsel %vm565_vm2, %v2238_v9, 0.0 }
 0xc0e   : > { %2243 = vadd.xlane.f32.xlu0 %v2242_v10 }
 0xc93   : > { %v2241_v12 = vpop.xlane.xlu1 %2240 }
 0xc94   : > { %v2245_v13 = vmul.f32 0.03125, %v2241_v12  ;;  %v2306_v12 = vld [vmem:[%s5398_s12 + $0xe0] sm:$0xff] }
 0xc95   : > { %v4577_v21 = vcombine.low %v2298_v1, %v2306_v12 }
 0xc96   : > { %v2247_v2 = vsub.f32 %v2237_v59, %v2245_v13  ;;  %v2281_v59 = vld [vmem:[%s5398_s12 + $0x18] sm:$0xff]  ;;  %v2299_v13 = vld [vmem:[%s5398_s12 + $0xa8] sm:$0xff] }
 0xc97   : > { %v2244_v4 = vpop.xlane.xlu0 %2243  ;;  %v4560_v10 = vcombine.high %v2281_v59, %v2289_v60 }
 0xc98   : > { %v2246_v15 = vmul.f32 0.03125, %v2244_v4  ;;  %v2249_v14 = vmul.f32 %v2247_v2, %v2247_v2  ;;  %v4557_v4 = vcombine.low %v2280_v58, %v2288_v5 }
 0xc9a   : > { %v2248_v17 = vsub.f32 %v2238_v9, %v2246_v15  ;;  %v2251_v18 = vsel %vm565_vm2, %v2249_v14, 0.0  ;;  %v4558_v9 = vcombine.high %v2280_v58, %v2288_v5  ;;  %v4559_v15 = vcombine.low %v2281_v59, %v2289_v60  ;;  %v5119_v58 = vld [vmem:[%s5410_s3 + $0x58] sm:$0xff]  }
 0xc9b   : > { %2252 = vadd.xlane.f32.xlu0 %v2251_v18  ;;  %v4578_v14 = vcombine.high %v2298_v1, %v2306_v12  ;;  %v2282_v18 = vld [vmem:[%s5398_s12 + $0x20] sm:$0xff]  ;;  %v5120_v5 = vld [vmem:[%s5410_s3 + $0xd8] sm:$0xff]   ;;  %v5126_v1 = vld [vmem:[%s5410_s3 + $0x90] sm:$0xff]  }
 0xc9c   : > { %v2250_v19 = vmul.f32 %v2248_v17, %v2248_v17  ;;  %v5121_v59 = vld [vmem:[%s5410_s3 + $0x18] sm:$0xff]   ;;  %v5127_v12 = vld [vmem:[%s5410_s3 + $0x48] sm:$0xff]  }
 0xc9d   : > { %v5122_v60 = vld [vmem:[%s5410_s3 + $0x98] sm:$0xff]  }
 0xc9e   : > { %v2254_v16 = vsel %vm565_vm2, %v2250_v19, 0.0  ;;  %v2290_v19 = vld [vmem:[%s5398_s12 + $0x60] sm:$0xff] }
 0xc9f   : > { %2255 = vadd.xlane.f32.xlu1 %v2254_v16  ;;  %v2283_v16 = vld [vmem:[%s5398_s12 + $0x28] sm:$0xff]  ;;  %v4562_v23 = vcombine.high %v2282_v18, %v2290_v19  ;;  %v4561_v29 = vcombine.low %v2282_v18, %v2290_v19  ;;  %v5134_v18 = vld [vmem:[%s5410_s3 + $0x80] sm:$0xff]   ;;  %v5135_v19 = vld [vmem:[%s5410_s3 + $0x178] sm:$0xff]  }
 0xca0   : > { %v4564_v24 = vcombine.high %v2283_v16, %v2291_v20  ;;  %v4563_v30 = vcombine.low %v2283_v16, %v2291_v20  ;;  %v5136_v16 = vld [vmem:[%s5410_s3 + $0x1f8] sm:$0xff]   ;;  %v5793_v20 = vld [vmem:[%s5403_s28] sm:$0xff] }
 0xca1   : > { %v2317_v25 = vrot.slane %v5793_v20, %v5578_v0  ;;  %v2325_v26 = vrot.slane %v5793_v20, %v5699_v47 }
 0xd24   : > { %v2253_v42 = vpop.xlane.xlu0 %2252 }
 0xd25   : > { %v2257_v43 = vmul.f32 0.03125, %v2253_v42  ;;  %v5104_v42 = vld [vmem:[%s5410_s3 + $0xf8] sm:$0xff]  }
 0xd27   : > { %v2259_v44 = vadd.f32 1e-05, %v2257_v43  ;;  %v5105_v43 = vld [vmem:[%s5410_s3 + $0x38] sm:$0xff]  }
 0xd28   : > { %v2256_v45 = vpop.xlane.xlu1 %2255 }
 0xd29   : > { %5267 = vrsqrt.f32 %v2259_v44  ;;  %v2258_v3 = vmul.f32 0.03125, %v2256_v45  ;;  %v5106_v44 = vld [vmem:[%s5410_s3 + $0xb8] sm:$0xff]   ;;  %v5107_v45 = vld [vmem:[%s5410_s3 + $0x70] sm:$0xff]  }
 0xd2b   : > { %v2260_v46 = vadd.f32 1e-05, %v2258_v3  ;;  %v5108_v3 = vld [vmem:[%s5410_s3 + $0xf0] sm:$0xff]  }
 0xd2d   : > { %5269 = vrsqrt.f32 %v2260_v46  ;;  %v5110_v46 = vld [vmem:[%s5410_s3 + $0xb0] sm:$0xff]  }
 0xd36   : > { %v5268_v48 = vpop.eup %5267 }
 0xd37   : > { %v2263_v52 = vmul.f32 %v5268_v48, %v2247_v2  ;;  %v2307_v2 = vld [vmem:[%s5398_s12 + $0xe8] sm:$0xff] }
 0xd38   : > { %v4579_v22 = vcombine.low %v2299_v13, %v2307_v2  ;;  %v5111_v48 = vld [vmem:[%s5410_s3 + $0x68] sm:$0xff]  }
 0xd39   : > { %v2269_v55 = vmul.f32 %v2268_v49, %v2263_v52  ;;  %v5113_v52 = vld [vmem:[%s5410_s3 + $0x28] sm:$0xff]  }
 0xd3a   : > { %v5270_v53 = vpop.eup %5269 }
 0xd3b   : > { %v2264_v56 = vmul.f32 %v5270_v53, %v2248_v17  ;;  %v5712_v61 = vadd.f32 %v2274_v54, %v2269_v55  ;;  %v4580_v17 = vcombine.high %v2299_v13, %v2307_v2  ;;  %v5114_v53 = vld [vmem:[%s5410_s3 + $0xa8] sm:$0xff]   ;;  %v5116_v55 = vld [vmem:[%s5410_s3 + $0xe0] sm:$0xff]  }
 0xd3c   : > { %v5128_v13 = vld [vmem:[%s5410_s3 + $0xc8] sm:$0xff]  }
 0xd3d   : > { %v2270_v57 = vmul.f32 %v2268_v49, %v2264_v56  ;;  %v5112_v49 = vld [vmem:[%s5410_s3 + $0xe8] sm:$0xff]   ;;  %v5117_v56 = vld [vmem:[%s5410_s3 + $0x20] sm:$0xff]  }
 0xd3e   : > { %v5129_v2 = vld [vmem:[%s5410_s3 + $0x8] sm:$0xff]  }
 0xd3f   : > { %v5714_v62 = vadd.f32 %v2274_v54, %v2270_v57  ;;  %v5115_v54 = vld [vmem:[%s5410_s3 + $0x60] sm:$0xff]  }
 0xd40   : > { %v5118_v57 = vld [vmem:[%s5410_s3 + $0xa0] sm:$0xff]  }
 0xd41   : > { %v5718_v7 = vpack.c.bf16 %v5714_v62, %v5712_v61 }
 0xd43   : > { %4585 = vmatmul.mubr.msk.bf16.vlgmr.msra.gmra.mxu0 %vm565_vm2, %v5718_v7  ;;  %4586 = vmatmul.mubr.msk.bf16.vlgmr.msra.gmra.mxu1 %vm565_vm2, %v5718_v7 }
 0xd44   : > { %2656 = vmatpush1.bf16.msra.mxu0 %v4573_v41  ;;  %2699 = vmatpush1.bf16.msra.mxu1 %v4575_v51  ;;  %v4565_v41 = vcombine.low %v2284_v33, %v2292_v31  ;;  %v4567_v51 = vcombine.low %v2285_v34, %v2293_v35 }
 0xd45   : > { %2657 = vmatprep.subr.bf16.mxu0 %v4558_v9  ;;  %2700 = vmatprep.subr.bf16.mxu1 %v4560_v10  ;;  %v5124_v9 = vld [vmem:[%s5410_s3 + $0xd0] sm:$0xff]  }
 0xd46   : > { %2675 = vmatprep.mubr.bf16.mxu0 %v5297_v38  ;;  %2718 = vmatprep.mubr.bf16.mxu1 %v5297_v38  ;;  %v5125_v10 = vld [vmem:[%s5410_s3 + $0x10] sm:$0xff]  }
 0xd48   : > { %2658 = vmatpush1.bf16.msra.mxu0 %v4557_v4  ;;  %2701 = vmatpush1.bf16.msra.mxu1 %v4559_v15  ;;  %v5130_v4 = vld [vmem:[%s5410_s3 + $0x88] sm:$0xff]   ;;  %v5131_v15 = vld [vmem:[%s5410_s3 + $0x40] sm:$0xff]  }
 0xd49   : > { %2741 = vmatprep.subr.bf16.mxu0 %v4578_v14  ;;  %2784 = vmatprep.subr.bf16.mxu1 %v4580_v17  ;;  %v5132_v14 = vld [vmem:[%s5410_s3 + $0xc0] sm:$0xff]  }
 0xd4a   : > { %v5133_v17 = vld [vmem:[%s5410_s3] sm:$0xff]  }
 0xd4b   : > { %4587 = vmatmul.mubr.msk.bf16.vlgmr.msra.gmra.mxu0 %vm565_vm2, %v5718_v7  ;;  %4588 = vmatmul.mubr.msk.bf16.vlgmr.msra.gmra.mxu1 %vm565_vm2, %v5718_v7 }
 0xd4c   : > { %2742 = vmatpush1.bf16.msra.mxu0 %v4577_v21  ;;  %2785 = vmatpush1.bf16.msra.mxu1 %v4579_v22 }
 0xd4d   : > { %2743 = vmatprep.subr.bf16.mxu0 %v4562_v23  ;;  %2786 = vmatprep.subr.bf16.mxu1 %v4564_v24  ;;  %v2321_v23 = vrot.slane %v5793_v20, %v5586_v11  ;;  %v2329_v24 = vrot.slane %v5793_v20, %v5704_v50 }
 0xd4e   : > { %2761 = vmatprep.mubr.bf16.mxu0 %v5297_v38  ;;  %2804 = vmatprep.mubr.bf16.mxu1 %v5297_v38 }
 0xd50   : > { %2744 = vmatpush1.bf16.msra.mxu0 %v4561_v29  ;;  %2787 = vmatpush1.bf16.msra.mxu1 %v4563_v30 }
 0xd51   : > { %2827 = vmatprep.subr.bf16.mxu0 %v4582_v8  ;;  %2870 = vmatprep.subr.bf16.mxu1 %v4584_v32  ;;  %v5804_v8 = vsub.s32 5, %v5572_v63  ;;  %v2344_v32 = vsub.s32 7, %v5572_v63 }
 0xd53   : > { %4589 = vmatmul.mubr.msk.bf16.vlgmr.msra.gmra.mxu0 %vm565_vm2, %v5718_v7  ;;  %4590 = vmatmul.mubr.msk.bf16.vlgmr.msra.gmra.mxu1 %vm565_vm2, %v5718_v7 }
 0xd54   : > { %2828 = vmatpush1.bf16.msra.mxu0 %v4581_v36  ;;  %2871 = vmatpush1.bf16.msra.mxu1 %v4583_v37 }
 0xd55   : > { %2829 = vmatprep.subr.bf16.mxu0 %v4566_v40  ;;  %2872 = vmatprep.subr.bf16.mxu1 %v4568_v39 }
 0xd56   : > { %2847 = vmatprep.mubr.bf16.mxu0 %v5297_v38  ;;  %2890 = vmatprep.mubr.bf16.mxu1 %v5297_v38  ;;  %v5109_v38 = vld [vmem:[%s5410_s3 + $0x30] sm:$0xff]  }
 0xd58   : > { %2830 = vmatpush1.bf16.msra.mxu0 %v4565_v41  ;;  %2873 = vmatpush1.bf16.msra.mxu1 %v4567_v51 }
 0xd59   : > { %4775 = vmatprep.subr.bf16.mxu0 %v5103_v6  ;;  %4797 = vmatprep.subr.bf16.mxu1 %v5104_v42 }
 0xd5b   : > { %4591 = vmatmul.mubr.msk.bf16.vlgmr.msra.gmra.mxu0 %vm565_vm2, %v5718_v7  ;;  %4592 = vmatmul.mubr.msk.bf16.vlgmr.msra.gmra.mxu1 %vm565_vm2, %v5718_v7  ;;  %v5123_v7 = vld [vmem:[%s5410_s3 + $0x50] sm:$0xff]  }
 0xd5c   : > { %4776 = vmatpush3.bf16.msra.mxu0 %v5105_v43  ;;  %4798 = vmatpush3.bf16.msra.mxu1 %v5106_v44 }
 0xd5d   : > { %4777 = vmatprep.subr.bf16.mxu0 %v5107_v45  ;;  %4799 = vmatprep.subr.bf16.mxu1 %v5108_v3  ;;  %v2337_v45 = vrot.slane %v5793_v20, %v5804_v8  ;;  %v2345_v3 = vrot.slane %v5793_v20, %v2344_v32 }
 0xd60   : > { %4778 = vmatpush3.bf16.msra.mxu0 %v5109_v38  ;;  %4800 = vmatpush3.bf16.msra.mxu1 %v5110_v46 }
 0xd61   : > { %4779 = vmatprep.subr.bf16.mxu0 %v5111_v48  ;;  %4801 = vmatprep.subr.bf16.mxu1 %v5112_v49 }
 0xd64   : > { %4780 = vmatpush3.bf16.msra.mxu0 %v5113_v52  ;;  %4802 = vmatpush3.bf16.msra.mxu1 %v5114_v53 }
 0xd65   : > { %4781 = vmatprep.subr.bf16.mxu0 %v5115_v54  ;;  %4803 = vmatprep.subr.bf16.mxu1 %v5116_v55 }
 0xd68   : > { %4782 = vmatpush3.bf16.msra.mxu0 %v5117_v56  ;;  %4804 = vmatpush3.bf16.msra.mxu1 %v5118_v57 }
 0xd69   : > { %4783 = vmatprep.subr.bf16.mxu0 %v5119_v58  ;;  %4805 = vmatprep.subr.bf16.mxu1 %v5120_v5  ;;  %v5137_v58 = vld [vmem:[%s5410_s3 + $0x138] sm:$0xff]  }
 0xd6a   : > { %v5138_v5 = vld [vmem:[%s5410_s3 + $0x1b8] sm:$0xff]  }
 0xd6c   : > { %4784 = vmatpush3.bf16.msra.mxu0 %v5121_v59  ;;  %4806 = vmatpush3.bf16.msra.mxu1 %v5122_v60 }
 0xd6d   : > { %4785 = vmatprep.subr.bf16.mxu0 %v5123_v7  ;;  %4807 = vmatprep.subr.bf16.mxu1 %v5124_v9 }
 0xd70   : > { %4786 = vmatpush3.bf16.msra.mxu0 %v5125_v10  ;;  %4808 = vmatpush3.bf16.msra.mxu1 %v5126_v1  ;;  %v5139_v10 = vld [vmem:[%s5410_s3 + $0x170] sm:$0xff]  }
 0xd71   : > { %4787 = vmatprep.subr.bf16.mxu0 %v5127_v12  ;;  %4809 = vmatprep.subr.bf16.mxu1 %v5128_v13  ;;  %v5140_v1 = vld [vmem:[%s5410_s3 + $0x1f0] sm:$0xff]  }
 0xd74   : > { %4788 = vmatpush3.bf16.msra.mxu0 %v5129_v2  ;;  %4810 = vmatpush3.bf16.msra.mxu1 %v5130_v4 }
 0xd75   : > { %4789 = vmatprep.subr.bf16.mxu0 %v5131_v15  ;;  %4811 = vmatprep.subr.bf16.mxu1 %v5132_v14 }
 0xd78   : > { %4790 = vmatpush3.bf16.msra.mxu0 %v5133_v17  ;;  %4812 = vmatpush3.bf16.msra.mxu1 %v5134_v18  ;;  %v5141_v17 = vld [vmem:[%s5410_s3 + $0x130] sm:$0xff]  }
 0xd79   : > { %4819 = vmatprep.subr.bf16.mxu0 %v5135_v19  ;;  %4841 = vmatprep.subr.bf16.mxu1 %v5136_v16  ;;  %v5142_v18 = vld [vmem:[%s5410_s3 + $0x1b0] sm:$0xff]   ;;  %v5143_v19 = vld [vmem:[%s5410_s3 + $0x168] sm:$0xff]  }
 0xe03   : > { %v2591_v21 = vpop.f32.mrf.mxu0  ;;  %v2634_v22 = vpop.f32.mrf.mxu1 }
 0xe04   : > { %v2592_v36 = vadd.f32 %v2591_v21, %v2317_v25  ;;  %v2635_v37 = vadd.f32 %v2634_v22, %v2325_v26 }
 0xe05   : > { %v2593_v27 = vpop.f32.mrf.mxu0  ;;  %v2636_v28 = vpop.f32.mrf.mxu1 }
 0xe06   : > { %v2594_v33 = vadd.f32 %v2593_v27, %v2321_v23  ;;  %v2637_v31 = vadd.f32 %v2636_v28, %v2329_v24  ;;  %v2901_v52 = vmax.f32 %v2592_v36, 0.0  ;;  %v2903_v53 = vmax.f32 %v2635_v37, 0.0  ;;  %v5145_v27 = vld [vmem:[%s5410_s3 + $0x128] sm:$0xff]   ;;  %v5151_v36 = vld [vmem:[%s5410_s3 + $0x158] sm:$0xff]  }
 0xe07   : > { %v2595_v29 = vpop.f32.mrf.mxu0  ;;  %v2638_v30 = vpop.f32.mrf.mxu1  ;;  %v5146_v28 = vld [vmem:[%s5410_s3 + $0x1a8] sm:$0xff]   ;;  %v5152_v37 = vld [vmem:[%s5410_s3 + $0x1d8] sm:$0xff]  }
 0xe08   : > { %v2596_v34 = vadd.f32 %v2595_v29, %v2317_v25  ;;  %v2639_v35 = vadd.f32 %v2638_v30, %v2325_v26  ;;  %v2902_v38 = vmax.f32 %v2594_v33, 0.0  ;;  %v2904_v46 = vmax.f32 %v2637_v31, 0.0  ;;  %v5147_v29 = vld [vmem:[%s5410_s3 + $0x160] sm:$0xff]  }
 0xe09   : > { %v2597_v40 = vpop.f32.mrf.mxu0  ;;  %v2640_v39 = vpop.f32.mrf.mxu1  ;;  %v5148_v30 = vld [vmem:[%s5410_s3 + $0x1e0] sm:$0xff]  }
 0xe0a   : > { %v2598_v41 = vadd.f32 %v2597_v40, %v2321_v23  ;;  %v2641_v51 = vadd.f32 %v2640_v39, %v2329_v24  ;;  %v2917_v6 = vmax.f32 %v2596_v34, 0.0  ;;  %v2919_v42 = vmax.f32 %v2639_v35, 0.0  ;;  %v5144_v24 = vld [vmem:[%s5410_s3 + $0x1e8] sm:$0xff]   ;;  %v5149_v31 = vld [vmem:[%s5410_s3 + $0x120] sm:$0xff]   ;;  %v5153_v39 = vld [vmem:[%s5410_s3 + $0x118] sm:$0xff]  }
 0xe0b   : > { %v5807_v43 = vpop.f32.mrf.mxu0  ;;  %v5809_v44 = vpop.f32.mrf.mxu1  ;;  %v5150_v35 = vld [vmem:[%s5410_s3 + $0x1a0] sm:$0xff]  }
 0xe0c   : > { %v2918_v48 = vmax.f32 %v2598_v41, 0.0  ;;  %v2920_v49 = vmax.f32 %v2641_v51, 0.0  ;;  %v2933_v59 = vpack.c.bf16 %v2917_v6, %v2901_v52  ;;  %v2935_v60 = vpack.c.bf16 %v2919_v42, %v2903_v53  ;;  %v5154_v51 = vld [vmem:[%s5410_s3 + $0x198] sm:$0xff]   ;;  %v5155_v6 = vld [vmem:[%s5410_s3 + $0x150] sm:$0xff]   ;;  %v5159_v52 = vld [vmem:[%s5410_s3 + $0x148] sm:$0xff]  }
 0xe0d   : > { %v2679_v54 = vpop.f32.mrf.mxu0  ;;  %v2722_v55 = vpop.f32.mrf.mxu1  ;;  %v5156_v42 = vld [vmem:[%s5410_s3 + $0x1d0] sm:$0xff]   ;;  %v5160_v53 = vld [vmem:[%s5410_s3 + $0x1c8] sm:$0xff]  }
 0xe0e   : > { %v2934_v56 = vpack.c.bf16 %v2918_v48, %v2902_v38  ;;  %v2936_v57 = vpack.c.bf16 %v2920_v49, %v2904_v46  ;;  %v2680_v12 = vadd.f32 %v2679_v54, %v2337_v45  ;;  %v2723_v13 = vadd.f32 %v2722_v55, %v2345_v3  ;;  %v5157_v46 = vld [vmem:[%s5410_s3 + $0x110] sm:$0xff]  }
 0xe0f   : > { %v5818_v7 = vpop.f32.mrf.mxu0  ;;  %v5820_v9 = vpop.f32.mrf.mxu1  ;;  %v5158_v49 = vld [vmem:[%s5410_s3 + $0x190] sm:$0xff]  }
 0xe10   : > { %4009 = vmatprep.mubr.bf16.mxu0 %v2934_v56  ;;  %4050 = vmatprep.mubr.bf16.mxu1 %v2936_v57  ;;  %v2906_v16 = vmax.f32 %v2680_v12, 0.0  ;;  %v2908_v21 = vmax.f32 %v2723_v13, 0.0  ;;  %v5863_v56 = vld [vmem:[%s5403_s28 + $0x8] sm:$0xff]  ;;  %v5164_v13 = vld [vmem:[%s5410_s3 + $0x1c0] sm:$0xff]   ;;  %s6031_s28 = sld [smem:[#allocation5_spill]] (!%p4721_p5) }
 0xe11   : > { %v2683_v2 = vpop.f32.mrf.mxu0  ;;  %v2726_v4 = vpop.f32.mrf.mxu1  ;;  %4010 = vmatmul.mubr.bf16.vlgmr.msra.gmra.mxu0 %v2933_v59  ;;  %4051 = vmatmul.mubr.bf16.vlgmr.msra.gmra.mxu1 %v2935_v60  ;;  %v2353_v59 = vrot.slane %v5863_v56, %v5586_v11  ;;  %v2361_v12 = vrot.slane %v5863_v56, %v5704_v50 }
 0xe12   : > { %v2684_v15 = vadd.f32 %v2683_v2, %v2337_v45  ;;  %v2727_v14 = vadd.f32 %v2726_v4, %v2345_v3  ;;  %4820 = vmatpush3.bf16.msra.mxu0 %v5137_v58  ;;  %4842 = vmatpush3.bf16.msra.mxu1 %v5138_v5  ;;  %v5845_v45 = vsub.s32 4, %v5572_v63  ;;  %v5848_v3 = vsub.s32 6, %v5572_v63  ;;  %v5161_v58 = vld [vmem:[%s5410_s3 + $0x108] sm:$0xff]   ;;  %v5199_v63 = vld [vmem:[%s5410_s3 + $0x378] sm:$0xff]  }
 0xe13   : > { %4821 = vmatprep.subr.bf16.mxu0 %v5139_v10  ;;  %4843 = vmatprep.subr.bf16.mxu1 %v5140_v1  ;;  %v5832_v33 = vpop.f32.mrf.mxu0  ;;  %v5835_v34 = vpop.f32.mrf.mxu1  ;;  %v5162_v10 = vld [vmem:[%s5410_s3 + $0x188] sm:$0xff]   ;;  %v5163_v1 = vld [vmem:[%s5410_s3 + $0x140] sm:$0xff]  }
 0xe14   : > { %v2922_v22 = vmax.f32 %v2684_v15, 0.0  ;;  %v2924_v23 = vmax.f32 %v2727_v14, 0.0  ;;  %v2333_v54 = vrot.slane %v5793_v20, %v5845_v45  ;;  %v2341_v55 = vrot.slane %v5793_v20, %v5848_v3  ;;  %v5165_v14 = vld [vmem:[%s5410_s3 + $0x100] sm:$0xff]  }
 0xe15   : > { %v2765_v40 = vpop.f32.mrf.mxu0  ;;  %v2808_v41 = vpop.f32.mrf.mxu1 }
 0xe16   : > { %v2938_v25 = vpack.c.bf16 %v2922_v22, %v2906_v16  ;;  %v2940_v26 = vpack.c.bf16 %v2924_v23, %v2908_v21  ;;  %4822 = vmatpush3.bf16.msra.mxu0 %v5141_v17  ;;  %4844 = vmatpush3.bf16.msra.mxu1 %v5142_v18  ;;  %v2682_v5 = vadd.f32 %v5818_v7, %v2333_v54  ;;  %v5168_v21 = vld [vmem:[%s5410_s3 + $0x2f8] sm:$0xff]  }
 0xe17   : > { %4823 = vmatprep.subr.bf16.mxu0 %v5143_v19  ;;  %4845 = vmatprep.subr.bf16.mxu1 %v5144_v24  ;;  %v5850_v38 = vpop.f32.mrf.mxu0  ;;  %v5853_v48 = vpop.f32.mrf.mxu1  ;;  %v2725_v20 = vadd.f32 %v5820_v9, %v2341_v55  ;;  %v2678_v7 = vadd.f32 %v5807_v43, %v2333_v54  ;;  %v2721_v4 = vadd.f32 %v5809_v44, %v2341_v55  ;;  %v5166_v9 = vld [vmem:[%s5410_s3 + $0x180] sm:$0xff]   ;;  %v5167_v19 = vld [vmem:[%s5410_s3 + $0x278] sm:$0xff]  }
 0xe18   : > { %4091 = vmatprep.mubr.bf16.mxu0 %v2938_v25  ;;  %4132 = vmatprep.mubr.bf16.mxu1 %v2940_v26  ;;  %v2921_v17 = vmax.f32 %v2682_v5, 0.0  ;;  %v2766_v18 = vadd.f32 %v2765_v40, %v2353_v59  ;;  %v2809_v16 = vadd.f32 %v2808_v41, %v2361_v12  ;;  %v5169_v24 = vld [vmem:[%s5410_s3 + $0x238] sm:$0xff]   ;;  %v5174_v40 = vld [vmem:[%s5410_s3 + $0x2b0] sm:$0xff]   ;;  %v5176_v41 = vld [vmem:[%s5410_s3 + $0x2e8] sm:$0xff]  }
 0xe19   : > { %v2769_v57 = vpop.f32.mrf.mxu0  ;;  %v2812_v60 = vpop.f32.mrf.mxu1  ;;  %v2923_v50 = vmax.f32 %v2725_v20, 0.0  ;;  %v2905_v43 = vmax.f32 %v2678_v7, 0.0  ;;  %v2907_v44 = vmax.f32 %v2721_v4, 0.0  ;;  %v5182_v54 = vld [vmem:[%s5410_s3 + $0x2a0] sm:$0xff]   ;;  %v5183_v55 = vld [vmem:[%s5410_s3 + $0x258] sm:$0xff]   ;;  %v5190_v7 = vld [vmem:[%s5410_s3 + $0x290] sm:$0xff]  }
 0xe1a   : > { %4824 = vmatpush3.bf16.msra.mxu0 %v5145_v27  ;;  %4846 = vmatpush3.bf16.msra.mxu1 %v5146_v28  ;;  %v2770_v2 = vadd.f32 %v2769_v57, %v2353_v59  ;;  %v2813_v15 = vadd.f32 %v2812_v60, %v2361_v12  ;;  %v2910_v26 = vmax.f32 %v2766_v18, 0.0  ;;  %v5170_v27 = vld [vmem:[%s5410_s3 + $0x2b8] sm:$0xff]   ;;  %v5189_v12 = vld [vmem:[%s5410_s3 + $0x210] sm:$0xff]   ;;  %v5192_v4 = vld [vmem:[%s5410_s3 + $0x2c8] sm:$0xff]  }
 0xe1b   : > { %4825 = vmatprep.subr.bf16.mxu0 %v5147_v29  ;;  %4847 = vmatprep.subr.bf16.mxu1 %v5148_v30  ;;  %v2937_v25 = vpack.c.bf16 %v2921_v17, %v2905_v43  ;;  %v2939_v28 = vpack.c.bf16 %v2923_v50, %v2907_v44  ;;  %v2912_v29 = vmax.f32 %v2809_v16, 0.0  ;;  %v5171_v30 = vld [vmem:[%s5410_s3 + $0x270] sm:$0xff]   ;;  %v5184_v57 = vld [vmem:[%s5410_s3 + $0x2d8] sm:$0xff]   ;;  %v5193_v18 = vld [vmem:[%s5410_s3 + $0x208] sm:$0xff]  }
 0xe1c   : > { %v2926_v22 = vmax.f32 %v2770_v2, 0.0  ;;  %v2928_v23 = vmax.f32 %v2813_v15, 0.0  ;;  %v5185_v5 = vld [vmem:[%s5410_s3 + $0x218] sm:$0xff]   ;;  %v5191_v2 = vld [vmem:[%s5410_s3 + $0x248] sm:$0xff]   ;;  %v2349_v15 = vrot.slane %v5863_v56, %v5578_v0 }
 0xe1d   : > { %v5186_v60 = vld [vmem:[%s5410_s3 + $0x298] sm:$0xff]   ;;  %v5194_v16 = vld [vmem:[%s5410_s3 + $0x288] sm:$0xff]  }
 0xe1e   : > { %4826 = vmatpush3.bf16.msra.mxu0 %v5149_v31  ;;  %4848 = vmatpush3.bf16.msra.mxu1 %v5150_v35  ;;  %v2942_v31 = vpack.c.bf16 %v2926_v22, %v2910_v26  ;;  %v5172_v35 = vld [vmem:[%s5410_s3 + $0x2f0] sm:$0xff]   ;;  %v5196_v22 = vld [vmem:[%s5410_s3 + $0x2c0] sm:$0xff]  }
 0xe1f   : > { %4827 = vmatprep.subr.bf16.mxu0 %v5151_v36  ;;  %4849 = vmatprep.subr.bf16.mxu1 %v5152_v37  ;;  %v2944_v36 = vpack.c.bf16 %v2928_v23, %v2912_v29  ;;  %v5173_v37 = vld [vmem:[%s5410_s3 + $0x230] sm:$0xff]   ;;  %v5200_v29 = vld [vmem:[%s5410_s3 + $0x3f8] sm:$0xff]  }
 0xe22   : > { %4828 = vmatpush3.bf16.msra.mxu0 %v5153_v39  ;;  %4850 = vmatpush3.bf16.msra.mxu1 %v5154_v51  ;;  %v5175_v39 = vld [vmem:[%s5410_s3 + $0x268] sm:$0xff]  }
 0xe23   : > { %4829 = vmatprep.subr.bf16.mxu0 %v5155_v6  ;;  %4851 = vmatprep.subr.bf16.mxu1 %v5156_v42  ;;  %v5177_v51 = vld [vmem:[%s5410_s3 + $0x228] sm:$0xff]   ;;  %v5179_v42 = vld [vmem:[%s5410_s3 + $0x260] sm:$0xff]  }
 0xe24   : > { %v5178_v6 = vld [vmem:[%s5410_s3 + $0x2a8] sm:$0xff]  }
 0xe26   : > { %4830 = vmatpush3.bf16.msra.mxu0 %v5157_v46  ;;  %4852 = vmatpush3.bf16.msra.mxu1 %v5158_v49  ;;  %v5180_v46 = vld [vmem:[%s5410_s3 + $0x2e0] sm:$0xff]   ;;  %v5893_v49 = vpop.f32.mrf.mxu0 }
 0xe27   : > { %4831 = vmatprep.subr.bf16.mxu0 %v5159_v52  ;;  %4853 = vmatprep.subr.bf16.mxu1 %v5160_v53  ;;  %v5181_v52 = vld [vmem:[%s5410_s3 + $0x220] sm:$0xff]   ;;  %v5896_v53 = vpop.f32.mrf.mxu1 }
 0xe29   : > { %v2894_v59 = vpop.f32.mrf.mxu1 }
 0xe2a   : > { %4832 = vmatpush3.bf16.msra.mxu0 %v5161_v58  ;;  %4854 = vmatpush3.bf16.msra.mxu1 %v5162_v10  ;;  %v2851_v58 = vpop.f32.mrf.mxu0  ;;  %v5187_v10 = vld [vmem:[%s5410_s3 + $0x250] sm:$0xff]  }
 0xe2b   : > { %4833 = vmatprep.subr.bf16.mxu0 %v5163_v1  ;;  %4855 = vmatprep.subr.bf16.mxu1 %v5164_v13  ;;  %v5188_v1 = vld [vmem:[%s5410_s3 + $0x2d0] sm:$0xff]   ;;  %v5908_v13 = vpop.f32.mrf.mxu1 }
 0xe2c   : > { %v5905_v20 = vpop.f32.mrf.mxu0 }
 0xe2d   : > { %v2898_v50 = vpop.f32.mrf.mxu1 }
 0xe2e   : > { %4834 = vmatpush3.bf16.msra.mxu0 %v5165_v14  ;;  %4856 = vmatpush3.bf16.msra.mxu1 %v5166_v9  ;;  %v2357_v14 = vrot.slane %v5863_v56, %v5699_v47  ;;  %v2855_v17 = vpop.f32.mrf.mxu0  ;;  %v2768_v9 = vadd.f32 %v5850_v38, %v2349_v15  ;;  %v2377_v47 = vrot.slane %v5863_v56, %v2344_v32 }
 0xe2f   : > { %4863 = vmatprep.subr.bf16.mxu0 %v5167_v19  ;;  %4885 = vmatprep.subr.bf16.mxu1 %v5168_v21  ;;  %v2369_v19 = vrot.slane %v5863_v56, %v5804_v8  ;;  %v5195_v21 = vld [vmem:[%s5410_s3 + $0x240] sm:$0xff]   ;;  %v2764_v38 = vadd.f32 %v5832_v33, %v2349_v15  ;;  %v5219_v15 = vld [vmem:[%s5410_s3 + $0x350] sm:$0xff]  }
 0xe30   : > { %v2811_v43 = vadd.f32 %v5853_v48, %v2357_v14  ;;  %v2807_v23 = vadd.f32 %v5835_v34, %v2357_v14  ;;  %v2925_v26 = vmax.f32 %v2768_v9, 0.0  ;;  %v5198_v48 = vld [vmem:[%s5410_s3 + $0x280] sm:$0xff]   ;;  %v5220_v14 = vld [vmem:[%s5410_s3 + $0x3d0] sm:$0xff]   ;;  %v5223_v9 = vld [vmem:[%s5410_s3 + $0x348] sm:$0xff]  }
 0xe31   : > { %4092 = vmatmul.mubr.bf16.vlgmr.msra.gmra.mxu0 %v2937_v25  ;;  %4133 = vmatmul.mubr.bf16.vlgmr.msra.gmra.mxu1 %v2939_v28  ;;  %v2856_v44 = vadd.f32 %v2855_v17, %v2369_v19  ;;  %v5197_v25 = vld [vmem:[%s5410_s3 + $0x200] sm:$0xff]   ;;  %v2895_v28 = vadd.f32 %v2894_v59, %v2377_v47  ;;  %v2909_v33 = vmax.f32 %v2764_v38, 0.0  ;;  %v5221_v17 = vld [vmem:[%s5410_s3 + $0x310] sm:$0xff]  }
 0xe32   : > { %4864 = vmatpush3.bf16.msra.mxu0 %v5169_v24  ;;  %4173 = vmatprep.mubr.bf16.mxu0 %v2942_v31  ;;  %v2899_v24 = vadd.f32 %v2898_v50, %v2377_v47  ;;  %v2927_v32 = vmax.f32 %v2811_v43, 0.0  ;;  %v2911_v34 = vmax.f32 %v2807_v23, 0.0  ;;  %v5211_v59 = vld [vmem:[%s5410_s3 + $0x360] sm:$0xff]   ;;  %v2365_v50 = vrot.slane %v5863_v56, %v5845_v45  ;;  %v5226_v47 = vld [vmem:[%s5410_s3 + $0x388] sm:$0xff]  }
 0xe33   : > { %4886 = vmatpush3.bf16.msra.mxu1 %v5170_v27  ;;  %4214 = vmatprep.mubr.bf16.mxu1 %v2944_v36  ;;  %v2852_v27 = vadd.f32 %v2851_v58, %v2369_v19  ;;  %v2941_v36 = vpack.c.bf16 %v2925_v26, %v2909_v33  ;;  %v5209_v58 = vld [vmem:[%s5410_s3 + $0x328] sm:$0xff]   ;;  %v5230_v26 = vld [vmem:[%s5410_s3 + $0x380] sm:$0xff]  }
 0xe34   : > { %4865 = vmatprep.subr.bf16.mxu0 %v5171_v30  ;;  %4887 = vmatprep.subr.bf16.mxu1 %v5172_v35  ;;  %v2930_v30 = vmax.f32 %v2856_v44, 0.0  ;;  %v2932_v31 = vmax.f32 %v2899_v24, 0.0  ;;  %v5201_v35 = vld [vmem:[%s5410_s3 + $0x338] sm:$0xff]   ;;  %v5224_v19 = vld [vmem:[%s5410_s3 + $0x3c8] sm:$0xff]   ;;  %v2854_v43 = vadd.f32 %v5905_v20, %v2365_v50  ;;  %v5228_v44 = vld [vmem:[%s5410_s3 + $0x3c0] sm:$0xff]   ;;  %v2850_v23 = vadd.f32 %v5893_v49, %v2365_v50 }
 0xe36   : > { %4866 = vmatpush3.bf16.msra.mxu0 %v5173_v37  ;;  %v2914_v37 = vmax.f32 %v2852_v27, 0.0  ;;  %v2913_v20 = vmax.f32 %v2850_v23, 0.0 }
 0xe37   : > { %4888 = vmatpush3.bf16.msra.mxu1 %v5174_v40  ;;  %4867 = vmatprep.subr.bf16.mxu0 %v5175_v39  ;;  %v5202_v40 = vld [vmem:[%s5410_s3 + $0x3b8] sm:$0xff]   ;;  %v2943_v39 = vpack.c.bf16 %v2927_v32, %v2911_v34 }
 0xe38   : > { %4889 = vmatprep.subr.bf16.mxu1 %v5176_v41  ;;  %v2916_v41 = vmax.f32 %v2895_v28, 0.0 }
 0xe3a   : > { %4868 = vmatpush3.bf16.msra.mxu0 %v5177_v51  ;;  %v5203_v51 = vld [vmem:[%s5410_s3 + $0x370] sm:$0xff]  }
 0xe3b   : > { %4890 = vmatpush3.bf16.msra.mxu1 %v5178_v6  ;;  %4869 = vmatprep.subr.bf16.mxu0 %v5179_v42  ;;  %v2946_v6 = vpack.c.bf16 %v2930_v30, %v2914_v37  ;;  %v5204_v42 = vld [vmem:[%s5410_s3 + $0x3f0] sm:$0xff]  }
 0xe3c   : > { %4891 = vmatprep.subr.bf16.mxu1 %v5180_v46  ;;  %v2948_v46 = vpack.c.bf16 %v2932_v31, %v2916_v41 }
 0xe3e   : > { %4870 = vmatpush3.bf16.msra.mxu0 %v5181_v52  ;;  %v5205_v52 = vld [vmem:[%s5410_s3 + $0x330] sm:$0xff]  }
 0xe3f   : > { %4892 = vmatpush3.bf16.msra.mxu1 %v5182_v54  ;;  %4871 = vmatprep.subr.bf16.mxu0 %v5183_v55  ;;  %v5206_v54 = vld [vmem:[%s5410_s3 + $0x3b0] sm:$0xff]   ;;  %v5207_v55 = vld [vmem:[%s5410_s3 + $0x368] sm:$0xff]  }
 0xe40   : > { %4893 = vmatprep.subr.bf16.mxu1 %v5184_v57  ;;  %v5208_v57 = vld [vmem:[%s5410_s3 + $0x3e8] sm:$0xff]  }
 0xe42   : > { %4872 = vmatpush3.bf16.msra.mxu0 %v5185_v5  ;;  %v5210_v5 = vld [vmem:[%s5410_s3 + $0x3a8] sm:$0xff]  }
 0xe43   : > { %4894 = vmatpush3.bf16.msra.mxu1 %v5186_v60  ;;  %4873 = vmatprep.subr.bf16.mxu0 %v5187_v10  ;;  %v5212_v60 = vld [vmem:[%s5410_s3 + $0x3e0] sm:$0xff]  }
 0xe44   : > { %4895 = vmatprep.subr.bf16.mxu1 %v5188_v1  ;;  %v5213_v10 = vld [vmem:[%s5410_s3 + $0x320] sm:$0xff]  }
 0xe45   : > { %v5214_v1 = vld [vmem:[%s5410_s3 + $0x3a0] sm:$0xff]  }
 0xe46   : > { %4874 = vmatpush3.bf16.msra.mxu0 %v5189_v12  ;;  %v5215_v12 = vld [vmem:[%s5410_s3 + $0x358] sm:$0xff]  }
 0xe47   : > { %4896 = vmatpush3.bf16.msra.mxu1 %v5190_v7  ;;  %4875 = vmatprep.subr.bf16.mxu0 %v5191_v2  ;;  %v5216_v7 = vld [vmem:[%s5410_s3 + $0x3d8] sm:$0xff]  }
 0xe48   : > { %4897 = vmatprep.subr.bf16.mxu1 %v5192_v4  ;;  %v5217_v2 = vld [vmem:[%s5410_s3 + $0x318] sm:$0xff]  }
 0xe49   : > { %v5218_v4 = vld [vmem:[%s5410_s3 + $0x398] sm:$0xff]  }
 0xe4a   : > { %4876 = vmatpush3.bf16.msra.mxu0 %v5193_v18  ;;  %v5222_v18 = vld [vmem:[%s5410_s3 + $0x390] sm:$0xff]  }
 0xe4b   : > { %4898 = vmatpush3.bf16.msra.mxu1 %v5194_v16  ;;  %4877 = vmatprep.subr.bf16.mxu0 %v5195_v21  ;;  %v2373_v16 = vrot.slane %v5863_v56, %v5848_v3  ;;  %v5225_v21 = vld [vmem:[%s5410_s3 + $0x308] sm:$0xff]   ;;  %v2929_v56 = vmax.f32 %v2854_v43, 0.0 }
 0xe4c   : > { %4899 = vmatprep.subr.bf16.mxu1 %v5196_v22  ;;  %v5227_v22 = vld [vmem:[%s5410_s3 + $0x340] sm:$0xff]  }
 0xe4d   : > { %v2897_v38 = vadd.f32 %v5908_v13, %v2373_v16  ;;  %v2893_v24 = vadd.f32 %v5896_v53, %v2373_v16 }
 0xe4e   : > { %4878 = vmatpush3.bf16.msra.mxu0 %v5197_v25  ;;  %v5229_v25 = vld [vmem:[%s5410_s3 + $0x300] sm:$0xff]  }
 0xe4f   : > { %4900 = vmatpush3.bf16.msra.mxu1 %v5198_v48  ;;  %4907 = vmatprep.subr.bf16.mxu0 %v5199_v63  ;;  %v2931_v27 = vmax.f32 %v2897_v38, 0.0  ;;  %v2915_v48 = vmax.f32 %v2893_v24, 0.0  ;;  %v2945_v63 = vpack.c.bf16 %v2929_v56, %v2913_v20 }
 0xe50   : > { %4929 = vmatprep.subr.bf16.mxu1 %v5200_v29 }
 0xe51   : > { %4174 = vmatmul.mubr.bf16.vlgmr.msra.gmra.mxu0 %v2941_v36  ;;  %v2947_v13 = vpack.c.bf16 %v2931_v27, %v2915_v48 }
 0xe52   : > { %4215 = vmatmul.mubr.bf16.vlgmr.msra.gmra.mxu1 %v2943_v39  ;;  %4908 = vmatpush3.bf16.msra.mxu0 %v5201_v35 }
 0xe53   : > { %4255 = vmatprep.mubr.bf16.mxu0 %v2946_v6  ;;  %4930 = vmatpush3.bf16.msra.mxu1 %v5202_v40 }
 0xe54   : > { %4296 = vmatprep.mubr.bf16.mxu1 %v2948_v46  ;;  %4909 = vmatprep.subr.bf16.mxu0 %v5203_v51  ;;  %v5973_v51 = vld [vmem:[%s5415_s18] sm:$0x7f] }
 0xe55   : > { %4931 = vmatprep.subr.bf16.mxu1 %v5204_v42  ;;  %v3208_v6 = vrot.slane %v5973_v51, %v5848_v3 }
 0xe56   : > { %4910 = vmatpush3.bf16.msra.mxu0 %v5205_v52 }
 0xe57   : > { %4932 = vmatpush3.bf16.msra.mxu1 %v5206_v54  ;;  %4911 = vmatprep.subr.bf16.mxu0 %v5207_v55 }
 0xe58   : > { %4933 = vmatprep.subr.bf16.mxu1 %v5208_v57 }
 0xe5a   : > { %4912 = vmatpush3.bf16.msra.mxu0 %v5209_v58 }
 0xe5b   : > { %4934 = vmatpush3.bf16.msra.mxu1 %v5210_v5  ;;  %4913 = vmatprep.subr.bf16.mxu0 %v5211_v59 }
 0xe5c   : > { %4935 = vmatprep.subr.bf16.mxu1 %v5212_v60 }
 0xe5e   : > { %4914 = vmatpush3.bf16.msra.mxu0 %v5213_v10 }
 0xe5f   : > { %4936 = vmatpush3.bf16.msra.mxu1 %v5214_v1  ;;  %4915 = vmatprep.subr.bf16.mxu0 %v5215_v12 }
 0xe60   : > { %4937 = vmatprep.subr.bf16.mxu1 %v5216_v7 }
 0xe62   : > { %4916 = vmatpush3.bf16.msra.mxu0 %v5217_v2 }
 0xe63   : > { %4938 = vmatpush3.bf16.msra.mxu1 %v5218_v4  ;;  %4917 = vmatprep.subr.bf16.mxu0 %v5219_v15 }
 0xe64   : > { %4939 = vmatprep.subr.bf16.mxu1 %v5220_v14 }
 0xe66   : > { %4918 = vmatpush3.bf16.msra.mxu0 %v5221_v17 }
 0xe67   : > { %4940 = vmatpush3.bf16.msra.mxu1 %v5222_v18  ;;  %4919 = vmatprep.subr.bf16.mxu0 %v5223_v9 }
 0xe68   : > { %4941 = vmatprep.subr.bf16.mxu1 %v5224_v19 }
 0xe6a   : > { %4920 = vmatpush3.bf16.msra.mxu0 %v5225_v21 }
 0xe6b   : > { %4942 = vmatpush3.bf16.msra.mxu1 %v5226_v47  ;;  %4921 = vmatprep.subr.bf16.mxu0 %v5227_v22 }
 0xe6c   : > { %4943 = vmatprep.subr.bf16.mxu1 %v5228_v44 }
 0xe6e   : > { %4922 = vmatpush3.bf16.msra.mxu0 %v5229_v25 }
 0xe6f   : > { %4944 = vmatpush3.bf16.msra.mxu1 %v5230_v26 }
 0xe71   : > { %4256 = vmatmul.mubr.bf16.vlgmr.msra.gmra.mxu0 %v2945_v63 }
 0xe72   : > { %4297 = vmatmul.mubr.bf16.vlgmr.msra.gmra.mxu1 %v2947_v13 }
 0xed1   : > { %v4791_v49 = vpop.f32.mrf.mxu0  ;;  %v4813_v32 = vpop.f32.mrf.mxu1 }
 0xed3   : > { %v4792_v53 = vpop.f32.mrf.mxu0  ;;  %v4814_v28 = vpop.f32.mrf.mxu1 }
 0xed4   : > { %v4793_v42 = vadd.f32 %v4792_v53, %v4791_v49  ;;  %v4815_v5 = vadd.f32 %v4814_v28, %v4813_v32 }
 0xed5   : > { %v4794_v29 = vpop.f32.mrf.mxu0  ;;  %v4816_v33 = vpop.f32.mrf.mxu1 }
 0xed6   : > { %v4012_v54 = vadd.f32 %v4793_v42, %v3208_v6 }
 0xed7   : > { %v4795_v30 = vpop.f32.mrf.mxu0  ;;  %v4817_v31 = vpop.f32.mrf.mxu1 }
 0xed8   : > { %v4796_v55 = vadd.f32 %v4795_v30, %v4794_v29  ;;  %v4053_v60 = vadd.f32 %v4815_v5, %v4012_v54  ;;  %v4818_v7 = vadd.f32 %v4817_v31, %v4816_v33 }
 0xeda   : > { %v4015_v10 = vadd.f32 %v4796_v55, %v3208_v6 }
 0xedc   : > { %v4056_v15 = vadd.f32 %v4818_v7, %v4015_v10  ;;  %v4336_v10 = vrot.slane %v5973_v51, %v5845_v45 }
 0xef1   : > { %v4835_v34 = vpop.f32.mrf.mxu0  ;;  %v4857_v35 = vpop.f32.mrf.mxu1 }
 0xef3   : > { %v4836_v36 = vpop.f32.mrf.mxu0  ;;  %v4858_v37 = vpop.f32.mrf.mxu1 }
 0xef4   : > { %v4837_v59 = vadd.f32 %v4836_v36, %v4835_v34  ;;  %v4859_v14 = vadd.f32 %v4858_v37, %v4857_v35 }
 0xef5   : > { %v4838_v40 = vpop.f32.mrf.mxu0  ;;  %v4860_v39 = vpop.f32.mrf.mxu1 }
 0xef6   : > { %v4094_v2 = vadd.f32 %v4837_v59, %v4053_v60 }
 0xef7   : > { %v4839_v41 = vpop.f32.mrf.mxu0  ;;  %v4861_v52 = vpop.f32.mrf.mxu1 }
 0xef8   : > { %v4840_v4 = vadd.f32 %v4839_v41, %v4838_v40  ;;  %v4135_v9 = vadd.f32 %v4859_v14, %v4094_v2  ;;  %v4862_v50 = vadd.f32 %v4861_v52, %v4860_v39 }
 0xefa   : > { %v4097_v19 = vadd.f32 %v4840_v4, %v4056_v15 }
 0xefc   : > { %v4138_v22 = vadd.f32 %v4862_v50, %v4097_v19 }
 0xf11   : > { %v4879_v46 = vpop.f32.mrf.mxu0 }
 0xf12   : > { %v4901_v57 = vpop.f32.mrf.mxu1 }
 0xf13   : > { %v4880_v58 = vpop.f32.mrf.mxu0 }
 0xf14   : > { %v4902_v1 = vpop.f32.mrf.mxu1  ;;  %v4881_v17 = vadd.f32 %v4880_v58, %v4879_v46 }
 0xf15   : > { %v4882_v12 = vpop.f32.mrf.mxu0  ;;  %v4903_v38 = vadd.f32 %v4902_v1, %v4901_v57 }
 0xf16   : > { %v4904_v3 = vpop.f32.mrf.mxu1  ;;  %v4176_v16 = vadd.f32 %v4881_v17, %v4135_v9 }
 0xf17   : > { %v4883_v18 = vpop.f32.mrf.mxu0 }
 0xf18   : > { %v4884_v21 = vadd.f32 %v4883_v18, %v4882_v12  ;;  %v4905_v43 = vpop.f32.mrf.mxu1  ;;  %v4217_v24 = vadd.f32 %v4903_v38, %v4176_v16  ;;  %v4342_v12 = vrot.slane %v5973_v51, %v5804_v8 }
 0xf19   : > { %v4906_v20 = vadd.f32 %v4905_v43, %v4904_v3 }
 0xf1a   : > { %v4179_v25 = vadd.f32 %v4884_v21, %v4138_v22 }
 0xf1c   : > { %v4220_v32 = vadd.f32 %v4906_v20, %v4179_v25 }
 0xf31   : > { %v4923_v47 = vpop.f32.mrf.mxu0 }
 0xf32   : > { %v4945_v44 = vpop.f32.mrf.mxu1 }
 0xf33   : > { %v4924_v23 = vpop.f32.mrf.mxu0 }
 0xf34   : > { %v4925_v56 = vadd.f32 %v4924_v23, %v4923_v47  ;;  %v4946_v26 = vpop.f32.mrf.mxu1 }
 0xf35   : > { %v4926_v27 = vpop.f32.mrf.mxu0  ;;  %v4947_v63 = vadd.f32 %v4946_v26, %v4945_v44 }
 0xf36   : > { %v4258_v48 = vadd.f32 %v4925_v56, %v4217_v24  ;;  %v4948_v13 = vpop.f32.mrf.mxu1 }
 0xf37   : > { %v4927_v49 = vpop.f32.mrf.mxu0 }
 0xf38   : > { %v4299_v53 = vadd.f32 %v4947_v63, %v4258_v48  ;;  %v4928_v28 = vadd.f32 %v4927_v49, %v4926_v27  ;;  %v4949_v29 = vpop.f32.mrf.mxu1 }
 0xf39   : > { %v4950_v30 = vadd.f32 %v4949_v29, %v4948_v13 }
 0xf3a   : > { %v4261_v33 = vadd.f32 %v4928_v28, %v4220_v32  ;;  %v4305_v34 = vadd.f32 %v4299_v53, %v5712_v61 }
 0xf3c   : > { %v4302_v31 = vadd.f32 %v4950_v30, %v4261_v33  ;;  %v4307_v35 = vsel %vm565_vm2, %v4305_v34, 0.0 }
 0xf3d   : > { %4308 = vadd.xlane.f32.xlu0 %v4307_v35 }
 0xf3e   : > { %v4306_v36 = vadd.f32 %v4302_v31, %v5714_v62 }
 0xf40   : > { %v4310_v37 = vsel %vm565_vm2, %v4306_v36, 0.0 }
 0xf41   : > { %4311 = vadd.xlane.f32.xlu1 %v4310_v37 }
 0xfc6   : > { %v4309_v40 = vpop.xlane.xlu0 %4308 }
 0xfc7   : > { %v4313_v39 = vmul.f32 0.03125, %v4309_v40 }
 0xfc9   : > { %v4315_v41 = vsub.f32 %v4305_v34, %v4313_v39 }
 0xfca   : > { %v4312_v6 = vpop.xlane.xlu1 %4311 }
 0xfcb   : > { %v4314_v42 = vmul.f32 0.03125, %v4312_v6  ;;  %v4317_v46 = vmul.f32 %v4315_v41, %v4315_v41 }
 0xfcd   : > { %v4316_v52 = vsub.f32 %v4306_v36, %v4314_v42  ;;  %v4319_v54 = vsel %vm565_vm2, %v4317_v46, 0.0 }
 0xfce   : > { %4320 = vadd.xlane.f32.xlu0 %v4319_v54 }
 0xfcf   : > { %v4318_v61 = vmul.f32 %v4316_v52, %v4316_v52 }
 0xfd1   : > { %v4322_v55 = vsel %vm565_vm2, %v4318_v61, 0.0 }
 0xfd2   : > { %4323 = vadd.xlane.f32.xlu1 %v4322_v55 }
0x1057   : > { %v4321_v57 = vpop.xlane.xlu0 %4320 }
0x1058   : > { %v4325_v58 = vmul.f32 0.03125, %v4321_v57 }
0x105a   : > { %v4327_v62 = vadd.f32 1e-05, %v4325_v58 }
0x105b   : > { %v4324_v5 = vpop.xlane.xlu1 %4323 }
0x105c   : > { %5271 = vrsqrt.f32 %v4327_v62  ;;  %v4326_v59 = vmul.f32 0.03125, %v4324_v5 }
0x105e   : > { %v4328_v60 = vadd.f32 1e-05, %v4326_v59 }
0x1060   : > { %5273 = vrsqrt.f32 %v4328_v60 }
0x1069   : > { %v5272_v1 = vpop.eup %5271 }
0x106a   : > { %v4331_v7 = vmul.f32 %v5272_v1, %v4315_v41 }
0x106c   : > { %v4337_v2 = vmul.f32 %v4336_v10, %v4331_v7 }
0x106d   : > { %v5274_v4 = vpop.eup %5273 }
0x106e   : > { %v4343_v15 = vadd.f32 %v4342_v12, %v4337_v2  ;;  %v4332_v14 = vmul.f32 %v5274_v4, %v4316_v52 }
0x1070   : > { %4345 = vst.msk [vmem:[#allocation2] sm:$0xff] %vm565_vm2, %v4343_v15  ;;  %v4338_v17 = vmul.f32 %v4336_v10, %v4332_v14  ;;  %4350 = sbr.rel (%p4721_p5) target bundleno = 4526 (0x11ae), region = 76 }
0x1072   : > { %v4344_v3 = vadd.f32 %v4342_v12, %v4338_v17 }
0x1074   : > { %4346 = vst.msk [vmem:[#allocation2 + $0x8] sm:$0xff] %vm565_vm2, %v4344_v3 }
0x1075   : > { %v4352_v45 = vsel %vm565_vm2, %v4343_v15, 0.0  ;;  %v4355_v18 = vsel %vm565_vm2, %v4344_v3, 0.0  ;;  %v4351_v26 = vld [vmem:[%s6021_s11] sm:$0x3] }
0x1076   : > { %4353 = vadd.xlane.f32.xlu0 %v4352_v45  ;;  %v4381_v27 = vrot.slane %v4351_v26, %v5578_v0  ;;  %v4387_v63 = vrot.slane %v4351_v26, %v5586_v11 }
0x107a   : > { %4356 = vadd.xlane.f32.xlu0 %v4355_v18 }
0x10ff   : > { %v4354_v8 = vpop.xlane.xlu0 %4353 }
0x1100   : > { %v4358_v51 = vmul.f32 0.03125, %v4354_v8 }
0x1102   : > { %v4360_v9 = vsub.f32 %v4343_v15, %v4358_v51 }
0x1103   : > { %v4357_v19 = vpop.xlane.xlu0 %4356 }
0x1104   : > { %v4359_v50 = vmul.f32 0.03125, %v4357_v19  ;;  %v4362_v16 = vmul.f32 %v4360_v9, %v4360_v9 }
0x1106   : > { %v4361_v21 = vsub.f32 %v4344_v3, %v4359_v50  ;;  %v4364_v43 = vsel %vm565_vm2, %v4362_v16, 0.0 }
0x1107   : > { %4365 = vadd.xlane.f32.xlu1 %v4364_v43 }
0x1108   : > { %v4363_v47 = vmul.f32 %v4361_v21, %v4361_v21 }
0x110a   : > { %v4367_v22 = vsel %vm565_vm2, %v4363_v47, 0.0 }
0x110b   : > { %4368 = vadd.xlane.f32.xlu1 %v4367_v22 }
0x1190   : > { %v4366_v38 = vpop.xlane.xlu1 %4365 }
0x1191   : > { %v4370_v44 = vmul.f32 0.03125, %v4366_v38 }
0x1193   : > { %v4372_v23 = vadd.f32 1e-05, %v4370_v44 }
0x1194   : > { %v4369_v24 = vpop.xlane.xlu1 %4368 }
0x1195   : > { %5276 = vrsqrt.f32 %v4372_v23  ;;  %v4371_v25 = vmul.f32 0.03125, %v4369_v24 }
0x1197   : > { %v4373_v56 = vadd.f32 1e-05, %v4371_v25 }
0x1199   : > { %5278 = vrsqrt.f32 %v4373_v56 }
0x11a2   : > { %v5277_v20 = vpop.eup %5276 }
0x11a3   : > { %v4376_v48 = vmul.f32 %v5277_v20, %v4360_v9 }
0x11a5   : > { %v4382_v13 = vmul.f32 %v4381_v27, %v4376_v48 }
0x11a6   : > { %v5279_v49 = vpop.eup %5278 }
0x11a7   : > { %v4388_v32 = vadd.f32 %v4387_v63, %v4382_v13  ;;  %v4377_v53 = vmul.f32 %v5279_v49, %v4361_v21 }
0x11a9   : > { %4390 = vst.msk [vmem:[%s6031_s28] sm:$0xff] %vm565_vm2, %v4388_v32  ;;  %v4383_v28 = vmul.f32 %v4381_v27, %v4377_v53 }
0x11ab   : > { %v4389_v29 = vadd.f32 %v4387_v63, %v4383_v28 }
0x11ad   : > { %4391 = vst.msk [vmem:[%s6031_s28 + $0x8] sm:$0xff] %vm565_vm2, %v4389_v29 }
0x11ae PF: > { %s6032_s17 = sld [smem:[#allocation3_spill]] }
0x11b4   : > { %s22_s21 = sadd.s32 1, %s6032_s17  }
0x11b5   : > { %p19_p6 = scmp.ge.s32.totalorder %s22_s21, 4  }
0x11b7   :  { %21 = sbr.rel (!%p19_p6) target bundleno = 3 (0x3), region = 124 }

</bundles_post_ra>
